<compile_context>
chip_gen: v5e
topology: v5e:2x2
jax: 0.10.0
libtpu: 0.0.40
codegen_flags: <defaults>
</compile_context>

<pallas_src>
import numpy as np
import jax
import jax.numpy as jnp
from jax import lax
from jax.experimental import pallas as pl
from jax.experimental.pallas import tpu as pltpu

H = W = 28            # image spatial size (the module samples 28x28 images)
C1 = 16               # hidden conv channels of the synthetic UNet
EMB = 32              # time / condition embedding width
TH = EMB // 2         # half-dim of the sinusoidal time embedding
COND_DIM = 32         # fMRI-embedding (condition) width

RPI = 32              # padded rows per image (rows 1..28 of x_pad hold the image)
WP_IN = 32            # padded input columns (cols 1..28 hold the image)
LANES = WP_IN * C1    # hidden-activation lane width = 512
WOUT = 32             # output lane width (cols 0..27 valid)
MAX_BB = 32           # max images packed per grid step (one-hot cols 96..127)
KDIM = 3 * WP_IN + MAX_BB   # 128: conv1 contraction dim (3 ky copies + selectors)


def _silu(x):
    return x * (1.0 / (1.0 + jnp.exp(-x)))


# ----------------------------------------------------------------------------
# Pallas kernel: one grid step == bb batch elements (bb = 8..32, static).
# ----------------------------------------------------------------------------
def unet_kernel(t_ref, cond_ref, xcat_ref,
                freqs2_ref, phase_ref, wt_ref, bt_ref, wc_ref, bc_ref,
                wpt_ref, bpt_ref, w1_ref, w2_ref, b2_ref,
                out_ref, rhs_ref):
    f32 = jnp.float32

    # ---- time + condition embeddings for the bb images of this block -------
    # [sin(ang) | cos(ang)] in one transcendental pass (cos(x) = sin(x + pi/2)).
    sc = jnp.sin(t_ref[...] * freqs2_ref[...] + phase_ref[...])          # (bb, 32)
    temb = _silu(jnp.dot(sc, wt_ref[...], preferred_element_type=f32) + bt_ref[...])
    cemb = _silu(jnp.dot(cond_ref[...], wc_ref[...], preferred_element_type=f32)
                 + bc_ref[...])
    emb = temb + cemb                                                    # (bb, EMB)
    # per-image channel bias (emb @ wp + bp + b1), already spread over 512 lanes
    chan_tile = (jnp.dot(emb, wpt_ref[...], preferred_element_type=f32)
                 + bpt_ref[...])                                         # (bb, LANES)
    bb = chan_tile.shape[0]

    # ---- conv1 RHS: [96 rows of 3x3 taps (kx pre-summed, ky stacked);
    #                  bb runtime bias rows; zeros] -- rebuilt every step (cheap,
    # ~256KB VMEM copy) so the kernel has no program_id dependence.
    rhs_ref[...] = w1_ref[...]
    rhs_ref[96:96 + bb, :] = chan_tile

    # ---- conv1 (3x3, 1->16) + per-image bias + SiLU: ONE K=128 matmul -------
    h1 = _silu(jnp.dot(xcat_ref[...], rhs_ref[...], preferred_element_type=f32))
    # h1 row n*RPI + j (j=0..27) is image-n hidden row j; junk rows (j=28..31)
    # and lane blocks 0, 29..31 are exactly zero (zeroed inputs / zero weights),
    # which provides the SAME-padding halo for conv2 with no masking.

    # ---- conv2 (3x3, 16->1): ONE matmul (3 ky groups along N), row shift-add
    q = jnp.dot(h1, w2_ref[...], preferred_element_type=f32)            # (rows, 96)
    q0 = q[:, :WOUT]                 # ky=0 partials -> shift down one row
    q1 = q[:, WOUT:2 * WOUT]         # ky=1 partials
    q2 = q[:, 2 * WOUT:]             # ky=2 partials -> shift up one row
    zrow = jnp.zeros((1, WOUT), f32)
    acc = (jnp.concatenate([zrow, q0[:-1]], axis=0)
           + q1
           + jnp.concatenate([q2[1:], zrow], axis=0))
    out_ref[...] = acc + b2_ref[...]


# ----------------------------------------------------------------------------
# Host-side parameter setup (built ONCE, reused by every forward call).
# ----------------------------------------------------------------------------
def init_params(key):
    ks = jax.random.split(key, 8)
    s = 0.2
    return {
        'freqs': jnp.exp(-jnp.log(10000.0) * jnp.arange(TH, dtype=jnp.float32) / TH)[None, :],
        'wt': s * jax.random.normal(ks[0], (EMB, EMB), jnp.float32),
        'bt': s * jax.random.normal(ks[1], (1, EMB), jnp.float32),
        'wc': s * jax.random.normal(ks[2], (COND_DIM, EMB), jnp.float32),
        'bc': s * jax.random.normal(ks[3], (1, EMB), jnp.float32),
        'wp': s * jax.random.normal(ks[4], (EMB, C1), jnp.float32),
        'bp': jnp.zeros((1, C1), jnp.float32),
        'w1': s * jax.random.normal(ks[5], (9, C1), jnp.float32),
        'b1': s * jax.random.normal(ks[6], (1, C1), jnp.float32),
        'w2': s * jax.random.normal(ks[7], (9, C1), jnp.float32),
        'b2': jnp.zeros((1, 1), jnp.float32),
    }


def prepare_kernel_params(params):
    """One-time build of shift-structured conv matrices (kx taps pre-summed)."""
    w1 = np.asarray(params['w1'], np.float32)          # (9, C1)  3x3, 1 -> C1
    w2 = np.asarray(params['w2'], np.float32)          # (9, C1)  3x3, C1 -> 1
    w1cat = np.zeros((3, WP_IN, LANES), np.float32)    # per-ky, summed over kx
    w2cat = np.zeros((3, LANES, WOUT), np.float32)
    for ky in range(3):
        for kx in range(3):
            tap = ky * 3 + kx
            for j in range(W):                         # output column
                cpad = j + kx                          # padded input column
                w1cat[ky, cpad, (j + 1) * C1:(j + 2) * C1] += w1[tap]
                w2cat[ky, cpad * C1:(cpad + 1) * C1, j] += w2[tap]

    w1cat128 = np.zeros((KDIM, LANES), np.float32)     # rows 96..127 stay zero
    w1cat128[:3 * WP_IN] = w1cat.reshape(3 * WP_IN, LANES)
    w2cat3 = np.concatenate([w2cat[0], w2cat[1], w2cat[2]], axis=1)   # (512, 96)

    # 0/1 selector spreading a length-C1 channel vector across valid lane blocks
    tile = np.zeros((C1, LANES), np.float32)
    for j in range(W):
        tile[:, (j + 1) * C1:(j + 2) * C1] = np.eye(C1, dtype=np.float32)
    wp_tile = np.asarray(params['wp'], np.float32) @ tile             # (EMB, LANES)
    bpb1_tile = np.asarray(params['bp'] + params['b1'], np.float32) @ tile

    freqs = np.asarray(params['freqs'], np.float32).reshape(-1)       # (TH,)
    freqs2 = np.concatenate([freqs, freqs])[None, :].astype(np.float32)
    phase = np.concatenate([np.zeros(TH, np.float32),
                            np.full(TH, np.pi / 2, np.float32)])[None, :]

    return {
        'freqs2': jnp.asarray(freqs2), 'phase': jnp.asarray(phase),
        'wt': params['wt'], 'bt': params['bt'],
        'wc': params['wc'], 'bc': params['bc'],
        'wp_tile': jnp.asarray(wp_tile), 'bpb1_tile': jnp.asarray(bpb1_tile),
        'w1cat128': jnp.asarray(w1cat128), 'w2cat3': jnp.asarray(w2cat3),
        'b2': params['b2'],
    }


def _pick_bb(batch):
    """Images per grid step: big slabs, but aim for >=2 steps (v7x has 2 TCs)."""
    half = (batch + 1) // 2
    bb = ((half + 7) // 8) * 8
    return max(8, min(MAX_BB, bb))


# ----------------------------------------------------------------------------
# Forward wrapper (Pallas-backed equivalent of forward(x_t, t, condition)).
# ----------------------------------------------------------------------------
@jax.jit
def unet_forward(kp, x_nchw, t, condition):
    f32 = jnp.float32
    B = x_nchw.shape[0]
    bb = _pick_bb(B)
    rows = bb * RPI
    n_blk = (B + bb - 1) // bb
    b_pad = n_blk * bb

    # padded image planes with zero borders: rows/cols 1..28 hold the image
    x = jnp.pad(x_nchw[:, 0].astype(f32),
                ((0, b_pad - B), (1, RPI - 1 - H), (1, WP_IN - 1 - W)))
    # 3 ky row-shifted copies stacked along lanes -> columns 0..95
    xk = jnp.concatenate(
        [jnp.pad(x[:, ky:, :], ((0, 0), (0, ky), (0, 0))) for ky in range(3)],
        axis=-1)                                                     # (b_pad, RPI, 96)
    # per-image one-hot selector columns 96..127 (picks the bias row of the RHS)
    onehot = jax.nn.one_hot(jnp.arange(b_pad) % bb, MAX_BB, dtype=f32)
    onehot = jnp.broadcast_to(onehot[:, None, :], (b_pad, RPI, MAX_BB))
    xcat = jnp.concatenate([xk, onehot], axis=-1)                    # (b_pad, RPI, 128)
    # zero the per-image junk rows 28..31 (incl. one-hot): h1 is exactly zero
    # there, giving the conv2 row halo for free (no in-kernel mask).
    rowmask = (jnp.arange(RPI) < H).astype(f32)[None, :, None]
    xcat = (xcat * rowmask).reshape(b_pad * RPI, KDIM)

    t2d = jnp.pad(t.astype(f32), (0, b_pad - B))[:, None]            # (b_pad, 1)
    cond = jnp.pad(condition.astype(f32), ((0, b_pad - B), (0, 0)))

    def fixed(shape):
        return pl.BlockSpec(shape, lambda i: (0,) * len(shape))

    out2d = pl.pallas_call(
        unet_kernel,
        out_shape=jax.ShapeDtypeStruct((b_pad * RPI, WOUT), f32),
        grid=(n_blk,),
        in_specs=[
            pl.BlockSpec((bb, 1), lambda i: (i, 0)),            # t
            pl.BlockSpec((bb, COND_DIM), lambda i: (i, 0)),     # condition
            pl.BlockSpec((rows, KDIM), lambda i: (i, 0)),       # xcat
            fixed((1, EMB)), fixed((1, EMB)),                   # freqs2, phase
            fixed((EMB, EMB)), fixed((1, EMB)),                 # wt, bt
            fixed((COND_DIM, EMB)), fixed((1, EMB)),            # wc, bc
            fixed((EMB, LANES)), fixed((1, LANES)),             # wp_tile, bpb1_tile
            fixed((KDIM, LANES)), fixed((LANES, 3 * WOUT)),     # w1cat128, w2cat3
            fixed((1, 1)),                                      # b2
        ],
        out_specs=pl.BlockSpec((rows, WOUT), lambda i: (i, 0)),
        scratch_shapes=[pltpu.VMEM((KDIM, LANES), f32)],        # conv1 RHS
        compiler_params=pltpu.CompilerParams(
            dimension_semantics=("parallel",),
            vmem_limit_bytes=48 * 1024 * 1024),
    )(t2d, cond, xcat, kp['freqs2'], kp['phase'], kp['wt'], kp['bt'],
      kp['wc'], kp['bc'], kp['wp_tile'], kp['bpb1_tile'],
      kp['w1cat128'], kp['w2cat3'], kp['b2'])

    out = out2d.reshape(b_pad, RPI, WOUT)[:B, :H, :W]
    return out[:, None, :, :]                          # NCHW, like the PyTorch module


# ----------------------------------------------------------------------------
# Pure-JAX reference (same math) for a correctness check.
# ----------------------------------------------------------------------------
def unet_forward_ref(params, x_nchw, t, condition):
    p = params
    tf = t.astype(jnp.float32)[:, None]
    ang = tf * p['freqs']
    temb = _silu(jnp.concatenate([jnp.sin(ang), jnp.cos(ang)], axis=-1) @ p['wt'] + p['bt'])
    cemb = _silu(condition.astype(jnp.float32) @ p['wc'] + p['bc'])
    emb = temb + cemb
    chan = emb @ p['wp'] + p['bp'] + p['b1']

    x = jnp.transpose(x_nchw, (0, 2, 3, 1)).astype(jnp.float32)          # NHWC
    w1 = p['w1'].reshape(3, 3, 1, C1)
    h = lax.conv_general_dilated(x, w1, (1, 1), 'SAME',
                                 dimension_numbers=('NHWC', 'HWIO', 'NHWC'),
                                 precision=lax.Precision.HIGHEST)
    h = _silu(h + chan[:, None, None, :])
    w2 = p['w2'].reshape(3, 3, C1, 1)
    out = lax.conv_general_dilated(h, w2, (1, 1), 'SAME',
                                   dimension_numbers=('NHWC', 'HWIO', 'NHWC'),
                                   precision=lax.Precision.HIGHEST)
    out = out + p['b2'].reshape(1, 1, 1, 1)
    return jnp.transpose(out, (0, 3, 1, 2))                              # NCHW


if __name__ == "__main__":
    key = jax.random.PRNGKey(0)
    NUM_TIMESTEPS = 1000

    params = init_params(jax.random.PRNGKey(42))
    kparams = prepare_kernel_params(params)       # hoisted one-time build

    # B=2: single grid step (bb=8);  B=11: two-step grid with padding (bb=8);
    # B=64: big-slab path (bb=32, two steps -> both TCs on v7x).
    for B in (2, 11, 64):
        k1, k2, k3 = jax.random.split(jax.random.fold_in(key, B), 3)
        x_t = jax.random.normal(k1, (B, 1, H, W), jnp.float32)            # like sample()'s x
        t = jax.random.randint(k2, (B,), 0, NUM_TIMESTEPS)                # diffusion timestep
        condition = jax.random.normal(k3, (B, COND_DIM), jnp.float32)     # fMRI embedding

        out = jax.block_until_ready(unet_forward(kparams, x_t, t, condition))
        assert out.shape == (B, 1, H, W), out.shape

        ref = unet_forward_ref(params, x_t, t, condition)
        err = float(jnp.max(jnp.abs(out - ref)))
        assert err < 2e-3, f"B={B}: max abs error {err}"

    # TODO(synk): compute_clip_guidance / sample() depend on an external pretrained
    # CLIP model and are outside forward(); they are not part of this kernel.
    print("KERNEL_OK")
</pallas_src>

<mosaic_0001>
module attributes {stable_mosaic.version = 11 : i64} {
  func.func @unet_kernel(%arg0: i32, %arg1: memref<8x1xf32, #tpu.memory_space<vmem>>, %arg2: memref<8x32xf32, #tpu.memory_space<vmem>>, %arg3: memref<256x128xf32, #tpu.memory_space<vmem>>, %arg4: memref<1x32xf32, #tpu.memory_space<vmem>>, %arg5: memref<1x32xf32, #tpu.memory_space<vmem>>, %arg6: memref<32x32xf32, #tpu.memory_space<vmem>>, %arg7: memref<1x32xf32, #tpu.memory_space<vmem>>, %arg8: memref<32x32xf32, #tpu.memory_space<vmem>>, %arg9: memref<1x32xf32, #tpu.memory_space<vmem>>, %arg10: memref<32x512xf32, #tpu.memory_space<vmem>>, %arg11: memref<1x512xf32, #tpu.memory_space<vmem>>, %arg12: memref<128x512xf32, #tpu.memory_space<vmem>>, %arg13: memref<512x96xf32, #tpu.memory_space<vmem>>, %arg14: memref<1x1xf32, #tpu.memory_space<vmem>>, %arg15: memref<256x32xf32, #tpu.memory_space<vmem>>, %arg16: memref<128x512xf32, #tpu.memory_space<vmem>>) attributes {dimension_semantics = [#tpu.dimension_semantics<parallel>], iteration_bounds = array<i64: 1>, scalar_prefetch = 0 : i64, scratch_operands = 1 : i64, tpu.core_type = #tpu.core_type<tc>, window_params = [{transform_indices = @transform_0, window_bounds = array<i64: 8, 1>}, {transform_indices = @transform_1, window_bounds = array<i64: 8, 32>}, {transform_indices = @transform_2, window_bounds = array<i64: 256, 128>}, {pipeline_mode = #tpu.pipeline_mode<synchronous>, transform_indices = @transform_3, window_bounds = array<i64: 1, 32>}, {pipeline_mode = #tpu.pipeline_mode<synchronous>, transform_indices = @transform_4, window_bounds = array<i64: 1, 32>}, {pipeline_mode = #tpu.pipeline_mode<synchronous>, transform_indices = @transform_5, window_bounds = array<i64: 32, 32>}, {pipeline_mode = #tpu.pipeline_mode<synchronous>, transform_indices = @transform_6, window_bounds = array<i64: 1, 32>}, {pipeline_mode = #tpu.pipeline_mode<synchronous>, transform_indices = @transform_7, window_bounds = array<i64: 32, 32>}, {pipeline_mode = #tpu.pipeline_mode<synchronous>, transform_indices = @transform_8, window_bounds = array<i64: 1, 32>}, {pipeline_mode = #tpu.pipeline_mode<synchronous>, transform_indices = @transform_9, window_bounds = array<i64: 32, 512>}, {pipeline_mode = #tpu.pipeline_mode<synchronous>, transform_indices = @transform_10, window_bounds = array<i64: 1, 512>}, {pipeline_mode = #tpu.pipeline_mode<synchronous>, transform_indices = @transform_11, window_bounds = array<i64: 128, 512>}, {pipeline_mode = #tpu.pipeline_mode<synchronous>, transform_indices = @transform_12, window_bounds = array<i64: 512, 96>}, {pipeline_mode = #tpu.pipeline_mode<synchronous>, transform_indices = @transform_13, window_bounds = array<i64: 1, 1>}, {transform_indices = @transform_14, window_bounds = array<i64: 256, 32>}]} {
    %c0 = arith.constant 0 : index
    %c0_0 = arith.constant 0 : index
    %0 = vector.load %arg1[%c0, %c0_0] : memref<8x1xf32, #tpu.memory_space<vmem>>, vector<8x1xf32>
    %c0_1 = arith.constant 0 : index
    %c0_2 = arith.constant 0 : index
    %1 = vector.load %arg4[%c0_1, %c0_2] : memref<1x32xf32, #tpu.memory_space<vmem>>, vector<1x32xf32>
    %2 = vector.broadcast %0 : vector<8x1xf32> to vector<8x32xf32>
    %3 = vector.broadcast %1 : vector<1x32xf32> to vector<8x32xf32>
    %4 = arith.mulf %2, %3 : vector<8x32xf32>
    %c0_3 = arith.constant 0 : index
    %c0_4 = arith.constant 0 : index
    %5 = vector.load %arg5[%c0_3, %c0_4] : memref<1x32xf32, #tpu.memory_space<vmem>>, vector<1x32xf32>
    %6 = vector.broadcast %5 : vector<1x32xf32> to vector<8x32xf32>
    %7 = arith.addf %4, %6 : vector<8x32xf32>
    %8 = math.sin %7 : vector<8x32xf32>
    %c0_5 = arith.constant 0 : index
    %c0_6 = arith.constant 0 : index
    %9 = vector.load %arg6[%c0_5, %c0_6] : memref<32x32xf32, #tpu.memory_space<vmem>>, vector<32x32xf32>
    %cst = arith.constant dense<0.000000e+00> : vector<8x32xf32>
    %10 = tpu.matmul %8, %9, %cst {dimension_numbers = #tpu.dot_dimension_numbers<[1], [0], [0], [1], [0, 0, 1, 1], [], []>} : vector<8x32xf32>, vector<32x32xf32>, vector<8x32xf32> -> vector<8x32xf32>
    %c0_7 = arith.constant 0 : index
    %c0_8 = arith.constant 0 : index
    %11 = vector.load %arg7[%c0_7, %c0_8] : memref<1x32xf32, #tpu.memory_space<vmem>>, vector<1x32xf32>
    %12 = vector.broadcast %11 : vector<1x32xf32> to vector<8x32xf32>
    %13 = arith.addf %10, %12 : vector<8x32xf32>
    %cst_9 = arith.constant 0.000000e+00 : f32
    %14 = vector.broadcast %cst_9 : f32 to vector<8x32xf32>
    %15 = arith.subf %14, %13 : vector<8x32xf32>
    %16 = math.exp %15 : vector<8x32xf32>
    %cst_10 = arith.constant 1.000000e+00 : f32
    %17 = vector.broadcast %cst_10 : f32 to vector<8x32xf32>
    %18 = arith.addf %17, %16 : vector<8x32xf32>
    %cst_11 = arith.constant 1.000000e+00 : f32
    %19 = vector.broadcast %cst_11 : f32 to vector<8x32xf32>
    %20 = arith.divf %19, %18 : vector<8x32xf32>
    %21 = arith.mulf %13, %20 : vector<8x32xf32>
    %c0_12 = arith.constant 0 : index
    %c0_13 = arith.constant 0 : index
    %22 = vector.load %arg2[%c0_12, %c0_13] : memref<8x32xf32, #tpu.memory_space<vmem>>, vector<8x32xf32>
    %c0_14 = arith.constant 0 : index
    %c0_15 = arith.constant 0 : index
    %23 = vector.load %arg8[%c0_14, %c0_15] : memref<32x32xf32, #tpu.memory_space<vmem>>, vector<32x32xf32>
    %cst_16 = arith.constant dense<0.000000e+00> : vector<8x32xf32>
    %24 = tpu.matmul %22, %23, %cst_16 {dimension_numbers = #tpu.dot_dimension_numbers<[1], [0], [0], [1], [0, 0, 1, 1], [], []>} : vector<8x32xf32>, vector<32x32xf32>, vector<8x32xf32> -> vector<8x32xf32>
    %c0_17 = arith.constant 0 : index
    %c0_18 = arith.constant 0 : index
    %25 = vector.load %arg9[%c0_17, %c0_18] : memref<1x32xf32, #tpu.memory_space<vmem>>, vector<1x32xf32>
    %26 = vector.broadcast %25 : vector<1x32xf32> to vector<8x32xf32>
    %27 = arith.addf %24, %26 : vector<8x32xf32>
    %cst_19 = arith.constant 0.000000e+00 : f32
    %28 = vector.broadcast %cst_19 : f32 to vector<8x32xf32>
    %29 = arith.subf %28, %27 : vector<8x32xf32>
    %30 = math.exp %29 : vector<8x32xf32>
    %cst_20 = arith.constant 1.000000e+00 : f32
    %31 = vector.broadcast %cst_20 : f32 to vector<8x32xf32>
    %32 = arith.addf %31, %30 : vector<8x32xf32>
    %cst_21 = arith.constant 1.000000e+00 : f32
    %33 = vector.broadcast %cst_21 : f32 to vector<8x32xf32>
    %34 = arith.divf %33, %32 : vector<8x32xf32>
    %35 = arith.mulf %27, %34 : vector<8x32xf32>
    %36 = arith.addf %21, %35 : vector<8x32xf32>
    %c0_22 = arith.constant 0 : index
    %c0_23 = arith.constant 0 : index
    %37 = vector.load %arg10[%c0_22, %c0_23] : memref<32x512xf32, #tpu.memory_space<vmem>>, vector<32x512xf32>
    %cst_24 = arith.constant dense<0.000000e+00> : vector<8x512xf32>
    %38 = tpu.matmul %36, %37, %cst_24 {dimension_numbers = #tpu.dot_dimension_numbers<[1], [0], [0], [1], [0, 0, 1, 1], [], []>} : vector<8x32xf32>, vector<32x512xf32>, vector<8x512xf32> -> vector<8x512xf32>
    %c0_25 = arith.constant 0 : index
    %c0_26 = arith.constant 0 : index
    %39 = vector.load %arg11[%c0_25, %c0_26] : memref<1x512xf32, #tpu.memory_space<vmem>>, vector<1x512xf32>
    %40 = vector.broadcast %39 : vector<1x512xf32> to vector<8x512xf32>
    %41 = arith.addf %38, %40 : vector<8x512xf32>
    %c0_27 = arith.constant 0 : index
    %c0_28 = arith.constant 0 : index
    %42 = vector.load %arg12[%c0_27, %c0_28] : memref<128x512xf32, #tpu.memory_space<vmem>>, vector<128x512xf32>
    %c0_29 = arith.constant 0 : index
    %c0_30 = arith.constant 0 : index
    %43 = vector.load %arg16[%c0_29, %c0_30] : memref<128x512xf32, #tpu.memory_space<vmem>>, vector<128x512xf32>
    tpu.vector_store %arg16[%c0_29, %c0_30], %42 {strides = array<i32>} : memref<128x512xf32, #tpu.memory_space<vmem>>, vector<128x512xf32>,
    %c96 = arith.constant 96 : index
    %c0_31 = arith.constant 0 : index
    %44 = vector.load %arg16[%c96, %c0_31] : memref<128x512xf32, #tpu.memory_space<vmem>>, vector<8x512xf32>
    tpu.vector_store %arg16[%c96, %c0_31], %41 {strides = array<i32>} : memref<128x512xf32, #tpu.memory_space<vmem>>, vector<8x512xf32>,
    %c0_32 = arith.constant 0 : index
    %c0_33 = arith.constant 0 : index
    %45 = vector.load %arg3[%c0_32, %c0_33] : memref<256x128xf32, #tpu.memory_space<vmem>>, vector<256x128xf32>
    %c0_34 = arith.constant 0 : index
    %c0_35 = arith.constant 0 : index
    %46 = vector.load %arg16[%c0_34, %c0_35] : memref<128x512xf32, #tpu.memory_space<vmem>>, vector<128x512xf32>
    %cst_36 = arith.constant dense<0.000000e+00> : vector<256x512xf32>
    %47 = tpu.matmul %45, %46, %cst_36 {dimension_numbers = #tpu.dot_dimension_numbers<[1], [0], [0], [1], [0, 0, 1, 1], [], []>} : vector<256x128xf32>, vector<128x512xf32>, vector<256x512xf32> -> vector<256x512xf32>
    %cst_37 = arith.constant 0.000000e+00 : f32
    %48 = vector.broadcast %cst_37 : f32 to vector<256x512xf32>
    %49 = arith.subf %48, %47 : vector<256x512xf32>
    %50 = math.exp %49 : vector<256x512xf32>
    %cst_38 = arith.constant 1.000000e+00 : f32
    %51 = vector.broadcast %cst_38 : f32 to vector<256x512xf32>
    %52 = arith.addf %51, %50 : vector<256x512xf32>
    %cst_39 = arith.constant 1.000000e+00 : f32
    %53 = vector.broadcast %cst_39 : f32 to vector<256x512xf32>
    %54 = arith.divf %53, %52 : vector<256x512xf32>
    %55 = arith.mulf %47, %54 : vector<256x512xf32>
    %c0_40 = arith.constant 0 : index
    %c0_41 = arith.constant 0 : index
    %56 = vector.load %arg13[%c0_40, %c0_41] : memref<512x96xf32, #tpu.memory_space<vmem>>, vector<512x96xf32>
    %cst_42 = arith.constant dense<0.000000e+00> : vector<256x96xf32>
    %57 = tpu.matmul %55, %56, %cst_42 {dimension_numbers = #tpu.dot_dimension_numbers<[1], [0], [0], [1], [0, 0, 1, 1], [], []>} : vector<256x512xf32>, vector<512x96xf32>, vector<256x96xf32> -> vector<256x96xf32>
    %58 = vector.extract_strided_slice %57 {offsets = [0, 0], sizes = [256, 32], strides = [1, 1]} : vector<256x96xf32> to vector<256x32xf32>
    %59 = vector.extract_strided_slice %57 {offsets = [0, 32], sizes = [256, 32], strides = [1, 1]} : vector<256x96xf32> to vector<256x32xf32>
    %60 = vector.extract_strided_slice %57 {offsets = [0, 64], sizes = [256, 32], strides = [1, 1]} : vector<256x96xf32> to vector<256x32xf32>
    %cst_43 = arith.constant 0.000000e+00 : f32
    %61 = vector.broadcast %cst_43 : f32 to vector<1x32xf32>
    %62 = vector.extract_strided_slice %58 {offsets = [0, 0], sizes = [255, 32], strides = [1, 1]} : vector<256x32xf32> to vector<255x32xf32>
    %63 = tpu.concatenate %61, %62 in 0 : vector<1x32xf32>, vector<255x32xf32> -> vector<256x32xf32>
    %64 = arith.addf %63, %59 : vector<256x32xf32>
    %65 = vector.extract_strided_slice %60 {offsets = [1, 0], sizes = [255, 32], strides = [1, 1]} : vector<256x32xf32> to vector<255x32xf32>
    %66 = tpu.concatenate %65, %61 in 0 : vector<255x32xf32>, vector<1x32xf32> -> vector<256x32xf32>
    %67 = arith.addf %64, %66 : vector<256x32xf32>
    %c0_44 = arith.constant 0 : index
    %c0_45 = arith.constant 0 : index
    %68 = vector.load %arg14[%c0_44, %c0_45] : memref<1x1xf32, #tpu.memory_space<vmem>>, vector<1x1xf32>
    %69 = vector.broadcast %68 : vector<1x1xf32> to vector<256x32xf32>
    %70 = arith.addf %67, %69 : vector<256x32xf32>
    %c0_46 = arith.constant 0 : index
    %c0_47 = arith.constant 0 : index
    %71 = vector.load %arg15[%c0_46, %c0_47] : memref<256x32xf32, #tpu.memory_space<vmem>>, vector<256x32xf32>
    tpu.vector_store %arg15[%c0_46, %c0_47], %70 {strides = array<i32>} : memref<256x32xf32, #tpu.memory_space<vmem>>, vector<256x32xf32>,
    return
  }
  func.func @transform_0(%arg0: i32) -> (i32, i32) {
    %c0_i32 = arith.constant 0 : i32
    %c0_i32_0 = arith.constant 0 : i32
    return %arg0, %c0_i32 : i32, i32
  }
  func.func @transform_1(%arg0: i32) -> (i32, i32) {
    %c0_i32 = arith.constant 0 : i32
    %c0_i32_0 = arith.constant 0 : i32
    return %arg0, %c0_i32 : i32, i32
  }
  func.func @transform_2(%arg0: i32) -> (i32, i32) {
    %c0_i32 = arith.constant 0 : i32
    %c0_i32_0 = arith.constant 0 : i32
    return %arg0, %c0_i32 : i32, i32
  }
  func.func @transform_3(%arg0: i32) -> (i32, i32) {
    %c0_i32 = arith.constant 0 : i32
    %c0_i32_0 = arith.constant 0 : i32
    %c0_i32_1 = arith.constant 0 : i32
    return %c0_i32, %c0_i32_0 : i32, i32
  }
  func.func @transform_4(%arg0: i32) -> (i32, i32) {
    %c0_i32 = arith.constant 0 : i32
    %c0_i32_0 = arith.constant 0 : i32
    %c0_i32_1 = arith.constant 0 : i32
    return %c0_i32, %c0_i32_0 : i32, i32
  }
  func.func @transform_5(%arg0: i32) -> (i32, i32) {
    %c0_i32 = arith.constant 0 : i32
    %c0_i32_0 = arith.constant 0 : i32
    %c0_i32_1 = arith.constant 0 : i32
    return %c0_i32, %c0_i32_0 : i32, i32
  }
  func.func @transform_6(%arg0: i32) -> (i32, i32) {
    %c0_i32 = arith.constant 0 : i32
    %c0_i32_0 = arith.constant 0 : i32
    %c0_i32_1 = arith.constant 0 : i32
    return %c0_i32, %c0_i32_0 : i32, i32
  }
  func.func @transform_7(%arg0: i32) -> (i32, i32) {
    %c0_i32 = arith.constant 0 : i32
    %c0_i32_0 = arith.constant 0 : i32
    %c0_i32_1 = arith.constant 0 : i32
    return %c0_i32, %c0_i32_0 : i32, i32
  }
  func.func @transform_8(%arg0: i32) -> (i32, i32) {
    %c0_i32 = arith.constant 0 : i32
    %c0_i32_0 = arith.constant 0 : i32
    %c0_i32_1 = arith.constant 0 : i32
    return %c0_i32, %c0_i32_0 : i32, i32
  }
  func.func @transform_9(%arg0: i32) -> (i32, i32) {
    %c0_i32 = arith.constant 0 : i32
    %c0_i32_0 = arith.constant 0 : i32
    %c0_i32_1 = arith.constant 0 : i32
    return %c0_i32, %c0_i32_0 : i32, i32
  }
  func.func @transform_10(%arg0: i32) -> (i32, i32) {
    %c0_i32 = arith.constant 0 : i32
    %c0_i32_0 = arith.constant 0 : i32
    %c0_i32_1 = arith.constant 0 : i32
    return %c0_i32, %c0_i32_0 : i32, i32
  }
  func.func @transform_11(%arg0: i32) -> (i32, i32) {
    %c0_i32 = arith.constant 0 : i32
    %c0_i32_0 = arith.constant 0 : i32
    %c0_i32_1 = arith.constant 0 : i32
    return %c0_i32, %c0_i32_0 : i32, i32
  }
  func.func @transform_12(%arg0: i32) -> (i32, i32) {
    %c0_i32 = arith.constant 0 : i32
    %c0_i32_0 = arith.constant 0 : i32
    %c0_i32_1 = arith.constant 0 : i32
    return %c0_i32, %c0_i32_0 : i32, i32
  }
  func.func @transform_13(%arg0: i32) -> (i32, i32) {
    %c0_i32 = arith.constant 0 : i32
    %c0_i32_0 = arith.constant 0 : i32
    %c0_i32_1 = arith.constant 0 : i32
    return %c0_i32, %c0_i32_0 : i32, i32
  }
  func.func @transform_14(%arg0: i32) -> (i32, i32) {
    %c0_i32 = arith.constant 0 : i32
    %c0_i32_0 = arith.constant 0 : i32
    return %arg0, %c0_i32 : i32, i32
  }
}

</mosaic_0001>

<bundles_post_ra>
// kernel: unet_forward.1
= control target key start
LH: loop header
LB: loop body
LE: loop exit
PB: predicated region body
PF: predicated region fallthrough
CT: control target
= control target key end

     0   :  { %v5262_v0 = vmov 0   ;;  %vm11369_vm0 = vcmask 261120   ;;  %v5263_v27 = vmov 2102212464   ;;  %v5264_v29 = vmov 920167782   ;;  %s11350_s0 = inlined_call_operand.vmem [shape: f32[8,1], index: 0, kind: input, shape index: {}]   ;;  %s11351_s3 = inlined_call_operand.vmem [shape: f32[1,32], index: 3, kind: input, shape index: {}]   ;;  %s11352_s4 = inlined_call_operand.vmem [shape: f32[1,32], index: 4, kind: input, shape index: {}]   ;;  %s11353_s8 = inlined_call_operand.vmem [shape: f32[1,32], index: 8, kind: input, shape index: {}]   ;;  %s11354_s7 = inlined_call_operand.vmem [shape: f32[32,32], index: 7, kind: input, shape index: {}]   ;;  %s11355_s5 = inlined_call_operand.vmem [shape: f32[32,32], index: 5, kind: input, shape index: {}]   ;;  %s11356_s1 = inlined_call_operand.vmem [shape: f32[8,32], index: 1, kind: input, shape index: {}]   ;;  %s11357_s6 = inlined_call_operand.vmem [shape: f32[1,32], index: 6, kind: input, shape index: {}]   ;;  %s11358_s9 = inlined_call_operand.vmem [shape: f32[32,512], index: 9, kind: input, shape index: {}]   ;;  %s11359_s11 = inlined_call_operand.vmem [shape: f32[128,512], index: 11, kind: input, shape index: {}]   ;;  %s11360_s10 = inlined_call_operand.vmem [shape: f32[1,512], index: 10, kind: input, shape index: {}]   ;;  %s11361_s2 = inlined_call_operand.vmem [shape: f32[256,128], index: 2, kind: input, shape index: {}]   ;;  %s11362_s12 = inlined_call_operand.vmem [shape: f32[512,96], index: 12, kind: input, shape index: {}]   ;;  %s11363_s13 = inlined_call_operand.<no memory space> [shape: f32[1,1], index: 13, kind: input, shape index: {}]   ;;  %s11364_s14 = inlined_call_operand.vmem [shape: f32[256,32], index: 14, kind: output, shape index: {}]  }
   0x1   :  { %4735 = vset.pattern.permute.xlu0 %v5262_v0  ;;  %v49_v1 = vld [vmem:[%s11350_s0] sm:$0xff]  ;;  %4736 = vset.pattern.permute.xlu2 %v5262_v0  ;;  %v276_v2 = vld [vmem:[%s11354_s7 + $0x18] sm:$0xff]  ;;  %v275_v3 = vld [vmem:[%s11354_s7 + $0x10] sm:$0xff]  ;;  %v5265_v32 = vmov 1326507024   ;;  %s5270_s21 = smov 64  }
   0x2   :  { %53 = vperm.xlu0 %4735, %v49_v1   ;;  %296 = vmatpush.msra.mxu1 %v276_v2  ;;  %v223_v4 = vld [vmem:[%s11355_s5 + $0x18] sm:$0xff]  ;;  %v274_v5 = vld [vmem:[%s11354_s7 + $0x8] sm:$0xff]  ;;  %v222_v6 = vld [vmem:[%s11355_s5 + $0x10] sm:$0xff]  ;;  %v5266_v34 = vmov 683565275  }
   0x3   :  { %244 = vmatpush.msra.mxu0 %v223_v4  ;;  %v221_v7 = vld [vmem:[%s11355_s5 + $0x8] sm:$0xff]  ;;  %v273_v8 = vld [vmem:[%s11354_s7] sm:$0xff]  ;;  %v5267_v36 = vmov 2475754826   ;;  %v5268_v39 = vmov 2131351028  }
   0x4   :  { %297 = vmatpush.msra.mxu1 %v275_v3  ;;  %v272_v9 = vld [vmem:[%s11356_s1] sm:$0xff] }
   0x5   :  { %245 = vmatpush.msra.mxu0 %v222_v6  ;;  %v220_v10 = vld [vmem:[%s11355_s5] sm:$0xff] }
   0x6   :  { %298 = vmatpush.msra.mxu1 %v274_v5  ;;  %v4737_v11 = vld [vmem:[%s11351_s3] ss:$0 sm:$0xff] }
   0x7   :  { %246 = vmatpush.msra.mxu0 %v221_v7  ;;  %v4738_v12 = vld [vmem:[%s11352_s4] ss:$0 sm:$0xff] }
   0x8   :  { %299 = vmatpush.msra.mxu1 %v273_v8 }
   0x9   :  { %4721 = vmatmul.msk.f32.vlgmr.msra.gmra.mxu1 %vm11369_vm0, %v272_v9  ;;  %247 = vmatpush.msra.mxu0 %v220_v10 }
  0x74   :  { %v54_v13 = vpop.permute.xlu0 %53 }
  0x75   :  { %v59_v14 = vmul.f32 %v4737_v11, %v54_v13 }
  0x77   :  { %v5385_v15 = vadd.f32 %v4738_v12, %v59_v14 }
  0x79   :  { %v68_v16 = vand.u32 2139095040, %v5385_v15  ;;  %v65_v19 = vand.u32 2147483647, %v5385_v15  ;;  %vm67_vm13 = vcmp.lt.s32.totalorder %v5385_v15, 0 }
  0x7b   :  { %v69_v17 = vshrl.u32 %v68_v16, 23  ;;  %v72_v21 = vand.u32 8388607, %v65_v19  ;;  %vm66_vm14 = vcmp.le.f32.partialorder %v65_v19, 0.7853982 }
  0x7d   :  { %v4717_v18 = vadd.s32 4294967169, %v69_v17  ;;  %v73_v25 = vor.u32 8388608, %v72_v21 }
  0x7f   :  { %v75_v20 = vadd.s32 1, %v4717_v18  ;;  %v5400_v46 = vshll.u32 %v73_v25, 8 }
  0x81   :  { %vm76_vm1 = vcmp.gt.s32.totalorder %v75_v20, 0  ;;  %v114_v56 = vand.u32 65535, %v5400_v46  ;;  %v115_v58 = vshrl.u32 %v5400_v46, 16 }
  0x82   :  { %v77_v22 = vsel %vm76_vm1, %v75_v20, 0 }
  0x83   :  { %v79_v23 = vand.u32 31, %v77_v22  ;;  %v5393_v26 = vshrl.u32 %v77_v22, 5 }
  0x85   :  { %v5391_v24 = vsub.s32 32, %v79_v23  ;;  %v91_v28 = vshll.u32 %v5263_v27, %v79_v23  ;;  %v94_v30 = vshll.u32 %v5264_v29, %v79_v23  ;;  %v82_v35 = vshll.u32 %v5266_v34, %v79_v23 }
  0x86   :  { %v85_v38 = vshll.u32 %v5267_v36, %v79_v23  ;;  %v88_v41 = vshll.u32 %v5268_v39, %v79_v23  ;;  %vm100_vm2 = vcmp.lt.s32.totalorder %v5393_v26, 4  ;;  %vm97_vm3 = vcmp.lt.s32.totalorder %v5393_v26, 1 }
  0x87   :  { %v92_v31 = vshrl.u32 %v5264_v29, %v5391_v24  ;;  %v95_v33 = vshrl.u32 %v5265_v32, %v5391_v24  ;;  %v83_v37 = vshrl.u32 %v5267_v36, %v5391_v24  ;;  %v86_v40 = vshrl.u32 %v5268_v39, %v5391_v24 }
  0x88   :  { %v89_v42 = vshrl.u32 %v5263_v27, %v5391_v24  ;;  %vm99_vm4 = vcmp.lt.s32.totalorder %v5393_v26, 3  ;;  %vm98_vm5 = vcmp.lt.s32.totalorder %v5393_v26, 2  ;;  %v81_v20 = vshrl.u32 %v5266_v34, %v5391_v24 }
  0x89   :  { %v93_v43 = vor.u32 %v92_v31, %v91_v28  ;;  %v96_v44 = vor.u32 %v95_v33, %v94_v30  ;;  %v84_v45 = vor.u32 %v83_v37, %v82_v35  ;;  %v87_v47 = vor.u32 %v86_v40, %v85_v38 }
  0x8a   :  { %v90_v48 = vor.u32 %v89_v42, %v88_v41 }
  0x8b   :  { %v106_v49 = vsel %vm100_vm2, %v93_v43, 920167782  ;;  %v110_v50 = vsel %vm100_vm2, %v96_v44, 1326507024  ;;  %v105_v51 = vsel %vm97_vm3, %v84_v45, %v87_v47  ;;  %v101_v28 = vsel %vm97_vm3, %v81_v20, %v84_v45 }
  0x8c   :  { %v107_v52 = vsel %vm99_vm4, %v90_v48, %v106_v49  ;;  %v109_v53 = vsel %vm97_vm3, %v87_v47, %v90_v48  ;;  %v111_v55 = vsel %vm99_vm4, %v93_v43, %v110_v50  ;;  %v102_v16 = vsel %vm100_vm2, %v90_v48, 2102212464 }
  0x8d   :  { %v108_v54 = vsel %vm98_vm5, %v105_v51, %v107_v52  ;;  %v112_v57 = vsel %vm98_vm5, %v109_v53, %v111_v55  ;;  %v103_v29 = vsel %vm99_vm4, %v87_v47, %v102_v16  ;;  %vm208_vm3 = vweird.f32 %v5385_v15 }
  0x8e   :  { %v138_v59 = vand.u32 65535, %v108_v54  ;;  %v139_v60 = vshrl.u32 %v108_v54, 16  ;;  %v116_v61 = vand.u32 65535, %v112_v57  ;;  %v117_v62 = vshrl.u32 %v112_v57, 16 }
  0x8f   :  { %v104_v34 = vsel %vm98_vm5, %v101_v28, %v103_v29 }
  0x90   :  { %v141_v63 = vmul.u32 %v139_v60, %v114_v56  ;;  %v142_v1 = vmul.u32 %v138_v59, %v115_v58  ;;  %v119_v2 = vmul.u32 %v117_v62, %v114_v56  ;;  %v120_v3 = vmul.u32 %v116_v61, %v115_v58 }
  0x91   :  { %v140_v4 = vmul.u32 %v138_v59, %v114_v56  ;;  %v118_v6 = vmul.u32 %v116_v61, %v114_v56  ;;  %v143_v8 = vmul.u32 %v139_v60, %v115_v58  ;;  %v121_v9 = vmul.u32 %v117_v62, %v115_v58 }
  0x92   :  { %v144_v5 = vshll.u32 %v141_v63, 16  ;;  %v122_v7 = vshll.u32 %v119_v2, 16  ;;  %v146_v10 = vshll.u32 %v142_v1, 16  ;;  %v124_v12 = vshll.u32 %v120_v3, 16 }
  0x93   :  { %v145_v25 = vshrl.u32 %v141_v63, 16  ;;  %v123_v30 = vshrl.u32 %v119_v2, 16  ;;  %v147_v32 = vshrl.u32 %v142_v1, 16  ;;  %v125_v35 = vshrl.u32 %v120_v3, 16 }
  0x94   :  { %vm148_vm6 = vc.u32 %v140_v4, %v144_v5  ;;  %v150_v11 = vadd.s32 %v144_v5, %v140_v4  ;;  %vm126_vm7 = vc.u32 %v118_v6, %v122_v7  ;;  %v128_v13 = vadd.s32 %v122_v7, %v118_v6 }
  0x95   :  { %v149_v14 = vsel %vm148_vm6, 1, %v5262_v0  ;;  %v127_v17 = vsel %vm126_vm7, 1, %v5262_v0  ;;  %v158_v39 = vmul.u32 %v5400_v46, %v104_v34 }
  0x96   :  { %v151_v18 = vadd.s32 %v149_v14, %v143_v8  ;;  %vm152_vm8 = vc.u32 %v150_v11, %v146_v10  ;;  %v129_v21 = vadd.s32 %v127_v17, %v121_v9  ;;  %vm130_vm9 = vc.u32 %v128_v13, %v124_v12 }
  0x97   :  { %v153_v22 = vsel %vm152_vm8, 1, %v5262_v0  ;;  %v131_v23 = vsel %vm130_vm9, 1, %v5262_v0  ;;  %v154_v0 = vadd.s32 %v150_v11, %v146_v10 }
  0x98   :  { %v155_v27 = vadd.s32 %v153_v22, %v151_v18  ;;  %v133_v31 = vadd.s32 %v131_v23, %v129_v21 }
  0x9a   :  { %v156_v33 = vadd.s32 %v155_v27, %v145_v25  ;;  %v134_v24 = vadd.s32 %v133_v31, %v123_v30  ;;  %v4739_v30 = vld [vmem:[%s11353_s8] ss:$0 sm:$0xff]  ;;  %v301_v31 = vpop.f32.mrf.mxu1 }
  0x9c   :  { %v157_v36 = vadd.s32 %v156_v33, %v147_v32  ;;  %v135_v37 = vadd.s32 %v134_v24, %v125_v35  ;;  %v5447_v32 = vadd.f32 %v4739_v30, %v301_v31  ;;  %v487_v30 = vld [vmem:[%s11359_s11 + $0x1a8] sm:$0xff]  ;;  %v341_v31 = vld [vmem:[%s11360_s10] sm:$0xf] }
  0x9e   :  { %v161_v38 = vadd.s32 1, %v157_v36  ;;  %vm160_vm10 = vc.u32 %v135_v37, %v154_v0  ;;  %v159_v51 = vadd.s32 %v154_v0, %v135_v37  ;;  %v304_v33 = vsub.f32 0.0, %v5447_v32  ;;  %v337_v37 = vld [vmem:[%s11358_s9 + $0x60] sm:$0xff]  ;;  %v338_v0 = vld [vmem:[%s11358_s9 + $0x68] sm:$0xff] }
  0x9f   :  { %366 = vmatpush.msra.mxu2 %v337_v37  ;;  %386 = vmatpush.msra.mxu3 %v338_v0  ;;  %v481_v37 = vld [vmem:[%s11359_s11 + $0x178] sm:$0xff]  ;;  %v343_v0 = vperm.slane %v341_v31, 0 }
  0xa0   :  { %v162_v40 = vsel %vm160_vm10, %v161_v38, %v157_v36  ;;  %v305_v35 = vmul.f32 1.442695, %v304_v33  ;;  %v339_v38 = vld [vmem:[%s11358_s9 + $0x70] sm:$0xff]  ;;  %v346_v33 = vperm.slane %v341_v31, 3 }
  0xa1   :  { %v163_v41 = vadd.s32 %v162_v40, %v158_v39  ;;  %v340_v40 = vld [vmem:[%s11358_s9 + $0x78] sm:$0xff]  ;;  %406 = vmatpush.msrb.mxu0 %v339_v38  ;;  %v344_v38 = vperm.slane %v341_v31, 1 }
  0xa2   :  { %4742 = vpow2.f32 %v305_v35  ;;  %426 = vmatpush.msrb.mxu1 %v340_v40  ;;  %v477_v40 = vld [vmem:[%s11359_s11 + $0x158] sm:$0xff] }
  0xa3   :  { %v164_v42 = vadd.s32 536870912, %v163_v41 }
  0xa5   :  { %v165_v43 = vshrl.u32 %v164_v42, 30  ;;  %v334_v42 = vld [vmem:[%s11358_s9 + $0x48] sm:$0xff] }
  0xa6   :  { %387 = vmatpush.msra.mxu3 %v334_v42 }
  0xa7   :  { %v166_v44 = vshll.u32 %v165_v43, 30  ;;  %v189_v1 = vsub.s32 4, %v165_v43 }
  0xa8   :  { %v4743_v24 = vpop.eup %4742 }
  0xa9   :  { %v167_v45 = vsub.s32 %v163_v41, %v166_v44  ;;  %v190_v6 = vsel %vm67_vm13, %v189_v1, %v165_v43  ;;  %v5453_v34 = vadd.f32 1.0, %v4743_v24  ;;  %v333_v41 = vld [vmem:[%s11358_s9 + $0x40] sm:$0xff]  ;;  %v335_v43 = vld [vmem:[%s11358_s9 + $0x50] sm:$0xff] }
  0xaa   :  { %v192_v9 = vsel %vm66_vm14, 0, %v190_v6  ;;  %367 = vmatpush.msra.mxu2 %v333_v41  ;;  %407 = vmatpush.msrb.mxu0 %v335_v43 }
  0xab   :  { %vm168_vm11 = vcmp.lt.s32.totalorder %v167_v45, 0  ;;  %v169_v47 = vsub.s32 0, %v167_v45  ;;  %v209_v14 = vadd.s32 3, %v192_v9  ;;  %4744 = vrcp.f32 %v5453_v34 }
  0xac   :  { %vm313_vm4 = vweird.f32 %v5453_v34 }
  0xad   :  { %v170_v48 = vsel %vm168_vm11, %v169_v47, %v167_v45  ;;  %v210_v20 = vand.u32 3, %v209_v14  ;;  %v329_v47 = vld [vmem:[%s11358_s9 + $0x20] sm:$0xff] }
  0xae   :  { %v171_v49 = vclz %v170_v48  ;;  %v330_v48 = vld [vmem:[%s11358_s9 + $0x28] sm:$0xff]  ;;  %368 = vmatpush.msra.mxu2 %v329_v47  ;;  %v473_v47 = vld [vmem:[%s11359_s11 + $0x138] sm:$0xff] }
  0xaf   :  { %vm212_vm15 = vcmp.eq.s32.totalorder %v210_v20, 0  ;;  %vm215_vm1 = vcmp.eq.s32.totalorder %v210_v20, 2  ;;  %vm211_vm2 = vcmp.lt.s32.totalorder %v210_v20, 2  ;;  %388 = vmatpush.msra.mxu3 %v330_v48  ;;  %v478_v48 = vld [vmem:[%s11359_s11 + $0x160] sm:$0xff] }
  0xb0   :  { %v4718_v50 = vadd.s32 4294967294, %v171_v49  ;;  %v331_v49 = vld [vmem:[%s11358_s9 + $0x30] sm:$0xff] }
  0xb1   :  { %408 = vmatpush.msrb.mxu0 %v331_v49  ;;  %v479_v49 = vld [vmem:[%s11359_s11 + $0x168] sm:$0xff] }
  0xb2   :  { %vm4719_vm12 = vcmp.lt.s32.totalorder %v4718_v50, 0 }
  0xb3   :  { %v174_v26 = vsel %vm4719_vm12, 0, %v4718_v50  ;;  %v332_v50 = vld [vmem:[%s11358_s9 + $0x38] sm:$0xff] }
  0xb4   :  { %v175_v52 = vsub.s32 32, %v174_v26  ;;  %v179_v53 = vsub.s32 4294967266, %v174_v26  ;;  %v176_v54 = vshll.u32 %v167_v45, %v174_v26  ;;  %v336_v45 = vld [vmem:[%s11358_s9 + $0x58] sm:$0xff]  ;;  %v325_v26 = vld [vmem:[%s11358_s9] sm:$0xff] }
  0xb5   :  { %427 = vmatpush.msrb.mxu1 %v336_v45  ;;  %369 = vmatpush.msra.mxu2 %v325_v26  ;;  %v472_v45 = vld [vmem:[%s11359_s11 + $0x130] sm:$0xff]  ;;  %v469_v26 = vld [vmem:[%s11359_s11 + $0x118] sm:$0xff] }
  0xb6   :  { %v177_v55 = vshrl.u32 %v159_v51, %v175_v52  ;;  %v180_v46 = vadd.s32 127, %v179_v53  ;;  %v326_v52 = vld [vmem:[%s11358_s9 + $0x8] sm:$0xff]  ;;  %v327_v53 = vld [vmem:[%s11358_s9 + $0x10] sm:$0xff] }
  0xb7   :  { %428 = vmatpush.msrb.mxu1 %v332_v50  ;;  %389 = vmatpush.msra.mxu3 %v326_v52  ;;  %v468_v50 = vld [vmem:[%s11359_s11 + $0x110] sm:$0xff]  ;;  %v475_v52 = vld [vmem:[%s11359_s11 + $0x148] sm:$0xff] }
  0xb8   :  { %v178_v56 = vor.u32 %v177_v55, %v176_v54  ;;  %v181_v57 = vshll.u32 %v180_v46, 23  ;;  %v328_v54 = vld [vmem:[%s11358_s9 + $0x18] sm:$0xff]  ;;  %v496_v55 = vld [vmem:[%s11359_s11 + $0x1f0] sm:$0xff]  ;;  %409 = vmatpush.msrb.mxu0 %v327_v53 }
  0xb9   :  { %v497_v46 = vld [vmem:[%s11359_s11 + $0x1f8] sm:$0xff]  ;;  %429 = vmatpush.msrb.mxu1 %v328_v54  ;;  %v464_v53 = vld [vmem:[%s11359_s11 + $0xf0] sm:$0xff] }
  0xba   :  { %v182_v58 = vor.u32 4788187, %v181_v57  ;;  %v185_v60 = vcvt.s32.f32 %v178_v56  ;;  %v4745_v56 = vpop.eup %4744  ;;  %v492_v57 = vld [vmem:[%s11359_s11 + $0x1d0] sm:$0xff]  ;;  %v465_v54 = vld [vmem:[%s11359_s11 + $0xf8] sm:$0xff] }
  0xbb   :  { %1001 = vmatpush.msra.mxu1 %v497_v46  ;;  %vm314_vm5 = vweird.f32 %v4745_v56  ;;  %v471_v46 = vld [vmem:[%s11359_s11 + $0x128] sm:$0xff] }
  0xbc   :  { %v183_v59 = vand.u32 2147483647, %v182_v58  ;;  %v493_v58 = vld [vmem:[%s11359_s11 + $0x1d8] sm:$0xff]  ;;  %vm315_vm6 = vmor %vm313_vm4, %vm314_vm5 }
  0xbd   :  { %1002 = vmatpush.msra.mxu1 %v493_v58  ;;  %v466_v58 = vld [vmem:[%s11359_s11 + $0x100] sm:$0xff] }
  0xbe   :  { %v186_v61 = vmul.f32 %v185_v60, %v183_v59  ;;  %v309_v59 = vmul.f32 %v4745_v56, %v5453_v34 }
  0xc0   :  { %v187_v62 = vxor.u32 2147483648, %v186_v61 }
  0xc2   :  { %v188_v63 = vsel %vm67_vm13, %v187_v62, %v186_v61  ;;  %v310_v62 = vsub.f32 1.0, %v309_v59  ;;  %v467_v59 = vld [vmem:[%s11359_s11 + $0x108] sm:$0xff] }
  0xc3   :  { %v191_v2 = vsel %vm66_vm14, %v5385_v15, %v188_v63  ;;  %v4740_v15 = vld [vmem:[%s11357_s6] ss:$0 sm:$0xff] }
  0xc4   :  { %v193_v3 = vmul.f32 %v191_v2, %v191_v2  ;;  %v311_v63 = vmul.f32 %v4745_v56, %v310_v62  ;;  %v462_v62 = vld [vmem:[%s11359_s11 + $0xe0] sm:$0xff] }
  0xc6   :  { %v194_v4 = vmul.f32 -0.001358992, %v193_v3  ;;  %v201_v5 = vmul.f32 -0.00019511016, %v193_v3 }
  0xc8   :  { %v195_v7 = vadd.f32 0.041655596, %v194_v4  ;;  %v202_v8 = vadd.f32 0.008332121, %v201_v5  ;;  %v312_v4 = vadd.f32 %v4745_v56, %v311_v63  ;;  %v463_v63 = vld [vmem:[%s11359_s11 + $0xe8] sm:$0xff] }
  0xca   :  { %v196_v10 = vmul.f32 %v195_v7, %v193_v3  ;;  %v203_v11 = vmul.f32 %v202_v8, %v193_v3  ;;  %v316_v9 = vsel %vm315_vm6, %v4745_v56, %v312_v4  ;;  %v460_v56 = vld [vmem:[%s11359_s11 + $0xd0] sm:$0xff]  ;;  %v459_v4 = vld [vmem:[%s11359_s11 + $0xc8] sm:$0xff] }
  0xcc   :  { %v197_v12 = vadd.f32 -0.4999988, %v196_v10  ;;  %v204_v13 = vadd.f32 -0.16666654, %v203_v11 }
  0xce   :  { %v198_v16 = vmul.f32 %v197_v12, %v193_v3  ;;  %v205_v17 = vmul.f32 %v204_v13, %v193_v3  ;;  %v319_v3 = vand.u32 2147483648, %v5453_v34 }
  0xd0   :  { %v199_v18 = vadd.f32 1.0, %v198_v16  ;;  %v206_v19 = vadd.f32 1.0, %v205_v17  ;;  %v320_v7 = vor.u32 1.1754944e-38, %v319_v3  ;;  %v458_v3 = vld [vmem:[%s11359_s11 + $0xc0] sm:$0xff] }
  0xd2   :  { %v207_v21 = vmul.f32 %v206_v19, %v191_v2  ;;  %v216_v22 = vxor.u32 2147483648, %v199_v18  ;;  %v317_v2 = vand.u32 2147483647, %v5453_v34 }
  0xd4   :  { %v213_v23 = vxor.u32 2147483648, %v207_v21  ;;  %v217_v27 = vsel %vm215_vm1, %v216_v22, %v207_v21  ;;  %vm318_vm7 = vcmp.eq.f32.partialorder %v317_v2, 8.507059e+37  ;;  %v488_v21 = vld [vmem:[%s11359_s11 + $0x1b0] sm:$0xff]  ;;  %v489_v22 = vld [vmem:[%s11359_s11 + $0x1b8] sm:$0xff] }
  0xd5   :  { %v321_v13 = vsel %vm318_vm7, %v320_v7, %v316_v9  ;;  %1003 = vmatpush.msra.mxu1 %v489_v22  ;;  %v453_v2 = vld [vmem:[%s11359_s11 + $0x98] sm:$0xff]  ;;  %v454_v7 = vld [vmem:[%s11359_s11 + $0xa0] sm:$0xff]  ;;  %v444_v9 = vld [vmem:[%s11359_s11 + $0x50] sm:$0xff] }
  0xd6   :  { %v214_v25 = vsel %vm212_vm15, %v199_v18, %v213_v23  ;;  %v323_v18 = vmul.f32 %v321_v13, %v5447_v32  ;;  %v494_v23 = vld [vmem:[%s11359_s11 + $0x1e0] sm:$0xff]  ;;  %v345_v32 = vperm.slane %v341_v31, 2  ;;  %v440_v13 = vld [vmem:[%s11359_s11 + $0x30] sm:$0xff]  ;;  %v443_v22 = vld [vmem:[%s11359_s11 + $0x48] sm:$0xff] }
  0xd7   :  { %v218_v28 = vsel %vm211_vm2, %v214_v25, %v217_v27  ;;  %v495_v25 = vld [vmem:[%s11359_s11 + $0x1e8] sm:$0xff]  ;;  %662 = vmatpush.msrb.mxu2 %v494_v23  ;;  %v490_v27 = vld [vmem:[%s11359_s11 + $0x1c0] sm:$0xff]  ;;  %v3721_v23 = vld [vmem:[%s11362_s12 + $0x178] sm:$0xff] }
  0xd8   :  { %v219_v29 = vsel %vm208_vm3, nan, %v218_v28  ;;  %775 = vmatpush.msrb.mxu3 %v495_v25  ;;  %v491_v28 = vld [vmem:[%s11359_s11 + $0x1c8] sm:$0xff]  ;;  %v3737_v25 = vld [vmem:[%s11362_s12 + $0x1f8] sm:$0xff]  ;;  %v434_v31 = vld [vmem:[%s11359_s11] sm:$0xff] }
  0xd9   :  { %4720 = vmatmul.msk.f32.vlgmr.msra.gmra.mxu0 %vm11369_vm0, %v219_v29  ;;  %663 = vmatpush.msrb.mxu2 %v490_v27  ;;  %v486_v29 = vld [vmem:[%s11359_s11 + $0x1a0] sm:$0xff] }
  0xda   :  { %888 = vmatpush.msra.mxu0 %v496_v55  ;;  %776 = vmatpush.msrb.mxu3 %v491_v28  ;;  %v470_v55 = vld [vmem:[%s11359_s11 + $0x120] sm:$0xff]  ;;  %v439_v28 = vld [vmem:[%s11359_s11 + $0x28] sm:$0xff] }
  0xdb   :  { %664 = vmatpush.msrb.mxu2 %v486_v29  ;;  %v438_v27 = vld [vmem:[%s11359_s11 + $0x20] sm:$0xff]  ;;  %v3720_v29 = vld [vmem:[%s11362_s12 + $0x170] sm:$0xff] }
  0xdc   :  { %889 = vmatpush.msra.mxu0 %v492_v57  ;;  %777 = vmatpush.msrb.mxu3 %v487_v30  ;;  %v461_v57 = vld [vmem:[%s11359_s11 + $0xd8] sm:$0xff]  ;;  %v3736_v30 = vld [vmem:[%s11362_s12 + $0x1f0] sm:$0xff] }
  0xde   :  { %890 = vmatpush.msra.mxu0 %v488_v21  ;;  %v442_v21 = vld [vmem:[%s11359_s11 + $0x40] sm:$0xff] }
 0x156   :  { %v249_v36 = vpop.f32.mrf.mxu0 }
 0x157   :  { %v5464_v39 = vadd.f32 %v4740_v15, %v249_v36  ;;  %v480_v36 = vld [vmem:[%s11359_s11 + $0x170] sm:$0xff] }
 0x159   :  { %v252_v44 = vsub.f32 0.0, %v5464_v39 }
 0x15b   :  { %v253_v51 = vmul.f32 1.442695, %v252_v44 }
 0x15d   :  { %4746 = vpow2.f32 %v253_v51  ;;  %v474_v51 = vld [vmem:[%s11359_s11 + $0x140] sm:$0xff] }
 0x163   :  { %v4747_v60 = vpop.eup %4746 }
 0x164   :  { %v255_v61 = vadd.f32 1.0, %v4747_v60  ;;  %v456_v60 = vld [vmem:[%s11359_s11 + $0xb0] sm:$0xff] }
 0x166   :  { %4748 = vrcp.f32 %v255_v61  ;;  %v267_v8 = vand.u32 2147483648, %v255_v61  ;;  %v265_v11 = vand.u32 2147483647, %v255_v61  ;;  %vm261_vm9 = vweird.f32 %v255_v61 }
 0x168   :  { %v268_v14 = vor.u32 1.1754944e-38, %v267_v8  ;;  %vm266_vm11 = vcmp.eq.f32.partialorder %v265_v11, 8.507059e+37  ;;  %v455_v8 = vld [vmem:[%s11359_s11 + $0xa8] sm:$0xff]  ;;  %v450_v11 = vld [vmem:[%s11359_s11 + $0x80] sm:$0xff] }
 0x16c   :  { %v4749_v1 = vpop.eup %4748 }
 0x16d   :  { %v257_v5 = vmul.f32 %v4749_v1, %v255_v61  ;;  %vm262_vm8 = vweird.f32 %v4749_v1  ;;  %v457_v61 = vld [vmem:[%s11359_s11 + $0xb8] sm:$0xff] }
 0x16e   :  { %vm263_vm10 = vmor %vm261_vm9, %vm262_vm8 }
 0x16f   :  { %v258_v6 = vsub.f32 1.0, %v257_v5  ;;  %v448_v5 = vld [vmem:[%s11359_s11 + $0x70] sm:$0xff] }
 0x171   :  { %v259_v10 = vmul.f32 %v4749_v1, %v258_v6  ;;  %v449_v6 = vld [vmem:[%s11359_s11 + $0x78] sm:$0xff] }
 0x173   :  { %v260_v12 = vadd.f32 %v4749_v1, %v259_v10  ;;  %v445_v10 = vld [vmem:[%s11359_s11 + $0x58] sm:$0xff] }
 0x175   :  { %v264_v16 = vsel %vm263_vm10, %v4749_v1, %v260_v12  ;;  %v452_v1 = vld [vmem:[%s11359_s11 + $0x90] sm:$0xff]  ;;  %v451_v12 = vld [vmem:[%s11359_s11 + $0x88] sm:$0xff] }
 0x176   :  { %v269_v17 = vsel %vm266_vm11, %v268_v14, %v264_v16  ;;  %v441_v14 = vld [vmem:[%s11359_s11 + $0x38] sm:$0xff]  ;;  %v446_v16 = vld [vmem:[%s11359_s11 + $0x60] sm:$0xff] }
 0x177   :  { %v271_v19 = vmul.f32 %v269_v17, %v5464_v39  ;;  %v476_v39 = vld [vmem:[%s11359_s11 + $0x150] sm:$0xff]  ;;  %v447_v17 = vld [vmem:[%s11359_s11 + $0x68] sm:$0xff] }
 0x179   :  { %v324_v20 = vadd.f32 %v323_v18, %v271_v19  ;;  %v436_v18 = vld [vmem:[%s11359_s11 + $0x10] sm:$0xff]  ;;  %v437_v19 = vld [vmem:[%s11359_s11 + $0x18] sm:$0xff] }
 0x17b   :  { %4722 = vmatmul.msk.f32.vlgmr.msra.gmra.mxu2 %vm11369_vm0, %v324_v20  ;;  %4723 = vmatmul.msk.f32.vlgmr.msra.gmra.mxu3 %vm11369_vm0, %v324_v20 }
 0x17c   :  { %4724 = vmatmul.msk.f32.vlgmr.msrb.gmra.mxu0 %vm11369_vm0, %v324_v20  ;;  %4725 = vmatmul.msk.f32.vlgmr.msrb.gmra.mxu1 %vm11369_vm0, %v324_v20  ;;  %v566_v20 = vld [vmem:[%s11361_s2] sm:$0xff] }
 0x1f9   :  { %v411_v35 = vpop.f32.mrf.mxu0  ;;  %v431_v24 = vpop.f32.mrf.mxu1 }
 0x1fa   :  { %v412_v15 = vadd.f32 %v411_v35, %v345_v32  ;;  %v432_v34 = vadd.f32 %v431_v24, %v346_v33  ;;  %v435_v32 = vld [vmem:[%s11359_s11 + $0x8] sm:$0xff]  ;;  %v3689_v33 = vld [vmem:[%s11362_s12 + $0x78] sm:$0xff] }
 0x1fb   :  { %v3705_v35 = vld [vmem:[%s11362_s12 + $0xf8] sm:$0xff]  ;;  %v567_v24 = vld [vmem:[%s11361_s2 + $0x8] sm:$0xff] }
 0x1fc   :  { %891 = vmatpush.msra.mxu0 %v412_v15  ;;  %1004 = vmatpush.msra.mxu1 %v432_v34  ;;  %v3688_v15 = vld [vmem:[%s11362_s12 + $0x70] sm:$0xff] }
 0x1fd   :  { %v3704_v34 = vld [vmem:[%s11362_s12 + $0xf0] sm:$0xff] }
 0x1fe   :  { %892 = vmatpush.msra.mxu0 %v480_v36  ;;  %1005 = vmatpush.msra.mxu1 %v481_v37  ;;  %v371_v41 = vpop.f32.mrf.mxu2  ;;  %v391_v42 = vpop.f32.mrf.mxu3  ;;  %v3687_v36 = vld [vmem:[%s11362_s12 + $0x68] sm:$0xff] }
 0x1ff   :  { %v372_v43 = vadd.f32 %v371_v41, %v343_v0  ;;  %v392_v44 = vadd.f32 %v391_v42, %v344_v38  ;;  %v3703_v37 = vld [vmem:[%s11362_s12 + $0xe8] sm:$0xff]  ;;  %v568_v0 = vld [vmem:[%s11361_s2 + $0x10] sm:$0xff]  ;;  %v3686_v41 = vld [vmem:[%s11362_s12 + $0x60] sm:$0xff] }
 0x200   :  { %893 = vmatpush.msra.mxu0 %v476_v39  ;;  %1006 = vmatpush.msra.mxu1 %v477_v40  ;;  %v3719_v38 = vld [vmem:[%s11362_s12 + $0x168] sm:$0xff]  ;;  %v569_v40 = vld [vmem:[%s11361_s2 + $0x18] sm:$0xff]  ;;  %v3702_v42 = vld [vmem:[%s11362_s12 + $0xe0] sm:$0xff] }
 0x201   :  { %665 = vmatpush.msrb.mxu2 %v372_v43  ;;  %778 = vmatpush.msrb.mxu3 %v392_v44  ;;  %v3735_v39 = vld [vmem:[%s11362_s12 + $0x1e8] sm:$0xff]  ;;  %v570_v43 = vld [vmem:[%s11361_s2 + $0x20] sm:$0xff] }
 0x202   :  { %894 = vmatpush.msra.mxu0 %v472_v45  ;;  %1007 = vmatpush.msra.mxu1 %v473_v47  ;;  %v3718_v44 = vld [vmem:[%s11362_s12 + $0x160] sm:$0xff]  ;;  %v571_v47 = vld [vmem:[%s11361_s2 + $0x28] sm:$0xff] }
 0x203   :  { %666 = vmatpush.msrb.mxu2 %v478_v48  ;;  %779 = vmatpush.msrb.mxu3 %v479_v49  ;;  %v3734_v45 = vld [vmem:[%s11362_s12 + $0x1e0] sm:$0xff]  ;;  %v3685_v48 = vld [vmem:[%s11362_s12 + $0x58] sm:$0xff] }
 0x204   :  { %895 = vmatpush.msra.mxu0 %v468_v50  ;;  %1008 = vmatpush.msra.mxu1 %v469_v26  ;;  %v3701_v49 = vld [vmem:[%s11362_s12 + $0xd8] sm:$0xff]  ;;  %v572_v50 = vld [vmem:[%s11361_s2 + $0x30] sm:$0xff] }
 0x205   :  { %667 = vmatpush.msrb.mxu2 %v474_v51  ;;  %780 = vmatpush.msrb.mxu3 %v475_v52  ;;  %v3717_v26 = vld [vmem:[%s11362_s12 + $0x158] sm:$0xff] }
 0x206   :  { %896 = vmatpush.msra.mxu0 %v464_v53  ;;  %1009 = vmatpush.msra.mxu1 %v465_v54  ;;  %v3733_v51 = vld [vmem:[%s11362_s12 + $0x1d8] sm:$0xff]  ;;  %v3684_v53 = vld [vmem:[%s11362_s12 + $0x50] sm:$0xff] }
 0x207   :  { %668 = vmatpush.msrb.mxu2 %v470_v55  ;;  %781 = vmatpush.msrb.mxu3 %v471_v46  ;;  %v573_v52 = vld [vmem:[%s11361_s2 + $0x38] sm:$0xff]  ;;  %v3700_v54 = vld [vmem:[%s11362_s12 + $0xd0] sm:$0xff]  ;;  %v574_v55 = vld [vmem:[%s11361_s2 + $0x40] sm:$0xff] }
 0x208   :  { %897 = vmatpush.msra.mxu0 %v460_v56  ;;  %1010 = vmatpush.msra.mxu1 %v461_v57  ;;  %v3716_v46 = vld [vmem:[%s11362_s12 + $0x150] sm:$0xff]  ;;  %v575_v57 = vld [vmem:[%s11361_s2 + $0x48] sm:$0xff] }
 0x209   :  { %669 = vmatpush.msrb.mxu2 %v466_v58  ;;  %782 = vmatpush.msrb.mxu3 %v467_v59  ;;  %v3732_v56 = vld [vmem:[%s11362_s12 + $0x1d0] sm:$0xff]  ;;  %v3683_v58 = vld [vmem:[%s11362_s12 + $0x48] sm:$0xff] }
 0x20a   :  { %898 = vmatpush.msra.mxu0 %v456_v60  ;;  %1011 = vmatpush.msra.mxu1 %v457_v61  ;;  %v3699_v59 = vld [vmem:[%s11362_s12 + $0xc8] sm:$0xff]  ;;  %v576_v60 = vld [vmem:[%s11361_s2 + $0x50] sm:$0xff] }
 0x20b   :  { %670 = vmatpush.msrb.mxu2 %v462_v62  ;;  %783 = vmatpush.msrb.mxu3 %v463_v63  ;;  %v3715_v61 = vld [vmem:[%s11362_s12 + $0x148] sm:$0xff]  ;;  %v577_v63 = vld [vmem:[%s11361_s2 + $0x58] sm:$0xff] }
 0x20c   :  { %899 = vmatpush.msra.mxu0 %v452_v1  ;;  %1012 = vmatpush.msra.mxu1 %v453_v2  ;;  %v3731_v62 = vld [vmem:[%s11362_s12 + $0x1c8] sm:$0xff]  ;;  %v3682_v1 = vld [vmem:[%s11362_s12 + $0x40] sm:$0xff] }
 0x20d   :  { %671 = vmatpush.msrb.mxu2 %v458_v3  ;;  %784 = vmatpush.msrb.mxu3 %v459_v4  ;;  %v3698_v2 = vld [vmem:[%s11362_s12 + $0xc0] sm:$0xff]  ;;  %v579_v4 = vld [vmem:[%s11361_s2 + $0x68] sm:$0xff] }
 0x20e   :  { %900 = vmatpush.msra.mxu0 %v448_v5  ;;  %1013 = vmatpush.msra.mxu1 %v449_v6  ;;  %v578_v3 = vld [vmem:[%s11361_s2 + $0x60] sm:$0xff]  ;;  %v580_v5 = vld [vmem:[%s11361_s2 + $0x70] sm:$0xff]  ;;  %v581_v6 = vld [vmem:[%s11361_s2 + $0x78] sm:$0xff] }
 0x20f   :  { %672 = vmatpush.msrb.mxu2 %v454_v7  ;;  %785 = vmatpush.msrb.mxu3 %v455_v8  ;;  %v3714_v7 = vld [vmem:[%s11362_s12 + $0x140] sm:$0xff] }
 0x210   :  { %901 = vmatpush.msra.mxu0 %v444_v9  ;;  %1014 = vmatpush.msra.mxu1 %v445_v10  ;;  %v582_v8 = vld [vmem:[%s11361_s2 + $0x80] sm:$0xff]  ;;  %v583_v10 = vld [vmem:[%s11361_s2 + $0x88] sm:$0xff] }
 0x211   :  { %673 = vmatpush.msrb.mxu2 %v450_v11  ;;  %786 = vmatpush.msrb.mxu3 %v451_v12  ;;  %v3730_v9 = vld [vmem:[%s11362_s12 + $0x1c0] sm:$0xff]  ;;  %v3681_v12 = vld [vmem:[%s11362_s12 + $0x38] sm:$0xff] }
 0x212   :  { %902 = vmatpush.msra.mxu0 %v440_v13  ;;  %1015 = vmatpush.msra.mxu1 %v441_v14  ;;  %v3697_v13 = vld [vmem:[%s11362_s12 + $0xb8] sm:$0xff] }
 0x213   :  { %674 = vmatpush.msrb.mxu2 %v446_v16  ;;  %787 = vmatpush.msrb.mxu3 %v447_v17 }
 0x214   :  { %903 = vmatpush.msra.mxu0 %v436_v18  ;;  %1016 = vmatpush.msra.mxu1 %v437_v19  ;;  %v584_v19 = vld [vmem:[%s11361_s2 + $0x90] sm:$0xff] }
 0x215   :  { %904 = vmatmul.f32.vlgmr.msra.gmra.mxu0 %v566_v20  ;;  %1017 = vmatmul.f32.vlgmr.msra.gmra.mxu1 %v566_v20 }
 0x216   :  { %675 = vmatpush.msrb.mxu2 %v442_v21  ;;  %788 = vmatpush.msrb.mxu3 %v443_v22 }
 0x217   :  { %3964 = vmatpush.msrb.mxu0 %v3721_v23  ;;  %4077 = vmatpush.msrb.mxu1 %v3737_v25 }
 0x218   :  { %676 = vmatpush.msrb.mxu2 %v438_v27  ;;  %789 = vmatpush.msrb.mxu3 %v439_v28  ;;  %v585_v27 = vld [vmem:[%s11361_s2 + $0x98] sm:$0xff] }
 0x219   :  { %3965 = vmatpush.msrb.mxu0 %v3720_v29  ;;  %4078 = vmatpush.msrb.mxu1 %v3736_v30  ;;  %v3713_v28 = vld [vmem:[%s11362_s12 + $0x138] sm:$0xff] }
 0x21a   :  { %677 = vmatpush.msrb.mxu2 %v434_v31  ;;  %790 = vmatpush.msrb.mxu3 %v435_v32  ;;  %v3729_v29 = vld [vmem:[%s11362_s12 + $0x1b8] sm:$0xff] }
 0x21b   :  { %678 = vmatmul.f32.vlgmr.msrb.gmra.mxu2 %v566_v20  ;;  %791 = vmatmul.f32.vlgmr.msrb.gmra.mxu3 %v566_v20 }
 0x21c   :  { %3738 = vmatpush.msra.mxu2 %v3689_v33  ;;  %3851 = vmatpush.msra.mxu3 %v3705_v35 }
 0x21d   :  { %907 = vmatmul.f32.gmra.mxu0 %v567_v24  ;;  %1020 = vmatmul.f32.gmra.mxu1 %v567_v24 }
 0x21e   :  { %3739 = vmatpush.msra.mxu2 %v3688_v15  ;;  %3852 = vmatpush.msra.mxu3 %v3704_v34 }
 0x21f   :  { %3966 = vmatpush.msrb.mxu0 %v3719_v38  ;;  %4079 = vmatpush.msrb.mxu1 %v3735_v39  ;;  %v586_v38 = vld [vmem:[%s11361_s2 + $0xa0] sm:$0xff] }
 0x220   :  { %3740 = vmatpush.msra.mxu2 %v3687_v36  ;;  %3853 = vmatpush.msra.mxu3 %v3703_v37 }
 0x221   :  { %3967 = vmatpush.msrb.mxu0 %v3718_v44  ;;  %4080 = vmatpush.msrb.mxu1 %v3734_v45 }
 0x222   :  { %3741 = vmatpush.msra.mxu2 %v3686_v41  ;;  %3854 = vmatpush.msra.mxu3 %v3702_v42 }
 0x223   :  { %681 = vmatmul.f32.gmra.mxu2 %v567_v24  ;;  %794 = vmatmul.f32.gmra.mxu3 %v567_v24 }
 0x224   :  { %3742 = vmatpush.msra.mxu2 %v3685_v48  ;;  %3855 = vmatpush.msra.mxu3 %v3701_v49 }
 0x225   :  { %910 = vmatmul.f32.gmra.mxu0 %v568_v0  ;;  %1023 = vmatmul.f32.gmra.mxu1 %v568_v0 }
 0x226   :  { %3968 = vmatpush.msrb.mxu0 %v3717_v26  ;;  %4081 = vmatpush.msrb.mxu1 %v3733_v51 }
 0x227   :  { %3743 = vmatpush.msra.mxu2 %v3684_v53  ;;  %3856 = vmatpush.msra.mxu3 %v3700_v54 }
 0x228   :  { %3969 = vmatpush.msrb.mxu0 %v3716_v46  ;;  %4082 = vmatpush.msrb.mxu1 %v3732_v56  ;;  %v3680_v56 = vld [vmem:[%s11362_s12 + $0x30] sm:$0xff] }
 0x229   :  { %3744 = vmatpush.msra.mxu2 %v3683_v58  ;;  %3857 = vmatpush.msra.mxu3 %v3699_v59 }
 0x22a   :  { %3970 = vmatpush.msrb.mxu0 %v3715_v61  ;;  %4083 = vmatpush.msrb.mxu1 %v3731_v62 }
 0x22b   :  { %684 = vmatmul.f32.gmra.mxu2 %v568_v0  ;;  %797 = vmatmul.f32.gmra.mxu3 %v568_v0 }
 0x22c   :  { %3745 = vmatpush.msra.mxu2 %v3682_v1  ;;  %3858 = vmatpush.msra.mxu3 %v3698_v2 }
 0x22d   :  { %913 = vmatmul.f32.gmra.mxu0 %v569_v40  ;;  %1026 = vmatmul.f32.gmra.mxu1 %v569_v40 }
 0x22e   :  { %3971 = vmatpush.msrb.mxu0 %v3714_v7  ;;  %4084 = vmatpush.msrb.mxu1 %v3730_v9 }
 0x22f   :  { %3746 = vmatpush.msra.mxu2 %v3681_v12  ;;  %3859 = vmatpush.msra.mxu3 %v3697_v13 }
 0x230   :  { %3972 = vmatpush.msrb.mxu0 %v3713_v28  ;;  %4085 = vmatpush.msrb.mxu1 %v3729_v29 }
 0x231   :  { %3747 = vmatpush.msra.mxu2 %v3680_v56 }
 0x233   :  { %687 = vmatmul.f32.gmra.mxu2 %v569_v40  ;;  %800 = vmatmul.f32.gmra.mxu3 %v569_v40 }
 0x235   :  { %916 = vmatmul.f32.gmra.mxu0 %v570_v43  ;;  %1029 = vmatmul.f32.gmra.mxu1 %v570_v43 }
 0x23b   :  { %690 = vmatmul.f32.gmra.mxu2 %v570_v43  ;;  %803 = vmatmul.f32.gmra.mxu3 %v570_v43 }
 0x23d   :  { %919 = vmatmul.f32.gmra.mxu0 %v571_v47  ;;  %1032 = vmatmul.f32.gmra.mxu1 %v571_v47 }
 0x243   :  { %693 = vmatmul.f32.gmra.mxu2 %v571_v47  ;;  %806 = vmatmul.f32.gmra.mxu3 %v571_v47 }
 0x245   :  { %922 = vmatmul.f32.gmra.mxu0 %v572_v50  ;;  %1035 = vmatmul.f32.gmra.mxu1 %v572_v50 }
 0x24b   :  { %696 = vmatmul.f32.gmra.mxu2 %v572_v50  ;;  %809 = vmatmul.f32.gmra.mxu3 %v572_v50 }
 0x24d   :  { %925 = vmatmul.f32.gmra.mxu0 %v573_v52  ;;  %1038 = vmatmul.f32.gmra.mxu1 %v573_v52 }
 0x253   :  { %699 = vmatmul.f32.gmra.mxu2 %v573_v52  ;;  %812 = vmatmul.f32.gmra.mxu3 %v573_v52 }
 0x255   :  { %928 = vmatmul.f32.gmra.mxu0 %v574_v55  ;;  %1041 = vmatmul.f32.gmra.mxu1 %v574_v55 }
 0x25b   :  { %702 = vmatmul.f32.gmra.mxu2 %v574_v55  ;;  %815 = vmatmul.f32.gmra.mxu3 %v574_v55 }
 0x25d   :  { %931 = vmatmul.f32.gmra.mxu0 %v575_v57  ;;  %1044 = vmatmul.f32.gmra.mxu1 %v575_v57 }
 0x263   :  { %705 = vmatmul.f32.gmra.mxu2 %v575_v57  ;;  %818 = vmatmul.f32.gmra.mxu3 %v575_v57  ;;  %v3696_v57 = vld [vmem:[%s11362_s12 + $0xb0] sm:$0xff] }
 0x264   :  { %3860 = vmatpush.msra.mxu3 %v3696_v57 }
 0x265   :  { %934 = vmatmul.f32.gmra.mxu0 %v576_v60  ;;  %1047 = vmatmul.f32.gmra.mxu1 %v576_v60 }
 0x26b   :  { %708 = vmatmul.f32.gmra.mxu2 %v576_v60  ;;  %821 = vmatmul.f32.gmra.mxu3 %v576_v60 }
 0x26d   :  { %937 = vmatmul.f32.gmra.mxu0 %v577_v63  ;;  %1050 = vmatmul.f32.gmra.mxu1 %v577_v63 }
 0x273   :  { %711 = vmatmul.f32.gmra.mxu2 %v577_v63  ;;  %824 = vmatmul.f32.gmra.mxu3 %v577_v63 }
 0x275   :  { %940 = vmatmul.f32.gmra.mxu0 %v578_v3  ;;  %1053 = vmatmul.f32.gmra.mxu1 %v578_v3 }
 0x27b   :  { %714 = vmatmul.f32.gmra.mxu2 %v578_v3  ;;  %827 = vmatmul.f32.gmra.mxu3 %v578_v3 }
 0x27d   :  { %943 = vmatmul.f32.gmra.mxu0 %v579_v4  ;;  %1056 = vmatmul.f32.gmra.mxu1 %v579_v4 }
 0x283   :  { %717 = vmatmul.f32.gmra.mxu2 %v579_v4  ;;  %830 = vmatmul.f32.gmra.mxu3 %v579_v4 }
 0x285   :  { %946 = vmatmul.f32.gmra.mxu0 %v580_v5  ;;  %1059 = vmatmul.f32.gmra.mxu1 %v580_v5 }
 0x28b   :  { %720 = vmatmul.f32.gmra.mxu2 %v580_v5  ;;  %833 = vmatmul.f32.gmra.mxu3 %v580_v5 }
 0x28d   :  { %949 = vmatmul.f32.gmra.mxu0 %v581_v6  ;;  %1062 = vmatmul.f32.gmra.mxu1 %v581_v6 }
 0x292   :  { %v5850_v11 = vpop.f32.mrf.mxu0  ;;  %v5858_v14 = vpop.f32.mrf.mxu1 }
 0x293   :  { %723 = vmatmul.f32.gmra.mxu2 %v581_v6  ;;  %836 = vmatmul.f32.gmra.mxu3 %v581_v6  ;;  %v1116_v16 = vsub.f32 0.0, %v5850_v11  ;;  %v1117_v17 = vsub.f32 0.0, %v5858_v14 }
 0x295   :  { %952 = vmatmul.f32.gmra.mxu0 %v582_v8  ;;  %1065 = vmatmul.f32.gmra.mxu1 %v582_v8  ;;  %v1246_v18 = vmul.f32 1.442695, %v1116_v16  ;;  %v1248_v20 = vmul.f32 1.442695, %v1117_v17 }
 0x297   :  { %4750 = vpow2.f32 %v1246_v18 }
 0x298   :  { %4752 = vpow2.f32 %v1248_v20 }
 0x29a   :  { %v5865_v21 = vpop.f32.mrf.mxu0  ;;  %v5867_v22 = vpop.f32.mrf.mxu1 }
 0x29b   :  { %726 = vmatmul.f32.gmra.mxu2 %v582_v8  ;;  %839 = vmatmul.f32.gmra.mxu3 %v582_v8  ;;  %v1120_v23 = vsub.f32 0.0, %v5865_v21  ;;  %v1121_v25 = vsub.f32 0.0, %v5867_v22 }
 0x29d   :  { %955 = vmatmul.f32.gmra.mxu0 %v583_v10  ;;  %1068 = vmatmul.f32.gmra.mxu1 %v583_v10  ;;  %v4751_v30 = vpop.eup %4750  ;;  %v1254_v31 = vmul.f32 1.442695, %v1120_v23  ;;  %v1256_v35 = vmul.f32 1.442695, %v1121_v25 }
 0x29e   :  { %v4753_v32 = vpop.eup %4752  ;;  %v5880_v33 = vpop.f32.mrf.mxu2  ;;  %v5882_v24 = vadd.f32 1.0, %v4751_v30 }
 0x29f   :  { %v5884_v15 = vadd.f32 1.0, %v4753_v32  ;;  %4754 = vpow2.f32 %v1254_v31  ;;  %v5886_v34 = vpop.f32.mrf.mxu3  ;;  %v1114_v36 = vsub.f32 0.0, %v5880_v33 }
 0x2a0   :  { %4756 = vpow2.f32 %v1256_v35  ;;  %v1115_v0 = vsub.f32 0.0, %v5886_v34  ;;  %vm1661_vm12 = vweird.f32 %v5882_v24  ;;  %v1665_v5 = vand.u32 2147483647, %v5882_v24 }
 0x2a1   :  { %4758 = vrcp.f32 %v5882_v24  ;;  %v1242_v42 = vmul.f32 1.442695, %v1114_v36  ;;  %v1667_v8 = vand.u32 2147483648, %v5882_v24  ;;  %vm1676_vm14 = vweird.f32 %v5884_v15 }
 0x2a2   :  { %v5890_v37 = vpop.f32.mrf.mxu0  ;;  %4760 = vrcp.f32 %v5884_v15  ;;  %v5898_v41 = vpop.f32.mrf.mxu1  ;;  %v1244_v45 = vmul.f32 1.442695, %v1115_v0  ;;  %v1680_v13 = vand.u32 2147483647, %v5884_v15  ;;  %v1682_v16 = vand.u32 2147483648, %v5884_v15  ;;  %v587_v0 = vld [vmem:[%s11361_s2 + $0xa8] sm:$0xff] }
 0x2a3   :  { %729 = vmatmul.f32.gmra.mxu2 %v583_v10  ;;  %842 = vmatmul.f32.gmra.mxu3 %v583_v10  ;;  %v1124_v40 = vsub.f32 0.0, %v5890_v37  ;;  %v1125_v49 = vsub.f32 0.0, %v5898_v41  ;;  %4762 = vpow2.f32 %v1242_v42  ;;  %vm5965_vm2 = vcmp.eq.f32.partialorder %v1665_v5, 8.507059e+37  ;;  %v3728_v5 = vld [vmem:[%s11362_s12 + $0x1b0] sm:$0xff] }
 0x2a4   :  { %4764 = vpow2.f32 %v1244_v45  ;;  %v1668_v31 = vor.u32 1.1754944e-38, %v1667_v8  ;;  %vm5984_vm4 = vcmp.eq.f32.partialorder %v1680_v13, 8.507059e+37  ;;  %4086 = vmatpush.msrb.mxu1 %v3728_v5 }
 0x2a5   :  { %958 = vmatmul.f32.gmra.mxu0 %v584_v19  ;;  %1071 = vmatmul.f32.gmra.mxu1 %v584_v19  ;;  %v4755_v39 = vpop.eup %4754  ;;  %v1262_v26 = vmul.f32 1.442695, %v1124_v40  ;;  %v1264_v55 = vmul.f32 1.442695, %v1125_v49 }
 0x2a6   :  { %v5900_v43 = vpop.f32.mrf.mxu2  ;;  %v4757_v44 = vpop.eup %4756  ;;  %v5904_v48 = vadd.f32 1.0, %v4755_v39  ;;  %v1683_v39 = vor.u32 1.1754944e-38, %v1682_v16 }
 0x2a7   :  { %v5902_v47 = vpop.eup %4758  ;;  %v1118_v51 = vsub.f32 0.0, %v5900_v43  ;;  %v5910_v52 = vadd.f32 1.0, %v4757_v44  ;;  %v5924_v62 = vpop.f32.mrf.mxu3 }
 0x2a8   :  { %v5907_v50 = vpop.eup %4760  ;;  %v1657_v53 = vmul.f32 %v5902_v47, %v5882_v24  ;;  %4766 = vrcp.f32 %v5904_v48  ;;  %v1119_v7 = vsub.f32 0.0, %v5924_v62  ;;  %vm1662_vm13 = vweird.f32 %v5902_v47 }
 0x2a9   :  { %v1672_v54 = vmul.f32 %v5907_v50, %v5884_v15  ;;  %4768 = vpow2.f32 %v1262_v26  ;;  %v1250_v46 = vmul.f32 1.442695, %v1118_v51  ;;  %v4763_v59 = vpop.eup %4762  ;;  %vm1677_vm15 = vweird.f32 %v5907_v50  ;;  %vm5959_vm1 = vmor %vm1661_vm12, %vm1662_vm13 }
 0x2aa   :  { %4770 = vrcp.f32 %v5910_v52  ;;  %v1658_v58 = vsub.f32 1.0, %v1657_v53  ;;  %v4765_v61 = vpop.eup %4764  ;;  %v5929_v3 = vadd.f32 1.0, %v4763_v59  ;;  %v5942_v10 = vpop.f32.mrf.mxu0  ;;  %v1252_v28 = vmul.f32 1.442695, %v1119_v7  ;;  %vm5973_vm3 = vmor %vm1676_vm14, %vm1677_vm15 }
 0x2ab   :  { %732 = vmatmul.f32.gmra.mxu2 %v584_v19  ;;  %845 = vmatmul.f32.gmra.mxu3 %v584_v19  ;;  %v1673_v60 = vsub.f32 1.0, %v1672_v54  ;;  %4772 = vpow2.f32 %v1264_v55  ;;  %v5947_v17 = vadd.f32 1.0, %v4765_v61  ;;  %v1128_v29 = vsub.f32 0.0, %v5942_v10  ;;  %v5979_v36 = vpop.f32.mrf.mxu1 }
 0x2ac   :  { %4774 = vpow2.f32 %v1250_v46  ;;  %v1659_v2 = vmul.f32 %v5902_v47, %v1658_v58  ;;  %vm1721_vm5 = vweird.f32 %v5904_v48  ;;  %v1129_v49 = vsub.f32 0.0, %v5979_v36 }
 0x2ad   :  { %961 = vmatmul.f32.gmra.mxu0 %v585_v27  ;;  %1074 = vmatmul.f32.gmra.mxu1 %v585_v27  ;;  %v1674_v6 = vmul.f32 %v5907_v50, %v1673_v60  ;;  %4776 = vrcp.f32 %v5929_v3  ;;  %v1270_v45 = vmul.f32 1.442695, %v1128_v29  ;;  %v1727_v53 = vand.u32 2147483648, %v5904_v48 }
 0x2ae   :  { %v5926_v63 = vpop.eup %4766  ;;  %v1660_v19 = vadd.f32 %v5902_v47, %v1659_v2  ;;  %4778 = vrcp.f32 %v5947_v17  ;;  %v6006_v54 = vpop.f32.mrf.mxu2  ;;  %v1742_v55 = vand.u32 2147483648, %v5910_v52  ;;  %v1637_v58 = vand.u32 2147483648, %v5929_v3  ;;  %v3712_v2 = vld [vmem:[%s11362_s12 + $0x130] sm:$0xff] }
 0x2af   :  { %v4769_v1 = vpop.eup %4768  ;;  %v1717_v9 = vmul.f32 %v5926_v63, %v5904_v48  ;;  %vm1722_vm6 = vweird.f32 %v5926_v63  ;;  %v1272_v61 = vmul.f32 1.442695, %v1129_v49  ;;  %3973 = vmatpush.msrb.mxu0 %v3712_v2  ;;  %vm1736_vm9 = vweird.f32 %v5910_v52  ;;  %v6064_v29 = vpop.f32.mrf.mxu3 }
 0x2b0   :  { %v5931_v4 = vpop.eup %4770  ;;  %v5953_v23 = vadd.f32 1.0, %v4769_v1  ;;  %v1664_v40 = vsel %vm5959_vm1, %v5902_v47, %v1660_v19  ;;  %v1725_v47 = vand.u32 2147483647, %v5904_v48  ;;  %v1122_v1 = vsub.f32 0.0, %v6006_v54  ;;  %vm6040_vm8 = vmor %vm1721_vm5, %vm1722_vm6  ;;  %v588_v19 = vld [vmem:[%s11361_s2 + $0xb0] sm:$0xff] }
 0x2b1   :  { %v4773_v12 = vpop.eup %4772  ;;  %v1732_v20 = vmul.f32 %v5931_v4, %v5910_v52  ;;  %v1718_v35 = vsub.f32 1.0, %v1717_v9  ;;  %v1669_v46 = vsel %vm5965_vm2, %v1668_v31, %v1664_v40  ;;  %v1728_v9 = vor.u32 1.1754944e-38, %v1727_v53 }
 0x2b2   :  { %v4775_v18 = vpop.eup %4774  ;;  %v5977_v24 = vadd.f32 1.0, %v4773_v12  ;;  %4780 = vrcp.f32 %v5953_v23  ;;  %vm6032_vm7 = vcmp.eq.f32.partialorder %v1725_v47, 8.507059e+37  ;;  %vm1737_vm10 = vweird.f32 %v5931_v4  ;;  %v6097_v47 = vpop.f32.mrf.mxu0 }
 0x2b3   :  { %735 = vmatmul.f32.gmra.mxu2 %v585_v27  ;;  %848 = vmatmul.f32.gmra.mxu3 %v585_v27  ;;  %v1675_v27 = vadd.f32 %v5907_v50, %v1674_v6  ;;  %v5989_v15 = vadd.f32 1.0, %v4775_v18  ;;  %v1733_v42 = vsub.f32 1.0, %v1732_v20  ;;  %4782 = vpow2.f32 %v1252_v28  ;;  %v6000_v26 = vpop.eup %4776  ;;  %vm6076_vm12 = vmor %vm1736_vm9, %vm1737_vm10  ;;  %v6118_v8 = vpop.f32.mrf.mxu1 }
 0x2b4   :  { %v1719_v51 = vmul.f32 %v5926_v63, %v1718_v35  ;;  %4784 = vrcp.f32 %v5977_v24  ;;  %v6018_v59 = vpop.eup %4778  ;;  %v1627_v60 = vmul.f32 %v6000_v26, %v5929_v3  ;;  %v1743_v18 = vor.u32 1.1754944e-38, %v1742_v55 }
 0x2b5   :  { %964 = vmatmul.f32.gmra.mxu0 %v586_v38  ;;  %1077 = vmatmul.f32.gmra.mxu1 %v586_v38  ;;  %v1679_v44 = vsel %vm5973_vm3, %v5907_v50, %v1675_v27  ;;  %v1740_v50 = vand.u32 2147483647, %v5910_v52  ;;  %4786 = vrcp.f32 %v5989_v15  ;;  %v1734_v57 = vmul.f32 %v5931_v4, %v1733_v42 }
 0x2b6   :  { %v1684_v56 = vsel %vm5984_vm4, %v1683_v39, %v1679_v44  ;;  %4788 = vpow2.f32 %v1270_v45  ;;  %v1720_v7 = vadd.f32 %v5926_v63, %v1719_v51  ;;  %v6056_v48 = vmul.f32 %v1669_v46, %v5850_v11 }
 0x2b7   :  { %vm6046_vm11 = vcmp.eq.f32.partialorder %v1740_v50, 8.507059e+37  ;;  %v6059_v25 = vmul.f32 %v1684_v56, %v5858_v14  ;;  %v1635_v27 = vand.u32 2147483647, %v5929_v3  ;;  %v6062_v28 = vor.u32 1.1754944e-38, %v1637_v58 }
 0x2b8   :  { %v6029_v6 = vpop.eup %4780  ;;  %v1735_v31 = vadd.f32 %v5931_v4, %v1734_v57  ;;  %v1628_v32 = vsub.f32 1.0, %v1627_v60  ;;  %4790 = vpow2.f32 %v1272_v61  ;;  %v1258_v35 = vmul.f32 1.442695, %v1122_v1 }
 0x2b9   :  { %v4783_v12 = vpop.eup %4782  ;;  %v1724_v11 = vsel %vm6040_vm8, %v5926_v63, %v1720_v7  ;;  %vm1631_vm13 = vweird.f32 %v5929_v3  ;;  %v1650_v63 = vand.u32 2147483647, %v5947_v17  ;;  %v1652_v42 = vand.u32 2147483648, %v5947_v17 }
 0x2ba   :  { %v6053_v20 = vpop.eup %4784  ;;  %v6084_v39 = vadd.f32 1.0, %v4783_v12  ;;  %v1123_v44 = vsub.f32 0.0, %v6064_v29  ;;  %vm1781_vm14 = vweird.f32 %v5953_v23  ;;  %v1785_v45 = vand.u32 2147483647, %v5953_v23 }
 0x2bb   :  { %738 = vmatmul.f32.gmra.mxu2 %v586_v38  ;;  %851 = vmatmul.f32.gmra.mxu3 %v586_v38  ;;  %v6066_v30 = vpop.eup %4786  ;;  %v1777_v38 = vmul.f32 %v6029_v6, %v5953_v23  ;;  %v1792_v52 = vmul.f32 %v6053_v20, %v5977_v24  ;;  %v1787_v49 = vand.u32 2147483648, %v5953_v23  ;;  %v1729_v53 = vsel %vm6032_vm7, %v1728_v9, %v1724_v11 }
 0x2bc   :  { %v4789_v40 = vpop.eup %4788  ;;  %v1687_v51 = vmul.f32 %v6066_v30, %v5989_v15  ;;  %v1739_v50 = vsel %vm6076_vm12, %v5931_v4, %v1735_v31  ;;  %v1629_v55 = vmul.f32 %v6000_v26, %v1628_v32  ;;  %4792 = vpow2.f32 %v1258_v35  ;;  %v6134_v32 = vpop.f32.mrf.mxu3 }
 0x2bd   :  { %967 = vmatmul.f32.gmra.mxu0 %v587_v0  ;;  %1080 = vmatmul.f32.gmra.mxu1 %v587_v0  ;;  %v1778_v56 = vsub.f32 1.0, %v1777_v38  ;;  %4794 = vrcp.f32 %v6084_v39  ;;  %v6106_v57 = vadd.f32 1.0, %v4789_v40  ;;  %vm1632_vm15 = vweird.f32 %v6000_v26 }
 0x2be   :  { %v4791_v58 = vpop.eup %4790  ;;  %v1793_v60 = vsub.f32 1.0, %v1792_v52  ;;  %v1260_v61 = vmul.f32 1.442695, %v1123_v44  ;;  %v1132_v1 = vsub.f32 0.0, %v6097_v47  ;;  %v6111_v2 = vmul.f32 %v1729_v53, %v5865_v21  ;;  %v6127_v21 = vpop.f32.mrf.mxu2  ;;  %vm6152_vm6 = vmor %vm1631_vm13, %vm1632_vm15 }
 0x2bf   :  { %vm1646_vm1 = vweird.f32 %v5947_v17  ;;  %v6114_v4 = vor.u32 1.1754944e-38, %v1652_v42  ;;  %v6116_v5 = vor.u32 1.1754944e-38, %v1787_v49  ;;  %v1688_v7 = vsub.f32 1.0, %v1687_v51 }
 0x2c0   :  { %11398 = vst [vmem:[#allocation4_spill] sm:$0xff] %v6111_v2  ;;  %v6122_v9 = vsel %vm6046_vm11, %v1743_v18, %v1739_v50  ;;  %v1630_v12 = vadd.f32 %v6000_v26, %v1629_v55  ;;  %vm1647_vm2 = vweird.f32 %v6018_v59  ;;  %vm1782_vm3 = vweird.f32 %v6029_v6 }
 0x2c1   :  { %4796 = vrcp.f32 %v6106_v57  ;;  %v6132_v31 = vadd.f32 1.0, %v4791_v58  ;;  %vm6136_vm4 = vcmp.eq.f32.partialorder %v1635_v27, 8.507059e+37  ;;  %vm6140_vm5 = vcmp.eq.f32.partialorder %v1785_v45, 8.507059e+37  ;;  %vm6179_vm10 = vmor %vm1781_vm14, %vm1782_vm3 }
 0x2c2   :  { %v4793_v16 = vpop.eup %4792  ;;  %v1794_v11 = vmul.f32 %v6053_v20, %v1793_v60  ;;  %4798 = vpow2.f32 %v1260_v61  ;;  %v1278_v14 = vmul.f32 1.442695, %v1132_v1  ;;  %vm6156_vm7 = vcmp.eq.f32.partialorder %v1650_v63, 8.507059e+37  ;;  %vm6201_vm14 = vmor %vm1646_vm1, %vm1647_vm2  ;;  %v6289_v1 = vpop.f32.mrf.mxu1 }
 0x2c3   :  { %741 = vmatmul.f32.gmra.mxu2 %v587_v0  ;;  %854 = vmatmul.f32.gmra.mxu3 %v587_v0  ;;  %v1642_v0 = vmul.f32 %v6018_v59, %v5947_v17  ;;  %v6146_v38 = vpop.eup %4794  ;;  %vm1796_vm8 = vweird.f32 %v5977_v24  ;;  %v1800_v42 = vand.u32 2147483647, %v5977_v24  ;;  %v1689_v52 = vmul.f32 %v6066_v30, %v1688_v7 }
 0x2c4   :  { %v1126_v44 = vsub.f32 0.0, %v6127_v21  ;;  %v1634_v3 = vsel %vm6152_vm6, %v6000_v26, %v1630_v12  ;;  %vm1797_vm9 = vweird.f32 %v6053_v20  ;;  %v1802_v45 = vand.u32 2147483648, %v5977_v24 }
 0x2c5   :  { %970 = vmatmul.f32.gmra.mxu0 %v588_v19  ;;  %1083 = vmatmul.f32.gmra.mxu1 %v588_v19  ;;  %v1643_v46 = vsub.f32 1.0, %v1642_v0  ;;  %v1133_v0 = vsub.f32 0.0, %v6118_v8  ;;  %v1127_v63 = vsub.f32 0.0, %v6134_v32  ;;  %4800 = vrcp.f32 %v6132_v31  ;;  %vm6190_vm11 = vmor %vm1796_vm8, %vm1797_vm9 }
 0x2c6   :  { %v6173_v53 = vadd.f32 1.0, %v4793_v16  ;;  %v1795_v50 = vadd.f32 %v6053_v20, %v1794_v11  ;;  %v1702_v55 = vmul.f32 %v6146_v38, %v6084_v39  ;;  %4802 = vpow2.f32 %v1278_v14 }
 0x2c7   :  { %v1644_v13 = vmul.f32 %v6018_v59, %v1643_v46  ;;  %v1280_v46 = vmul.f32 1.442695, %v1133_v0  ;;  %v1690_v23 = vadd.f32 %v6066_v30, %v1689_v52  ;;  %vm1691_vm12 = vweird.f32 %v5989_v15 }
 0x2c8   :  { %vm1692_vm13 = vweird.f32 %v6066_v30  ;;  %v1266_v60 = vmul.f32 1.442695, %v1126_v44  ;;  %vm6205_vm15 = vcmp.eq.f32.partialorder %v1800_v42, 8.507059e+37  ;;  %v1695_v7 = vand.u32 2147483647, %v5989_v15 }
 0x2c9   :  { %v1645_v49 = vadd.f32 %v6018_v59, %v1644_v13  ;;  %v1697_v12 = vand.u32 2147483648, %v5989_v15  ;;  %v1268_v13 = vmul.f32 1.442695, %v1127_v63  ;;  %v1803_v16 = vor.u32 1.1754944e-38, %v1802_v45  ;;  %vm6221_vm1 = vmor %vm1691_vm12, %vm1692_vm13 }
 0x2ca   :  { %4804 = vrcp.f32 %v6173_v53  ;;  %v1799_v11 = vsel %vm6190_vm11, %v6053_v20, %v1795_v50  ;;  %v1703_v15 = vsub.f32 1.0, %v1702_v55  ;;  %v1639_v20 = vsel %vm6136_vm4, %v6062_v28, %v1634_v3 }
 0x2cb   :  { %744 = vmatmul.f32.gmra.mxu2 %v588_v19  ;;  %857 = vmatmul.f32.gmra.mxu3 %v588_v19  ;;  %v1779_v19 = vmul.f32 %v6029_v6, %v1778_v56  ;;  %v6186_v56 = vpop.eup %4796  ;;  %4806 = vpow2.f32 %v1280_v46  ;;  %v1694_v42 = vsel %vm6221_vm1, %v6066_v30, %v1690_v23  ;;  %vm1696_vm2 = vcmp.eq.f32.partialorder %v1695_v7, 8.507059e+37 }
 0x2cc   :  { %v4799_v61 = vpop.eup %4798  ;;  %v1837_v0 = vmul.f32 %v6186_v56, %v6106_v57  ;;  %4808 = vpow2.f32 %v1266_v60  ;;  %v1698_v63 = vor.u32 1.1754944e-38, %v1697_v12  ;;  %v1804_v30 = vsel %vm6205_vm15, %v1803_v16, %v1799_v11  ;;  %v3711_v16 = vld [vmem:[%s11362_s12 + $0x128] sm:$0xff] }
 0x2cd   :  { %v1780_v51 = vadd.f32 %v6029_v6, %v1779_v19  ;;  %v1649_v19 = vsel %vm6201_vm14, %v6018_v59, %v1645_v49  ;;  %v3679_v59 = vld [vmem:[%s11362_s12 + $0x28] sm:$0xff]  ;;  %v6233_v27 = vpop.eup %4800  ;;  %v6241_v52 = vadd.f32 1.0, %v4799_v61  ;;  %4810 = vpow2.f32 %v1268_v13  ;;  %3974 = vmatpush.msrb.mxu0 %v3711_v16 }
 0x2ce   :  { %3748 = vmatpush.msra.mxu2 %v3679_v59  ;;  %v4803_v44 = vpop.eup %4802  ;;  %v1654_v45 = vsel %vm6156_vm7, %v6114_v4, %v1649_v19  ;;  %v1710_v18 = vand.u32 2147483647, %v6084_v39  ;;  %v1712_v3 = vand.u32 2147483648, %v6084_v39  ;;  %v1699_v49 = vsel %vm1696_vm2, %v1698_v63, %v1694_v42  ;;  %v3727_v11 = vld [vmem:[%s11362_s12 + $0x1a8] sm:$0xff] }
 0x2cf   :  { %v1784_v17 = vsel %vm6179_vm10, %v6029_v6, %v1780_v51  ;;  %v3695_v6 = vld [vmem:[%s11362_s12 + $0xa8] sm:$0xff]  ;;  %v1704_v51 = vmul.f32 %v6146_v38, %v1703_v15  ;;  %v1838_v26 = vsub.f32 1.0, %v1837_v0  ;;  %v1852_v4 = vmul.f32 %v6233_v27, %v6132_v31  ;;  %4087 = vmatpush.msrb.mxu1 %v3727_v11 }
 0x2d0   :  { %3861 = vmatpush.msra.mxu3 %v3695_v6  ;;  %v1789_v28 = vsel %vm6140_vm5, %v6116_v5, %v1784_v17  ;;  %v6256_v40 = vpop.eup %4804  ;;  %v6260_v35 = vmul.f32 %v6122_v9, %v5867_v22  ;;  %v6263_v5 = vmul.f32 %v1639_v20, %v5880_v33  ;;  %4812 = vrcp.f32 %v6241_v52  ;;  %v6278_v22 = vpop.f32.mrf.mxu0 }
 0x2d1   :  { %v6266_v50 = vadd.f32 1.0, %v4803_v44  ;;  %v4807_v55 = vpop.eup %4806  ;;  %v6269_v46 = vmul.f32 %v1654_v45, %v5886_v34  ;;  %v6272_v58 = vmul.f32 %v1789_v28, %v5890_v37  ;;  %v6275_v23 = vmul.f32 %v1804_v30, %v5898_v41  ;;  %v589_v41 = vld [vmem:[%s11361_s2 + $0xb8] sm:$0xff]  ;;  %v6329_v44 = vpop.f32.mrf.mxu2 }
 0x2d2   :  { %11417 = vst [vmem:[#allocation5_spill] sm:$0xff] %v6260_v35  ;;  %vm1706_vm3 = vweird.f32 %v6084_v39  ;;  %v4809_v33 = vpop.eup %4808  ;;  %v6281_v9 = vmul.f32 %v1699_v49, %v5900_v43  ;;  %vm6283_vm4 = vcmp.eq.f32.partialorder %v1710_v18, 8.507059e+37  ;;  %v1713_v34 = vor.u32 1.1754944e-38, %v1712_v3  ;;  %973 = vmatmul.f32.gmra.mxu0 %v589_v41  ;;  %1086 = vmatmul.f32.gmra.mxu1 %v589_v41 }
 0x2d3   :  { %11418 = vst [vmem:[#allocation6_spill] sm:$0xff] %v6272_v58  ;;  %v1845_v61 = vand.u32 2147483647, %v6106_v57  ;;  %v1847_v37 = vand.u32 2147483648, %v6106_v57  ;;  %v4811_v24 = vpop.eup %4810  ;;  %v1705_v7 = vadd.f32 %v6146_v38, %v1704_v51  ;;  %vm1707_vm5 = vweird.f32 %v6146_v38  ;;  %747 = vmatmul.f32.gmra.mxu2 %v589_v41  ;;  %860 = vmatmul.f32.gmra.mxu3 %v589_v41 }
 0x2d4   :  { %11419 = vst [vmem:[#allocation7_spill] sm:$0xff] %v6275_v23  ;;  %v1839_v43 = vmul.f32 %v6186_v56, %v1838_v26  ;;  %v1853_v12 = vsub.f32 1.0, %v1852_v4  ;;  %v1747_v13 = vmul.f32 %v6256_v40, %v6173_v53  ;;  %4814 = vrcp.f32 %v6266_v50  ;;  %vm6320_vm7 = vmor %vm1706_vm3, %vm1707_vm5 }
 0x2d5   :  { %11420 = vst [vmem:[#allocation8_spill] sm:$0xff] %v6281_v9  ;;  %v6300_v19 = vadd.f32 1.0, %v4807_v55  ;;  %v1136_v17 = vsub.f32 0.0, %v6278_v22  ;;  %vm1841_vm6 = vweird.f32 %v6106_v57  ;;  %v1860_v14 = vand.u32 2147483647, %v6132_v31 }
 0x2d6   :  { %v6311_v15 = vadd.f32 1.0, %v4809_v33  ;;  %v1137_v0 = vsub.f32 0.0, %v6289_v1  ;;  %v6314_v59 = vpop.eup %4812  ;;  %vm1842_vm8 = vweird.f32 %v6186_v56  ;;  %vm1856_vm9 = vweird.f32 %v6132_v31 }
 0x2d7   :  { %v1862_v20 = vand.u32 2147483648, %v6132_v31  ;;  %v6327_v42 = vadd.f32 1.0, %v4811_v24  ;;  %v1709_v45 = vsel %vm6320_vm7, %v6146_v38, %v1705_v7  ;;  %v1840_v39 = vadd.f32 %v6186_v56, %v1839_v43  ;;  %vm6343_vm11 = vmor %vm1841_vm6, %vm1842_vm8 }
 0x2d8   :  { %vm6335_vm10 = vcmp.eq.f32.partialorder %v1845_v61, 8.507059e+37  ;;  %v1848_v28 = vor.u32 1.1754944e-38, %v1847_v37  ;;  %v1854_v30 = vmul.f32 %v6233_v27, %v1853_v12  ;;  %v1748_v18 = vsub.f32 1.0, %v1747_v13  ;;  %v6361_v61 = vpop.f32.mrf.mxu3  ;;  %v6372_v13 = vpop.f32.mrf.mxu0 }
 0x2d9   :  { %4816 = vrcp.f32 %v6300_v19  ;;  %v1286_v3 = vmul.f32 1.442695, %v1136_v17  ;;  %vm6347_vm12 = vcmp.eq.f32.partialorder %v1860_v14, 8.507059e+37  ;;  %v1762_v51 = vmul.f32 %v6314_v59, %v6241_v52  ;;  %v6419_v63 = vpop.f32.mrf.mxu2 }
 0x2da   :  { %4818 = vrcp.f32 %v6311_v15  ;;  %v1288_v26 = vmul.f32 1.442695, %v1137_v0  ;;  %v1130_v4 = vsub.f32 0.0, %v6329_v44  ;;  %v6355_v55 = vpop.eup %4814  ;;  %vm1857_vm13 = vweird.f32 %v6233_v27 }
 0x2db   :  { %v1757_v57 = vand.u32 2147483648, %v6173_v53  ;;  %v1772_v33 = vand.u32 2147483648, %v6241_v52  ;;  %4820 = vrcp.f32 %v6327_v42  ;;  %v1714_v37 = vsel %vm6283_vm4, %v1713_v34, %v1709_v45  ;;  %vm6376_vm15 = vmor %vm1856_vm9, %vm1857_vm13 }
 0x2dc   :  { %v1863_v41 = vor.u32 1.1754944e-38, %v1862_v20  ;;  %vm1751_vm14 = vweird.f32 %v6173_v53  ;;  %v1755_v24 = vand.u32 2147483647, %v6173_v53  ;;  %v1844_v7 = vsel %vm6343_vm11, %v6186_v56, %v1840_v39  ;;  %v6382_v56 = vpop.f32.mrf.mxu1  ;;  %v590_v20 = vld [vmem:[%s11361_s2 + $0xc0] sm:$0xff] }
 0x2dd   :  { %v1855_v43 = vadd.f32 %v6233_v27, %v1854_v30  ;;  %v1749_v12 = vmul.f32 %v6256_v40, %v1748_v18  ;;  %4822 = vpow2.f32 %v1286_v3  ;;  %v1763_v34 = vsub.f32 1.0, %v1762_v51  ;;  %976 = vmatmul.f32.gmra.mxu0 %v590_v20  ;;  %1089 = vmatmul.f32.gmra.mxu1 %v590_v20 }
 0x2de   :  { %v1897_v17 = vmul.f32 %v6355_v55, %v6266_v50  ;;  %4824 = vpow2.f32 %v1288_v26  ;;  %v1274_v16 = vmul.f32 1.442695, %v1130_v4  ;;  %v6386_v14 = vor.u32 1.1754944e-38, %v1757_v57  ;;  %750 = vmatmul.f32.gmra.mxu2 %v590_v20  ;;  %863 = vmatmul.f32.gmra.mxu3 %v590_v20  ;;  %v3678_v20 = vld [vmem:[%s11362_s12 + $0x20] sm:$0xff] }
 0x2df   :  { %v6384_v11 = vpop.eup %4816  ;;  %v1770_v0 = vand.u32 2147483647, %v6241_v52  ;;  %v6389_v6 = vor.u32 1.1754944e-38, %v1772_v33  ;;  %v1131_v31 = vsub.f32 0.0, %v6361_v61  ;;  %vm1752_vm1 = vweird.f32 %v6256_v40  ;;  %3749 = vmatpush.msra.mxu2 %v3678_v20 }
 0x2e0   :  { %v6395_v45 = vpop.eup %4818  ;;  %vm1766_vm2 = vweird.f32 %v6241_v52  ;;  %vm1901_vm3 = vweird.f32 %v6266_v50  ;;  %v1907_v39 = vand.u32 2147483648, %v6266_v50  ;;  %v1140_v30 = vsub.f32 0.0, %v6372_v13  ;;  %vm6440_vm6 = vmor %vm1751_vm14, %vm1752_vm1 }
 0x2e1   :  { %v6402_v18 = vpop.eup %4820  ;;  %v6405_v3 = vmul.f32 %v1714_v37, %v5924_v62  ;;  %v1849_v49 = vsel %vm6335_vm10, %v1848_v28, %v1844_v7  ;;  %v1859_v51 = vsel %vm6376_vm15, %v6233_v27, %v1855_v43  ;;  %vm6412_vm4 = vcmp.eq.f32.partialorder %v1755_v24, 8.507059e+37 }
 0x2e2   :  { %v1141_v4 = vsub.f32 0.0, %v6382_v56  ;;  %v1750_v57 = vadd.f32 %v6256_v40, %v1749_v12  ;;  %v1764_v62 = vmul.f32 %v6314_v59, %v1763_v34  ;;  %v1898_v33 = vsub.f32 1.0, %v1897_v17 }
 0x2e3   :  { %11433 = vst [vmem:[#allocation9_spill] sm:$0xff] %v6405_v3  ;;  %4826 = vpow2.f32 %v1274_v16  ;;  %v4823_v28 = vpop.eup %4822  ;;  %v1905_v37 = vand.u32 2147483647, %v6266_v50  ;;  %v1912_v27 = vmul.f32 %v6384_v11, %v6300_v19  ;;  %v1807_v24 = vmul.f32 %v6395_v45, %v6311_v15 }
 0x2e4   :  { %v1276_v7 = vmul.f32 1.442695, %v1131_v31  ;;  %v4825_v43 = vpop.eup %4824  ;;  %vm1767_vm5 = vweird.f32 %v6314_v59  ;;  %v6427_v12 = vor.u32 1.1754944e-38, %v1907_v39  ;;  %v1822_v60 = vmul.f32 %v6402_v18, %v6327_v42 }
 0x2e5   :  { %v1294_v34 = vmul.f32 1.442695, %v1140_v30  ;;  %v6432_v17 = vmul.f32 %v1849_v49, %v5942_v10  ;;  %v1864_v16 = vsel %vm6347_vm12, %v1863_v41, %v1859_v51  ;;  %vm6444_vm7 = vcmp.eq.f32.partialorder %v1770_v0, 8.507059e+37  ;;  %v6449_v10 = vpop.f32.mrf.mxu3  ;;  %vm6473_vm10 = vmor %vm1766_vm2, %vm1767_vm5 }
 0x2e6   :  { %v1296_v39 = vmul.f32 1.442695, %v1141_v4  ;;  %v1134_v30 = vsub.f32 0.0, %v6419_v63  ;;  %v1754_v38 = vsel %vm6440_vm6, %v6256_v40, %v1750_v57  ;;  %v1765_v41 = vadd.f32 %v6314_v59, %v1764_v62 }
 0x2e7   :  { %11436 = vst [vmem:[#allocation10_spill] sm:$0xff] %v6432_v17  ;;  %v1899_v53 = vmul.f32 %v6355_v55, %v1898_v33  ;;  %v6456_v49 = vadd.f32 1.0, %v4823_v28  ;;  %vm6458_vm8 = vcmp.eq.f32.partialorder %v1905_v37, 8.507059e+37  ;;  %v1913_v51 = vsub.f32 1.0, %v1912_v27 }
 0x2e8   :  { %v1808_v4 = vsub.f32 1.0, %v1807_v24  ;;  %v6462_v17 = vadd.f32 1.0, %v4825_v43  ;;  %4828 = vpow2.f32 %v1276_v7  ;;  %vm1902_vm9 = vweird.f32 %v6355_v55 }
 0x2e9   :  { %v4827_v23 = vpop.eup %4826  ;;  %v1823_v31 = vsub.f32 1.0, %v1822_v60  ;;  %4830 = vpow2.f32 %v1294_v34  ;;  %v1135_v40 = vsub.f32 0.0, %v6449_v10  ;;  %v6467_v57 = vmul.f32 %v1864_v16, %v5979_v36  ;;  %vm6488_vm11 = vmor %vm1901_vm3, %vm1902_vm9 }
 0x2ea   :  { %v1920_v33 = vand.u32 2147483647, %v6300_v19  ;;  %4832 = vpow2.f32 %v1296_v39  ;;  %v1282_v28 = vmul.f32 1.442695, %v1134_v30  ;;  %v1759_v37 = vsel %vm6412_vm4, %v6386_v14, %v1754_v38 }
 0x2eb   :  { %11443 = vst [vmem:[#allocation11_spill] sm:$0xff] %v6467_v57  ;;  %v1769_v36 = vsel %vm6473_vm10, %v6314_v59, %v1765_v41  ;;  %v1900_v27 = vadd.f32 %v6355_v55, %v1899_v53  ;;  %4834 = vrcp.f32 %v6456_v49  ;;  %v1914_v24 = vmul.f32 %v6384_v11, %v1913_v51 }
 0x2ec   :  { %v1809_v7 = vmul.f32 %v6395_v45, %v1808_v4  ;;  %4836 = vrcp.f32 %v6462_v17  ;;  %v6495_v14 = vadd.f32 1.0, %v4827_v23  ;;  %vm1916_vm12 = vweird.f32 %v6300_v19  ;;  %v3694_v4 = vld [vmem:[%s11362_s12 + $0xa0] sm:$0xff] }
 0x2ed   :  { %v1922_v59 = vand.u32 2147483648, %v6300_v19  ;;  %v1824_v26 = vmul.f32 %v6402_v18, %v1823_v31  ;;  %v1284_v43 = vmul.f32 1.442695, %v1135_v40  ;;  %v6501_v60 = vmul.f32 %v1759_v37, %v6006_v54  ;;  %3862 = vmatpush.msra.mxu3 %v3694_v4 }
 0x2ee   :  { %v4829_v50 = vpop.eup %4828  ;;  %vm1917_vm13 = vweird.f32 %v6384_v11  ;;  %vm6504_vm14 = vcmp.eq.f32.partialorder %v1920_v33, 8.507059e+37  ;;  %4838 = vpow2.f32 %v1282_v28  ;;  %v1774_v16 = vsel %vm6444_vm7, %v6389_v6, %v1769_v36  ;;  %v6623_v28 = vpop.f32.mrf.mxu2 }
 0x2ef   :  { %11448 = vst [vmem:[#allocation12_spill] sm:$0xff] %v6501_v60  ;;  %v4831_v23 = vpop.eup %4830  ;;  %v1904_v39 = vsel %vm6488_vm11, %v6355_v55, %v1900_v27  ;;  %v1815_v30 = vand.u32 2147483647, %v6311_v15  ;;  %v1817_v54 = vand.u32 2147483648, %v6311_v15  ;;  %v1915_v41 = vadd.f32 %v6384_v11, %v1914_v24  ;;  %vm6524_vm1 = vmor %vm1916_vm12, %vm1917_vm13  ;;  %v6560_v27 = vpop.f32.mrf.mxu0 }
 0x2f0   :  { %v4833_v38 = vpop.eup %4832  ;;  %v1810_v53 = vadd.f32 %v6395_v45, %v1809_v7  ;;  %vm1812_vm15 = vweird.f32 %v6395_v45  ;;  %4840 = vrcp.f32 %v6495_v14  ;;  %vm1811_vm2 = vweird.f32 %v6311_v15 }
 0x2f1   :  { %v6520_v51 = vpop.eup %4834  ;;  %v1825_v55 = vadd.f32 %v6402_v18, %v1824_v26  ;;  %vm1827_vm3 = vweird.f32 %v6402_v18  ;;  %4842 = vpow2.f32 %v1284_v43  ;;  %v1923_v31 = vor.u32 1.1754944e-38, %v1922_v59  ;;  %vm6550_vm5 = vmor %vm1811_vm2, %vm1812_vm15 }
 0x2f2   :  { %v6537_v19 = vpop.eup %4836  ;;  %vm1826_vm4 = vweird.f32 %v6327_v42  ;;  %v1830_v15 = vand.u32 2147483647, %v6327_v42  ;;  %v1832_v40 = vand.u32 2147483648, %v6327_v42  ;;  %v6543_v62 = vmul.f32 %v1774_v16, %v6064_v29 }
 0x2f3   :  { %v1909_v33 = vsel %vm6458_vm8, %v6427_v12, %v1904_v39  ;;  %vm6554_vm6 = vcmp.eq.f32.partialorder %v1815_v30, 8.507059e+37  ;;  %v6558_v36 = vadd.f32 1.0, %v4829_v50  ;;  %v1919_v12 = vsel %vm6524_vm1, %v6384_v11, %v1915_v41  ;;  %vm6572_vm7 = vmor %vm1826_vm4, %vm1827_vm3 }
 0x2f4   :  { %11453 = vst [vmem:[#allocation13_spill] sm:$0xff] %v6543_v62  ;;  %v4839_v29 = vpop.eup %4838  ;;  %v1814_v0 = vsel %vm6550_vm5, %v6395_v45, %v1810_v53  ;;  %v1818_v52 = vor.u32 1.1754944e-38, %v1817_v54  ;;  %v6576_v7 = vadd.f32 1.0, %v4831_v23  ;;  %v1829_v59 = vsel %vm6572_vm7, %v6402_v18, %v1825_v55  ;;  %v6600_v54 = vpop.f32.mrf.mxu1  ;;  %v591_v55 = vld [vmem:[%s11361_s2 + $0xc8] sm:$0xff] }
 0x2f5   :  { %v1957_v11 = vmul.f32 %v6520_v51, %v6456_v49  ;;  %v1972_v45 = vmul.f32 %v6537_v19, %v6462_v17  ;;  %v6585_v26 = vadd.f32 1.0, %v4833_v38  ;;  %v6590_v42 = vmul.f32 %v1909_v33, %v6097_v47  ;;  %979 = vmatmul.f32.gmra.mxu0 %v591_v55  ;;  %1092 = vmatmul.f32.gmra.mxu1 %v591_v55 }
 0x2f6   :  { %v6587_v43 = vpop.eup %4840  ;;  %vm1831_vm8 = vcmp.eq.f32.partialorder %v1830_v15, 8.507059e+37  ;;  %v1833_v50 = vor.u32 1.1754944e-38, %v1832_v40  ;;  %v1144_v23 = vsub.f32 0.0, %v6560_v27  ;;  %v1924_v18 = vsel %vm6504_vm14, %v1923_v31, %v1919_v12  ;;  %753 = vmatmul.f32.gmra.mxu2 %v591_v55  ;;  %866 = vmatmul.f32.gmra.mxu3 %v591_v55  ;;  %v6632_v12 = vpop.f32.mrf.mxu3 }
 0x2f7   :  { %11460 = vst [vmem:[#allocation14_spill] sm:$0xff] %v6590_v42  ;;  %v4843_v16 = vpop.eup %4842  ;;  %v1819_v39 = vsel %vm6554_vm6, %v1818_v52, %v1814_v0  ;;  %4844 = vrcp.f32 %v6558_v36  ;;  %v6598_v30 = vadd.f32 1.0, %v4839_v29  ;;  %v1965_v47 = vand.u32 2147483647, %v6456_v49 }
 0x2f8   :  { %v1834_v38 = vsel %vm1831_vm8, %v1833_v50, %v1829_v59  ;;  %v1967_v41 = vand.u32 2147483648, %v6456_v49  ;;  %4846 = vrcp.f32 %v6576_v7  ;;  %v1958_v53 = vsub.f32 1.0, %v1957_v11  ;;  %v3710_v11 = vld [vmem:[%s11362_s12 + $0x120] sm:$0xff] }
 0x2f9   :  { %v1973_v6 = vsub.f32 1.0, %v1972_v45  ;;  %v1867_v34 = vmul.f32 %v6587_v43, %v6495_v14  ;;  %4848 = vrcp.f32 %v6585_v26  ;;  %v6612_v20 = vmul.f32 %v1924_v18, %v6118_v8  ;;  %v3726_v45 = vld [vmem:[%s11362_s12 + $0x1a0] sm:$0xff]  ;;  %3975 = vmatpush.msrb.mxu0 %v3710_v11 }
 0x2fa   :  { %v6614_v4 = vadd.f32 1.0, %v4843_v16  ;;  %v1302_v31 = vmul.f32 1.442695, %v1144_v23  ;;  %v1145_v15 = vsub.f32 0.0, %v6600_v54  ;;  %v6618_v40 = vmul.f32 %v1819_v39, %v6127_v21  ;;  %4088 = vmatpush.msrb.mxu1 %v3726_v45 }
 0x2fb   :  { %11461 = vst [vmem:[#allocation15_spill] sm:$0xff] %v6612_v20  ;;  %vm1961_vm9 = vweird.f32 %v6456_v49  ;;  %v1980_v33 = vand.u32 2147483647, %v6462_v17  ;;  %4850 = vrcp.f32 %v6598_v30  ;;  %v6626_v8 = vmul.f32 %v1834_v38, %v6134_v32 }
 0x2fc   :  { %11462 = vst [vmem:[#allocation16_spill] sm:$0xff] %v6618_v40  ;;  %v6628_v37 = vor.u32 1.1754944e-38, %v1967_v41  ;;  %v1982_v29 = vand.u32 2147483648, %v6462_v17  ;;  %v1877_v21 = vand.u32 2147483648, %v6495_v14  ;;  %v1959_v52 = vmul.f32 %v6520_v51, %v1958_v53 }
 0x2fd   :  { %11463 = vst [vmem:[#allocation17_spill] sm:$0xff] %v6626_v8  ;;  %v6634_v0 = vpop.eup %4844  ;;  %vm6637_vm10 = vcmp.eq.f32.partialorder %v1965_v47, 8.507059e+37  ;;  %v1974_v59 = vmul.f32 %v6537_v19, %v1973_v6  ;;  %vm1976_vm11 = vweird.f32 %v6462_v17  ;;  %v1868_v32 = vsub.f32 1.0, %v1867_v34  ;;  %v6667_v34 = vpop.f32.mrf.mxu0 }
 0x2fe   :  { %v6649_v50 = vpop.eup %4846  ;;  %v1875_v23 = vand.u32 2147483647, %v6495_v14  ;;  %4852 = vrcp.f32 %v6614_v4  ;;  %v1304_v16 = vmul.f32 1.442695, %v1145_v15  ;;  %v1138_v18 = vsub.f32 0.0, %v6623_v28 }
 0x2ff   :  { %v6654_v39 = vpop.eup %4848  ;;  %vm1962_vm12 = vweird.f32 %v6520_v51  ;;  %vm6657_vm13 = vcmp.eq.f32.partialorder %v1980_v33, 8.507059e+37  ;;  %vm1871_vm14 = vweird.f32 %v6495_v14  ;;  %4854 = vpow2.f32 %v1302_v31 }
 0x300   :  { %v1139_v47 = vsub.f32 0.0, %v6632_v12  ;;  %vm1977_vm15 = vweird.f32 %v6537_v19  ;;  %v1983_v41 = vor.u32 1.1754944e-38, %v1982_v29  ;;  %v6664_v53 = vor.u32 1.1754944e-38, %v1877_v21  ;;  %vm6680_vm1 = vmor %vm1961_vm9, %vm1962_vm12 }
 0x301   :  { %v1892_v6 = vand.u32 2147483648, %v6558_v36  ;;  %v6669_v55 = vpop.eup %4850  ;;  %v1960_v15 = vadd.f32 %v6520_v51, %v1959_v52  ;;  %v1975_v33 = vadd.f32 %v6537_v19, %v1974_v59  ;;  %v1869_v11 = vmul.f32 %v6587_v43, %v1868_v32  ;;  %v592_v32 = vld [vmem:[%s11361_s2 + $0xd0] sm:$0xff]  ;;  %vm6695_vm2 = vmor %vm1976_vm11, %vm1977_vm15 }
 0x302   :  { %v1882_v31 = vmul.f32 %v6634_v0, %v6558_v36  ;;  %v2017_v21 = vmul.f32 %v6649_v50, %v6576_v7  ;;  %v2032_v52 = vmul.f32 %v6654_v39, %v6585_v26  ;;  %4856 = vpow2.f32 %v1304_v16  ;;  %982 = vmatmul.f32.gmra.mxu0 %v592_v32  ;;  %1095 = vmatmul.f32.gmra.mxu1 %v592_v32 }
 0x303   :  { %v1290_v59 = vmul.f32 1.442695, %v1138_v18  ;;  %v1890_v45 = vand.u32 2147483647, %v6558_v36  ;;  %v2027_v20 = vand.u32 2147483648, %v6576_v7  ;;  %v1148_v16 = vsub.f32 0.0, %v6667_v34  ;;  %756 = vmatmul.f32.gmra.mxu2 %v592_v32  ;;  %869 = vmatmul.f32.gmra.mxu3 %v592_v32  ;;  %v6724_v32 = vpop.f32.mrf.mxu1 }
 0x304   :  { %v1292_v42 = vmul.f32 1.442695, %v1139_v47  ;;  %v6702_v18 = vpop.eup %4852  ;;  %vm1872_vm3 = vweird.f32 %v6587_v43  ;;  %vm6705_vm4 = vcmp.eq.f32.partialorder %v1875_v23, 8.507059e+37  ;;  %v6709_v17 = vor.u32 1.1754944e-38, %v1892_v6 }
 0x305   :  { %vm2021_vm5 = vweird.f32 %v6576_v7  ;;  %v2025_v40 = vand.u32 2147483647, %v6576_v7  ;;  %v1927_v47 = vmul.f32 %v6669_v55, %v6598_v30  ;;  %v4855_v57 = vpop.eup %4854  ;;  %v1964_v62 = vsel %vm6680_vm1, %v6520_v51, %v1960_v15  ;;  %vm6738_vm7 = vmor %vm1871_vm14, %vm1872_vm3 }
 0x306   :  { %v1870_v23 = vadd.f32 %v6587_v43, %v1869_v11  ;;  %v1883_v60 = vsub.f32 1.0, %v1882_v31  ;;  %vm2036_vm6 = vweird.f32 %v6585_v26  ;;  %v2040_v6 = vand.u32 2147483647, %v6585_v26  ;;  %v6729_v11 = vpop.f32.mrf.mxu2 }
 0x307   :  { %v1979_v58 = vsel %vm6695_vm2, %v6537_v19, %v1975_v33  ;;  %v2018_v3 = vsub.f32 1.0, %v2017_v21  ;;  %v2033_v9 = vsub.f32 1.0, %v2032_v52  ;;  %4858 = vpow2.f32 %v1290_v59 }
 0x308   :  { %v6726_v35 = vor.u32 1.1754944e-38, %v2027_v20  ;;  %v2042_v51 = vand.u32 2147483648, %v6585_v26  ;;  %4860 = vpow2.f32 %v1292_v42  ;;  %v1310_v15 = vmul.f32 1.442695, %v1148_v16  ;;  %v4857_v31 = vpop.eup %4856 }
 0x309   :  { %v1969_v29 = vsel %vm6637_vm10, %v6628_v37, %v1964_v62  ;;  %vm1886_vm8 = vweird.f32 %v6558_v36  ;;  %v1928_v20 = vsub.f32 1.0, %v1927_v47  ;;  %v1942_v42 = vmul.f32 %v6702_v18, %v6614_v4 }
 0x30a   :  { %v6745_v33 = vadd.f32 1.0, %v4855_v57  ;;  %v1984_v24 = vsel %vm6657_vm13, %v1983_v41, %v1979_v58  ;;  %v1874_v62 = vsel %vm6738_vm7, %v6587_v43, %v1870_v23  ;;  %vm1887_vm9 = vweird.f32 %v6634_v0 }
 0x30b   :  { %v1149_v14 = vsub.f32 0.0, %v6724_v32  ;;  %v1884_v37 = vmul.f32 %v6634_v0, %v1883_v60  ;;  %v2019_v21 = vmul.f32 %v6649_v50, %v2018_v3  ;;  %v2034_v52 = vmul.f32 %v6654_v39, %v2033_v9  ;;  %vm6823_vm3 = vmor %vm1886_vm8, %vm1887_vm9  ;;  %v6904_v26 = vpop.f32.mrf.mxu1 }
 0x30c   :  { %v1142_v57 = vsub.f32 0.0, %v6729_v11  ;;  %v6759_v59 = vmul.f32 %v1969_v29, %v6278_v22  ;;  %vm2022_vm10 = vweird.f32 %v6649_v50  ;;  %v6762_v58 = vadd.f32 1.0, %v4857_v31  ;;  %v6774_v22 = vpop.f32.mrf.mxu3 }
 0x30d   :  { %4862 = vpow2.f32 %v1310_v15  ;;  %v4859_v43 = vpop.eup %4858  ;;  %vm6764_vm11 = vcmp.eq.f32.partialorder %v2025_v40, 8.507059e+37  ;;  %vm6768_vm12 = vcmp.eq.f32.partialorder %v2040_v6, 8.507059e+37  ;;  %v2043_v9 = vor.u32 1.1754944e-38, %v2042_v51  ;;  %v6787_v6 = vpop.f32.mrf.mxu0  ;;  %vm6796_vm15 = vmor %vm2021_vm5, %vm2022_vm10 }
 0x30e   :  { %11476 = vst [vmem:[#allocation18_spill] sm:$0xff] %v6759_v59  ;;  %v1929_v3 = vmul.f32 %v6669_v55, %v1928_v20  ;;  %v1943_v41 = vsub.f32 1.0, %v1942_v42  ;;  %4864 = vrcp.f32 %v6745_v33  ;;  %v4861_v49 = vpop.eup %4860  ;;  %v6777_v16 = vmul.f32 %v1984_v24, %v6289_v1 }
 0x30f   :  { %v1879_v40 = vsel %vm6705_vm4, %v6664_v53, %v1874_v62  ;;  %vm6782_vm13 = vcmp.eq.f32.partialorder %v1890_v45, 8.507059e+37  ;;  %vm2037_vm14 = vweird.f32 %v6654_v39  ;;  %v1312_v23 = vmul.f32 1.442695, %v1149_v14 }
 0x310   :  { %11481 = vst [vmem:[#allocation19_spill] sm:$0xff] %v6777_v16  ;;  %v1885_v51 = vadd.f32 %v6634_v0, %v1884_v37  ;;  %v2020_v15 = vadd.f32 %v6649_v50, %v2019_v21  ;;  %v2035_v1 = vadd.f32 %v6654_v39, %v2034_v52  ;;  %v1298_v31 = vmul.f32 1.442695, %v1142_v57  ;;  %vm6807_vm2 = vmor %vm2036_vm6, %vm2037_vm14 }
 0x311   :  { %vm1932_vm1 = vweird.f32 %v6669_v55  ;;  %4866 = vrcp.f32 %v6762_v58  ;;  %v6802_v53 = vadd.f32 1.0, %v4859_v43  ;;  %v1143_v45 = vsub.f32 0.0, %v6774_v22 }
 0x312   :  { %v1930_v7 = vadd.f32 %v6669_v55, %v1929_v3  ;;  %v1944_v19 = vmul.f32 %v6702_v18, %v1943_v41  ;;  %v6813_v20 = vadd.f32 1.0, %v4861_v49  ;;  %v1152_v42 = vsub.f32 0.0, %v6787_v6 }
 0x313   :  { %v4863_v24 = vpop.eup %4862  ;;  %v6817_v62 = vmul.f32 %v1879_v40, %v6329_v44  ;;  %vm1931_vm4 = vweird.f32 %v6598_v30  ;;  %v1937_v14 = vand.u32 2147483648, %v6598_v30  ;;  %4868 = vpow2.f32 %v1312_v23 }
 0x314   :  { %v6829_v37 = vpop.eup %4864  ;;  %v1889_v44 = vsel %vm6823_vm3, %v6634_v0, %v1885_v51  ;;  %v2024_v21 = vsel %vm6796_vm15, %v6649_v50, %v2020_v15  ;;  %v1935_v36 = vand.u32 2147483647, %v6598_v30  ;;  %4870 = vpow2.f32 %v1298_v31  ;;  %vm6843_vm5 = vmor %vm1931_vm4, %vm1932_vm1  ;;  %v3677_v51 = vld [vmem:[%s11362_s12 + $0x18] sm:$0xff]  ;;  %v6919_v57 = vpop.f32.mrf.mxu3 }
 0x315   :  { %11488 = vst [vmem:[#allocation20_spill] sm:$0xff] %v6817_v62  ;;  %v2039_v52 = vsel %vm6807_vm2, %v6654_v39, %v2035_v1  ;;  %vm1947_vm6 = vweird.f32 %v6702_v18  ;;  %4872 = vrcp.f32 %v6802_v53  ;;  %v1300_v0 = vmul.f32 1.442695, %v1143_v45  ;;  %v3693_v15 = vld [vmem:[%s11362_s12 + $0x98] sm:$0xff]  ;;  %3750 = vmatpush.msra.mxu2 %v3677_v51 }
 0x316   :  { %v1934_v30 = vsel %vm6843_vm5, %v6669_v55, %v1930_v7  ;;  %v1945_v50 = vadd.f32 %v6702_v18, %v1944_v19  ;;  %4874 = vrcp.f32 %v6813_v20  ;;  %v1318_v39 = vmul.f32 1.442695, %v1152_v42  ;;  %3863 = vmatpush.msra.mxu3 %v3693_v15 }
 0x317   :  { %v6854_v43 = vpop.eup %4866  ;;  %v1938_v3 = vor.u32 1.1754944e-38, %v1937_v14  ;;  %v1952_v41 = vand.u32 2147483648, %v6614_v4  ;;  %v2077_v49 = vmul.f32 %v6829_v37, %v6745_v33  ;;  %v6859_v40 = vadd.f32 1.0, %v4863_v24 }
 0x318   :  { %v1894_v23 = vsel %vm6782_vm13, %v6709_v17, %v1889_v44  ;;  %vm1936_vm7 = vcmp.eq.f32.partialorder %v1935_v36, 8.507059e+37  ;;  %vm1946_vm8 = vweird.f32 %v6614_v4  ;;  %v1950_v55 = vand.u32 2147483647, %v6614_v4  ;;  %v6911_v36 = vpop.f32.mrf.mxu2 }
 0x319   :  { %v4869_v1 = vpop.eup %4868  ;;  %v2029_v31 = vsel %vm6764_vm11, %v6726_v35, %v2024_v21  ;;  %v2044_v17 = vsel %vm6768_vm12, %v2043_v9, %v2039_v52  ;;  %v1939_v47 = vsel %vm1936_vm7, %v1938_v3, %v1934_v30  ;;  %vm6879_vm9 = vmor %vm1946_vm8, %vm1947_vm6  ;;  %4876 = vpow2.f32 %v1300_v0 }
 0x31a   :  { %v4871_v8 = vpop.eup %4870  ;;  %v1949_v45 = vsel %vm6879_vm9, %v6702_v18, %v1945_v50  ;;  %v2087_v35 = vand.u32 2147483648, %v6745_v33  ;;  %v2092_v38 = vmul.f32 %v6854_v43, %v6762_v58  ;;  %4878 = vpow2.f32 %v1318_v39 }
 0x31b   :  { %v6889_v60 = vpop.eup %4872  ;;  %v1953_v9 = vor.u32 1.1754944e-38, %v1952_v41  ;;  %v2078_v29 = vsub.f32 1.0, %v2077_v49  ;;  %v2085_v7 = vand.u32 2147483647, %v6745_v33  ;;  %4880 = vrcp.f32 %v6859_v40 }
 0x31c   :  { %v6893_v19 = vpop.eup %4874  ;;  %v6896_v42 = vmul.f32 %v1894_v23, %v6361_v61  ;;  %v6899_v18 = vmul.f32 %v2029_v31, %v6372_v13  ;;  %v6902_v24 = vmul.f32 %v2044_v17, %v6382_v56  ;;  %vm1951_vm10 = vcmp.eq.f32.partialorder %v1950_v55, 8.507059e+37 }
 0x31d   :  { %v6907_v14 = vmul.f32 %v1939_v47, %v6419_v63  ;;  %v1954_v44 = vsel %vm1951_vm10, %v1953_v9, %v1949_v45  ;;  %vm2081_vm11 = vweird.f32 %v6745_v33  ;;  %v2102_v21 = vand.u32 2147483648, %v6762_v58  ;;  %v593_v63 = vld [vmem:[%s11361_s2 + $0xd8] sm:$0xff] }
 0x31e   :  { %11495 = vst [vmem:[#allocation21_spill] sm:$0xff] %v6896_v42  ;;  %v6913_v61 = vor.u32 1.1754944e-38, %v2087_v35  ;;  %v2093_v13 = vsub.f32 1.0, %v2092_v38  ;;  %v1987_v56 = vmul.f32 %v6889_v60, %v6802_v53  ;;  %v6917_v52 = vadd.f32 1.0, %v4869_v1  ;;  %985 = vmatmul.f32.gmra.mxu0 %v593_v63  ;;  %1098 = vmatmul.f32.gmra.mxu1 %v593_v63  ;;  %v3725_v47 = vld [vmem:[%s11362_s12 + $0x198] sm:$0xff] }
 0x31f   :  { %11496 = vst [vmem:[#allocation22_spill] sm:$0xff] %v6899_v18  ;;  %v4877_v0 = vpop.eup %4876  ;;  %v2079_v30 = vmul.f32 %v6829_v37, %v2078_v29  ;;  %vm6925_vm12 = vcmp.eq.f32.partialorder %v2085_v7, 8.507059e+37  ;;  %v2100_v39 = vand.u32 2147483647, %v6762_v58  ;;  %v2002_v3 = vmul.f32 %v6893_v19, %v6813_v20  ;;  %759 = vmatmul.f32.gmra.mxu2 %v593_v63  ;;  %872 = vmatmul.f32.gmra.mxu3 %v593_v63 }
 0x320   :  { %11497 = vst [vmem:[#allocation23_spill] sm:$0xff] %v6902_v24  ;;  %v6932_v41 = vadd.f32 1.0, %v4871_v8  ;;  %v4879_v49 = vpop.eup %4878  ;;  %v6935_v23 = vmul.f32 %v1954_v44, %v6449_v10  ;;  %vm2096_vm13 = vweird.f32 %v6762_v58  ;;  %v1153_v55 = vsub.f32 0.0, %v6904_v26  ;;  %v3709_v10 = vld [vmem:[%s11362_s12 + $0x118] sm:$0xff]  ;;  %4089 = vmatpush.msrb.mxu1 %v3725_v47 }
 0x321   :  { %11498 = vst [vmem:[#allocation24_spill] sm:$0xff] %v6907_v14  ;;  %v1146_v51 = vsub.f32 0.0, %v6911_v36  ;;  %v6940_v15 = vpop.eup %4880  ;;  %vm2082_vm14 = vweird.f32 %v6829_v37  ;;  %v6943_v1 = vor.u32 1.1754944e-38, %v2102_v21  ;;  %v1997_v31 = vand.u32 2147483648, %v6802_v53  ;;  %3976 = vmatpush.msrb.mxu0 %v3709_v10 }
 0x322   :  { %11501 = vst [vmem:[#allocation25_spill] sm:$0xff] %v6935_v23  ;;  %v2012_v17 = vand.u32 2147483648, %v6813_v20  ;;  %v2094_v4 = vmul.f32 %v6854_v43, %v2093_v13  ;;  %v1988_v8 = vsub.f32 1.0, %v1987_v56  ;;  %v1995_v45 = vand.u32 2147483647, %v6802_v53  ;;  %vm6968_vm1 = vmor %vm2081_vm11, %vm2082_vm14 }
 0x323   :  { %4882 = vrcp.f32 %v6917_v52  ;;  %v2080_v35 = vadd.f32 %v6829_v37, %v2079_v30  ;;  %vm6957_vm15 = vcmp.eq.f32.partialorder %v2100_v39, 8.507059e+37  ;;  %v2003_v9 = vsub.f32 1.0, %v2002_v3  ;;  %v6985_v30 = vpop.f32.mrf.mxu0 }
 0x324   :  { %4884 = vrcp.f32 %v6932_v41  ;;  %v6962_v29 = vadd.f32 1.0, %v4877_v0  ;;  %vm2097_vm2 = vweird.f32 %v6854_v43  ;;  %vm1991_vm3 = vweird.f32 %v6802_v53 }
 0x325   :  { %v2010_v44 = vand.u32 2147483647, %v6813_v20  ;;  %v2137_v21 = vmul.f32 %v6940_v15, %v6859_v40  ;;  %v6977_v13 = vadd.f32 1.0, %v4879_v49  ;;  %v6979_v56 = vor.u32 1.1754944e-38, %v1997_v31  ;;  %v6992_v31 = vpop.f32.mrf.mxu1  ;;  %vm7001_vm7 = vmor %vm2096_vm13, %vm2097_vm2 }
 0x326   :  { %vm2006_vm4 = vweird.f32 %v6813_v20  ;;  %v6982_v33 = vor.u32 1.1754944e-38, %v2012_v17  ;;  %v2147_v63 = vand.u32 2147483648, %v6859_v40  ;;  %v1320_v0 = vmul.f32 1.442695, %v1153_v55 }
 0x327   :  { %v2095_v39 = vadd.f32 %v6854_v43, %v2094_v4  ;;  %v1989_v3 = vmul.f32 %v6889_v60, %v1988_v8  ;;  %vm1992_vm5 = vweird.f32 %v6889_v60  ;;  %vm2141_vm6 = vweird.f32 %v6859_v40  ;;  %v7008_v4 = vpop.f32.mrf.mxu2 }
 0x328   :  { %v2145_v49 = vand.u32 2147483647, %v6859_v40  ;;  %v2084_v17 = vsel %vm6968_vm1, %v6829_v37, %v2080_v35  ;;  %v2004_v10 = vmul.f32 %v6893_v19, %v2003_v9  ;;  %4886 = vrcp.f32 %v6962_v29  ;;  %v7014_v35 = vpop.f32.mrf.mxu3 }
 0x329   :  { %v1147_v47 = vsub.f32 0.0, %v6919_v57  ;;  %v7010_v8 = vpop.eup %4882  ;;  %v2138_v7 = vsub.f32 1.0, %v2137_v21  ;;  %4888 = vrcp.f32 %v6977_v13  ;;  %v1306_v37 = vmul.f32 1.442695, %v1146_v51 }
 0x32a   :  { %v1156_v58 = vsub.f32 0.0, %v6985_v30  ;;  %v7016_v24 = vpop.eup %4884  ;;  %vm2007_vm8 = vweird.f32 %v6893_v19  ;;  %v7019_v9 = vor.u32 1.1754944e-38, %v2147_v63  ;;  %4890 = vpow2.f32 %v1320_v0 }
 0x32b   :  { %v1157_v18 = vsub.f32 0.0, %v6992_v31  ;;  %v2089_v21 = vsel %vm6925_vm12, %v6913_v61, %v2084_v17  ;;  %v2099_v51 = vsel %vm7001_vm7, %v6854_v43, %v2095_v39  ;;  %v1990_v23 = vadd.f32 %v6889_v60, %v1989_v3  ;;  %vm7061_vm12 = vmor %vm1991_vm3, %vm1992_vm5 }
 0x32c   :  { %vm7029_vm9 = vcmp.eq.f32.partialorder %v1995_v45, 8.507059e+37  ;;  %vm7033_vm10 = vcmp.eq.f32.partialorder %v2010_v44, 8.507059e+37  ;;  %v1150_v0 = vsub.f32 0.0, %v7008_v4  ;;  %v2005_v16 = vadd.f32 %v6893_v19, %v2004_v10  ;;  %v594_v45 = vld [vmem:[%s11361_s2 + $0xe0] sm:$0xff]  ;;  %vm7079_vm1 = vmor %vm2006_vm4, %vm2007_vm8 }
 0x32d   :  { %v2152_v61 = vmul.f32 %v7010_v8, %v6917_v52  ;;  %v1308_v50 = vmul.f32 1.442695, %v1147_v47  ;;  %v1151_v43 = vsub.f32 0.0, %v7014_v35  ;;  %v2139_v39 = vmul.f32 %v6940_v15, %v2138_v7  ;;  %988 = vmatmul.f32.gmra.mxu0 %v594_v45  ;;  %1101 = vmatmul.f32.gmra.mxu1 %v594_v45 }
 0x32e   :  { %vm7046_vm11 = vcmp.eq.f32.partialorder %v2145_v49, 8.507059e+37  ;;  %v2047_v3 = vmul.f32 %v7016_v24, %v6932_v41  ;;  %4892 = vpow2.f32 %v1306_v37  ;;  %v1326_v17 = vmul.f32 1.442695, %v1156_v58  ;;  %v7052_v55 = vpop.eup %4886  ;;  %762 = vmatmul.f32.gmra.mxu2 %v594_v45  ;;  %875 = vmatmul.f32.gmra.mxu3 %v594_v45 }
 0x32f   :  { %v7055_v10 = vmul.f32 %v2089_v21, %v6560_v27  ;;  %vm2142_vm13 = vweird.f32 %v6940_v15  ;;  %vm2156_vm14 = vweird.f32 %v6917_v52  ;;  %v1328_v47 = vmul.f32 1.442695, %v1157_v18  ;;  %v7067_v7 = vpop.eup %4888 }
 0x330   :  { %v2104_v27 = vsel %vm6957_vm15, %v6943_v1, %v2099_v51  ;;  %v1994_v53 = vsel %vm7061_vm12, %v6889_v60, %v1990_v23  ;;  %v2162_v18 = vand.u32 2147483648, %v6917_v52  ;;  %v1314_v58 = vmul.f32 1.442695, %v1150_v0  ;;  %v4891_v21 = vpop.eup %4890  ;;  %vm7097_vm15 = vmor %vm2141_vm6, %vm2142_vm13 }
 0x331   :  { %11514 = vst [vmem:[#allocation26_spill] sm:$0xff] %v7055_v10  ;;  %v2009_v1 = vsel %vm7079_vm1, %v6893_v19, %v2005_v16  ;;  %v2153_v38 = vsub.f32 1.0, %v2152_v61  ;;  %4894 = vpow2.f32 %v1308_v50  ;;  %v1316_v51 = vmul.f32 1.442695, %v1151_v43 }
 0x332   :  { %v2140_v60 = vadd.f32 %v6940_v15, %v2139_v39  ;;  %v2048_v23 = vsub.f32 1.0, %v2047_v3  ;;  %v2062_v20 = vmul.f32 %v7052_v55, %v6962_v29  ;;  %4896 = vpow2.f32 %v1326_v17 }
 0x333   :  { %v7091_v45 = vmul.f32 %v2104_v27, %v6600_v54  ;;  %v2160_v16 = vand.u32 2147483647, %v6917_v52  ;;  %v2197_v19 = vmul.f32 %v7067_v7, %v6977_v13  ;;  %4898 = vpow2.f32 %v1328_v47 }
 0x334   :  { %v4893_v61 = vpop.eup %4892  ;;  %v2055_v50 = vand.u32 2147483647, %v6932_v41  ;;  %v2057_v54 = vand.u32 2147483648, %v6932_v41  ;;  %v7106_v43 = vadd.f32 1.0, %v4891_v21  ;;  %4900 = vpow2.f32 %v1314_v58  ;;  %v7136_v58 = vpop.f32.mrf.mxu0 }
 0x335   :  { %11519 = vst [vmem:[#allocation27_spill] sm:$0xff] %v7091_v45  ;;  %v1999_v40 = vsel %vm7029_vm9, %v6979_v56, %v1994_v53  ;;  %v2014_v39 = vsel %vm7033_vm10, %v6982_v33, %v2009_v1  ;;  %v2154_v3 = vmul.f32 %v7010_v8, %v2153_v38  ;;  %4902 = vpow2.f32 %v1316_v51 }
 0x336   :  { %v2144_v17 = vsel %vm7097_vm15, %v6940_v15, %v2140_v60  ;;  %v7118_v49 = vor.u32 1.1754944e-38, %v2162_v18  ;;  %v2049_v47 = vmul.f32 %v7016_v24, %v2048_v23  ;;  %v2063_v27 = vsub.f32 1.0, %v2062_v20 }
 0x337   :  { %v4895_v37 = vpop.eup %4894  ;;  %vm2157_vm2 = vweird.f32 %v7010_v8  ;;  %vm7122_vm3 = vcmp.eq.f32.partialorder %v2160_v16, 8.507059e+37  ;;  %vm2051_vm4 = vweird.f32 %v6932_v41  ;;  %v2198_v56 = vsub.f32 1.0, %v2197_v19  ;;  %v3692_v41 = vld [vmem:[%s11362_s12 + $0x90] sm:$0xff] }
 0x338   :  { %v7127_v33 = vadd.f32 1.0, %v4893_v61  ;;  %v4897_v63 = vpop.eup %4896  ;;  %v7130_v15 = vmul.f32 %v1999_v40, %v6623_v28  ;;  %v7133_v53 = vmul.f32 %v2014_v39, %v6632_v12  ;;  %v2058_v18 = vor.u32 1.1754944e-38, %v2057_v54  ;;  %vm7152_vm7 = vmor %vm2156_vm14, %vm2157_vm2  ;;  %3864 = vmatpush.msra.mxu3 %v3692_v41  ;;  %v7259_v40 = vpop.f32.mrf.mxu3 }
 0x339   :  { %4904 = vrcp.f32 %v7106_v43  ;;  %v4899_v21 = vpop.eup %4898  ;;  %v2149_v1 = vsel %vm7046_vm11, %v7019_v9, %v2144_v17  ;;  %v2155_v38 = vadd.f32 %v7010_v8, %v2154_v3  ;;  %vm7142_vm5 = vcmp.eq.f32.partialorder %v2055_v50, 8.507059e+37  ;;  %v7184_v17 = vpop.f32.mrf.mxu1  ;;  %11541 = vst [vmem:[#allocation31_spill] sm:$0xff] %v7259_v40 }
 0x33a   :  { %11524 = vst [vmem:[#allocation28_spill] sm:$0xff] %v7130_v15  ;;  %vm2066_vm6 = vweird.f32 %v6962_v29  ;;  %v2070_v28 = vand.u32 2147483647, %v6962_v29  ;;  %v4901_v12 = vpop.eup %4900  ;;  %v2050_v9 = vadd.f32 %v7016_v24, %v2049_v47  ;;  %vm2052_vm8 = vweird.f32 %v7016_v24  ;;  %v3676_v47 = vld [vmem:[%s11362_s12 + $0x10] sm:$0xff] }
 0x33b   :  { %11525 = vst [vmem:[#allocation29_spill] sm:$0xff] %v7133_v53  ;;  %v2064_v44 = vmul.f32 %v7052_v55, %v2063_v27  ;;  %v7159_v23 = vadd.f32 1.0, %v4895_v37  ;;  %v4903_v20 = vpop.eup %4902  ;;  %v2199_v0 = vmul.f32 %v7067_v7, %v2198_v56  ;;  %4906 = vrcp.f32 %v7127_v33  ;;  %vm7176_vm10 = vmor %vm2051_vm4, %vm2052_vm8  ;;  %3751 = vmatpush.msra.mxu2 %v3676_v47 }
 0x33c   :  { %v7163_v16 = vadd.f32 1.0, %v4897_v63  ;;  %v1160_v52 = vsub.f32 0.0, %v7136_v58  ;;  %v2072_v19 = vand.u32 2147483648, %v6962_v29  ;;  %vm2201_vm9 = vweird.f32 %v6977_v13 }
 0x33d   :  { %v2205_v61 = vand.u32 2147483647, %v6977_v13  ;;  %v7169_v50 = vadd.f32 1.0, %v4899_v21  ;;  %v2159_v54 = vsel %vm7152_vm7, %v7010_v8, %v2155_v38  ;;  %vm2202_vm11 = vweird.f32 %v7067_v7 }
 0x33e   :  { %v2207_v39 = vand.u32 2147483648, %v6977_v13  ;;  %v7182_v3 = vadd.f32 1.0, %v4901_v12  ;;  %v2054_v27 = vsel %vm7176_vm10, %v7016_v24, %v2050_v9  ;;  %vm2067_vm12 = vweird.f32 %v7052_v55  ;;  %vm7215_vm14 = vmor %vm2201_vm9, %vm2202_vm11  ;;  %v7230_v13 = vpop.f32.mrf.mxu2 }
 0x33f   :  { %v7192_v8 = vpop.eup %4904  ;;  %4908 = vrcp.f32 %v7159_v23  ;;  %v7199_v37 = vadd.f32 1.0, %v4903_v20  ;;  %v2065_v56 = vadd.f32 %v7052_v55, %v2064_v44  ;;  %v2200_v63 = vadd.f32 %v7067_v7, %v2199_v0  ;;  %vm7241_vm15 = vmor %vm2066_vm6, %vm2067_vm12  ;;  %v3708_v0 = vld [vmem:[%s11362_s12 + $0x110] sm:$0xff] }
 0x340   :  { %4910 = vrcp.f32 %v7163_v16  ;;  %v1334_v21 = vmul.f32 1.442695, %v1160_v52  ;;  %v7205_v38 = vmul.f32 %v2149_v1, %v6667_v34  ;;  %vm7207_vm13 = vcmp.eq.f32.partialorder %v2070_v28, 8.507059e+37  ;;  %3977 = vmatpush.msrb.mxu0 %v3708_v0 }
 0x341   :  { %4912 = vrcp.f32 %v7169_v50  ;;  %v1161_v60 = vsub.f32 0.0, %v7184_v17  ;;  %v7221_v9 = vpop.eup %4906  ;;  %v2073_v34 = vor.u32 1.1754944e-38, %v2072_v19  ;;  %vm7223_vm1 = vcmp.eq.f32.partialorder %v2205_v61, 8.507059e+37  ;;  %v7334_v53 = vpop.f32.mrf.mxu1 }
 0x342   :  { %11532 = vst [vmem:[#allocation30_spill] sm:$0xff] %v7205_v38  ;;  %v2212_v28 = vmul.f32 %v7192_v8, %v7106_v43  ;;  %4914 = vrcp.f32 %v7182_v3  ;;  %v2164_v44 = vsel %vm7122_vm3, %v7118_v49, %v2159_v54  ;;  %v2059_v20 = vsel %vm7142_vm5, %v2058_v18, %v2054_v27  ;;  %v7330_v38 = vpop.f32.mrf.mxu0 }
 0x343   :  { %v2208_v52 = vor.u32 1.1754944e-38, %v2207_v39  ;;  %4916 = vrcp.f32 %v7199_v37  ;;  %v2069_v19 = vsel %vm7241_vm15, %v7052_v55, %v2065_v56  ;;  %v2204_v49 = vsel %vm7215_vm14, %v7067_v7, %v2200_v63  ;;  %v595_v55 = vld [vmem:[%s11361_s2 + $0xe8] sm:$0xff]  ;;  %11546 = vst [vmem:[#allocation34_spill] sm:$0xff] %v7330_v38 }
 0x344   :  { %v2222_v14 = vand.u32 2147483648, %v7106_v43  ;;  %4918 = vpow2.f32 %v1334_v21  ;;  %v2107_v29 = vmul.f32 %v7221_v9, %v7127_v33  ;;  %v2117_v51 = vand.u32 2147483648, %v7127_v33  ;;  %991 = vmatmul.f32.gmra.mxu0 %v595_v55  ;;  %1104 = vmatmul.f32.gmra.mxu1 %v595_v55  ;;  %11547 = vst [vmem:[#allocation35_spill] sm:$0xff] %v7334_v53 }
 0x345   :  { %v7253_v18 = vpop.eup %4908  ;;  %v1336_v61 = vmul.f32 1.442695, %v1161_v60  ;;  %v1154_v54 = vsub.f32 0.0, %v7230_v13  ;;  %v7267_v39 = vmul.f32 %v2164_v44, %v6724_v32  ;;  %v7270_v47 = vmul.f32 %v2059_v20, %v6729_v11  ;;  %765 = vmatmul.f32.gmra.mxu2 %v595_v55  ;;  %878 = vmatmul.f32.gmra.mxu3 %v595_v55 }
 0x346   :  { %v7264_v7 = vpop.eup %4910  ;;  %v2213_v41 = vsub.f32 1.0, %v2212_v28  ;;  %v2220_v27 = vand.u32 2147483647, %v7106_v43  ;;  %v7277_v63 = vsel %vm7207_vm13, %v2073_v34, %v2069_v19  ;;  %v7281_v21 = vsel %vm7223_vm1, %v2208_v52, %v2204_v49  ;;  %v3724_v52 = vld [vmem:[%s11362_s12 + $0x190] sm:$0xff]  ;;  %v7351_v59 = vpop.f32.mrf.mxu2 }
 0x347   :  { %11542 = vst [vmem:[#allocation32_spill] sm:$0xff] %v7267_v39  ;;  %v7273_v56 = vpop.eup %4912  ;;  %vm2216_vm2 = vweird.f32 %v7106_v43  ;;  %v2132_v32 = vand.u32 2147483648, %v7159_v23  ;;  %v7287_v12 = vor.u32 1.1754944e-38, %v2222_v14  ;;  %v1155_v34 = vsub.f32 0.0, %v7259_v40  ;;  %4090 = vmatpush.msrb.mxu1 %v3724_v52 }
 0x348   :  { %11543 = vst [vmem:[#allocation33_spill] sm:$0xff] %v7270_v47  ;;  %v7285_v11 = vpop.eup %4914  ;;  %v2108_v1 = vsub.f32 1.0, %v2107_v29  ;;  %v7294_v44 = vor.u32 1.1754944e-38, %v2117_v51  ;;  %4920 = vpow2.f32 %v1336_v61  ;;  %v1322_v20 = vmul.f32 1.442695, %v1154_v54 }
 0x349   :  { %v7292_v28 = vpop.eup %4916  ;;  %v2214_v49 = vmul.f32 %v7192_v8, %v2213_v41  ;;  %vm2217_vm3 = vweird.f32 %v7192_v8  ;;  %vm7304_vm4 = vcmp.eq.f32.partialorder %v2220_v27, 8.507059e+37  ;;  %v2122_v29 = vmul.f32 %v7253_v18, %v7159_v23  ;;  %11550 = vst [vmem:[#allocation36_spill] sm:$0xff] %v7351_v59 }
 0x34a   :  { %v4919_v19 = vpop.eup %4918  ;;  %v2257_v51 = vmul.f32 %v7264_v7, %v7163_v16  ;;  %vm2111_vm5 = vweird.f32 %v7127_v33  ;;  %v7313_v61 = vor.u32 1.1754944e-38, %v2132_v32  ;;  %v2267_v54 = vand.u32 2147483648, %v7163_v16  ;;  %vm7340_vm9 = vmor %vm2216_vm2, %vm2217_vm3 }
 0x34b   :  { %v2272_v55 = vmul.f32 %v7273_v56, %v7169_v50  ;;  %v2282_v41 = vand.u32 2147483648, %v7169_v50  ;;  %vm2261_vm6 = vweird.f32 %v7163_v16  ;;  %v2265_v27 = vand.u32 2147483647, %v7163_v16 }
 0x34c   :  { %v2167_v24 = vmul.f32 %v7285_v11, %v7182_v3  ;;  %v2182_v0 = vmul.f32 %v7292_v28, %v7199_v37  ;;  %v1324_v52 = vmul.f32 1.442695, %v1155_v34  ;;  %v2109_v32 = vmul.f32 %v7221_v9, %v2108_v1 }
 0x34d   :  { %vm2276_vm7 = vweird.f32 %v7169_v50  ;;  %v2280_v60 = vand.u32 2147483647, %v7169_v50  ;;  %v7328_v39 = vadd.f32 1.0, %v4919_v19  ;;  %4922 = vpow2.f32 %v1322_v20 }
 0x34e   :  { %v2215_v47 = vadd.f32 %v7192_v8, %v2214_v49  ;;  %vm2112_vm8 = vweird.f32 %v7221_v9  ;;  %v2123_v45 = vsub.f32 1.0, %v2122_v29  ;;  %v2258_v10 = vsub.f32 1.0, %v2257_v51  ;;  %v4921_v34 = vpop.eup %4920 }
 0x34f   :  { %vm2127_vm10 = vweird.f32 %v7253_v18  ;;  %v7345_v20 = vor.u32 1.1754944e-38, %v2267_v54  ;;  %v2273_v19 = vsub.f32 1.0, %v2272_v55  ;;  %v7347_v49 = vor.u32 1.1754944e-38, %v2282_v41  ;;  %v7360_v41 = vpop.f32.mrf.mxu3  ;;  %vm7388_vm15 = vmor %vm2111_vm5, %vm2112_vm8 }
 0x350   :  { %vm2126_vm11 = vweird.f32 %v7159_v23  ;;  %v2168_v29 = vsub.f32 1.0, %v2167_v24  ;;  %v2183_v51 = vsub.f32 1.0, %v2182_v0  ;;  %4924 = vpow2.f32 %v1324_v52  ;;  %v596_v24 = vld [vmem:[%s11361_s2 + $0xf0] sm:$0xff] }
 0x351   :  { %v1164_v15 = vsub.f32 0.0, %v7330_v38  ;;  %v7354_v43 = vadd.f32 %v7221_v9, %v2109_v32  ;;  %vm2171_vm12 = vweird.f32 %v7182_v3  ;;  %v2175_v54 = vand.u32 2147483647, %v7182_v3  ;;  %994 = vmatmul.f32.gmra.mxu0 %v596_v24  ;;  %1107 = vmatmul.f32.gmra.mxu1 %v596_v24 }
 0x352   :  { %4926 = vrcp.f32 %v7328_v39  ;;  %v1165_v55 = vsub.f32 0.0, %v7334_v53  ;;  %v2219_v0 = vsel %vm7340_vm9, %v7192_v8, %v2215_v47  ;;  %v2124_v52 = vmul.f32 %v7253_v18, %v2123_v45  ;;  %768 = vmatmul.f32.gmra.mxu2 %v596_v24  ;;  %881 = vmatmul.f32.gmra.mxu3 %v596_v24 }
 0x353   :  { %v2259_v32 = vmul.f32 %v7264_v7, %v2258_v10  ;;  %v7370_v42 = vadd.f32 1.0, %v4921_v34  ;;  %v4923_v62 = vpop.eup %4922  ;;  %vm2262_vm13 = vweird.f32 %v7264_v7  ;;  %vm7373_vm14 = vcmp.eq.f32.partialorder %v2265_v27, 8.507059e+37 }
 0x354   :  { %v2274_v38 = vmul.f32 %v7273_v56, %v2273_v19  ;;  %vm7378_vm1 = vcmp.eq.f32.partialorder %v2280_v60, 8.507059e+37  ;;  %v2177_v45 = vand.u32 2147483648, %v7182_v3  ;;  %v1158_v10 = vsub.f32 0.0, %v7351_v59 }
 0x355   :  { %v11557_v47 = vand.u32 2147483647, %v7127_v33  ;;  %v11560_v27 = vand.u32 2147483647, %v7159_v23  ;;  %v2169_v19 = vmul.f32 %v7285_v11, %v2168_v29  ;;  %v2184_v24 = vmul.f32 %v7292_v28, %v2183_v51 }
 0x356   :  { %v1342_v59 = vmul.f32 1.442695, %v1164_v15  ;;  %v1159_v40 = vsub.f32 0.0, %v7360_v41  ;;  %v7410_v33 = vsel %vm7304_vm4, %v7287_v12, %v2219_v0  ;;  %vm2277_vm5 = vweird.f32 %v7273_v56  ;;  %v4925_v2 = vpop.eup %4924  ;;  %vm7432_vm4 = vmor %vm2261_vm6, %vm2262_vm13 }
 0x357   :  { %vm7394_vm2 = vcmp.eq.f32.partialorder %v11557_v47, 8.507059e+37  ;;  %vm7400_vm3 = vcmp.eq.f32.partialorder %v11560_v27, 8.507059e+37  ;;  %v2114_v47 = vsel %vm7388_vm15, %v7221_v9, %v7354_v43  ;;  %v1344_v27 = vmul.f32 1.442695, %v1165_v55  ;;  %vm7441_vm0 = vmor %vm2276_vm7, %vm2277_vm5 }
 0x358   :  { %v2125_v29 = vadd.f32 %v7253_v18, %v2124_v52  ;;  %v2260_v15 = vadd.f32 %v7264_v7, %v2259_v32  ;;  %vm7419_vm8 = vcmp.eq.f32.partialorder %v2175_v54, 8.507059e+37  ;;  %4928 = vrcp.f32 %v7370_v42  ;;  %v7426_v14 = vpop.eup %4926  ;;  %v7447_v52 = vpop.f32.mrf.mxu0  ;;  %vm7453_vm6 = vmor %vm2126_vm11, %vm2127_vm10 }
 0x359   :  { %v7424_v12 = vadd.f32 1.0, %v4923_v62  ;;  %v2275_v43 = vadd.f32 %v7273_v56, %v2274_v38  ;;  %vm2172_vm9 = vweird.f32 %v7285_v11  ;;  %vm2187_vm15 = vweird.f32 %v7292_v28 }
 0x35a   :  { %v1330_v54 = vmul.f32 1.442695, %v1158_v10  ;;  %v2170_v55 = vadd.f32 %v7285_v11, %v2169_v19  ;;  %v2185_v16 = vadd.f32 %v7292_v28, %v2184_v24  ;;  %4930 = vpow2.f32 %v1342_v59  ;;  %vm7467_vm13 = vmor %vm2171_vm12, %vm2172_vm9 }
 0x35b   :  { %v1332_v0 = vmul.f32 1.442695, %v1159_v40  ;;  %vm2186_vm7 = vweird.f32 %v7199_v37  ;;  %v2190_v50 = vand.u32 2147483647, %v7199_v37  ;;  %v2192_v32 = vand.u32 2147483648, %v7199_v37 }
 0x35c   :  { %4932 = vpow2.f32 %v1344_v27  ;;  %v2129_v59 = vsel %vm7453_vm6, %v7253_v18, %v2125_v29  ;;  %v2317_v40 = vmul.f32 %v7426_v14, %v7328_v39  ;;  %v7474_v10 = vadd.f32 1.0, %v4925_v2  ;;  %vm7484_vm10 = vmor %vm2186_vm7, %vm2187_vm15 }
 0x35d   :  { %4934 = vrcp.f32 %v7424_v12  ;;  %v2264_v37 = vsel %vm7432_vm4, %v7264_v7, %v2260_v15  ;;  %v2279_v18 = vsel %vm7441_vm0, %v7273_v56, %v2275_v43  ;;  %v1168_v8 = vsub.f32 0.0, %v7447_v52 }
 0x35e   :  { %4936 = vpow2.f32 %v1330_v54  ;;  %v7489_v19 = vpop.eup %4928  ;;  %v2174_v2 = vsel %vm7467_vm13, %v7285_v11, %v2170_v55  ;;  %v2178_v7 = vor.u32 1.1754944e-38, %v2177_v45  ;;  %v2189_v56 = vsel %vm7484_vm10, %v7292_v28, %v2185_v16  ;;  %v3675_v54 = vld [vmem:[%s11362_s12 + $0x8] sm:$0xff] }
 0x35f   :  { %4938 = vpow2.f32 %v1332_v0  ;;  %v2119_v24 = vsel %vm7394_vm2, %v7294_v44, %v2114_v47  ;;  %v2134_v27 = vsel %vm7400_vm3, %v7313_v61, %v2129_v59  ;;  %vm2191_vm0 = vcmp.eq.f32.partialorder %v2190_v50, 8.507059e+37  ;;  %v3707_v44 = vld [vmem:[%s11362_s12 + $0x108] sm:$0xff]  ;;  %3752 = vmatpush.msra.mxu2 %v3675_v54  ;;  %v7564_v0 = vpop.f32.mrf.mxu2 }
 0x360   :  { %v2193_v29 = vor.u32 1.1754944e-38, %v2192_v32  ;;  %v4931_v15 = vpop.eup %4930  ;;  %v2269_v11 = vsel %vm7373_vm14, %v7345_v20, %v2264_v37  ;;  %v2284_v28 = vsel %vm7378_vm1, %v7347_v49, %v2279_v18  ;;  %v2318_v45 = vsub.f32 1.0, %v2317_v40  ;;  %v3723_v61 = vld [vmem:[%s11362_s12 + $0x188] sm:$0xff]  ;;  %3978 = vmatpush.msrb.mxu0 %v3707_v44 }
 0x361   :  { %4940 = vrcp.f32 %v7474_v10  ;;  %v2179_v53 = vsel %vm7419_vm8, %v2178_v7, %v2174_v2  ;;  %v2332_v1 = vmul.f32 %v7489_v19, %v7370_v42  ;;  %v1350_v49 = vmul.f32 1.442695, %v1168_v8  ;;  %4091 = vmatpush.msrb.mxu1 %v3723_v61 }
 0x362   :  { %v4933_v60 = vpop.eup %4932  ;;  %v2194_v20 = vsel %vm2191_vm0, %v2193_v29, %v2189_v56  ;;  %v7524_v47 = vmul.f32 %v7277_v63, %v6774_v22  ;;  %v7528_v9 = vmul.f32 %v7281_v21, %v6787_v6  ;;  %v7532_v51 = vmul.f32 %v7410_v33, %v6904_v26  ;;  %v3691_v22 = vld [vmem:[%s11362_s12 + $0x88] sm:$0xff]  ;;  %v7553_v21 = vpop.f32.mrf.mxu1 }
 0x363   :  { %v7520_v34 = vpop.eup %4934  ;;  %v7535_v43 = vmul.f32 %v2119_v24, %v6911_v36  ;;  %v7544_v62 = vmul.f32 %v2134_v27, %v6919_v57  ;;  %v7547_v6 = vmul.f32 %v2269_v11, %v6985_v30  ;;  %v7550_v26 = vmul.f32 %v2284_v28, %v6992_v31  ;;  %3865 = vmatpush.msra.mxu3 %v3691_v22 }
 0x364   :  { %v4937_v63 = vpop.eup %4936  ;;  %v2325_v36 = vand.u32 2147483647, %v7328_v39  ;;  %v7556_v55 = vmul.f32 %v2179_v53, %v7008_v4  ;;  %v7559_v16 = vmul.f32 %v2194_v20, %v7014_v35  ;;  %v2319_v57 = vmul.f32 %v7426_v14, %v2318_v45  ;;  %v7608_v45 = vpop.f32.mrf.mxu3 }
 0x365   :  { %v4939_v33 = vpop.eup %4938  ;;  %v7562_v30 = vadd.f32 1.0, %v4931_v15  ;;  %v2333_v31 = vsub.f32 1.0, %v2332_v1  ;;  %v2227_v38 = vmul.f32 %v7520_v34, %v7424_v12  ;;  %v7568_v50 = vadd.f32 1.0, %v4933_v60  ;;  %v597_v15 = vld [vmem:[%s11361_s2 + $0xf8] sm:$0xff] }
 0x366   :  { %4942 = vpow2.f32 %v1350_v49  ;;  %vm2321_vm11 = vweird.f32 %v7328_v39  ;;  %v2327_v4 = vand.u32 2147483648, %v7328_v39  ;;  %v7574_v35 = vadd.f32 1.0, %v4937_v63  ;;  %997 = vmatmul.f32.gmra.mxu0 %v597_v15  ;;  %1110 = vmatmul.f32.gmra.mxu1 %v597_v15 }
 0x367   :  { %v7570_v32 = vpop.eup %4940  ;;  %v1169_v59 = vsub.f32 0.0, %v7553_v21  ;;  %vm2322_vm12 = vweird.f32 %v7426_v14  ;;  %vm7578_vm14 = vcmp.eq.f32.partialorder %v2325_v36, 8.507059e+37  ;;  %v7582_v40 = vadd.f32 1.0, %v4939_v33  ;;  %771 = vmatmul.f32.gmra.mxu2 %v597_v15  ;;  %884 = vmatmul.f32.gmra.mxu3 %v597_v15 }
 0x368   :  { %v1162_v37 = vsub.f32 0.0, %v7564_v0  ;;  %v2320_v18 = vadd.f32 %v7426_v14, %v2319_v57  ;;  %v2340_v3 = vand.u32 2147483647, %v7370_v42  ;;  %v2342_v8 = vand.u32 2147483648, %v7370_v42  ;;  %vm7595_vm1 = vmor %vm2321_vm11, %vm2322_vm12 }
 0x369   :  { %4944 = vrcp.f32 %v7562_v30  ;;  %v2334_v2 = vmul.f32 %v7489_v19, %v2333_v31  ;;  %v2228_v7 = vsub.f32 1.0, %v2227_v38  ;;  %v2242_v56 = vmul.f32 %v7570_v32, %v7474_v10 }
 0x36a   :  { %4946 = vrcp.f32 %v7568_v50  ;;  %v2328_v27 = vor.u32 1.1754944e-38, %v2327_v4  ;;  %vm2336_vm2 = vweird.f32 %v7370_v42  ;;  %v1352_v29 = vmul.f32 1.442695, %v1169_v59  ;;  %v7642_v4 = vpop.f32.mrf.mxu0 }
 0x36b   :  { %4948 = vrcp.f32 %v7574_v35  ;;  %vm2337_vm3 = vweird.f32 %v7489_v19  ;;  %v2237_v28 = vand.u32 2147483648, %v7424_v12  ;;  %v2252_v39 = vand.u32 2147483648, %v7474_v10 }
 0x36c   :  { %v4943_v11 = vpop.eup %4942  ;;  %4950 = vrcp.f32 %v7582_v40  ;;  %vm7610_vm5 = vcmp.eq.f32.partialorder %v2340_v3, 8.507059e+37  ;;  %v2343_v61 = vor.u32 1.1754944e-38, %v2342_v8  ;;  %v2235_v60 = vand.u32 2147483647, %v7424_v12  ;;  %vm7626_vm8 = vmor %vm2336_vm2, %vm2337_vm3 }
 0x36d   :  { %v1338_v53 = vmul.f32 1.442695, %v1162_v37  ;;  %v2324_v20 = vsel %vm7595_vm1, %v7426_v14, %v2320_v18  ;;  %v2335_v1 = vadd.f32 %v7489_v19, %v2334_v2  ;;  %v2229_v49 = vmul.f32 %v7520_v34, %v2228_v7 }
 0x36e   :  { %v2243_v54 = vsub.f32 1.0, %v2242_v56  ;;  %vm2231_vm4 = vweird.f32 %v7424_v12  ;;  %v7631_v36 = vadd.f32 1.0, %v4943_v11  ;;  %4952 = vpow2.f32 %v1352_v29 }
 0x36f   :  { %v7620_v22 = vpop.eup %4944  ;;  %v1163_v14 = vsub.f32 0.0, %v7608_v45  ;;  %v7636_v57 = vor.u32 1.1754944e-38, %v2237_v28  ;;  %v2250_v31 = vand.u32 2147483647, %v7474_v10  ;;  %v7639_v38 = vor.u32 1.1754944e-38, %v2252_v39  ;;  %v7677_v28 = vpop.f32.mrf.mxu1 }
 0x370   :  { %v7634_v33 = vpop.eup %4946  ;;  %v2387_v42 = vand.u32 2147483648, %v7562_v30  ;;  %v2329_v37 = vsel %vm7578_vm14, %v2328_v27, %v2324_v20  ;;  %vm2232_vm9 = vweird.f32 %v7520_v34  ;;  %vm7649_vm15 = vcmp.eq.f32.partialorder %v2235_v60, 8.507059e+37 }
 0x371   :  { %v7644_v59 = vpop.eup %4948  ;;  %vm2246_vm6 = vweird.f32 %v7474_v10  ;;  %4954 = vpow2.f32 %v1338_v53  ;;  %v2339_v2 = vsel %vm7626_vm8, %v7489_v19, %v2335_v1  ;;  %v2230_v23 = vadd.f32 %v7520_v34, %v2229_v49  ;;  %vm7683_vm10 = vmor %vm2231_vm4, %vm2232_vm9  ;;  %v7696_v49 = vpop.f32.mrf.mxu2 }
 0x372   :  { %v7655_v8 = vpop.eup %4950  ;;  %v2244_v7 = vmul.f32 %v7570_v32, %v2243_v54  ;;  %v2377_v56 = vmul.f32 %v7620_v22, %v7562_v30  ;;  %v2392_v24 = vmul.f32 %v7634_v33, %v7568_v50  ;;  %4956 = vrcp.f32 %v7631_v36 }
 0x373   :  { %v1340_v27 = vmul.f32 1.442695, %v1163_v14  ;;  %v1172_v29 = vsub.f32 0.0, %v7642_v4  ;;  %v7669_v15 = vmul.f32 %v2329_v37, %v7136_v58  ;;  %vm2247_vm7 = vweird.f32 %v7570_v32 }
 0x374   :  { %vm2381_vm13 = vweird.f32 %v7562_v30  ;;  %v7673_v19 = vor.u32 1.1754944e-38, %v2387_v42  ;;  %v2287_v11 = vmul.f32 %v7644_v59, %v7574_v35  ;;  %v4953_v39 = vpop.eup %4952  ;;  %vm7687_vm0 = vcmp.eq.f32.partialorder %v2250_v31, 8.507059e+37  ;;  %v3706_v31 = vld [vmem:[%s11362_s12 + $0x100] sm:$0xff]  ;;  %vm7738_vm14 = vmor %vm2246_vm6, %vm2247_vm7 }
 0x375   :  { %11585 = vst [vmem:[#allocation37_spill] sm:$0xff] %v7669_v15  ;;  %vm2396_vm11 = vweird.f32 %v7568_v50  ;;  %v2400_v53 = vand.u32 2147483647, %v7568_v50  ;;  %v2402_v20 = vand.u32 2147483648, %v7568_v50  ;;  %v2302_v1 = vmul.f32 %v7655_v8, %v7582_v40  ;;  %v3722_v42 = vld [vmem:[%s11362_s12 + $0x180] sm:$0xff]  ;;  %3979 = vmatpush.msrb.mxu0 %v3706_v31 }
 0x376   :  { %v2344_v12 = vsel %vm7610_vm5, %v2343_v61, %v2339_v2  ;;  %v2234_v54 = vsel %vm7683_vm10, %v7520_v34, %v2230_v23  ;;  %v2245_v63 = vadd.f32 %v7570_v32, %v2244_v7  ;;  %v2378_v14 = vsub.f32 1.0, %v2377_v56  ;;  %4092 = vmatpush.msrb.mxu1 %v3722_v42  ;;  %v3674_v7 = vld [vmem:[%s11362_s12] sm:$0xff]  ;;  %3980 = vmatmul.f32.vlgmr.msrb.gmra.mxu0 %v6056_v48 }
 0x377   :  { %v4955_v37 = vpop.eup %4954  ;;  %v2393_v3 = vsub.f32 1.0, %v2392_v24  ;;  %4958 = vpow2.f32 %v1340_v27  ;;  %v1358_v44 = vmul.f32 1.442695, %v1172_v29  ;;  %v1173_v61 = vsub.f32 0.0, %v7677_v28  ;;  %v3690_v56 = vld [vmem:[%s11362_s12 + $0x80] sm:$0xff]  ;;  %4093 = vmatmul.f32.vlgmr.msrb.gmra.mxu1 %v6059_v25  ;;  %3753 = vmatpush.msra.mxu2 %v3674_v7  ;;  %s5269_s12 = smov 96  }
 0x378   :  { %vm2382_vm12 = vweird.f32 %v7620_v22  ;;  %v2288_v34 = vsub.f32 1.0, %v2287_v11  ;;  %v7712_v2 = vadd.f32 1.0, %v4953_v39  ;;  %v1166_v23 = vsub.f32 0.0, %v7696_v49  ;;  %v7723_v24 = vpop.eup %4956  ;;  %3866 = vmatpush.msra.mxu3 %v3690_v56  ;;  %3754 = vmatmul.f32.vlgmr.msra.gmra.mxu2 %v6263_v5  ;;  %v11602_v56 = vld [vmem:[#allocation4_spill] sm:$0xff] }
 0x379   :  { %v7726_v27 = vmul.f32 %v2344_v12, %v7184_v17  ;;  %v7728_v29 = vor.u32 1.1754944e-38, %v2402_v20  ;;  %v2295_v11 = vand.u32 2147483647, %v7574_v35  ;;  %v2303_v39 = vsub.f32 1.0, %v2302_v1  ;;  %v7747_v1 = vpop.f32.mrf.mxu3  ;;  %3867 = vmatmul.f32.vlgmr.msra.gmra.mxu3 %v6269_v46  ;;  %v7755_v12 = vpop.f32.mrf.mxu0  ;;  %vm7787_vm8 = vmor %vm2381_vm13, %vm2382_vm12 }
 0x37a   :  { %v2239_v60 = vsel %vm7649_vm15, %v7636_v57, %v2234_v54  ;;  %v2379_v25 = vmul.f32 %v7620_v22, %v2378_v14  ;;  %vm2291_vm1 = vweird.f32 %v7574_v35  ;;  %v2297_v17 = vand.u32 2147483648, %v7574_v35  ;;  %v11626_v35 = vld [vmem:[#allocation36_spill] sm:$0xff] }
 0x37b   :  { %11590 = vst [vmem:[#allocation38_spill] sm:$0xff] %v7726_v27  ;;  %v7745_v20 = vadd.f32 1.0, %v4955_v37  ;;  %v2249_v10 = vsel %vm7738_vm14, %v7570_v32, %v2245_v63  ;;  %v2394_v57 = vmul.f32 %v7634_v33, %v2393_v3  ;;  %4960 = vpow2.f32 %v1358_v44 }
 0x37c   :  { %v1360_v18 = vmul.f32 1.442695, %v1173_v61  ;;  %v11593_v54 = vand.u32 2147483647, %v7562_v30  ;;  %vm7763_vm3 = vcmp.eq.f32.partialorder %v2400_v53, 8.507059e+37  ;;  %v2289_v46 = vmul.f32 %v7644_v59, %v2288_v34 }
 0x37d   :  { %v2437_v32 = vmul.f32 %v7723_v24, %v7631_v36  ;;  %4962 = vrcp.f32 %v7712_v2  ;;  %v1346_v3 = vmul.f32 1.442695, %v1166_v23  ;;  %v4959_v63 = vpop.eup %4958  ;;  %v7772_v31 = vmul.f32 %v2239_v60, %v7230_v13 }
 0x37e   :  { %vm7759_vm2 = vcmp.eq.f32.partialorder %v11593_v54, 8.507059e+37  ;;  %vm2397_vm5 = vweird.f32 %v7634_v33  ;;  %v2304_v42 = vmul.f32 %v7655_v8, %v2303_v39  ;;  %v1167_v53 = vsub.f32 0.0, %v7747_v1  ;;  %3983 = vmatmul.f32.gmra.mxu0 %v11602_v56  ;;  %v11603_v39 = vld [vmem:[#allocation5_spill] sm:$0xff] }
 0x37f   :  { %v2254_v37 = vsel %vm7687_vm0, %v7639_v38, %v2249_v10  ;;  %v2380_v44 = vadd.f32 %v7620_v22, %v2379_v25  ;;  %4964 = vrcp.f32 %v7745_v20  ;;  %v1176_v61 = vsub.f32 0.0, %v7755_v12  ;;  %vm7796_vm9 = vmor %vm2396_vm11, %vm2397_vm5  ;;  %4096 = vmatmul.f32.gmra.mxu1 %v11603_v39 }
 0x380   :  { %v2395_v34 = vadd.f32 %v7634_v33, %v2394_v57  ;;  %vm2292_vm4 = vweird.f32 %v7644_v59  ;;  %v2312_v38 = vand.u32 2147483648, %v7582_v40  ;;  %4966 = vpow2.f32 %v1360_v18 }
 0x381   :  { %v2290_v23 = vadd.f32 %v7644_v59, %v2289_v46  ;;  %v2438_v30 = vsub.f32 1.0, %v2437_v32  ;;  %v7801_v7 = vadd.f32 1.0, %v4959_v63  ;;  %4968 = vpow2.f32 %v1346_v3  ;;  %v4961_v60 = vpop.eup %4960  ;;  %v11606_v46 = vld [vmem:[#allocation8_spill] sm:$0xff]  ;;  %vm7826_vm13 = vmor %vm2291_vm1, %vm2292_vm4  ;;  %v7832_v63 = vpop.f32.mrf.mxu1  ;;  %v11623_v3 = vld [vmem:[#allocation13_spill] sm:$0xff] }
 0x382   :  { %vm7805_vm15 = vcmp.eq.f32.partialorder %v2295_v11, 8.507059e+37  ;;  %v2305_v50 = vadd.f32 %v7655_v8, %v2304_v42  ;;  %vm2307_vm6 = vweird.f32 %v7655_v8  ;;  %v1348_v25 = vmul.f32 1.442695, %v1167_v53  ;;  %3757 = vmatmul.f32.gmra.mxu2 %v11606_v46  ;;  %v11607_v11 = vld [vmem:[#allocation9_spill] sm:$0xff] }
 0x383   :  { %v7811_v10 = vpop.eup %4962  ;;  %v2384_v57 = vsel %vm7787_vm8, %v7620_v22, %v2380_v44  ;;  %v2298_v18 = vor.u32 1.1754944e-38, %v2297_v17  ;;  %vm2306_vm7 = vweird.f32 %v7582_v40  ;;  %v1366_v54 = vmul.f32 1.442695, %v1176_v61  ;;  %3870 = vmatmul.f32.gmra.mxu3 %v11607_v11 }
 0x384   :  { %v2399_v32 = vsel %vm7796_vm9, %v7634_v33, %v2395_v34  ;;  %v2310_v22 = vand.u32 2147483647, %v7582_v40  ;;  %v2313_v17 = vor.u32 1.1754944e-38, %v2312_v38  ;;  %vm2441_vm10 = vweird.f32 %v7631_v36  ;;  %vm7841_vm0 = vmor %vm2306_vm7, %vm2307_vm6 }
 0x385   :  { %v7834_v42 = vpop.eup %4964  ;;  %v2294_v33 = vsel %vm7826_vm13, %v7644_v59, %v2290_v23  ;;  %v2439_v53 = vmul.f32 %v7723_v24, %v2438_v30  ;;  %4970 = vrcp.f32 %v7801_v7  ;;  %v7847_v40 = vadd.f32 1.0, %v4961_v60 }
 0x386   :  { %v4967_v44 = vpop.eup %4966  ;;  %v2309_v61 = vsel %vm7841_vm0, %v7655_v8, %v2305_v50  ;;  %v2445_v13 = vand.u32 2147483647, %v7631_v36  ;;  %v2452_v59 = vmul.f32 %v7811_v10, %v7712_v2  ;;  %4972 = vpow2.f32 %v1348_v25  ;;  %v11612_v50 = vld [vmem:[#allocation6_spill] sm:$0xff]  ;;  %v11613_v25 = vld [vmem:[#allocation7_spill] sm:$0xff] }
 0x387   :  { %v4969_v34 = vpop.eup %4968  ;;  %vm2442_vm11 = vweird.f32 %v7723_v24  ;;  %v2447_v38 = vand.u32 2147483648, %v7631_v36  ;;  %4974 = vpow2.f32 %v1366_v54  ;;  %v1177_v58 = vsub.f32 0.0, %v7832_v63  ;;  %3986 = vmatmul.f32.gmra.mxu0 %v11612_v50  ;;  %4099 = vmatmul.f32.gmra.mxu1 %v11613_v25  ;;  %v11618_v54 = vld [vmem:[#allocation34_spill] sm:$0xff] }
 0x388   :  { %v2389_v23 = vsel %vm7759_vm2, %v7673_v19, %v2384_v57  ;;  %v2404_v8 = vsel %vm7763_vm3, %v7728_v29, %v2399_v32  ;;  %v2299_v30 = vsel %vm7805_vm15, %v2298_v18, %v2294_v33  ;;  %vm2311_vm12 = vcmp.eq.f32.partialorder %v2310_v22, 8.507059e+37  ;;  %v11614_v19 = vld [vmem:[#allocation31_spill] sm:$0xff]  ;;  %vm7879_vm14 = vmor %vm2441_vm10, %vm2442_vm11  ;;  %v11622_v32 = vld [vmem:[#allocation12_spill] sm:$0xff] }
 0x389   :  { %v2314_v56 = vsel %vm2311_vm12, %v2313_v17, %v2309_v61  ;;  %v2440_v39 = vadd.f32 %v7723_v24, %v2439_v53  ;;  %4976 = vrcp.f32 %v7847_v40  ;;  %v7868_v60 = vadd.f32 1.0, %v4967_v44  ;;  %v11624_v17 = vld [vmem:[#allocation35_spill] sm:$0xff] }
 0x38a   :  { %v7873_v14 = vmul.f32 %v2254_v37, %v11614_v19  ;;  %v2453_v5 = vsub.f32 1.0, %v2452_v59  ;;  %v2347_v48 = vmul.f32 %v7834_v42, %v7745_v20  ;;  %v7885_v57 = vadd.f32 1.0, %v4969_v34  ;;  %3760 = vmatmul.f32.gmra.mxu2 %v11622_v32  ;;  %v11634_v32 = vld [vmem:[#allocation11_spill] sm:$0xff] }
 0x38b   :  { %v7887_v18 = vpop.eup %4970  ;;  %v7890_v46 = vmul.f32 %v2389_v23, %v11618_v54  ;;  %vm7892_vm1 = vcmp.eq.f32.partialorder %v2445_v13, 8.507059e+37  ;;  %v2448_v36 = vor.u32 1.1754944e-38, %v2447_v38  ;;  %v1368_v11 = vmul.f32 1.442695, %v1177_v58  ;;  %3873 = vmatmul.f32.gmra.mxu3 %v11623_v3  ;;  %v7908_v13 = vpop.f32.mrf.mxu2 }
 0x38c   :  { %11615 = vst [vmem:[#allocation4_spill] sm:$0xff] %v7873_v14  ;;  %v4973_v22 = vpop.eup %4972  ;;  %v7899_v33 = vmul.f32 %v2404_v8, %v11624_v17  ;;  %v7902_v53 = vmul.f32 %v2299_v30, %v11626_v35  ;;  %v7905_v44 = vmul.f32 %v2314_v56, %v7360_v41  ;;  %v2460_v61 = vand.u32 2147483647, %v7712_v2  ;;  %v7916_v23 = vpop.f32.mrf.mxu3  ;;  %v11653_v14 = vld [vmem:[#allocation20_spill] sm:$0xff] }
 0x38d   :  { %11619 = vst [vmem:[#allocation5_spill] sm:$0xff] %v7890_v46  ;;  %v4975_v59 = vpop.eup %4974  ;;  %v2444_v34 = vsel %vm7879_vm14, %v7723_v24, %v2440_v39  ;;  %v2462_v38 = vand.u32 2147483648, %v7712_v2  ;;  %v2357_v58 = vand.u32 2147483648, %v7745_v20  ;;  %4978 = vrcp.f32 %v7868_v60 }
 0x38e   :  { %11625 = vst [vmem:[#allocation8_spill] sm:$0xff] %v7899_v33  ;;  %v2454_v41 = vmul.f32 %v7811_v10, %v2453_v5  ;;  %v2348_v8 = vsub.f32 1.0, %v2347_v48  ;;  %v2362_v30 = vmul.f32 %v7887_v18, %v7801_v7  ;;  %4980 = vrcp.f32 %v7885_v57  ;;  %v11654_v5 = vld [vmem:[#allocation21_spill] sm:$0xff] }
 0x38f   :  { %11627 = vst [vmem:[#allocation9_spill] sm:$0xff] %v7902_v53  ;;  %v7922_v56 = vpop.eup %4976  ;;  %vm2456_vm2 = vweird.f32 %v7712_v2  ;;  %v7925_v24 = vadd.f32 1.0, %v4973_v22  ;;  %4982 = vpow2.f32 %v1368_v11  ;;  %v1170_v39 = vsub.f32 0.0, %v7908_v13  ;;  %v11633_v11 = vld [vmem:[#allocation10_spill] sm:$0xff]  ;;  %4102 = vmatmul.f32.gmra.mxu1 %v11634_v32 }
 0x390   :  { %11628 = vst [vmem:[#allocation6_spill] sm:$0xff] %v7905_v44  ;;  %vm2457_vm3 = vweird.f32 %v7811_v10  ;;  %vm2351_vm5 = vweird.f32 %v7745_v20  ;;  %v2355_v50 = vand.u32 2147483647, %v7745_v20  ;;  %v2372_v25 = vand.u32 2147483648, %v7801_v7  ;;  %3989 = vmatmul.f32.gmra.mxu0 %v11633_v11  ;;  %v7972_v11 = vpop.f32.mrf.mxu0  ;;  %v11650_v20 = vld [vmem:[#allocation15_spill] sm:$0xff] }
 0x391   :  { %11629 = vst [vmem:[#allocation7_spill] sm:$0xff] %v7908_v13  ;;  %v7932_v19 = vadd.f32 1.0, %v4975_v59  ;;  %v2449_v29 = vsel %vm7892_vm1, %v2448_v36, %v2444_v34  ;;  %vm7936_vm8 = vcmp.eq.f32.partialorder %v2460_v61, 8.507059e+37  ;;  %v2463_v48 = vor.u32 1.1754944e-38, %v2462_v38  ;;  %vm7954_vm4 = vmor %vm2456_vm2, %vm2457_vm3  ;;  %v11637_v38 = vld [vmem:[#allocation16_spill] sm:$0xff] }
 0x392   :  { %11630 = vst [vmem:[#allocation31_spill] sm:$0xff] %v7916_v23  ;;  %v7940_v54 = vor.u32 1.1754944e-38, %v2357_v58  ;;  %v2455_v3 = vadd.f32 %v7811_v10, %v2454_v41  ;;  %v2349_v22 = vmul.f32 %v7834_v42, %v2348_v8  ;;  %v2363_v17 = vsub.f32 1.0, %v2362_v30  ;;  %3763 = vmatmul.f32.gmra.mxu2 %v11637_v38  ;;  %v11638_v58 = vld [vmem:[#allocation17_spill] sm:$0xff] }
 0x393   :  { %v2497_v37 = vmul.f32 %v7922_v56, %v7847_v40  ;;  %v7948_v36 = vpop.eup %4978  ;;  %v2370_v61 = vand.u32 2147483647, %v7801_v7  ;;  %4984 = vrcp.f32 %v7925_v24  ;;  %v1354_v59 = vmul.f32 1.442695, %v1170_v39  ;;  %3876 = vmatmul.f32.gmra.mxu3 %v11638_v58  ;;  %11640 = vst [vmem:[#allocation12_spill] sm:$0xff] %v7972_v11 }
 0x394   :  { %v1171_v34 = vsub.f32 0.0, %v7916_v23  ;;  %v7963_v41 = vpop.eup %4980  ;;  %v7966_v8 = vmul.f32 %v2449_v29, %v7447_v52  ;;  %v7968_v2 = vor.u32 1.1754944e-38, %v2372_v25  ;;  %v2507_v30 = vand.u32 2147483648, %v7847_v40  ;;  %v7983_v25 = vpop.f32.mrf.mxu1 }
 0x395   :  { %4986 = vrcp.f32 %v7932_v19  ;;  %v4983_v39 = vpop.eup %4982  ;;  %vm2352_vm9 = vweird.f32 %v7834_v42  ;;  %vm7975_vm15 = vcmp.eq.f32.partialorder %v2355_v50, 8.507059e+37  ;;  %vm2366_vm6 = vweird.f32 %v7801_v7  ;;  %11643 = vst [vmem:[#allocation13_spill] sm:$0xff] %v7983_v25  ;;  %v7995_v53 = vpop.f32.mrf.mxu3 }
 0x396   :  { %11639 = vst [vmem:[#allocation34_spill] sm:$0xff] %v7966_v8  ;;  %vm2367_vm7 = vweird.f32 %v7887_v18  ;;  %vm2501_vm13 = vweird.f32 %v7847_v40  ;;  %v2505_v52 = vand.u32 2147483647, %v7847_v40  ;;  %v2459_v29 = vsel %vm7954_vm4, %v7811_v10, %v2455_v3  ;;  %v7990_v8 = vpop.f32.mrf.mxu2  ;;  %vm8010_vm10 = vmor %vm2351_vm5, %vm2352_vm9 }
 0x397   :  { %v2350_v38 = vadd.f32 %v7834_v42, %v2349_v22  ;;  %v2364_v50 = vmul.f32 %v7887_v18, %v2363_v17  ;;  %v2498_v58 = vsub.f32 1.0, %v2497_v37  ;;  %11644 = vst [vmem:[#allocation35_spill] sm:$0xff] %v7990_v8  ;;  %v2512_v33 = vmul.f32 %v7948_v36, %v7868_v60  ;;  %4105 = vmatmul.f32.gmra.mxu1 %v11650_v20  ;;  %vm8058_vm1 = vmor %vm2366_vm6, %vm2367_vm7 }
 0x398   :  { %4988 = vpow2.f32 %v1354_v59  ;;  %v1356_v46 = vmul.f32 1.442695, %v1171_v34  ;;  %v1180_v44 = vsub.f32 0.0, %v7972_v11  ;;  %v7997_v27 = vor.u32 1.1754944e-38, %v2507_v30 }
 0x399   :  { %v2407_v10 = vmul.f32 %v7963_v41, %v7885_v57  ;;  %v8001_v3 = vadd.f32 1.0, %v4983_v39  ;;  %v1181_v22 = vsub.f32 0.0, %v7983_v25  ;;  %v8004_v17 = vpop.eup %4984  ;;  %vm8014_vm0 = vcmp.eq.f32.partialorder %v2370_v61, 8.507059e+37  ;;  %v11649_v39 = vld [vmem:[#allocation14_spill] sm:$0xff] }
 0x39a   :  { %vm2502_vm11 = vweird.f32 %v7922_v56  ;;  %vm2516_vm12 = vweird.f32 %v7868_v60  ;;  %v2520_v59 = vand.u32 2147483647, %v7868_v60  ;;  %v2522_v34 = vand.u32 2147483648, %v7868_v60  ;;  %3992 = vmatmul.f32.gmra.mxu0 %v11649_v39  ;;  %3766 = vmatmul.f32.gmra.mxu2 %v11653_v14 }
 0x39b   :  { %v1174_v30 = vsub.f32 0.0, %v7990_v8  ;;  %v8025_v15 = vpop.eup %4986  ;;  %v2464_v61 = vsel %vm7936_vm8, %v2463_v48, %v2459_v29  ;;  %v2354_v25 = vsel %vm8010_vm10, %v7834_v42, %v2350_v38  ;;  %v2365_v11 = vadd.f32 %v7887_v18, %v2364_v50  ;;  %3879 = vmatmul.f32.gmra.mxu3 %v11654_v5  ;;  %vm8073_vm2 = vmor %vm2501_vm13, %vm2502_vm11 }
 0x39c   :  { %v1175_v23 = vsub.f32 0.0, %v7995_v53  ;;  %v2499_v13 = vmul.f32 %v7922_v56, %v2498_v58  ;;  %vm8035_vm14 = vcmp.eq.f32.partialorder %v2505_v52, 8.507059e+37  ;;  %v2513_v39 = vsub.f32 1.0, %v2512_v33 }
 0x39d   :  { %4990 = vpow2.f32 %v1356_v46  ;;  %v1374_v20 = vmul.f32 1.442695, %v1180_v44  ;;  %v2408_v48 = vsub.f32 1.0, %v2407_v10  ;;  %v2422_v42 = vmul.f32 %v8004_v17, %v7925_v24 }
 0x39e   :  { %4992 = vrcp.f32 %v8001_v3  ;;  %v1376_v29 = vmul.f32 1.442695, %v1181_v22  ;;  %v4989_v38 = vpop.eup %4988  ;;  %v8045_v52 = vmul.f32 %v2464_v61, %v7553_v21  ;;  %v8047_v50 = vor.u32 1.1754944e-38, %v2522_v34 }
 0x39f   :  { %v2557_v46 = vmul.f32 %v8025_v15, %v7932_v19  ;;  %v1362_v33 = vmul.f32 1.442695, %v1174_v30  ;;  %v2359_v14 = vsel %vm7975_vm15, %v7940_v54, %v2354_v25  ;;  %v2415_v21 = vand.u32 2147483647, %v7885_v57  ;;  %v11662_v30 = vld [vmem:[#allocation19_spill] sm:$0xff] }
 0x3a0   :  { %v2417_v58 = vand.u32 2147483648, %v7885_v57  ;;  %v1364_v10 = vmul.f32 1.442695, %v1175_v23  ;;  %v2369_v22 = vsel %vm8058_vm1, %v7887_v18, %v2365_v11  ;;  %v2500_v32 = vadd.f32 %v7922_v56, %v2499_v13  ;;  %v8084_v13 = vpop.f32.mrf.mxu0  ;;  %4108 = vmatmul.f32.gmra.mxu1 %v11662_v30  ;;  %v11671_v30 = vld [vmem:[#allocation22_spill] sm:$0xff] }
 0x3a1   :  { %v2514_v54 = vmul.f32 %v7948_v36, %v2513_v39  ;;  %4994 = vpow2.f32 %v1374_v20  ;;  %vm8077_vm3 = vcmp.eq.f32.partialorder %v2520_v59, 8.507059e+37  ;;  %v2409_v23 = vmul.f32 %v7963_v41, %v2408_v48  ;;  %v11661_v59 = vld [vmem:[#allocation18_spill] sm:$0xff] }
 0x3a2   :  { %v2423_v18 = vsub.f32 1.0, %v2422_v42  ;;  %v8082_v11 = vadd.f32 1.0, %v4989_v38  ;;  %4996 = vpow2.f32 %v1376_v29  ;;  %v8087_v34 = vmul.f32 %v2359_v14, %v7564_v0  ;;  %3995 = vmatmul.f32.gmra.mxu0 %v11661_v59  ;;  %v11666_v42 = vld [vmem:[#allocation25_spill] sm:$0xff] }
 0x3a3   :  { %v4991_v37 = vpop.eup %4990  ;;  %vm2517_vm5 = vweird.f32 %v7948_v36  ;;  %v2558_v40 = vsub.f32 1.0, %v2557_v46  ;;  %4998 = vpow2.f32 %v1362_v33  ;;  %v8097_v39 = vsel %vm8014_vm0, %v7968_v2, %v2369_v22  ;;  %v11665_v2 = vld [vmem:[#allocation24_spill] sm:$0xff]  ;;  %3882 = vmatmul.f32.gmra.mxu3 %v11666_v42 }
 0x3a4   :  { %v8092_v61 = vpop.eup %4992  ;;  %vm2411_vm8 = vweird.f32 %v7885_v57  ;;  %v2418_v20 = vor.u32 1.1754944e-38, %v2417_v58  ;;  %5000 = vpow2.f32 %v1364_v10  ;;  %v2504_v0 = vsel %vm8073_vm2, %v7922_v56, %v2500_v32  ;;  %3769 = vmatmul.f32.gmra.mxu2 %v11665_v2  ;;  %vm8116_vm15 = vmor %vm2516_vm12, %vm2517_vm5 }
 0x3a5   :  { %v2515_v5 = vadd.f32 %v7948_v36, %v2514_v54  ;;  %vm8104_vm4 = vcmp.eq.f32.partialorder %v2415_v21, 8.507059e+37  ;;  %vm2426_vm9 = vweird.f32 %v7925_v24  ;;  %v1184_v35 = vsub.f32 0.0, %v8084_v13 }
 0x3a6   :  { %v2410_v29 = vadd.f32 %v7963_v41, %v2409_v23  ;;  %vm2412_vm6 = vweird.f32 %v7963_v41  ;;  %v2424_v38 = vmul.f32 %v8004_v17, %v2423_v18  ;;  %5002 = vrcp.f32 %v8082_v11 }
 0x3a7   :  { %v4995_v46 = vpop.eup %4994  ;;  %v2430_v33 = vand.u32 2147483647, %v7925_v24  ;;  %v2559_v14 = vmul.f32 %v8025_v15, %v2558_v40  ;;  %v2572_v60 = vmul.f32 %v8092_v61, %v8001_v3  ;;  %v8128_v44 = vadd.f32 1.0, %v4991_v37  ;;  %vm8143_vm13 = vmor %vm2411_vm8, %vm2412_vm6 }
 0x3a8   :  { %v4997_v21 = vpop.eup %4996  ;;  %v2509_v58 = vsel %vm8035_vm14, %v7997_v27, %v2504_v0  ;;  %v2432_v10 = vand.u32 2147483648, %v7925_v24  ;;  %vm2561_vm7 = vweird.f32 %v7932_v19  ;;  %v2565_v22 = vand.u32 2147483647, %v7932_v19  ;;  %v11672_v0 = vld [vmem:[#allocation23_spill] sm:$0xff] }
 0x3a9   :  { %v4999_v32 = vpop.eup %4998  ;;  %v2519_v54 = vsel %vm8116_vm15, %v7948_v36, %v2515_v5  ;;  %vm2562_vm10 = vweird.f32 %v8025_v15  ;;  %v2567_v27 = vand.u32 2147483648, %v7932_v19  ;;  %v1382_v8 = vmul.f32 1.442695, %v1184_v35  ;;  %4111 = vmatmul.f32.gmra.mxu1 %v11672_v0  ;;  %v11690_v19 = vld [vmem:[#allocation33_spill] sm:$0xff] }
 0x3aa   :  { %v5001_v23 = vpop.eup %5000  ;;  %v2414_v18 = vsel %vm8143_vm13, %v7963_v41, %v2410_v29  ;;  %v2425_v36 = vadd.f32 %v8004_v17, %v2424_v38  ;;  %vm2427_vm0 = vweird.f32 %v8004_v17  ;;  %v8154_v37 = vadd.f32 1.0, %v4995_v46  ;;  %3998 = vmatmul.f32.gmra.mxu0 %v11671_v30  ;;  %vm8172_vm12 = vmor %vm2561_vm7, %vm2562_vm10  ;;  %v8261_v41 = vpop.f32.mrf.mxu2 }
 0x3ab   :  { %v2560_v57 = vadd.f32 %v8025_v15, %v2559_v14  ;;  %v2573_v40 = vsub.f32 1.0, %v2572_v60  ;;  %5004 = vrcp.f32 %v8128_v44  ;;  %v8158_v59 = vadd.f32 1.0, %v4997_v21  ;;  %vm8189_vm1 = vmor %vm2426_vm9, %vm2427_vm0  ;;  %v11681_v14 = vld [vmem:[#allocation28_spill] sm:$0xff]  ;;  %v11682_v60 = vld [vmem:[#allocation29_spill] sm:$0xff] }
 0x3ac   :  { %v8162_v5 = vpop.eup %5002  ;;  %vm8164_vm11 = vcmp.eq.f32.partialorder %v2430_v33, 8.507059e+37  ;;  %v2433_v35 = vor.u32 1.1754944e-38, %v2432_v10  ;;  %vm8176_vm14 = vcmp.eq.f32.partialorder %v2565_v22, 8.507059e+37  ;;  %v8180_v56 = vadd.f32 1.0, %v4999_v32  ;;  %v8195_v33 = vpop.f32.mrf.mxu1  ;;  %3772 = vmatmul.f32.gmra.mxu2 %v11681_v14  ;;  %3885 = vmatmul.f32.gmra.mxu3 %v11682_v60 }
 0x3ad   :  { %v2524_v29 = vsel %vm8077_vm3, %v8047_v50, %v2519_v54  ;;  %v2568_v38 = vor.u32 1.1754944e-38, %v2567_v27  ;;  %v8193_v46 = vadd.f32 1.0, %v5001_v23  ;;  %5006 = vpow2.f32 %v1382_v8 }
 0x3ae   :  { %v2419_v50 = vsel %vm8104_vm4, %v2418_v20, %v2414_v18  ;;  %v2429_v24 = vsel %vm8189_vm1, %v8004_v17, %v2425_v36  ;;  %v2580_v25 = vand.u32 2147483647, %v8001_v3  ;;  %5008 = vrcp.f32 %v8154_v37 }
 0x3af   :  { %v2564_v21 = vsel %vm8172_vm12, %v8025_v15, %v2560_v57  ;;  %v2574_v10 = vmul.f32 %v8092_v61, %v2573_v40  ;;  %v2467_v22 = vmul.f32 %v8162_v5, %v8082_v11  ;;  %5010 = vrcp.f32 %v8158_v59 }
 0x3b0   :  { %vm2576_vm2 = vweird.f32 %v8001_v3  ;;  %v2582_v20 = vand.u32 2147483648, %v8001_v3  ;;  %5012 = vrcp.f32 %v8180_v56  ;;  %v1185_v17 = vsub.f32 0.0, %v8195_v33 }
 0x3b1   :  { %v8217_v48 = vpop.eup %5004  ;;  %v2434_v15 = vsel %vm8164_vm11, %v2433_v35, %v2429_v24  ;;  %vm2577_vm3 = vweird.f32 %v8092_v61  ;;  %v2477_v32 = vand.u32 2147483648, %v8082_v11  ;;  %5014 = vrcp.f32 %v8193_v46  ;;  %v8284_v24 = vpop.f32.mrf.mxu0 }
 0x3b2   :  { %v8226_v54 = vmul.f32 %v8097_v39, %v7608_v45  ;;  %v8229_v7 = vmul.f32 %v2509_v58, %v7642_v4  ;;  %v8232_v27 = vmul.f32 %v2524_v29, %v7677_v28  ;;  %v2569_v8 = vsel %vm8176_vm14, %v2568_v38, %v2564_v21  ;;  %v11685_v39 = vld [vmem:[#allocation26_spill] sm:$0xff]  ;;  %v11686_v4 = vld [vmem:[#allocation27_spill] sm:$0xff]  ;;  %vm8255_vm8 = vmor %vm2576_vm2, %vm2577_vm3  ;;  %v8272_v29 = vpop.f32.mrf.mxu3 }
 0x3b3   :  { %v5007_v23 = vpop.eup %5006  ;;  %v8237_v18 = vmul.f32 %v2419_v50, %v7696_v49  ;;  %v2575_v36 = vadd.f32 %v8092_v61, %v2574_v10  ;;  %vm8240_vm5 = vcmp.eq.f32.partialorder %v2580_v25, 8.507059e+37  ;;  %v2468_v45 = vsub.f32 1.0, %v2467_v22  ;;  %4001 = vmatmul.f32.gmra.mxu0 %v11685_v39  ;;  %4114 = vmatmul.f32.gmra.mxu1 %v11686_v4 }
 0x3b4   :  { %v8246_v28 = vpop.eup %5008  ;;  %v8249_v58 = vmul.f32 %v2434_v15, %v7747_v1  ;;  %v2583_v40 = vor.u32 1.1754944e-38, %v2582_v20  ;;  %v2482_v30 = vmul.f32 %v8217_v48, %v8128_v44  ;;  %v1384_v0 = vmul.f32 1.442695, %v1185_v17  ;;  %3775 = vmatmul.f32.gmra.mxu2 %v11690_v19  ;;  %3888 = vmatmul.f32.gmra.mxu3 %v7524_v47  ;;  %v11694_v19 = vld [vmem:[#allocation32_spill] sm:$0xff] }
 0x3b5   :  { %v8263_v35 = vpop.eup %5010  ;;  %v8266_v1 = vmul.f32 %v2569_v8, %v7755_v12  ;;  %v2475_v2 = vand.u32 2147483647, %v8082_v11  ;;  %v8269_v42 = vor.u32 1.1754944e-38, %v2477_v32  ;;  %v2490_v3 = vand.u32 2147483647, %v8128_v44 }
 0x3b6   :  { %v8276_v38 = vpop.eup %5012  ;;  %vm2471_vm4 = vweird.f32 %v8082_v11  ;;  %v2492_v14 = vand.u32 2147483648, %v8128_v44  ;;  %v2625_v12 = vand.u32 2147483647, %v8154_v37  ;;  %v2627_v60 = vand.u32 2147483648, %v8154_v37 }
 0x3b7   :  { %11689 = vst [vmem:[#allocation36_spill] sm:$0xff] %v8266_v1  ;;  %v8282_v50 = vadd.f32 1.0, %v5007_v23  ;;  %v8286_v25 = vpop.eup %5014  ;;  %v2579_v47 = vsel %vm8255_vm8, %v8092_v61, %v2575_v36  ;;  %v2469_v21 = vmul.f32 %v8162_v5, %v2468_v45  ;;  %5016 = vpow2.f32 %v1384_v0  ;;  %v8318_v0 = vpop.f32.mrf.mxu1 }
 0x3b8   :  { %v1178_v10 = vsub.f32 0.0, %v8261_v41  ;;  %v2483_v22 = vsub.f32 1.0, %v2482_v30  ;;  %v2617_v20 = vmul.f32 %v8246_v28, %v8154_v37  ;;  %v2632_v17 = vmul.f32 %v8263_v35, %v8158_v59 }
 0x3b9   :  { %v1179_v15 = vsub.f32 0.0, %v8272_v29  ;;  %v2642_v32 = vand.u32 2147483648, %v8158_v59  ;;  %v2527_v8 = vmul.f32 %v8276_v38, %v8180_v56  ;;  %v1188_v23 = vsub.f32 0.0, %v8284_v24 }
 0x3ba   :  { %v1370_v61 = vmul.f32 1.442695, %v1178_v10  ;;  %vm8302_vm9 = vcmp.eq.f32.partialorder %v2475_v2, 8.507059e+37  ;;  %vm2486_vm15 = vweird.f32 %v8128_v44  ;;  %v8307_v45 = vor.u32 1.1754944e-38, %v2492_v14  ;;  %v11693_v2 = vld [vmem:[#allocation30_spill] sm:$0xff] }
 0x3bb   :  { %v2542_v39 = vmul.f32 %v8286_v25, %v8193_v46  ;;  %5018 = vrcp.f32 %v8282_v50  ;;  %v1372_v4 = vmul.f32 1.442695, %v1179_v15  ;;  %v2584_v49 = vsel %vm8240_vm5, %v2583_v40, %v2579_v47  ;;  %4004 = vmatmul.f32.gmra.mxu0 %v11693_v2  ;;  %4117 = vmatmul.f32.gmra.mxu1 %v11694_v19 }
 0x3bc   :  { %vm2472_vm6 = vweird.f32 %v8162_v5  ;;  %vm2621_vm7 = vweird.f32 %v8154_v37  ;;  %v8316_v30 = vor.u32 1.1754944e-38, %v2627_v60  ;;  %5020 = vpow2.f32 %v1370_v61  ;;  %3778 = vmatmul.f32.gmra.mxu2 %v7535_v43  ;;  %3891 = vmatmul.f32.gmra.mxu3 %v7544_v62 }
 0x3bd   :  { %v2470_v14 = vadd.f32 %v8162_v5, %v2469_v21  ;;  %v2484_v10 = vmul.f32 %v8217_v48, %v2483_v22  ;;  %v2618_v15 = vsub.f32 1.0, %v2617_v20  ;;  %v2633_v57 = vsub.f32 1.0, %v2632_v17  ;;  %v5017_v40 = vpop.eup %5016  ;;  %v8333_v22 = vpop.f32.mrf.mxu2  ;;  %vm8342_vm10 = vmor %vm2471_vm4, %vm2472_vm6 }
 0x3be   :  { %vm2636_vm13 = vweird.f32 %v8158_v59  ;;  %v2640_v47 = vand.u32 2147483647, %v8158_v59  ;;  %v8326_v60 = vor.u32 1.1754944e-38, %v2642_v32  ;;  %v2528_v61 = vsub.f32 1.0, %v2527_v8 }
 0x3bf   :  { %v1390_v1 = vmul.f32 1.442695, %v1188_v23  ;;  %v2543_v2 = vsub.f32 1.0, %v2542_v39  ;;  %v8330_v19 = vadd.f32 1.0, %v5017_v40  ;;  %5022 = vpow2.f32 %v1372_v4 }
 0x3c0   :  { %v1189_v21 = vsub.f32 0.0, %v8318_v0  ;;  %v8336_v20 = vmul.f32 %v2584_v49, %v7832_v63  ;;  %vm2487_vm0 = vweird.f32 %v8217_v48  ;;  %vm8347_vm11 = vcmp.eq.f32.partialorder %v2490_v3, 8.507059e+37  ;;  %v8361_v3 = vpop.f32.mrf.mxu3 }
 0x3c1   :  { %vm2622_vm12 = vweird.f32 %v8246_v28  ;;  %vm2637_vm14 = vweird.f32 %v8263_v35  ;;  %v8353_v62 = vpop.eup %5018  ;;  %v2474_v63 = vsel %vm8342_vm10, %v8162_v5, %v2470_v14  ;;  %v2485_v11 = vadd.f32 %v8217_v48, %v2484_v10  ;;  %vm8382_vm3 = vmor %vm2486_vm15, %vm2487_vm0 }
 0x3c2   :  { %v2619_v32 = vmul.f32 %v8246_v28, %v2618_v15  ;;  %v2634_v8 = vmul.f32 %v8263_v35, %v2633_v57  ;;  %v5021_v23 = vpop.eup %5020  ;;  %vm8363_vm1 = vcmp.eq.f32.partialorder %v2625_v12, 8.507059e+37  ;;  %vm2531_vm2 = vweird.f32 %v8180_v56  ;;  %vm8425_vm15 = vmor %vm2636_vm13, %vm2637_vm14 }
 0x3c3   :  { %v2535_v4 = vand.u32 2147483647, %v8180_v56  ;;  %5024 = vpow2.f32 %v1390_v1  ;;  %v1182_v5 = vsub.f32 0.0, %v8333_v22  ;;  %v2529_v49 = vmul.f32 %v8276_v38, %v2528_v61  ;;  %4007 = vmatmul.f32.gmra.mxu0 %v7528_v9  ;;  %4120 = vmatmul.f32.gmra.mxu1 %v7532_v51 }
 0x3c4   :  { %v2544_v14 = vmul.f32 %v8286_v25, %v2543_v2  ;;  %5026 = vrcp.f32 %v8330_v19  ;;  %v1392_v10 = vmul.f32 1.442695, %v1189_v21  ;;  %v8376_v12 = vsel %vm8302_vm9, %v8269_v42, %v2474_v63  ;;  %v8395_v42 = vpop.f32.mrf.mxu0  ;;  %3781 = vmatmul.f32.gmra.mxu2 %v7556_v55  ;;  %3894 = vmatmul.f32.gmra.mxu3 %v7559_v16  ;;  %vm8414_vm9 = vmor %vm2621_vm7, %vm2622_vm12 }
 0x3c5   :  { %vm8386_vm5 = vcmp.eq.f32.partialorder %v2640_v47, 8.507059e+37  ;;  %v2537_v57 = vand.u32 2147483648, %v8180_v56  ;;  %v2677_v40 = vmul.f32 %v8353_v62, %v8282_v50  ;;  %v8393_v36 = vadd.f32 1.0, %v5021_v23  ;;  %v5023_v44 = vpop.eup %5022  ;;  %v8466_v1 = vpop.f32.mrf.mxu2  ;;  %v11730_v56 = vld [vmem:[#allocation35_spill] sm:$0xff] }
 0x3c6   :  { %v2489_v47 = vsel %vm8382_vm3, %v8217_v48, %v2485_v11  ;;  %v2620_v61 = vadd.f32 %v8246_v28, %v2619_v32  ;;  %v2635_v2 = vadd.f32 %v8263_v35, %v2634_v8  ;;  %v2550_v21 = vand.u32 2147483647, %v8193_v46  ;;  %11717 = vst [vmem:[#allocation10_spill] sm:$0xff] %v8466_v1 }
 0x3c7   :  { %vm2532_vm8 = vweird.f32 %v8276_v38  ;;  %vm2547_vm4 = vweird.f32 %v8286_v25  ;;  %v1378_v17 = vmul.f32 1.442695, %v1182_v5  ;;  %v1183_v9 = vsub.f32 0.0, %v8361_v3 }
 0x3c8   :  { %v2530_v48 = vadd.f32 %v8276_v38, %v2529_v49  ;;  %v2545_v63 = vadd.f32 %v8286_v25, %v2544_v14  ;;  %5028 = vpow2.f32 %v1392_v10  ;;  %v1192_v11 = vsub.f32 0.0, %v8395_v42  ;;  %vm8445_vm7 = vmor %vm2531_vm2, %vm2532_vm8  ;;  %v8464_v10 = vpop.f32.mrf.mxu1 }
 0x3c9   :  { %v5025_v32 = vpop.eup %5024  ;;  %vm8429_vm6 = vcmp.eq.f32.partialorder %v2535_v4, 8.507059e+37  ;;  %v2678_v37 = vsub.f32 1.0, %v2677_v40  ;;  %5030 = vrcp.f32 %v8393_v36  ;;  %v8434_v8 = vadd.f32 1.0, %v5023_v44  ;;  %v8477_v44 = vpop.f32.mrf.mxu3 }
 0x3ca   :  { %v8436_v23 = vpop.eup %5026  ;;  %v2494_v5 = vsel %vm8347_vm11, %v8307_v45, %v2489_v47  ;;  %v2538_v4 = vor.u32 1.1754944e-38, %v2537_v57  ;;  %vm2546_vm13 = vweird.f32 %v8193_v46  ;;  %v2552_v49 = vand.u32 2147483648, %v8193_v46  ;;  %11718 = vst [vmem:[#allocation11_spill] sm:$0xff] %v8477_v44 }
 0x3cb   :  { %v2624_v14 = vsel %vm8414_vm9, %v8246_v28, %v2620_v61  ;;  %vm8456_vm10 = vmor %vm2546_vm13, %vm2547_vm4  ;;  %vm8460_vm0 = vcmp.eq.f32.partialorder %v2550_v21, 8.507059e+37  ;;  %5032 = vpow2.f32 %v1378_v17  ;;  %v1380_v43 = vmul.f32 1.442695, %v1183_v9  ;;  %4010 = vmatmul.f32.gmra.mxu0 %v7547_v6  ;;  %4123 = vmatmul.f32.gmra.mxu1 %v7550_v26  ;;  %v11719_v26 = vld [vmem:[#allocation4_spill] sm:$0xff] }
 0x3cc   :  { %v2639_v46 = vsel %vm8425_vm15, %v8263_v35, %v2635_v2  ;;  %v2534_v28 = vsel %vm8445_vm7, %v8276_v38, %v2530_v48  ;;  %v2549_v57 = vsel %vm8456_vm10, %v8286_v25, %v2545_v63  ;;  %v1398_v40 = vmul.f32 1.442695, %v1192_v11  ;;  %3784 = vmatmul.f32.gmra.mxu2 %v7772_v31  ;;  %3897 = vmatmul.f32.gmra.mxu3 %v11719_v26 }
 0x3cd   :  { %v2679_v47 = vmul.f32 %v8353_v62, %v2678_v37  ;;  %v2692_v61 = vmul.f32 %v8436_v23, %v8330_v19  ;;  %5034 = vrcp.f32 %v8434_v8  ;;  %v8483_v21 = vadd.f32 1.0, %v5025_v32  ;;  %v11720_v32 = vld [vmem:[#allocation7_spill] sm:$0xff] }
 0x3ce   :  { %v5029_v35 = vpop.eup %5028  ;;  %v2629_v38 = vsel %vm8363_vm1, %v8316_v30, %v2624_v14  ;;  %v2553_v25 = vor.u32 1.1754944e-38, %v2552_v49  ;;  %vm2681_vm11 = vweird.f32 %v8282_v50  ;;  %v1193_v2 = vsub.f32 0.0, %v8464_v10  ;;  %v11724_v49 = vld [vmem:[#allocation12_spill] sm:$0xff]  ;;  %v11726_v14 = vld [vmem:[#allocation13_spill] sm:$0xff] }
 0x3cf   :  { %v8492_v17 = vpop.eup %5030  ;;  %vm2682_vm12 = vweird.f32 %v8353_v62  ;;  %v2685_v9 = vand.u32 2147483647, %v8282_v50  ;;  %v2687_v6 = vand.u32 2147483648, %v8282_v50  ;;  %5036 = vpow2.f32 %v1380_v43 }
 0x3d0   :  { %v2644_v30 = vsel %vm8386_vm5, %v8326_v60, %v2639_v46  ;;  %v2539_v39 = vsel %vm8429_vm6, %v2538_v4, %v2534_v28  ;;  %v2554_v51 = vsel %vm8460_vm0, %v2553_v25, %v2549_v57  ;;  %5038 = vpow2.f32 %v1398_v40  ;;  %v11721_v60 = vld [vmem:[#allocation31_spill] sm:$0xff]  ;;  %vm8521_vm14 = vmor %vm2681_vm11, %vm2682_vm12  ;;  %v11733_v25 = vld [vmem:[#allocation37_spill] sm:$0xff] }
 0x3d1   :  { %v5033_v48 = vpop.eup %5032  ;;  %v2680_v63 = vadd.f32 %v8353_v62, %v2679_v47  ;;  %v2693_v11 = vsub.f32 1.0, %v2692_v61  ;;  %5040 = vrcp.f32 %v8483_v21  ;;  %v8508_v31 = vadd.f32 1.0, %v5029_v35  ;;  %v8561_v26 = vpop.f32.mrf.mxu3 }
 0x3d2   :  { %v8512_v55 = vmul.f32 %v8376_v12, %v11720_v32  ;;  %v8515_v15 = vmul.f32 %v2494_v5, %v11721_v60  ;;  %v2587_v37 = vmul.f32 %v8492_v17, %v8393_v36  ;;  %v1400_v59 = vmul.f32 1.442695, %v1193_v2 }
 0x3d3   :  { %v8527_v4 = vpop.eup %5034  ;;  %v8530_v12 = vmul.f32 %v2629_v38, %v11724_v49  ;;  %v8533_v5 = vmul.f32 %v2644_v30, %v11726_v14  ;;  %vm8535_vm1 = vcmp.eq.f32.partialorder %v2685_v9, 8.507059e+37  ;;  %v2688_v50 = vor.u32 1.1754944e-38, %v2687_v6  ;;  %v8554_v38 = vpop.f32.mrf.mxu2  ;;  %4013 = vmatmul.f32.gmra.mxu0 %v11733_v25 }
 0x3d4   :  { %v8540_v43 = vmul.f32 %v2539_v39, %v11730_v56  ;;  %v8543_v46 = vmul.f32 %v2554_v51, %v7995_v53  ;;  %v2700_v28 = vand.u32 2147483647, %v8330_v19  ;;  %v8546_v57 = vadd.f32 1.0, %v5033_v48  ;;  %v11734_v53 = vld [vmem:[#allocation38_spill] sm:$0xff]  ;;  %v8569_v48 = vpop.f32.mrf.mxu0 }
 0x3d5   :  { %11725 = vst [vmem:[#allocation16_spill] sm:$0xff] %v8530_v12  ;;  %v5037_v40 = vpop.eup %5036  ;;  %v2684_v47 = vsel %vm8521_vm14, %v8353_v62, %v2680_v63  ;;  %v2694_v61 = vmul.f32 %v8436_v23, %v2693_v11  ;;  %v2702_v35 = vand.u32 2147483648, %v8330_v19  ;;  %5042 = vrcp.f32 %v8508_v31  ;;  %4126 = vmatmul.f32.gmra.mxu1 %v11734_v53  ;;  %v8571_v63 = vpop.f32.mrf.mxu1  ;;  %v11736_v11 = vld [vmem:[#allocation9_spill] sm:$0xff] }
 0x3d6   :  { %11727 = vst [vmem:[#allocation17_spill] sm:$0xff] %v8533_v5  ;;  %v5039_v2 = vpop.eup %5038  ;;  %v2588_v9 = vsub.f32 1.0, %v2587_v37  ;;  %v2602_v6 = vmul.f32 %v8527_v4, %v8434_v8  ;;  %5044 = vpow2.f32 %v1400_v59  ;;  %v1186_v62 = vsub.f32 0.0, %v8466_v1  ;;  %3787 = vmatmul.f32.gmra.mxu2 %v11736_v11  ;;  %v11737_v37 = vld [vmem:[#allocation6_spill] sm:$0xff]  ;;  %v11746_v11 = vld [vmem:[#allocation8_spill] sm:$0xff] }
 0x3d7   :  { %11731 = vst [vmem:[#allocation14_spill] sm:$0xff] %v8540_v43  ;;  %v8563_v30 = vpop.eup %5040  ;;  %vm2696_vm2 = vweird.f32 %v8330_v19  ;;  %vm2697_vm3 = vweird.f32 %v8436_v23  ;;  %v2595_v39 = vand.u32 2147483647, %v8393_v36  ;;  %v2597_v51 = vand.u32 2147483648, %v8393_v36  ;;  %3900 = vmatmul.f32.gmra.mxu3 %v11737_v37 }
 0x3d8   :  { %11732 = vst [vmem:[#allocation15_spill] sm:$0xff] %v8543_v46  ;;  %v2689_v32 = vsel %vm8535_vm1, %v2688_v50, %v2684_v47  ;;  %v2612_v60 = vand.u32 2147483648, %v8434_v8  ;;  %5046 = vrcp.f32 %v8546_v57  ;;  %v8578_v16 = vadd.f32 1.0, %v5037_v40  ;;  %vm8592_vm8 = vmor %vm2696_vm2, %vm2697_vm3 }
 0x3d9   :  { %11735 = vst [vmem:[#allocation20_spill] sm:$0xff] %v8569_v48  ;;  %v2695_v59 = vadd.f32 %v8436_v23, %v2694_v61  ;;  %vm8582_vm5 = vcmp.eq.f32.partialorder %v2700_v28, 8.507059e+37  ;;  %v2703_v14 = vor.u32 1.1754944e-38, %v2702_v35  ;;  %v8586_v56 = vadd.f32 1.0, %v5039_v2 }
 0x3da   :  { %v2589_v50 = vmul.f32 %v8492_v17, %v2588_v9  ;;  %v2603_v40 = vsub.f32 1.0, %v2602_v6  ;;  %v2737_v28 = vmul.f32 %v8563_v30, %v8483_v21  ;;  %v1386_v47 = vmul.f32 1.442695, %v1186_v62 }
 0x3db   :  { %v8599_v61 = vpop.eup %5042  ;;  %v8602_v35 = vmul.f32 %v2689_v32, %v8084_v13  ;;  %vm2591_vm4 = vweird.f32 %v8393_v36  ;;  %v2598_v25 = vor.u32 1.1754944e-38, %v2597_v51  ;;  %v2610_v19 = vand.u32 2147483647, %v8434_v8  ;;  %v11745_v51 = vld [vmem:[#allocation5_spill] sm:$0xff] }
 0x3dc   :  { %v5045_v53 = vpop.eup %5044  ;;  %vm8606_vm9 = vcmp.eq.f32.partialorder %v2595_v39, 8.507059e+37  ;;  %vm2606_vm15 = vweird.f32 %v8434_v8  ;;  %v8611_v9 = vor.u32 1.1754944e-38, %v2612_v60  ;;  %v2745_v6 = vand.u32 2147483647, %v8483_v21  ;;  %4016 = vmatmul.f32.gmra.mxu0 %v11745_v51  ;;  %v8634_v51 = vpop.f32.mrf.mxu2 }
 0x3dd   :  { %11742 = vst [vmem:[#allocation21_spill] sm:$0xff] %v8602_v35  ;;  %v2747_v62 = vand.u32 2147483648, %v8483_v21  ;;  %5048 = vrcp.f32 %v8578_v16  ;;  %v2699_v13 = vsel %vm8592_vm8, %v8436_v23, %v2695_v59  ;;  %vm2592_vm6 = vweird.f32 %v8492_v17  ;;  %4129 = vmatmul.f32.gmra.mxu1 %v11746_v11  ;;  %v8665_v11 = vpop.f32.mrf.mxu0  ;;  %v8667_v49 = vpop.f32.mrf.mxu1 }
 0x3de   :  { %v2762_v39 = vand.u32 2147483648, %v8508_v31  ;;  %5050 = vrcp.f32 %v8586_v56  ;;  %v8624_v32 = vpop.eup %5046  ;;  %v2590_v60 = vadd.f32 %v8492_v17, %v2589_v50  ;;  %v2604_v37 = vmul.f32 %v8527_v4, %v2603_v40  ;;  %3790 = vmatmul.f32.gmra.mxu2 %v8087_v34  ;;  %vm8655_vm0 = vmor %vm2591_vm4, %vm2592_vm6 }
 0x3df   :  { %v2738_v35 = vsub.f32 1.0, %v2737_v28  ;;  %v2752_v23 = vmul.f32 %v8599_v61, %v8508_v31  ;;  %v8630_v59 = vadd.f32 1.0, %v5045_v53  ;;  %5052 = vpow2.f32 %v1386_v47  ;;  %v8646_v47 = vpop.f32.mrf.mxu3  ;;  %3903 = vmatmul.f32.gmra.mxu3 %v8226_v54 }
 0x3e0   :  { %v1187_v45 = vsub.f32 0.0, %v8477_v44  ;;  %v1196_v46 = vsub.f32 0.0, %v8569_v48  ;;  %vm2607_vm7 = vweird.f32 %v8527_v4  ;;  %vm8638_vm13 = vcmp.eq.f32.partialorder %v2610_v19, 8.507059e+37 }
 0x3e1   :  { %vm2741_vm10 = vweird.f32 %v8483_v21  ;;  %v8643_v40 = vor.u32 1.1754944e-38, %v2747_v62  ;;  %v2760_v28 = vand.u32 2147483647, %v8508_v31  ;;  %v2704_v53 = vsel %vm8582_vm5, %v2703_v14, %v2699_v13  ;;  %vm8695_vm1 = vmor %vm2606_vm15, %vm2607_vm7 }
 0x3e2   :  { %vm2756_vm11 = vweird.f32 %v8508_v31  ;;  %v8660_v19 = vor.u32 1.1754944e-38, %v2762_v39  ;;  %v2647_v62 = vmul.f32 %v8624_v32, %v8546_v57  ;;  %v2655_v54 = vand.u32 2147483647, %v8546_v57 }
 0x3e3   :  { %v8669_v14 = vpop.eup %5048  ;;  %v2594_v36 = vsel %vm8655_vm0, %v8492_v17, %v2590_v60  ;;  %v2605_v13 = vadd.f32 %v8527_v4, %v2604_v37  ;;  %v2657_v39 = vand.u32 2147483648, %v8546_v57  ;;  %v1388_v48 = vmul.f32 1.442695, %v1187_v45 }
 0x3e4   :  { %v8676_v43 = vpop.eup %5050  ;;  %v2739_v44 = vmul.f32 %v8563_v30, %v2738_v35  ;;  %vm8679_vm12 = vcmp.eq.f32.partialorder %v2745_v6, 8.507059e+37  ;;  %v2753_v1 = vsub.f32 1.0, %v2752_v23  ;;  %5054 = vrcp.f32 %v8630_v59 }
 0x3e5   :  { %v1406_v12 = vmul.f32 1.442695, %v1196_v46  ;;  %v8685_v34 = vmul.f32 %v2704_v53, %v8195_v33  ;;  %vm2742_vm14 = vweird.f32 %v8563_v30  ;;  %5056 = vpow2.f32 %v1388_v48  ;;  %v5053_v60 = vpop.eup %5052  ;;  %v11755_v48 = vld [vmem:[#allocation34_spill] sm:$0xff]  ;;  %4132 = vmatmul.f32.gmra.mxu1 %v8045_v52 }
 0x3e6   :  { %v1197_v17 = vsub.f32 0.0, %v8571_v63  ;;  %v2599_v35 = vsel %vm8606_vm9, %v2598_v25, %v2594_v36  ;;  %vm2757_vm2 = vweird.f32 %v8599_v61  ;;  %v2648_v33 = vsub.f32 1.0, %v2647_v62  ;;  %4019 = vmatmul.f32.gmra.mxu0 %v11755_v48  ;;  %vm8724_vm5 = vmor %vm2741_vm10, %vm2742_vm14  ;;  %v8757_v48 = vpop.f32.mrf.mxu1 }
 0x3e7   :  { %v2662_v46 = vmul.f32 %v8669_v14, %v8578_v16  ;;  %v2609_v25 = vsel %vm8695_vm1, %v8527_v4, %v2605_v13  ;;  %v8707_v2 = vor.u32 1.1754944e-38, %v2657_v39  ;;  %v2797_v8 = vmul.f32 %v8676_v43, %v8586_v56  ;;  %vm8763_vm6 = vmor %vm2756_vm11, %vm2757_vm2 }
 0x3e8   :  { %v8711_v37 = vadd.f32 1.0, %v5053_v60  ;;  %v2740_v23 = vadd.f32 %v8563_v30, %v2739_v44  ;;  %v2754_v45 = vmul.f32 %v8599_v61, %v2753_v1  ;;  %vm2651_vm3 = vweird.f32 %v8546_v57 }
 0x3e9   :  { %5058 = vpow2.f32 %v1406_v12  ;;  %v1190_v52 = vsub.f32 0.0, %v8554_v38  ;;  %v8718_v53 = vmul.f32 %v2599_v35, %v8261_v41  ;;  %vm8728_vm8 = vcmp.eq.f32.partialorder %v2760_v28, 8.507059e+37 }
 0x3ea   :  { %5060 = vrcp.f32 %v8711_v37  ;;  %v1408_v1 = vmul.f32 1.442695, %v1197_v17  ;;  %v1191_v12 = vsub.f32 0.0, %v8561_v26  ;;  %v8734_v62 = vpop.eup %5054  ;;  %v2614_v41 = vsel %vm8638_vm13, %v8611_v9, %v2609_v25 }
 0x3eb   :  { %v2649_v21 = vmul.f32 %v8624_v32, %v2648_v33  ;;  %v2663_v36 = vsub.f32 1.0, %v2662_v46  ;;  %v1200_v13 = vsub.f32 0.0, %v8665_v11  ;;  %v5057_v28 = vpop.eup %5056  ;;  %vm2652_vm4 = vweird.f32 %v8624_v32  ;;  %v8755_v46 = vpop.f32.mrf.mxu0 }
 0x3ec   :  { %v2670_v39 = vand.u32 2147483647, %v8578_v16  ;;  %v2672_v17 = vand.u32 2147483648, %v8578_v16  ;;  %v2798_v60 = vsub.f32 1.0, %v2797_v8  ;;  %v2744_v35 = vsel %vm8724_vm5, %v8563_v30, %v2740_v23  ;;  %vm8798_vm10 = vmor %vm2651_vm3, %vm2652_vm4 }
 0x3ed   :  { %v2755_v50 = vadd.f32 %v8599_v61, %v2754_v45  ;;  %vm8748_vm9 = vcmp.eq.f32.partialorder %v2655_v54, 8.507059e+37  ;;  %vm2666_vm15 = vweird.f32 %v8578_v16  ;;  %v8753_v6 = vadd.f32 1.0, %v5057_v28  ;;  %4135 = vmatmul.f32.gmra.mxu1 %v8232_v27 }
 0x3ee   :  { %v1394_v33 = vmul.f32 1.442695, %v1190_v52  ;;  %vm2801_vm7 = vweird.f32 %v8586_v56  ;;  %v2812_v54 = vmul.f32 %v8734_v62, %v8630_v59  ;;  %5062 = vpow2.f32 %v1408_v1  ;;  %4022 = vmatmul.f32.gmra.mxu0 %v8229_v7 }
 0x3ef   :  { %v1396_v25 = vmul.f32 1.442695, %v1191_v12  ;;  %v5059_v8 = vpop.eup %5058  ;;  %v2650_v23 = vadd.f32 %v8624_v32, %v2649_v21  ;;  %v2664_v45 = vmul.f32 %v8669_v14, %v2663_v36  ;;  %v2805_v52 = vand.u32 2147483647, %v8586_v56  ;;  %v8783_v21 = vpop.f32.mrf.mxu2  ;;  %3793 = vmatmul.f32.gmra.mxu2 %v8237_v18 }
 0x3f0   :  { %v1414_v4 = vmul.f32 1.442695, %v1200_v13  ;;  %v8775_v31 = vpop.eup %5060  ;;  %v2749_v28 = vsel %vm8679_vm12, %v8643_v40, %v2744_v35  ;;  %v2799_v1 = vmul.f32 %v8676_v43, %v2798_v60  ;;  %v2807_v12 = vand.u32 2147483648, %v8586_v56  ;;  %v8785_v36 = vpop.f32.mrf.mxu3  ;;  %3906 = vmatmul.f32.gmra.mxu3 %v8249_v58 }
 0x3f1   :  { %5064 = vrcp.f32 %v8753_v6  ;;  %v2759_v7 = vsel %vm8763_vm6, %v8599_v61, %v2755_v50  ;;  %vm2667_vm13 = vweird.f32 %v8669_v14  ;;  %v1201_v27 = vsub.f32 0.0, %v8667_v49 }
 0x3f2   :  { %5066 = vpow2.f32 %v1394_v33  ;;  %vm2802_vm0 = vweird.f32 %v8676_v43  ;;  %v2813_v18 = vsub.f32 1.0, %v2812_v54  ;;  %v8803_v58 = vadd.f32 1.0, %v5059_v8  ;;  %vm8846_vm1 = vmor %vm2666_vm15, %vm2667_vm13  ;;  %v8860_v8 = vpop.f32.mrf.mxu1 }
 0x3f3   :  { %5068 = vpow2.f32 %v1396_v25  ;;  %v2654_v61 = vsel %vm8798_vm10, %v8624_v32, %v2650_v23  ;;  %v2665_v40 = vadd.f32 %v8669_v14, %v2664_v45  ;;  %v2707_v13 = vmul.f32 %v8775_v31, %v8711_v37  ;;  %vm8829_vm12 = vmor %vm2801_vm7, %vm2802_vm0  ;;  %v8858_v16 = vpop.f32.mrf.mxu0  ;;  %11775 = vst [vmem:[#allocation19_spill] sm:$0xff] %v8860_v8  ;;  %v11776_v23 = vld [vmem:[#allocation36_spill] sm:$0xff] }
 0x3f4   :  { %5070 = vpow2.f32 %v1414_v4  ;;  %v5063_v57 = vpop.eup %5062  ;;  %v8812_v60 = vmul.f32 %v2614_v41, %v8272_v29  ;;  %vm8814_vm11 = vcmp.eq.f32.partialorder %v2670_v39, 8.507059e+37  ;;  %v2673_v50 = vor.u32 1.1754944e-38, %v2672_v17  ;;  %11774 = vst [vmem:[#allocation18_spill] sm:$0xff] %v8858_v16 }
 0x3f5   :  { %v2800_v33 = vadd.f32 %v8676_v43, %v2799_v1  ;;  %v8820_v30 = vmul.f32 %v2749_v28, %v8284_v24  ;;  %v2764_v32 = vsel %vm8728_vm8, %v8660_v19, %v2759_v7  ;;  %vm8833_vm14 = vcmp.eq.f32.partialorder %v2805_v52, 8.507059e+37  ;;  %4138 = vmatmul.f32.gmra.mxu1 %v8336_v20 }
 0x3f6   :  { %v1416_v39 = vmul.f32 1.442695, %v1201_v27  ;;  %v2659_v24 = vsel %vm8748_vm9, %v8707_v2, %v2654_v61  ;;  %v2808_v19 = vor.u32 1.1754944e-38, %v2807_v12  ;;  %v2814_v44 = vmul.f32 %v8734_v62, %v2813_v18  ;;  %4025 = vmatmul.f32.gmra.mxu0 %v11776_v23 }
 0x3f7   :  { %v8837_v17 = vpop.eup %5064  ;;  %5072 = vrcp.f32 %v8803_v58  ;;  %v2669_v25 = vsel %vm8846_vm1, %v8669_v14, %v2665_v40  ;;  %vm2816_vm2 = vweird.f32 %v8630_v59  ;;  %v2708_v2 = vsub.f32 1.0, %v2707_v13 }
 0x3f8   :  { %v5067_v54 = vpop.eup %5066  ;;  %v8856_v9 = vadd.f32 1.0, %v5063_v57  ;;  %v2804_v52 = vsel %vm8829_vm12, %v8676_v43, %v2800_v33  ;;  %vm2817_vm3 = vweird.f32 %v8734_v62  ;;  %v2820_v14 = vand.u32 2147483647, %v8630_v59 }
 0x3f9   :  { %v5069_v45 = vpop.eup %5068  ;;  %v2822_v4 = vand.u32 2147483648, %v8630_v59  ;;  %v8871_v1 = vmul.f32 %v2764_v32, %v8318_v0  ;;  %v8874_v12 = vmul.f32 %v2659_v24, %v8333_v22  ;;  %v2722_v20 = vmul.f32 %v8837_v17, %v8753_v6  ;;  %vm8888_vm5 = vmor %vm2816_vm2, %vm2817_vm3 }
 0x3fa   :  { %v5071_v28 = vpop.eup %5070  ;;  %5074 = vpow2.f32 %v1416_v39  ;;  %v2674_v43 = vsel %vm8814_vm11, %v2673_v50, %v2669_v25  ;;  %v2815_v7 = vadd.f32 %v8734_v62, %v2814_v44  ;;  %v2715_v27 = vand.u32 2147483647, %v8711_v37 }
 0x3fb   :  { %v8882_v5 = vadd.f32 1.0, %v5067_v54  ;;  %v2809_v0 = vsel %vm8833_vm14, %v2808_v19, %v2804_v52  ;;  %v2709_v18 = vmul.f32 %v8775_v31, %v2708_v2  ;;  %5076 = vrcp.f32 %v8856_v9 }
 0x3fc   :  { %v8894_v61 = vadd.f32 1.0, %v5069_v45  ;;  %vm8898_vm8 = vcmp.eq.f32.partialorder %v2820_v14, 8.507059e+37  ;;  %v2823_v57 = vor.u32 1.1754944e-38, %v2822_v4  ;;  %v2717_v35 = vand.u32 2147483648, %v8711_v37  ;;  %v8947_v4 = vpop.f32.mrf.mxu2  ;;  %3796 = vmatmul.f32.gmra.mxu2 %v8512_v55 }
 0x3fd   :  { %v8896_v40 = vpop.eup %5072  ;;  %v8903_v59 = vadd.f32 1.0, %v5071_v28  ;;  %v8906_v50 = vmul.f32 %v2674_v43, %v8361_v3  ;;  %vm2711_vm4 = vweird.f32 %v8711_v37  ;;  %v2723_v33 = vsub.f32 1.0, %v2722_v20 }
 0x3fe   :  { %v1194_v32 = vsub.f32 0.0, %v8634_v51  ;;  %v8911_v29 = vmul.f32 %v2809_v0, %v8395_v42  ;;  %v2819_v41 = vsel %vm8888_vm5, %v8734_v62, %v2815_v7  ;;  %vm8916_vm9 = vcmp.eq.f32.partialorder %v2715_v27, 8.507059e+37 }
 0x3ff   :  { %5078 = vrcp.f32 %v8882_v5  ;;  %v2710_v24 = vadd.f32 %v8775_v31, %v2709_v18  ;;  %vm2712_vm15 = vweird.f32 %v8775_v31  ;;  %v2857_v56 = vmul.f32 %v8896_v40, %v8803_v58  ;;  %v8965_v18 = vpop.f32.mrf.mxu3  ;;  %3909 = vmatmul.f32.gmra.mxu3 %v8515_v15  ;;  %v9021_v15 = vpop.f32.mrf.mxu1 }
 0x400   :  { %11781 = vst [vmem:[#allocation24_spill] sm:$0xff] %v8911_v29  ;;  %v5075_v3 = vpop.eup %5074  ;;  %5080 = vrcp.f32 %v8894_v61  ;;  %v2718_v42 = vor.u32 1.1754944e-38, %v2717_v35  ;;  %v2730_v19 = vand.u32 2147483647, %v8753_v6  ;;  %v2732_v62 = vand.u32 2147483648, %v8753_v6  ;;  %vm8938_vm7 = vmor %vm2711_vm4, %vm2712_vm15 }
 0x401   :  { %5082 = vrcp.f32 %v8903_v59  ;;  %v8929_v44 = vpop.eup %5076  ;;  %v2824_v54 = vsel %vm8898_vm8, %v2823_v57, %v2819_v41  ;;  %v2724_v25 = vmul.f32 %v8837_v17, %v2723_v33  ;;  %vm2726_vm6 = vweird.f32 %v8753_v6 }
 0x402   :  { %v2867_v2 = vand.u32 2147483648, %v8803_v58  ;;  %vm2861_vm13 = vweird.f32 %v8803_v58  ;;  %v2865_v45 = vand.u32 2147483647, %v8803_v58  ;;  %v2882_v52 = vand.u32 2147483648, %v8856_v9  ;;  %v11799_v58 = vld [vmem:[#allocation11_spill] sm:$0xff] }
 0x403   :  { %v8945_v14 = vadd.f32 1.0, %v5075_v3  ;;  %v2714_v37 = vsel %vm8938_vm7, %v8775_v31, %v2710_v24  ;;  %v2858_v28 = vsub.f32 1.0, %v2857_v56  ;;  %v2777_v20 = vand.u32 2147483648, %v8882_v5 }
 0x404   :  { %v1402_v43 = vmul.f32 1.442695, %v1194_v32  ;;  %v8957_v27 = vmul.f32 %v2824_v54, %v8464_v10  ;;  %vm8959_vm10 = vcmp.eq.f32.partialorder %v2730_v19, 8.507059e+37  ;;  %v2733_v22 = vor.u32 1.1754944e-38, %v2732_v62 }
 0x405   :  { %v8954_v7 = vpop.eup %5078  ;;  %v2872_v55 = vmul.f32 %v8929_v44, %v8856_v9  ;;  %v2725_v13 = vadd.f32 %v8837_v17, %v2724_v25  ;;  %vm2727_vm0 = vweird.f32 %v8837_v17  ;;  %v8972_v10 = vor.u32 1.1754944e-38, %v2867_v2 }
 0x406   :  { %11786 = vst [vmem:[#allocation25_spill] sm:$0xff] %v8957_v27  ;;  %v8968_v31 = vpop.eup %5080  ;;  %5084 = vrcp.f32 %v8945_v14  ;;  %v2719_v35 = vsel %vm8916_vm9, %v2718_v42, %v2714_v37  ;;  %v2880_v33 = vand.u32 2147483647, %v8856_v9  ;;  %v8980_v32 = vor.u32 1.1754944e-38, %v2882_v52  ;;  %vm8990_vm11 = vmor %vm2726_vm6, %vm2727_vm0  ;;  %v11796_v27 = vld [vmem:[#allocation17_spill] sm:$0xff] }
 0x407   :  { %v8975_v57 = vpop.eup %5082  ;;  %v2859_v41 = vmul.f32 %v8896_v40, %v2858_v28  ;;  %v2767_v3 = vmul.f32 %v8954_v7, %v8882_v5  ;;  %v8986_v24 = vor.u32 1.1754944e-38, %v2777_v20  ;;  %5086 = vpow2.f32 %v1402_v43  ;;  %v9011_v20 = vpop.f32.mrf.mxu0  ;;  %v11794_v43 = vld [vmem:[#allocation10_spill] sm:$0xff]  ;;  %4141 = vmatmul.f32.gmra.mxu1 %v11796_v27 }
 0x408   :  { %v2873_v39 = vsub.f32 1.0, %v2872_v55  ;;  %vm2876_vm12 = vweird.f32 %v8856_v9  ;;  %v1195_v42 = vsub.f32 0.0, %v8646_v47  ;;  %v1204_v19 = vsub.f32 0.0, %v8755_v46 }
 0x409   :  { %v1205_v62 = vsub.f32 0.0, %v8757_v48  ;;  %v2729_v54 = vsel %vm8990_vm11, %v8837_v17, %v2725_v13  ;;  %vm9001_vm14 = vcmp.eq.f32.partialorder %v2865_v45, 8.507059e+37  ;;  %v2782_v6 = vmul.f32 %v8968_v31, %v8894_v61  ;;  %v11793_v17 = vld [vmem:[#allocation16_spill] sm:$0xff] }
 0x40a   :  { %v2917_v2 = vmul.f32 %v8975_v57, %v8903_v59  ;;  %v1198_v23 = vsub.f32 0.0, %v8783_v21  ;;  %vm2862_vm1 = vweird.f32 %v8896_v40  ;;  %v1404_v52 = vmul.f32 1.442695, %v1195_v42  ;;  %4028 = vmatmul.f32.gmra.mxu0 %v11793_v17 }
 0x40b   :  { %v1422_v37 = vmul.f32 1.442695, %v1204_v19  ;;  %v1424_v28 = vmul.f32 1.442695, %v1205_v62  ;;  %v9017_v55 = vmul.f32 %v2719_v35, %v11794_v43  ;;  %v2860_v13 = vadd.f32 %v8896_v40, %v2859_v41  ;;  %vm9032_vm5 = vmor %vm2861_vm13, %vm2862_vm1 }
 0x40c   :  { %v9014_v45 = vpop.eup %5084  ;;  %vm2877_vm2 = vweird.f32 %v8929_v44  ;;  %v2768_v56 = vsub.f32 1.0, %v2767_v3  ;;  %v2734_v42 = vsel %vm8959_vm10, %v2733_v22, %v2729_v54  ;;  %vm2771_vm3 = vweird.f32 %v8882_v5 }
 0x40d   :  { %11795 = vst [vmem:[#allocation22_spill] sm:$0xff] %v9017_v55  ;;  %5088 = vpow2.f32 %v1404_v52  ;;  %v1410_v19 = vmul.f32 1.442695, %v1198_v23  ;;  %v1199_v62 = vsub.f32 0.0, %v8785_v36  ;;  %v5087_v35 = vpop.eup %5086  ;;  %v2874_v27 = vmul.f32 %v8929_v44, %v2873_v39  ;;  %vm9066_vm6 = vmor %vm2876_vm12, %vm2877_vm2  ;;  %v11820_v55 = vld [vmem:[#allocation20_spill] sm:$0xff] }
 0x40e   :  { %v2783_v3 = vsub.f32 1.0, %v2782_v6  ;;  %v2918_v0 = vsub.f32 1.0, %v2917_v2  ;;  %5090 = vpow2.f32 %v1422_v37  ;;  %v2932_v22 = vmul.f32 %v9014_v45, %v8945_v14 }
 0x40f   :  { %v9039_v54 = vadd.f32 1.0, %v5087_v35  ;;  %5092 = vpow2.f32 %v1424_v28  ;;  %v1412_v23 = vmul.f32 1.442695, %v1199_v62  ;;  %v2769_v52 = vmul.f32 %v8954_v7, %v2768_v56 }
 0x410   :  { %vm2772_vm8 = vweird.f32 %v8954_v7  ;;  %vm2786_vm4 = vweird.f32 %v8894_v61  ;;  %5094 = vpow2.f32 %v1410_v19  ;;  %v9045_v17 = vmul.f32 %v2734_v42, %v11799_v58 }
 0x411   :  { %v2864_v39 = vsel %vm9032_vm5, %v8896_v40, %v2860_v13  ;;  %v2790_v6 = vand.u32 2147483647, %v8894_v61  ;;  %v2792_v2 = vand.u32 2147483648, %v8894_v61  ;;  %vm9052_vm9 = vcmp.eq.f32.partialorder %v2880_v33, 8.507059e+37  ;;  %vm9096_vm11 = vmor %vm2771_vm3, %vm2772_vm8 }
 0x412   :  { %11800 = vst [vmem:[#allocation23_spill] sm:$0xff] %v9045_v17  ;;  %v2784_v28 = vmul.f32 %v8968_v31, %v2783_v3  ;;  %v2919_v43 = vmul.f32 %v8975_v57, %v2918_v0  ;;  %5096 = vrcp.f32 %v9039_v54  ;;  %v1208_v56 = vsub.f32 0.0, %v8858_v16  ;;  %v11813_v17 = vld [vmem:[#allocation15_spill] sm:$0xff] }
 0x413   :  { %v5089_v42 = vpop.eup %5088  ;;  %v2875_v19 = vadd.f32 %v8929_v44, %v2874_v27  ;;  %vm2921_vm15 = vweird.f32 %v8903_v59  ;;  %v2933_v40 = vsub.f32 1.0, %v2932_v22  ;;  %5098 = vpow2.f32 %v1412_v23 }
 0x414   :  { %v5091_v13 = vpop.eup %5090  ;;  %v2770_v62 = vadd.f32 %v8954_v7, %v2769_v52  ;;  %v11805_v35 = vand.u32 2147483647, %v8882_v5  ;;  %vm2922_vm13 = vweird.f32 %v8975_v57  ;;  %v2925_v27 = vand.u32 2147483647, %v8903_v59 }
 0x415   :  { %v9079_v3 = vadd.f32 1.0, %v5089_v42  ;;  %v5093_v0 = vpop.eup %5092  ;;  %v2869_v9 = vsel %vm9001_vm14, %v8972_v10, %v2864_v39  ;;  %vm2787_vm10 = vweird.f32 %v8968_v31  ;;  %vm9085_vm0 = vcmp.eq.f32.partialorder %v2790_v6, 8.507059e+37  ;;  %v9103_v6 = vpop.f32.mrf.mxu2  ;;  %vm9116_vm12 = vmor %vm2921_vm15, %vm2922_vm13 }
 0x416   :  { %vm9073_vm7 = vcmp.eq.f32.partialorder %v11805_v35, 8.507059e+37  ;;  %v2927_v23 = vand.u32 2147483648, %v8903_v59  ;;  %v9090_v52 = vadd.f32 1.0, %v5091_v13  ;;  %v5095_v58 = vpop.eup %5094  ;;  %v2785_v10 = vadd.f32 %v8968_v31, %v2784_v28  ;;  %v9105_v13 = vpop.f32.mrf.mxu3  ;;  %v11812_v35 = vld [vmem:[#allocation14_spill] sm:$0xff]  ;;  %3912 = vmatmul.f32.gmra.mxu3 %v11813_v17  ;;  %vm9138_vm2 = vmor %vm2786_vm4, %vm2787_vm10 }
 0x417   :  { %v2920_v25 = vadd.f32 %v8975_v57, %v2919_v43  ;;  %5100 = vrcp.f32 %v9079_v3  ;;  %v1430_v39 = vmul.f32 1.442695, %v1208_v56  ;;  %3799 = vmatmul.f32.gmra.mxu2 %v11812_v35  ;;  %v2879_v5 = vsel %vm9066_vm6, %v8929_v44, %v2875_v19 }
 0x418   :  { %v2934_v43 = vmul.f32 %v9014_v45, %v2933_v40  ;;  %5102 = vrcp.f32 %v9090_v52  ;;  %v1209_v56 = vsub.f32 0.0, %v8860_v8  ;;  %v9123_v35 = vpop.eup %5096  ;;  %v2774_v44 = vsel %vm9096_vm11, %v8954_v7, %v2770_v62 }
 0x419   :  { %vm9128_vm14 = vcmp.eq.f32.partialorder %v2925_v27, 8.507059e+37  ;;  %vm2936_vm1 = vweird.f32 %v8945_v14  ;;  %v2940_v59 = vand.u32 2147483647, %v8945_v14  ;;  %v5099_v19 = vpop.eup %5098  ;;  %vm2937_vm3 = vweird.f32 %v9014_v45 }
 0x41a   :  { %v2942_v7 = vand.u32 2147483648, %v8945_v14  ;;  %v9144_v33 = vadd.f32 1.0, %v5093_v0  ;;  %v9146_v62 = vadd.f32 1.0, %v5095_v58  ;;  %v2789_v27 = vsel %vm9138_vm2, %v8968_v31, %v2785_v10  ;;  %vm9167_vm5 = vmor %vm2936_vm1, %vm2937_vm3 }
 0x41b   :  { %v2924_v61 = vsel %vm9116_vm12, %v8975_v57, %v2920_v25  ;;  %v2928_v42 = vor.u32 1.1754944e-38, %v2927_v23  ;;  %5104 = vpow2.f32 %v1430_v39  ;;  %v2935_v8 = vadd.f32 %v9014_v45, %v2934_v43 }
 0x41c   :  { %v2827_v16 = vmul.f32 %v9123_v35, %v9039_v54  ;;  %5106 = vrcp.f32 %v9144_v33  ;;  %v1432_v0 = vmul.f32 1.442695, %v1209_v56  ;;  %v9161_v29 = vmul.f32 %v2869_v9, %v11820_v55 }
 0x41d   :  { %v9158_v58 = vpop.eup %5100  ;;  %v2793_v31 = vor.u32 1.1754944e-38, %v2792_v2  ;;  %5108 = vrcp.f32 %v9146_v62  ;;  %v9172_v23 = vadd.f32 1.0, %v5099_v19  ;;  %v2884_v55 = vsel %vm9052_vm9, %v8980_v32, %v2879_v5  ;;  %v9192_v32 = vpop.f32.mrf.mxu0 }
 0x41e   :  { %v9174_v10 = vpop.eup %5102  ;;  %v2779_v2 = vsel %vm9073_vm7, %v8986_v24, %v2774_v44  ;;  %vm9182_vm8 = vcmp.eq.f32.partialorder %v2940_v59, 8.507059e+37  ;;  %v2943_v9 = vor.u32 1.1754944e-38, %v2942_v7  ;;  %v2929_v39 = vsel %vm9128_vm14, %v2928_v42, %v2924_v61  ;;  %v9194_v5 = vpop.f32.mrf.mxu1  ;;  %v11825_v24 = vld [vmem:[#allocation21_spill] sm:$0xff]  ;;  %4144 = vmatmul.f32.gmra.mxu1 %v8685_v34 }
 0x41f   :  { %v2794_v25 = vsel %vm9085_vm0, %v2793_v31, %v2789_v27  ;;  %v2837_v28 = vand.u32 2147483648, %v9039_v54  ;;  %v1202_v37 = vsub.f32 0.0, %v8947_v4  ;;  %4031 = vmatmul.f32.gmra.mxu0 %v11825_v24  ;;  %v2939_v41 = vsel %vm9167_vm5, %v9014_v45, %v2935_v8  ;;  %v9228_v27 = vpop.f32.mrf.mxu2  ;;  %3802 = vmatmul.f32.gmra.mxu2 %v8718_v53 }
 0x420   :  { %v2828_v22 = vsub.f32 1.0, %v2827_v16  ;;  %v2842_v43 = vmul.f32 %v9158_v58, %v9079_v3  ;;  %5110 = vpow2.f32 %v1432_v0  ;;  %v9204_v44 = vmul.f32 %v2884_v55, %v8571_v63 }
 0x421   :  { %v5105_v56 = vpop.eup %5104  ;;  %v9207_v17 = vmul.f32 %v2779_v2, %v8554_v38  ;;  %v2977_v59 = vmul.f32 %v9174_v10, %v9090_v52  ;;  %5112 = vrcp.f32 %v9172_v23  ;;  %v9215_v16 = vmul.f32 %v2794_v25, %v8561_v26 }
 0x422   :  { %v9212_v34 = vpop.eup %5106  ;;  %v9218_v8 = vmul.f32 %v2929_v39, %v8665_v11  ;;  %v2835_v45 = vand.u32 2147483647, %v9039_v54  ;;  %v1203_v63 = vsub.f32 0.0, %v8965_v18  ;;  %v2944_v38 = vsel %vm9182_vm8, %v2943_v9, %v2939_v41 }
 0x423   :  { %v9222_v19 = vpop.eup %5108  ;;  %vm2831_vm4 = vweird.f32 %v9039_v54  ;;  %v2838_v40 = vor.u32 1.1754944e-38, %v2837_v28  ;;  %v2852_v7 = vand.u32 2147483648, %v9079_v3  ;;  %v2829_v26 = vmul.f32 %v9123_v35, %v2828_v22 }
 0x424   :  { %v2843_v11 = vsub.f32 1.0, %v2842_v43  ;;  %v2987_v61 = vand.u32 2147483648, %v9090_v52  ;;  %v1418_v42 = vmul.f32 1.442695, %v1202_v37  ;;  %v2978_v0 = vsub.f32 1.0, %v2977_v59 }
 0x425   :  { %v2992_v31 = vmul.f32 %v9212_v34, %v9144_v33  ;;  %v2887_v57 = vmul.f32 %v9222_v19, %v9146_v62  ;;  %v9237_v55 = vadd.f32 1.0, %v5105_v56  ;;  %v9240_v14 = vmul.f32 %v2944_v38, %v8667_v49  ;;  %v9255_v49 = vpop.f32.mrf.mxu3  ;;  %3915 = vmatmul.f32.gmra.mxu3 %v8812_v60 }
 0x426   :  { %v5111_v2 = vpop.eup %5110  ;;  %vm9242_vm9 = vcmp.eq.f32.partialorder %v2835_v45, 8.507059e+37  ;;  %vm2846_vm15 = vweird.f32 %v9079_v3  ;;  %v2985_v9 = vand.u32 2147483647, %v9090_v52  ;;  %v1420_v25 = vmul.f32 1.442695, %v1203_v63 }
 0x427   :  { %v9248_v39 = vpop.eup %5112  ;;  %vm2832_vm6 = vweird.f32 %v9123_v35  ;;  %v2850_v28 = vand.u32 2147483647, %v9079_v3  ;;  %v9252_v37 = vor.u32 1.1754944e-38, %v2852_v7  ;;  %vm2981_vm7 = vweird.f32 %v9090_v52 }
 0x428   :  { %v2830_v24 = vadd.f32 %v9123_v35, %v2829_v26  ;;  %v2844_v41 = vmul.f32 %v9158_v58, %v2843_v11  ;;  %v9260_v22 = vor.u32 1.1754944e-38, %v2987_v61  ;;  %vm2996_vm13 = vweird.f32 %v9144_v33  ;;  %vm9278_vm0 = vmor %vm2831_vm4, %vm2832_vm6 }
 0x429   :  { %v2979_v43 = vmul.f32 %v9174_v10, %v2978_v0  ;;  %v2993_v56 = vsub.f32 1.0, %v2992_v31  ;;  %v2888_v59 = vsub.f32 1.0, %v2887_v57  ;;  %5114 = vrcp.f32 %v9237_v55 }
 0x42a   :  { %vm9265_vm10 = vcmp.eq.f32.partialorder %v2985_v9, 8.507059e+37  ;;  %v3002_v60 = vand.u32 2147483648, %v9144_v33  ;;  %v2902_v63 = vmul.f32 %v9248_v39, %v9172_v23  ;;  %v9272_v38 = vadd.f32 1.0, %v5111_v2 }
 0x42b   :  { %5116 = vpow2.f32 %v1418_v42  ;;  %vm2982_vm11 = vweird.f32 %v9174_v10  ;;  %v3000_v26 = vand.u32 2147483647, %v9144_v33  ;;  %v1212_v11 = vsub.f32 0.0, %v9011_v20  ;;  %v9368_v33 = vpop.f32.mrf.mxu1  ;;  %4147 = vmatmul.f32.gmra.mxu1 %v8871_v1 }
 0x42c   :  { %5118 = vpow2.f32 %v1420_v25  ;;  %v2834_v61 = vsel %vm9278_vm0, %v9123_v35, %v2830_v24  ;;  %v2845_v42 = vadd.f32 %v9158_v58, %v2844_v41  ;;  %vm2847_vm12 = vweird.f32 %v9158_v58  ;;  %vm9301_vm2 = vmor %vm2981_vm7, %vm2982_vm11 }
 0x42d   :  { %vm9290_vm14 = vcmp.eq.f32.partialorder %v2850_v28, 8.507059e+37  ;;  %vm2891_vm1 = vweird.f32 %v9146_v62  ;;  %v2980_v0 = vadd.f32 %v9174_v10, %v2979_v43  ;;  %v2994_v31 = vmul.f32 %v9212_v34, %v2993_v56  ;;  %vm9315_vm3 = vmor %vm2846_vm15, %vm2847_vm12 }
 0x42e   :  { %v2889_v57 = vmul.f32 %v9222_v19, %v2888_v59  ;;  %v2895_v2 = vand.u32 2147483647, %v9146_v62  ;;  %v9305_v9 = vor.u32 1.1754944e-38, %v3002_v60  ;;  %v2897_v25 = vand.u32 2147483648, %v9146_v62 }
 0x42f   :  { %v2903_v28 = vsub.f32 1.0, %v2902_v63  ;;  %5120 = vrcp.f32 %v9272_v38  ;;  %v9309_v24 = vpop.eup %5114  ;;  %v2839_v41 = vsel %vm9242_vm9, %v2838_v40, %v2834_v61  ;;  %vm9319_vm5 = vcmp.eq.f32.partialorder %v3000_v26, 8.507059e+37 }
 0x430   :  { %v2910_v56 = vand.u32 2147483647, %v9172_v23  ;;  %v2912_v59 = vand.u32 2147483648, %v9172_v23  ;;  %v1438_v60 = vmul.f32 1.442695, %v1212_v11  ;;  %v2849_v40 = vsel %vm9315_vm3, %v9158_v58, %v2845_v42  ;;  %v9343_v42 = vpop.f32.mrf.mxu0  ;;  %4034 = vmatmul.f32.gmra.mxu0 %v8820_v30 }
 0x431   :  { %v5117_v63 = vpop.eup %5116  ;;  %vm2997_vm8 = vweird.f32 %v9212_v34  ;;  %vm2892_vm4 = vweird.f32 %v9222_v19  ;;  %v1213_v3 = vsub.f32 0.0, %v9021_v15  ;;  %v2984_v7 = vsel %vm9301_vm2, %v9174_v10, %v2980_v0 }
 0x432   :  { %v5119_v53 = vpop.eup %5118  ;;  %v2995_v26 = vadd.f32 %v9212_v34, %v2994_v31  ;;  %v2890_v11 = vadd.f32 %v9222_v19, %v2889_v57  ;;  %vm9336_vm9 = vcmp.eq.f32.partialorder %v2895_v2, 8.507059e+37  ;;  %vm2906_vm15 = vweird.f32 %v9172_v23  ;;  %vm9355_vm6 = vmor %vm2996_vm13, %vm2997_vm8  ;;  %v11856_v31 = vld [vmem:[#allocation24_spill] sm:$0xff] }
 0x433   :  { %v9341_v58 = vadd.f32 1.0, %v5117_v63  ;;  %v2904_v52 = vmul.f32 %v9248_v39, %v2903_v28  ;;  %v3037_v10 = vmul.f32 %v9309_v24, %v9237_v55  ;;  %v9349_v0 = vadd.f32 1.0, %v5119_v53  ;;  %vm9381_vm13 = vmor %vm2891_vm1, %vm2892_vm4 }
 0x434   :  { %5122 = vpow2.f32 %v1438_v60  ;;  %v2898_v57 = vor.u32 1.1754944e-38, %v2897_v25  ;;  %v1440_v30 = vmul.f32 1.442695, %v1213_v3  ;;  %v1206_v2 = vsub.f32 0.0, %v9103_v6 }
 0x435   :  { %5124 = vrcp.f32 %v9341_v58  ;;  %v9361_v35 = vpop.eup %5120  ;;  %v9364_v28 = vmul.f32 %v2839_v41, %v8634_v51  ;;  %v2913_v60 = vor.u32 1.1754944e-38, %v2912_v59  ;;  %vm3041_vm7 = vweird.f32 %v9237_v55  ;;  %v9445_v51 = vpop.f32.mrf.mxu3  ;;  %3918 = vmatmul.f32.gmra.mxu3 %v8906_v50 }
 0x436   :  { %5126 = vrcp.f32 %v9349_v0  ;;  %v2854_v25 = vsel %vm9290_vm14, %v9252_v37, %v2849_v40  ;;  %v2989_v63 = vsel %vm9265_vm10, %v9260_v22, %v2984_v7  ;;  %vm2907_vm0 = vweird.f32 %v9248_v39 }
 0x437   :  { %vm9386_vm11 = vcmp.eq.f32.partialorder %v2910_v56, 8.507059e+37  ;;  %v3045_v37 = vand.u32 2147483647, %v9237_v55  ;;  %v2999_v22 = vsel %vm9355_vm6, %v9212_v34, %v2995_v26  ;;  %v2894_v62 = vsel %vm9381_vm13, %v9222_v19, %v2890_v11  ;;  %vm9425_vm10 = vmor %vm2906_vm15, %vm2907_vm0 }
 0x438   :  { %v2905_v45 = vadd.f32 %v9248_v39, %v2904_v52  ;;  %v3038_v54 = vsub.f32 1.0, %v3037_v10  ;;  %v3052_v41 = vmul.f32 %v9361_v35, %v9272_v38  ;;  %5128 = vpow2.f32 %v1440_v30 }
 0x439   :  { %v1426_v56 = vmul.f32 1.442695, %v1206_v2  ;;  %v1207_v59 = vsub.f32 0.0, %v9105_v13  ;;  %v9402_v3 = vmul.f32 %v2854_v25, %v8646_v47  ;;  %v9405_v34 = vmul.f32 %v2989_v63, %v8755_v46  ;;  %v9443_v63 = vpop.f32.mrf.mxu2  ;;  %3805 = vmatmul.f32.gmra.mxu2 %v8874_v12 }
 0x43a   :  { %v5123_v40 = vpop.eup %5122  ;;  %v1216_v53 = vsub.f32 0.0, %v9192_v32  ;;  %v1217_v19 = vsub.f32 0.0, %v9194_v5  ;;  %v3047_v26 = vand.u32 2147483648, %v9237_v55  ;;  %v3004_v47 = vsel %vm9319_vm5, %v9305_v9, %v2999_v22 }
 0x43b   :  { %v9409_v7 = vpop.eup %5124  ;;  %v9412_v11 = vadd.f32 1.0, %v5123_v40  ;;  %5130 = vpow2.f32 %v1426_v56  ;;  %v1428_v52 = vmul.f32 1.442695, %v1207_v59  ;;  %v2899_v46 = vsel %vm9336_vm9, %v2898_v57, %v2894_v62 }
 0x43c   :  { %v9414_v10 = vpop.eup %5126  ;;  %v3039_v30 = vmul.f32 %v9309_v24, %v3038_v54  ;;  %v2947_v2 = vmul.f32 %v9409_v7, %v9341_v58  ;;  %v2909_v9 = vsel %vm9425_vm10, %v9248_v39, %v2905_v45  ;;  %v3053_v43 = vsub.f32 1.0, %v3052_v41 }
 0x43d   :  { %5132 = vrcp.f32 %v9412_v11  ;;  %v1446_v61 = vmul.f32 1.442695, %v1216_v53  ;;  %vm3042_vm12 = vweird.f32 %v9309_v24  ;;  %vm9437_vm14 = vcmp.eq.f32.partialorder %v3045_v37, 8.507059e+37 }
 0x43e   :  { %v2962_v57 = vmul.f32 %v9414_v10, %v9349_v0  ;;  %v1448_v25 = vmul.f32 1.442695, %v1217_v19  ;;  %v5129_v39 = vpop.eup %5128  ;;  %v9450_v22 = vmul.f32 %v3004_v47, %v8757_v48  ;;  %v9453_v37 = vmul.f32 %v2899_v46, %v8783_v21  ;;  %vm9463_vm1 = vmor %vm3041_vm7, %vm3042_vm12  ;;  %v9492_v47 = vpop.f32.mrf.mxu0  ;;  %4037 = vmatmul.f32.gmra.mxu0 %v11856_v31 }
 0x43f   :  { %v3048_v62 = vor.u32 1.1754944e-38, %v3047_v26  ;;  %5134 = vpow2.f32 %v1428_v52  ;;  %v2914_v45 = vsel %vm9386_vm11, %v2913_v60, %v2909_v9  ;;  %v3040_v54 = vadd.f32 %v9309_v24, %v3039_v30  ;;  %v9494_v46 = vpop.f32.mrf.mxu1  ;;  %v11857_v30 = vld [vmem:[#allocation25_spill] sm:$0xff] }
 0x440   :  { %v3060_v41 = vand.u32 2147483647, %v9272_v38  ;;  %v2948_v56 = vsub.f32 1.0, %v2947_v2  ;;  %v3054_v21 = vmul.f32 %v9361_v35, %v3053_v43  ;;  %v3062_v50 = vand.u32 2147483648, %v9272_v38  ;;  %4150 = vmatmul.f32.gmra.mxu1 %v11857_v30 }
 0x441   :  { %v5131_v12 = vpop.eup %5130  ;;  %v9469_v1 = vadd.f32 1.0, %v5129_v39  ;;  %5136 = vpow2.f32 %v1446_v61  ;;  %v2963_v60 = vsub.f32 1.0, %v2962_v57  ;;  %v1210_v40 = vsub.f32 0.0, %v9228_v27  ;;  %v11865_v61 = vld [vmem:[#allocation18_spill] sm:$0xff] }
 0x442   :  { %v9471_v59 = vadd.f32 1.0, %v5131_v12  ;;  %5138 = vpow2.f32 %v1448_v25  ;;  %v9477_v55 = vmul.f32 %v2914_v45, %v8785_v36  ;;  %vm3056_vm2 = vweird.f32 %v9272_v38 }
 0x443   :  { %v9474_v53 = vpop.eup %5132  ;;  %vm3057_vm3 = vweird.f32 %v9361_v35  ;;  %5140 = vrcp.f32 %v9469_v1  ;;  %v3044_v19 = vsel %vm9463_vm1, %v9309_v24, %v3040_v54  ;;  %vm9485_vm5 = vcmp.eq.f32.partialorder %v3060_v41, 8.507059e+37 }
 0x444   :  { %v2949_v52 = vmul.f32 %v9409_v7, %v2948_v56  ;;  %v3097_v36 = vmul.f32 %v9474_v53, %v9412_v11  ;;  %v3055_v24 = vadd.f32 %v9361_v35, %v3054_v21  ;;  %v3063_v9 = vor.u32 1.1754944e-38, %v3062_v50  ;;  %vm9505_vm4 = vmor %vm3056_vm2, %vm3057_vm3 }
 0x445   :  { %v5135_v2 = vpop.eup %5134  ;;  %vm2951_vm8 = vweird.f32 %v9341_v58  ;;  %v2955_v43 = vand.u32 2147483647, %v9341_v58  ;;  %v2964_v57 = vmul.f32 %v9414_v10, %v2963_v60  ;;  %5142 = vrcp.f32 %v9471_v59 }
 0x446   :  { %v3098_v25 = vsub.f32 1.0, %v3097_v36  ;;  %v1434_v39 = vmul.f32 1.442695, %v1210_v40  ;;  %v3049_v54 = vsel %vm9437_vm14, %v3048_v62, %v3044_v19  ;;  %v2957_v41 = vand.u32 2147483648, %v9341_v58  ;;  %v9533_v40 = vpop.f32.mrf.mxu2  ;;  %v11862_v19 = vld [vmem:[#allocation22_spill] sm:$0xff] }
 0x447   :  { %v5137_v45 = vpop.eup %5136  ;;  %vm2966_vm9 = vweird.f32 %v9349_v0  ;;  %v2970_v38 = vand.u32 2147483647, %v9349_v0  ;;  %v2950_v12 = vadd.f32 %v9409_v7, %v2949_v52  ;;  %vm2952_vm15 = vweird.f32 %v9409_v7  ;;  %3808 = vmatmul.f32.gmra.mxu2 %v11862_v19 }
 0x448   :  { %v5139_v56 = vpop.eup %5138  ;;  %v9518_v48 = vadd.f32 1.0, %v5135_v2  ;;  %v9520_v21 = vadd.f32 1.0, %v5137_v45  ;;  %v3059_v23 = vsel %vm9505_vm4, %v9361_v35, %v3055_v24  ;;  %vm9527_vm6 = vcmp.eq.f32.partialorder %v2955_v43, 8.507059e+37  ;;  %vm9542_vm13 = vmor %vm2951_vm8, %vm2952_vm15 }
 0x449   :  { %v9522_v50 = vpop.eup %5140  ;;  %vm2967_vm7 = vweird.f32 %v9414_v10  ;;  %v2972_v60 = vand.u32 2147483648, %v9349_v0  ;;  %v2965_v52 = vadd.f32 %v9414_v10, %v2964_v57  ;;  %v3099_v36 = vmul.f32 %v9474_v53, %v3098_v25 }
 0x44a   :  { %v3112_v31 = vmul.f32 %v9522_v50, %v9469_v1  ;;  %5144 = vpow2.f32 %v1434_v39  ;;  %vm3101_vm0 = vweird.f32 %v9412_v11  ;;  %v3105_v30 = vand.u32 2147483647, %v9412_v11  ;;  %vm9568_vm10 = vmor %vm2966_vm9, %vm2967_vm7 }
 0x44b   :  { %5146 = vrcp.f32 %v9518_v48  ;;  %v1211_v2 = vsub.f32 0.0, %v9255_v49  ;;  %v9550_v24 = vpop.eup %5142  ;;  %v2954_v43 = vsel %vm9542_vm13, %v9409_v7, %v2950_v12  ;;  %vm3102_vm11 = vweird.f32 %v9474_v53 }
 0x44c   :  { %5148 = vrcp.f32 %v9520_v21  ;;  %v9557_v58 = vadd.f32 1.0, %v5139_v56  ;;  %v9560_v57 = vmul.f32 %v3049_v54, %v11865_v61  ;;  %v3064_v25 = vsel %vm9485_vm5, %v3063_v9, %v3059_v23  ;;  %v9578_v9 = vpop.f32.mrf.mxu3  ;;  %vm9587_vm12 = vmor %vm3101_vm0, %vm3102_vm11 }
 0x44d   :  { %v2958_v39 = vor.u32 1.1754944e-38, %v2957_v41  ;;  %v3107_v7 = vand.u32 2147483648, %v9412_v11  ;;  %v2969_v56 = vsel %vm9568_vm10, %v9414_v10, %v2965_v52  ;;  %v3100_v54 = vadd.f32 %v9474_v53, %v3099_v36  ;;  %v11868_v41 = vld [vmem:[#allocation23_spill] sm:$0xff] }
 0x44e   :  { %v3113_v12 = vsub.f32 1.0, %v3112_v31  ;;  %v3120_v26 = vand.u32 2147483647, %v9469_v1  ;;  %3921 = vmatmul.f32.gmra.mxu3 %v11868_v41  ;;  %v2973_v23 = vor.u32 1.1754944e-38, %v2972_v60  ;;  %v3122_v10 = vand.u32 2147483648, %v9469_v1  ;;  %v11873_v11 = vld [vmem:[#allocation19_spill] sm:$0xff] }
 0x44f   :  { %v2959_v0 = vsel %vm9527_vm6, %v2958_v39, %v2954_v43  ;;  %v3007_v52 = vmul.f32 %v9550_v24, %v9471_v59  ;;  %vm2971_vm14 = vcmp.eq.f32.partialorder %v2970_v38, 8.507059e+37  ;;  %vm9594_vm1 = vcmp.eq.f32.partialorder %v3105_v30, 8.507059e+37 }
 0x450   :  { %v5145_v36 = vpop.eup %5144  ;;  %5150 = vrcp.f32 %v9557_v58  ;;  %v1436_v62 = vmul.f32 1.442695, %v1211_v2  ;;  %v9602_v35 = vmul.f32 %v3064_v25, %v11873_v11  ;;  %v2974_v43 = vsel %vm2971_vm14, %v2973_v23, %v2969_v56 }
 0x451   :  { %v9599_v60 = vpop.eup %5146  ;;  %v3108_v61 = vor.u32 1.1754944e-38, %v3107_v7  ;;  %vm3116_vm2 = vweird.f32 %v9469_v1  ;;  %v9608_v38 = vmul.f32 %v2959_v0, %v8947_v4  ;;  %v3104_v30 = vsel %vm9587_vm12, %v9474_v53, %v3100_v54 }
 0x452   :  { %v9605_v39 = vpop.eup %5148  ;;  %v3114_v2 = vmul.f32 %v9522_v50, %v3113_v12  ;;  %vm9614_vm3 = vcmp.eq.f32.partialorder %v3120_v26, 8.507059e+37  ;;  %v3017_v25 = vand.u32 2147483648, %v9471_v59  ;;  %v3123_v7 = vor.u32 1.1754944e-38, %v3122_v10 }
 0x453   :  { %11874 = vst [vmem:[#allocation28_spill] sm:$0xff] %v9608_v38  ;;  %v3008_v56 = vsub.f32 1.0, %v3007_v52  ;;  %v3032_v41 = vand.u32 2147483648, %v9518_v48  ;;  %v9620_v23 = vadd.f32 1.0, %v5145_v36  ;;  %v9623_v4 = vmul.f32 %v2974_v43, %v8965_v18  ;;  %v9641_v52 = vpop.f32.mrf.mxu0  ;;  %4040 = vmatmul.f32.gmra.mxu0 %v9161_v29 }
 0x454   :  { %vm3117_vm5 = vweird.f32 %v9522_v50  ;;  %v3022_v53 = vmul.f32 %v9599_v60, %v9518_v48  ;;  %5152 = vpow2.f32 %v1436_v62  ;;  %v3109_v54 = vsel %vm9594_vm1, %v3108_v61, %v3104_v30 }
 0x455   :  { %11877 = vst [vmem:[#allocation29_spill] sm:$0xff] %v9623_v4  ;;  %v3015_v12 = vand.u32 2147483647, %v9471_v59  ;;  %v3157_v26 = vmul.f32 %v9605_v39, %v9520_v21  ;;  %5154 = vrcp.f32 %v9620_v23  ;;  %v3115_v18 = vadd.f32 %v9522_v50, %v3114_v2  ;;  %vm9646_vm4 = vmor %vm3116_vm2, %vm3117_vm5 }
 0x456   :  { %v9634_v0 = vpop.eup %5150  ;;  %vm3011_vm8 = vweird.f32 %v9471_v59  ;;  %v9638_v19 = vor.u32 1.1754944e-38, %v3017_v25  ;;  %v3030_v10 = vand.u32 2147483647, %v9518_v48  ;;  %v3009_v31 = vmul.f32 %v9550_v24, %v3008_v56 }
 0x457   :  { %vm3012_vm9 = vweird.f32 %v9550_v24  ;;  %v9652_v62 = vor.u32 1.1754944e-38, %v3032_v41  ;;  %v1220_v11 = vsub.f32 0.0, %v9343_v42  ;;  %v9656_v43 = vmul.f32 %v3109_v54, %v9011_v20  ;;  %v9667_v41 = vpop.f32.mrf.mxu1  ;;  %4153 = vmatmul.f32.gmra.mxu1 %v9204_v44 }
 0x458   :  { %v3023_v61 = vsub.f32 1.0, %v3022_v53  ;;  %vm3161_vm15 = vweird.f32 %v9520_v21  ;;  %v1221_v29 = vsub.f32 0.0, %v9368_v33  ;;  %vm9660_vm6 = vcmp.eq.f32.partialorder %v3015_v12, 8.507059e+37  ;;  %vm9700_vm10 = vmor %vm3011_vm8, %vm3012_vm9 }
 0x459   :  { %11880 = vst [vmem:[#allocation26_spill] sm:$0xff] %v9656_v43  ;;  %v3158_v30 = vsub.f32 1.0, %v3157_v26  ;;  %v3165_v2 = vand.u32 2147483647, %v9520_v21  ;;  %v3172_v25 = vmul.f32 %v9634_v0, %v9557_v58  ;;  %v1454_v56 = vmul.f32 1.442695, %v1220_v11 }
 0x45a   :  { %v5153_v20 = vpop.eup %5152  ;;  %v3119_v53 = vsel %vm9646_vm4, %v9522_v50, %v3115_v18  ;;  %vm3026_vm7 = vweird.f32 %v9518_v48  ;;  %v3167_v54 = vand.u32 2147483648, %v9520_v21  ;;  %v1456_v12 = vmul.f32 1.442695, %v1221_v29 }
 0x45b   :  { %v1214_v26 = vsub.f32 0.0, %v9443_v63  ;;  %v9676_v43 = vpop.eup %5154  ;;  %v3010_v11 = vadd.f32 %v9550_v24, %v3009_v31  ;;  %vm3176_vm13 = vweird.f32 %v9557_v58  ;;  %v3182_v44 = vand.u32 2147483648, %v9557_v58 }
 0x45c   :  { %v9681_v4 = vadd.f32 1.0, %v5153_v20  ;;  %5156 = vpow2.f32 %v1454_v56  ;;  %v3024_v50 = vmul.f32 %v9599_v60, %v3023_v61  ;;  %vm3027_vm0 = vweird.f32 %v9599_v60  ;;  %v9727_v61 = vpop.f32.mrf.mxu2  ;;  %3811 = vmatmul.f32.gmra.mxu2 %v9207_v17 }
 0x45d   :  { %v3180_v18 = vand.u32 2147483647, %v9557_v58  ;;  %v3067_v36 = vmul.f32 %v9676_v43, %v9620_v23  ;;  %v3124_v29 = vsel %vm9614_vm3, %v3123_v7, %v3119_v53  ;;  %v3159_v31 = vmul.f32 %v9605_v39, %v3158_v30  ;;  %vm9753_vm3 = vmor %vm3026_vm7, %vm3027_vm0 }
 0x45e   :  { %vm9691_vm11 = vcmp.eq.f32.partialorder %v3165_v2, 8.507059e+37  ;;  %v3173_v20 = vsub.f32 1.0, %v3172_v25  ;;  %5158 = vrcp.f32 %v9681_v4  ;;  %v3168_v56 = vor.u32 1.1754944e-38, %v3167_v54 }
 0x45f   :  { %v3068_v45 = vsub.f32 1.0, %v3067_v36  ;;  %5160 = vpow2.f32 %v1456_v12  ;;  %v1442_v7 = vmul.f32 1.442695, %v1214_v26  ;;  %v3014_v30 = vsel %vm9700_vm10, %v9550_v24, %v3010_v11  ;;  %v9811_v2 = vpop.f32.mrf.mxu1  ;;  %4156 = vmatmul.f32.gmra.mxu1 %v9240_v14 }
 0x460   :  { %vm9707_vm12 = vcmp.eq.f32.partialorder %v3030_v10, 8.507059e+37  ;;  %vm3162_vm14 = vweird.f32 %v9605_v39  ;;  %v9712_v25 = vor.u32 1.1754944e-38, %v3182_v44  ;;  %v1215_v59 = vsub.f32 0.0, %v9445_v51 }
 0x461   :  { %v9716_v53 = vmul.f32 %v3124_v29, %v9021_v15  ;;  %v3025_v54 = vadd.f32 %v9599_v60, %v3024_v50  ;;  %5162 = vpow2.f32 %v1442_v7  ;;  %v1224_v12 = vsub.f32 0.0, %v9492_v47  ;;  %vm9737_vm2 = vmor %vm3161_vm15, %vm3162_vm14 }
 0x462   :  { %v5157_v26 = vpop.eup %5156  ;;  %v3160_v24 = vadd.f32 %v9605_v39, %v3159_v31  ;;  %v3174_v10 = vmul.f32 %v9634_v0, %v3173_v20  ;;  %vm9722_vm1 = vcmp.eq.f32.partialorder %v3180_v18, 8.507059e+37  ;;  %v1444_v44 = vmul.f32 1.442695, %v1215_v59  ;;  %v9744_v20 = vpop.f32.mrf.mxu3  ;;  %3924 = vmatmul.f32.gmra.mxu3 %v9215_v16 }
 0x463   :  { %v1225_v36 = vsub.f32 0.0, %v9494_v46  ;;  %v3019_v15 = vsel %vm9660_vm6, %v9638_v19, %v3014_v30  ;;  %v3069_v18 = vmul.f32 %v9676_v43, %v3068_v45  ;;  %v9742_v29 = vadd.f32 1.0, %v5157_v26 }
 0x464   :  { %v1462_v31 = vmul.f32 1.442695, %v1224_v12  ;;  %v9747_v17 = vpop.eup %5158  ;;  %vm3177_vm5 = vweird.f32 %v9634_v0  ;;  %v3075_v19 = vand.u32 2147483647, %v9620_v23  ;;  %5164 = vpow2.f32 %v1444_v44  ;;  %v9845_v11 = vpop.f32.mrf.mxu2  ;;  %3814 = vmatmul.f32.gmra.mxu2 %v9364_v28 }
 0x465   :  { %v1464_v1 = vmul.f32 1.442695, %v1225_v36  ;;  %v5161_v45 = vpop.eup %5160  ;;  %v3029_v16 = vsel %vm9753_vm3, %v9599_v60, %v3025_v54  ;;  %v3077_v7 = vand.u32 2147483648, %v9620_v23  ;;  %v3082_v48 = vmul.f32 %v9747_v17, %v9681_v4  ;;  %vm9774_vm4 = vmor %vm3176_vm13, %vm3177_vm5 }
 0x466   :  { %5166 = vrcp.f32 %v9742_v29  ;;  %v3164_v30 = vsel %vm9737_vm2, %v9605_v39, %v3160_v24  ;;  %v3175_v59 = vadd.f32 %v9634_v0, %v3174_v10  ;;  %vm3072_vm8 = vweird.f32 %v9676_v43 }
 0x467   :  { %v1218_v12 = vsub.f32 0.0, %v9533_v40  ;;  %v5163_v26 = vpop.eup %5162  ;;  %v3070_v54 = vadd.f32 %v9676_v43, %v3069_v18  ;;  %v3083_v44 = vsub.f32 1.0, %v3082_v48  ;;  %v9779_v36 = vadd.f32 1.0, %v5161_v45 }
 0x468   :  { %5168 = vpow2.f32 %v1462_v31  ;;  %v9782_v39 = vmul.f32 %v3019_v15, %v9103_v6  ;;  %vm3071_vm9 = vweird.f32 %v9620_v23  ;;  %v9785_v24 = vadd.f32 1.0, %v5163_v26 }
 0x469   :  { %5170 = vpow2.f32 %v1464_v1  ;;  %v3034_v58 = vsel %vm9707_vm12, %v9652_v62, %v3029_v16  ;;  %v3169_v10 = vsel %vm9691_vm11, %v3168_v56, %v3164_v30  ;;  %v3090_v50 = vand.u32 2147483647, %v9681_v4  ;;  %vm9799_vm15 = vmor %vm3071_vm9, %vm3072_vm8  ;;  %v9809_v56 = vpop.f32.mrf.mxu0  ;;  %4043 = vmatmul.f32.gmra.mxu0 %v9218_v8 }
 0x46a   :  { %5172 = vrcp.f32 %v9779_v36  ;;  %v5165_v18 = vpop.eup %5164  ;;  %v3179_v6 = vsel %vm9774_vm4, %v9634_v0, %v3175_v59  ;;  %vm9803_vm6 = vcmp.eq.f32.partialorder %v3075_v19, 8.507059e+37  ;;  %v3084_v38 = vmul.f32 %v9747_v17, %v3083_v44 }
 0x46b   :  { %5174 = vrcp.f32 %v9785_v24  ;;  %v3074_v15 = vsel %vm9799_vm15, %v9676_v43, %v3070_v54  ;;  %v3078_v31 = vor.u32 1.1754944e-38, %v3077_v7  ;;  %v9820_v21 = vadd.f32 1.0, %v5165_v18 }
 0x46c   :  { %v9815_v0 = vpop.eup %5166  ;;  %v1450_v19 = vmul.f32 1.442695, %v1218_v12  ;;  %v9823_v1 = vmul.f32 %v3034_v58, %v9105_v13  ;;  %v9826_v45 = vmul.f32 %v3169_v10, %v9192_v32  ;;  %v3092_v8 = vand.u32 2147483648, %v9681_v4 }
 0x46d   :  { %v3217_v14 = vmul.f32 %v9815_v0, %v9742_v29  ;;  %v3184_v43 = vsel %vm9722_vm1, %v9712_v25, %v3179_v6  ;;  %vm3086_vm7 = vweird.f32 %v9681_v4  ;;  %vm9835_vm13 = vcmp.eq.f32.partialorder %v3090_v50, 8.507059e+37 }
 0x46e   :  { %v5169_v16 = vpop.eup %5168  ;;  %5176 = vrcp.f32 %v9820_v21  ;;  %v3079_v32 = vsel %vm9803_vm6, %v3078_v31, %v3074_v15  ;;  %v3085_v48 = vadd.f32 %v9747_v17, %v3084_v38  ;;  %vm3087_vm0 = vweird.f32 %v9747_v17  ;;  %v9879_v38 = vpop.f32.mrf.mxu3  ;;  %3927 = vmatmul.f32.gmra.mxu3 %v9402_v3 }
 0x46f   :  { %v5171_v13 = vpop.eup %5170  ;;  %v1219_v30 = vsub.f32 0.0, %v9578_v9  ;;  %v3218_v59 = vsub.f32 1.0, %v3217_v14  ;;  %v9850_v12 = vadd.f32 1.0, %v5169_v16  ;;  %5178 = vpow2.f32 %v1450_v19  ;;  %vm9874_vm11 = vmor %vm3086_vm7, %vm3087_vm0 }
 0x470   :  { %v9848_v25 = vpop.eup %5172  ;;  %v9852_v26 = vadd.f32 1.0, %v5171_v13  ;;  %v3093_v54 = vor.u32 1.1754944e-38, %v3092_v8  ;;  %v3225_v44 = vand.u32 2147483647, %v9742_v29  ;;  %v3227_v58 = vand.u32 2147483648, %v9742_v29 }
 0x471   :  { %v9854_v60 = vpop.eup %5174  ;;  %v3232_v10 = vmul.f32 %v9848_v25, %v9779_v36  ;;  %v9861_v28 = vmul.f32 %v3184_v43, %v9194_v5  ;;  %5180 = vrcp.f32 %v9850_v12  ;;  %v1228_v18 = vsub.f32 0.0, %v9641_v52 }
 0x472   :  { %v3127_v50 = vmul.f32 %v9854_v60, %v9785_v24  ;;  %v9868_v6 = vmul.f32 %v3079_v32, %v9228_v27  ;;  %vm3221_vm10 = vweird.f32 %v9742_v29  ;;  %v1452_v62 = vmul.f32 1.442695, %v1219_v30 }
 0x473   :  { %v3233_v5 = vsub.f32 1.0, %v3232_v10  ;;  %v3089_v27 = vsel %vm9874_vm11, %v9747_v17, %v3085_v48  ;;  %v3219_v4 = vmul.f32 %v9815_v0, %v3218_v59  ;;  %5182 = vrcp.f32 %v9852_v26 }
 0x474   :  { %v9882_v15 = vpop.eup %5176  ;;  %v3128_v31 = vsub.f32 1.0, %v3127_v50  ;;  %vm9889_vm12 = vcmp.eq.f32.partialorder %v3225_v44, 8.507059e+37  ;;  %v3228_v8 = vor.u32 1.1754944e-38, %v3227_v58  ;;  %v3240_v14 = vand.u32 2147483647, %v9779_v36 }
 0x475   :  { %v3242_v3 = vand.u32 2147483648, %v9779_v36  ;;  %v5179_v16 = vpop.eup %5178  ;;  %vm3222_vm14 = vweird.f32 %v9815_v0  ;;  %v3234_v43 = vmul.f32 %v9848_v25, %v3233_v5  ;;  %v3135_v17 = vand.u32 2147483647, %v9785_v24 }
 0x476   :  { %v3137_v13 = vand.u32 2147483648, %v9785_v24  ;;  %v3094_v32 = vsel %vm9835_vm13, %v3093_v54, %v3089_v27  ;;  %vm3236_vm1 = vweird.f32 %v9779_v36  ;;  %vm3237_vm2 = vweird.f32 %v9848_v25  ;;  %vm9913_vm3 = vmor %vm3221_vm10, %vm3222_vm14 }
 0x477   :  { %v3142_v48 = vmul.f32 %v9882_v15, %v9820_v21  ;;  %v9905_v30 = vpop.eup %5180  ;;  %v3220_v59 = vadd.f32 %v9815_v0, %v3219_v4  ;;  %v3129_v44 = vmul.f32 %v9854_v60, %v3128_v31  ;;  %v9909_v58 = vadd.f32 1.0, %v5179_v16  ;;  %vm9939_vm9 = vmor %vm3236_vm1, %vm3237_vm2  ;;  %v9945_v16 = vpop.f32.mrf.mxu0  ;;  %4046 = vmatmul.f32.gmra.mxu0 %v9405_v34 }
 0x478   :  { %5184 = vpow2.f32 %v1452_v62  ;;  %vm9917_vm5 = vcmp.eq.f32.partialorder %v3240_v14, 8.507059e+37  ;;  %vm3131_vm8 = vweird.f32 %v9785_v24  ;;  %v3152_v10 = vand.u32 2147483648, %v9820_v21  ;;  %11915 = vst [vmem:[#allocation27_spill] sm:$0xff] %v9945_v16 }
 0x479   :  { %v3277_v50 = vmul.f32 %v9905_v30, %v9850_v12  ;;  %v9925_v23 = vpop.eup %5182  ;;  %v3235_v5 = vadd.f32 %v9848_v25, %v3234_v43  ;;  %v3243_v29 = vor.u32 1.1754944e-38, %v3242_v3  ;;  %vm9928_vm4 = vcmp.eq.f32.partialorder %v3135_v17, 8.507059e+37 }
 0x47a   :  { %v3138_v27 = vor.u32 1.1754944e-38, %v3137_v13  ;;  %v9933_v4 = vmul.f32 %v3094_v32, %v9255_v49  ;;  %vm3132_vm15 = vweird.f32 %v9854_v60  ;;  %v3143_v14 = vsub.f32 1.0, %v3142_v48 }
 0x47b   :  { %v3150_v3 = vand.u32 2147483647, %v9820_v21  ;;  %v3224_v49 = vsel %vm9913_vm3, %v9815_v0, %v3220_v59  ;;  %v3130_v43 = vadd.f32 %v9854_v60, %v3129_v44  ;;  %vm3146_vm6 = vweird.f32 %v9820_v21  ;;  %vm9971_vm0 = vmor %vm3131_vm8, %vm3132_vm15 }
 0x47c   :  { %v3278_v36 = vsub.f32 1.0, %v3277_v50  ;;  %5186 = vrcp.f32 %v9909_v58  ;;  %v9954_v17 = vor.u32 1.1754944e-38, %v3152_v10  ;;  %vm3281_vm7 = vweird.f32 %v9850_v12 }
 0x47d   :  { %v3285_v13 = vand.u32 2147483647, %v9850_v12  ;;  %v3292_v34 = vmul.f32 %v9925_v23, %v9852_v26  ;;  %v3239_v0 = vsel %vm9939_vm9, %v9848_v25, %v3235_v5  ;;  %vm3147_vm13 = vweird.f32 %v9882_v15 }
 0x47e   :  { %v5185_v32 = vpop.eup %5184  ;;  %v3287_v48 = vand.u32 2147483648, %v9850_v12  ;;  %v1470_v59 = vmul.f32 1.442695, %v1228_v18  ;;  %v3229_v44 = vsel %vm9889_vm12, %v3228_v8, %v3224_v49  ;;  %v3144_v10 = vmul.f32 %v9882_v15, %v3143_v14  ;;  %vm10022_vm1 = vmor %vm3146_vm6, %vm3147_vm13 }
 0x47f   :  { %vm3296_vm11 = vweird.f32 %v9852_v26  ;;  %v3302_v25 = vand.u32 2147483648, %v9852_v26  ;;  %v9978_v50 = vadd.f32 1.0, %v5185_v32  ;;  %v3134_v18 = vsel %vm9971_vm0, %v9854_v60, %v3130_v43 }
 0x480   :  { %v3279_v19 = vmul.f32 %v9905_v30, %v3278_v36  ;;  %5188 = vpow2.f32 %v1470_v59  ;;  %v1229_v24 = vsub.f32 0.0, %v9667_v41  ;;  %v3244_v8 = vsel %vm9917_vm5, %v3243_v29, %v3239_v0 }
 0x481   :  { %vm9987_vm10 = vcmp.eq.f32.partialorder %v3285_v13, 8.507059e+37  ;;  %v3293_v31 = vsub.f32 1.0, %v3292_v34  ;;  %v3300_v14 = vand.u32 2147483647, %v9852_v26  ;;  %5190 = vrcp.f32 %v9978_v50 }
 0x482   :  { %v9993_v49 = vpop.eup %5186  ;;  %v9996_v60 = vmul.f32 %v3229_v44, %v9343_v42  ;;  %vm9998_vm12 = vcmp.eq.f32.partialorder %v3150_v3, 8.507059e+37  ;;  %vm3282_vm14 = vweird.f32 %v9905_v30  ;;  %v3288_v54 = vor.u32 1.1754944e-38, %v3287_v48  ;;  %v10010_v42 = vpop.f32.mrf.mxu1  ;;  %4159 = vmatmul.f32.gmra.mxu1 %v9450_v22 }
 0x483   :  { %v1472_v29 = vmul.f32 1.442695, %v1229_v24  ;;  %v3139_v36 = vsel %vm9928_vm4, %v3138_v27, %v3134_v18  ;;  %v3145_v13 = vadd.f32 %v9882_v15, %v3144_v10  ;;  %v10006_v34 = vor.u32 1.1754944e-38, %v3302_v25  ;;  %11922 = vst [vmem:[#allocation33_spill] sm:$0xff] %v10010_v42  ;;  %vm10040_vm3 = vmor %vm3281_vm7, %vm3282_vm14 }
 0x484   :  { %v3187_v32 = vmul.f32 %v9993_v49, %v9909_v58  ;;  %v10014_v3 = vmul.f32 %v3244_v8, %v9368_v33  ;;  %v3280_v0 = vadd.f32 %v9905_v30, %v3279_v19  ;;  %v1222_v62 = vsub.f32 0.0, %v9727_v61 }
 0x485   :  { %5192 = vpow2.f32 %v1472_v29  ;;  %v3294_v48 = vmul.f32 %v9925_v23, %v3293_v31  ;;  %vm10027_vm2 = vcmp.eq.f32.partialorder %v3300_v14, 8.507059e+37  ;;  %v1223_v59 = vsub.f32 0.0, %v9744_v20  ;;  %v10056_v29 = vpop.f32.mrf.mxu2  ;;  %3817 = vmatmul.f32.gmra.mxu2 %v9453_v37 }
 0x486   :  { %v3188_v33 = vsub.f32 1.0, %v3187_v32  ;;  %v1232_v44 = vsub.f32 0.0, %v9809_v56  ;;  %v5189_v7 = vpop.eup %5188  ;;  %v10034_v10 = vmul.f32 %v3139_v36, %v9443_v63  ;;  %vm3297_vm5 = vweird.f32 %v9925_v23  ;;  %v10058_v36 = vpop.f32.mrf.mxu3  ;;  %3930 = vmatmul.f32.gmra.mxu3 %v9477_v55 }
 0x487   :  { %v1458_v25 = vmul.f32 1.442695, %v1222_v62  ;;  %v1233_v18 = vsub.f32 0.0, %v9811_v2  ;;  %v10046_v19 = vpop.eup %5190  ;;  %v3149_v63 = vsel %vm10022_vm1, %v9882_v15, %v3145_v13  ;;  %v10051_v24 = vadd.f32 1.0, %v5189_v7  ;;  %vm10072_vm4 = vmor %vm3296_vm11, %vm3297_vm5 }
 0x488   :  { %v1460_v8 = vmul.f32 1.442695, %v1223_v59  ;;  %v1478_v31 = vmul.f32 1.442695, %v1232_v44  ;;  %vm3191_vm8 = vweird.f32 %v9909_v58  ;;  %v3202_v12 = vmul.f32 %v10046_v19, %v9978_v50 }
 0x489   :  { %5194 = vpow2.f32 %v1458_v25  ;;  %v1480_v14 = vmul.f32 1.442695, %v1233_v18  ;;  %v3284_v15 = vsel %vm10040_vm3, %v9905_v30, %v3280_v0  ;;  %v3295_v13 = vadd.f32 %v9925_v23, %v3294_v48 }
 0x48a   :  { %v3189_v32 = vmul.f32 %v9993_v49, %v3188_v33  ;;  %5196 = vrcp.f32 %v10051_v24  ;;  %v3195_v37 = vand.u32 2147483647, %v9909_v58  ;;  %v3203_v55 = vsub.f32 1.0, %v3202_v12  ;;  %v10096_v21 = vpop.f32.mrf.mxu1  ;;  %4162 = vmatmul.f32.gmra.mxu1 %v9602_v35 }
 0x48b   :  { %v5193_v62 = vpop.eup %5192  ;;  %5198 = vpow2.f32 %v1460_v8  ;;  %v1226_v30 = vsub.f32 0.0, %v9845_v11  ;;  %v3154_v0 = vsel %vm9998_vm12, %v9954_v17, %v3149_v63  ;;  %v3197_v48 = vand.u32 2147483648, %v9909_v58  ;;  %v10094_v17 = vpop.f32.mrf.mxu0  ;;  %4049 = vmatmul.f32.gmra.mxu0 %v9560_v57 }
 0x48c   :  { %v10082_v33 = vadd.f32 1.0, %v5193_v62  ;;  %5200 = vpow2.f32 %v1478_v31  ;;  %v3289_v26 = vsel %vm9987_vm10, %v3288_v54, %v3284_v15  ;;  %v3210_v59 = vand.u32 2147483647, %v9978_v50 }
 0x48d   :  { %v3212_v44 = vand.u32 2147483648, %v9978_v50  ;;  %5202 = vpow2.f32 %v1480_v14  ;;  %v3299_v7 = vsel %vm10072_vm4, %v9925_v23, %v3295_v13  ;;  %v3190_v43 = vadd.f32 %v9993_v49, %v3189_v32 }
 0x48e   :  { %vm3192_vm9 = vweird.f32 %v9993_v49  ;;  %5204 = vrcp.f32 %v10082_v33  ;;  %v10101_v54 = vmul.f32 %v3154_v0, %v9445_v51  ;;  %vm10103_vm15 = vcmp.eq.f32.partialorder %v3195_v37, 8.507059e+37  ;;  %v10142_v37 = vpop.f32.mrf.mxu2 }
 0x48f   :  { %v5195_v5 = vpop.eup %5194  ;;  %v3204_v25 = vmul.f32 %v10046_v19, %v3203_v55  ;;  %v1466_v18 = vmul.f32 1.442695, %v1226_v30  ;;  %v10111_v8 = vmul.f32 %v3289_v26, %v9492_v47  ;;  %v3198_v31 = vor.u32 1.1754944e-38, %v3197_v48  ;;  %vm10123_vm7 = vmor %vm3191_vm8, %vm3192_vm9  ;;  %v11937_v55 = vld [vmem:[#allocation28_spill] sm:$0xff] }
 0x490   :  { %v10108_v63 = vpop.eup %5196  ;;  %vm3206_vm6 = vweird.f32 %v9978_v50  ;;  %v10114_v57 = vadd.f32 1.0, %v5195_v5  ;;  %v3304_v51 = vsel %vm10027_vm2, %v10006_v34, %v3299_v7  ;;  %vm10127_vm13 = vcmp.eq.f32.partialorder %v3210_v59, 8.507059e+37  ;;  %3820 = vmatmul.f32.gmra.mxu2 %v11937_v55 }
 0x491   :  { %v5199_v35 = vpop.eup %5198  ;;  %v3213_v14 = vor.u32 1.1754944e-38, %v3212_v44  ;;  %v3337_v15 = vmul.f32 %v10108_v63, %v10051_v24  ;;  %v3194_v34 = vsel %vm10123_vm7, %v9993_v49, %v3190_v43  ;;  %vm3207_vm0 = vweird.f32 %v10046_v19 }
 0x492   :  { %v5201_v13 = vpop.eup %5200  ;;  %v3345_v58 = vand.u32 2147483647, %v10051_v24  ;;  %5206 = vrcp.f32 %v10114_v57  ;;  %v3205_v32 = vadd.f32 %v10046_v19, %v3204_v25  ;;  %v10140_v27 = vadd.f32 1.0, %v5199_v35  ;;  %vm10164_vm10 = vmor %vm3206_vm6, %vm3207_vm0 }
 0x493   :  { %v5203_v22 = vpop.eup %5202  ;;  %v3338_v62 = vsub.f32 1.0, %v3337_v15  ;;  %5208 = vpow2.f32 %v1466_v18  ;;  %v10148_v49 = vmul.f32 %v3304_v51, %v9494_v46  ;;  %v3347_v0 = vand.u32 2147483648, %v10051_v24  ;;  %v10262_v43 = vpop.f32.mrf.mxu0 }
 0x494   :  { %v10145_v30 = vpop.eup %5204  ;;  %v10151_v48 = vadd.f32 1.0, %v5201_v13  ;;  %v1227_v26 = vsub.f32 0.0, %v9879_v38  ;;  %v3199_v59 = vsel %vm10103_vm15, %v3198_v31, %v3194_v34  ;;  %vm3341_vm11 = vweird.f32 %v10051_v24 }
 0x495   :  { %v3339_v44 = vmul.f32 %v10108_v63, %v3338_v62  ;;  %v3352_v7 = vmul.f32 %v10145_v30, %v10082_v33  ;;  %vm10168_vm12 = vcmp.eq.f32.partialorder %v3345_v58, 8.507059e+37  ;;  %v3360_v5 = vand.u32 2147483647, %v10082_v33  ;;  %v10192_v58 = vpop.f32.mrf.mxu3 }
 0x496   :  { %5210 = vrcp.f32 %v10140_v27  ;;  %v10174_v23 = vadd.f32 1.0, %v5203_v22  ;;  %v3209_v25 = vsel %vm10164_vm10, %v10046_v19, %v3205_v32  ;;  %vm3342_vm14 = vweird.f32 %v10108_v63  ;;  %v11942_v22 = vld [vmem:[#allocation29_spill] sm:$0xff] }
 0x497   :  { %v3353_v50 = vsub.f32 1.0, %v3352_v7  ;;  %5212 = vrcp.f32 %v10151_v48  ;;  %v10184_v31 = vmul.f32 %v3199_v59, %v9533_v40  ;;  %v3348_v35 = vor.u32 1.1754944e-38, %v3347_v0  ;;  %3933 = vmatmul.f32.gmra.mxu3 %v11942_v22  ;;  %vm10201_vm2 = vmor %vm3341_vm11, %vm3342_vm14 }
 0x498   :  { %v10181_v18 = vpop.eup %5206  ;;  %v3362_v51 = vand.u32 2147483648, %v10082_v33  ;;  %v1468_v12 = vmul.f32 1.442695, %v1227_v26  ;;  %v3340_v13 = vadd.f32 %v10108_v63, %v3339_v44  ;;  %vm3356_vm1 = vweird.f32 %v10082_v33 }
 0x499   :  { %v5209_v15 = vpop.eup %5208  ;;  %v3354_v34 = vmul.f32 %v10145_v30, %v3353_v50  ;;  %v3247_v19 = vmul.f32 %v10181_v18, %v10114_v57  ;;  %v3214_v40 = vsel %vm10127_vm13, %v3213_v14, %v3209_v25  ;;  %vm10205_vm3 = vcmp.eq.f32.partialorder %v3360_v5, 8.507059e+37 }
 0x49a   :  { %5214 = vrcp.f32 %v10174_v23  ;;  %v1236_v55 = vsub.f32 0.0, %v9945_v16  ;;  %vm3357_vm5 = vweird.f32 %v10145_v30  ;;  %v3255_v14 = vand.u32 2147483647, %v10114_v57 }
 0x49b   :  { %v3248_v47 = vsub.f32 1.0, %v3247_v19  ;;  %v3257_v0 = vand.u32 2147483648, %v10114_v57  ;;  %v3363_v26 = vor.u32 1.1754944e-38, %v3362_v51  ;;  %v10216_v59 = vadd.f32 1.0, %v5209_v15  ;;  %vm10235_vm8 = vmor %vm3356_vm1, %vm3357_vm5 }
 0x49c   :  { %v10214_v24 = vpop.eup %5210  ;;  %5216 = vpow2.f32 %v1468_v12  ;;  %v1237_v44 = vsub.f32 0.0, %v10010_v42  ;;  %v3344_v46 = vsel %vm10201_vm2, %v10108_v63, %v3340_v13  ;;  %v3355_v5 = vadd.f32 %v10145_v30, %v3354_v34 }
 0x49d   :  { %v10219_v7 = vpop.eup %5212  ;;  %v3249_v25 = vmul.f32 %v10181_v18, %v3248_v47  ;;  %v3262_v50 = vmul.f32 %v10214_v24, %v10140_v27  ;;  %v10229_v51 = vmul.f32 %v3214_v40, %v9578_v9  ;;  %vm3251_vm4 = vweird.f32 %v10114_v57 }
 0x49e   :  { %v3272_v63 = vand.u32 2147483648, %v10140_v27  ;;  %v3397_v15 = vmul.f32 %v10219_v7, %v10151_v48  ;;  %vm10243_vm9 = vcmp.eq.f32.partialorder %v3255_v14, 8.507059e+37  ;;  %v3258_v9 = vor.u32 1.1754944e-38, %v3257_v0 }
 0x49f   :  { %v3263_v34 = vsub.f32 1.0, %v3262_v50  ;;  %v3407_v19 = vand.u32 2147483648, %v10151_v48  ;;  %v3349_v22 = vsel %vm10168_vm12, %v3348_v35, %v3344_v46  ;;  %vm3252_vm15 = vweird.f32 %v10181_v18  ;;  %v10264_v35 = vpop.f32.mrf.mxu1  ;;  %v11952_v46 = vld [vmem:[#allocation26_spill] sm:$0xff]  ;;  %4165 = vmatmul.f32.gmra.mxu1 %v9716_v53 }
 0x4a0   :  { %v10248_v33 = vpop.eup %5214  ;;  %vm3266_vm6 = vweird.f32 %v10140_v27  ;;  %v3270_v40 = vand.u32 2147483647, %v10140_v27  ;;  %5218 = vrcp.f32 %v10216_v59  ;;  %v3359_v32 = vsel %vm10235_vm8, %v10145_v30, %v3355_v5  ;;  %11951 = vst [vmem:[#allocation30_spill] sm:$0xff] %v10264_v35  ;;  %4052 = vmatmul.f32.gmra.mxu0 %v11952_v46  ;;  %vm10285_vm13 = vmor %vm3251_vm4, %vm3252_vm15 }
 0x4a1   :  { %v3250_v47 = vadd.f32 %v10181_v18, %v3249_v25  ;;  %v3398_v14 = vsub.f32 1.0, %v3397_v15  ;;  %v3412_v0 = vmul.f32 %v10248_v33, %v10174_v23  ;;  %v3264_v42 = vmul.f32 %v10214_v24, %v3263_v34 }
 0x4a2   :  { %v5217_v50 = vpop.eup %5216  ;;  %v3273_v16 = vor.u32 1.1754944e-38, %v3272_v63  ;;  %vm3401_vm7 = vweird.f32 %v10151_v48  ;;  %v3405_v30 = vand.u32 2147483647, %v10151_v48  ;;  %v10271_v5 = vor.u32 1.1754944e-38, %v3407_v19 }
 0x4a3   :  { %v3413_v25 = vsub.f32 1.0, %v3412_v0  ;;  %v3420_v12 = vand.u32 2147483647, %v10174_v23  ;;  %v10274_v15 = vadd.f32 1.0, %v5217_v50  ;;  %v10277_v35 = vmul.f32 %v3349_v22, %v9641_v52 }
 0x4a4   :  { %v3364_v53 = vsel %vm10205_vm3, %v3363_v26, %v3359_v32  ;;  %vm3416_vm0 = vweird.f32 %v10174_v23  ;;  %v3422_v34 = vand.u32 2147483648, %v10174_v23  ;;  %v3254_v52 = vsel %vm10285_vm13, %v10181_v18, %v3250_v47  ;;  %v10300_v26 = vpop.f32.mrf.mxu2  ;;  %3823 = vmatmul.f32.gmra.mxu2 %v9782_v39 }
 0x4a5   :  { %vm10294_vm11 = vcmp.eq.f32.partialorder %v3270_v40, 8.507059e+37  ;;  %v3399_v62 = vmul.f32 %v10219_v7, %v3398_v14  ;;  %5220 = vrcp.f32 %v10274_v15  ;;  %v1486_v57 = vmul.f32 1.442695, %v1236_v55  ;;  %v10322_v14 = vpop.f32.mrf.mxu3  ;;  %3936 = vmatmul.f32.gmra.mxu3 %v9823_v1 }
 0x4a6   :  { %v10303_v22 = vpop.eup %5218  ;;  %v3265_v32 = vadd.f32 %v10214_v24, %v3264_v42  ;;  %vm3267_vm10 = vweird.f32 %v10214_v24  ;;  %vm3402_vm12 = vweird.f32 %v10219_v7  ;;  %vm10308_vm14 = vcmp.eq.f32.partialorder %v3405_v30, 8.507059e+37 }
 0x4a7   :  { %v1488_v40 = vmul.f32 1.442695, %v1237_v44  ;;  %v10313_v47 = vmul.f32 %v3364_v53, %v9667_v41  ;;  %v3414_v55 = vmul.f32 %v10248_v33, %v3413_v25  ;;  %vm10316_vm1 = vcmp.eq.f32.partialorder %v3420_v12, 8.507059e+37  ;;  %vm10331_vm3 = vmor %vm3266_vm6, %vm3267_vm10 }
 0x4a8   :  { %v3307_v42 = vmul.f32 %v10303_v22, %v10216_v59  ;;  %v3259_v0 = vsel %vm10243_vm9, %v3258_v9, %v3254_v52  ;;  %vm3417_vm2 = vweird.f32 %v10248_v33  ;;  %v3423_v41 = vor.u32 1.1754944e-38, %v3422_v34  ;;  %vm10348_vm5 = vmor %vm3401_vm7, %vm3402_vm12 }
 0x4a9   :  { %v3315_v44 = vand.u32 2147483647, %v10216_v59  ;;  %v3400_v50 = vadd.f32 %v10219_v7, %v3399_v62  ;;  %5222 = vpow2.f32 %v1486_v57  ;;  %v1230_v1 = vsub.f32 0.0, %v10056_v29  ;;  %vm10359_vm8 = vmor %vm3416_vm0, %vm3417_vm2 }
 0x4aa   :  { %v3308_v30 = vsub.f32 1.0, %v3307_v42  ;;  %v3269_v13 = vsel %vm10331_vm3, %v10214_v24, %v3265_v32  ;;  %5224 = vpow2.f32 %v1488_v40  ;;  %v1231_v9 = vsub.f32 0.0, %v10058_v36 }
 0x4ab   :  { %v1240_v25 = vsub.f32 0.0, %v10094_v17  ;;  %v10342_v27 = vpop.eup %5220  ;;  %v3415_v53 = vadd.f32 %v10248_v33, %v3414_v55  ;;  %v1474_v24 = vmul.f32 1.442695, %v1230_v1  ;;  %v1241_v34 = vsub.f32 0.0, %v10096_v21  ;;  %v10379_v1 = vpop.f32.mrf.mxu0  ;;  %4055 = vmatmul.f32.gmra.mxu0 %v9826_v45 }
 0x4ac   :  { %v3309_v63 = vmul.f32 %v10303_v22, %v3308_v30  ;;  %vm3311_vm4 = vweird.f32 %v10216_v59  ;;  %v3322_v48 = vmul.f32 %v10342_v27, %v10274_v15  ;;  %v1476_v62 = vmul.f32 1.442695, %v1231_v9 }
 0x4ad   :  { %v1494_v57 = vmul.f32 1.442695, %v1240_v25  ;;  %v10367_v32 = vmul.f32 %v3259_v0, %v9727_v61  ;;  %v3317_v40 = vand.u32 2147483648, %v10216_v59  ;;  %5226 = vpow2.f32 %v1474_v24  ;;  %v10381_v61 = vpop.f32.mrf.mxu1  ;;  %4168 = vmatmul.f32.gmra.mxu1 %v9861_v28 }
 0x4ae   :  { %v1496_v55 = vmul.f32 1.442695, %v1241_v34  ;;  %v3274_v23 = vsel %vm10294_vm11, %v3273_v16, %v3269_v13  ;;  %v3404_v42 = vsel %vm10348_vm5, %v10219_v7, %v3400_v50  ;;  %vm10375_vm9 = vcmp.eq.f32.partialorder %v3315_v44, 8.507059e+37 }
 0x4af   :  { %v3323_v30 = vsub.f32 1.0, %v3322_v48  ;;  %5228 = vpow2.f32 %v1476_v62  ;;  %v5223_v19 = vpop.eup %5222  ;;  %v3419_v16 = vsel %vm10359_vm8, %v10248_v33, %v3415_v53  ;;  %v3310_v7 = vadd.f32 %v10303_v22, %v3309_v63  ;;  %v10406_v53 = vpop.f32.mrf.mxu2  ;;  %3826 = vmatmul.f32.gmra.mxu2 %v9868_v6 }
 0x4b0   :  { %vm3312_vm15 = vweird.f32 %v10303_v22  ;;  %5230 = vpow2.f32 %v1494_v57  ;;  %v5225_v0 = vpop.eup %5224  ;;  %v10391_v50 = vadd.f32 1.0, %v5223_v19  ;;  %v1234_v45 = vsub.f32 0.0, %v10142_v37  ;;  %v10408_v63 = vpop.f32.mrf.mxu3  ;;  %3939 = vmatmul.f32.gmra.mxu3 %v9933_v4 }
 0x4b1   :  { %v3324_v44 = vmul.f32 %v10342_v27, %v3323_v30  ;;  %5232 = vpow2.f32 %v1496_v55  ;;  %v3409_v28 = vsel %vm10308_vm14, %v10271_v5, %v3404_v42  ;;  %v3330_v13 = vand.u32 2147483647, %v10274_v15  ;;  %vm10419_vm7 = vmor %vm3311_vm4, %vm3312_vm15 }
 0x4b2   :  { %v3332_v33 = vand.u32 2147483648, %v10274_v15  ;;  %v10399_v9 = vadd.f32 1.0, %v5225_v0  ;;  %v3424_v25 = vsel %vm10316_vm1, %v3423_v41, %v3419_v16  ;;  %vm3327_vm6 = vweird.f32 %v10342_v27 }
 0x4b3   :  { %v3325_v12 = vadd.f32 %v10342_v27, %v3324_v44  ;;  %5234 = vrcp.f32 %v10391_v50  ;;  %v5227_v5 = vpop.eup %5226  ;;  %v10413_v18 = vmul.f32 %v3274_v23, %v9744_v20  ;;  %v3318_v41 = vor.u32 1.1754944e-38, %v3317_v40  ;;  %v10454_v55 = vpop.f32.mrf.mxu0  ;;  %4058 = vmatmul.f32.gmra.mxu0 %v9996_v60 }
 0x4b4   :  { %vm3326_vm13 = vweird.f32 %v10274_v15  ;;  %5236 = vrcp.f32 %v10399_v9  ;;  %v10426_v4 = vmul.f32 %v3409_v28, %v9809_v56  ;;  %v3314_v20 = vsel %vm10419_vm7, %v10303_v22, %v3310_v7 }
 0x4b5   :  { %v5229_v6 = vpop.eup %5228  ;;  %v10431_v24 = vadd.f32 1.0, %v5227_v5  ;;  %v1482_v59 = vmul.f32 1.442695, %v1234_v45  ;;  %v10434_v52 = vmul.f32 %v3424_v25, %v9811_v2  ;;  %vm10438_vm0 = vmor %vm3326_vm13, %vm3327_vm6  ;;  %vm10442_vm11 = vcmp.eq.f32.partialorder %v3330_v13, 8.507059e+37  ;;  %v10456_v23 = vpop.f32.mrf.mxu1  ;;  %4171 = vmatmul.f32.gmra.mxu1 %v10014_v3 }
 0x4b6   :  { %v5231_v34 = vpop.eup %5230  ;;  %v3333_v48 = vor.u32 1.1754944e-38, %v3332_v33  ;;  %v10446_v62 = vadd.f32 1.0, %v5229_v6  ;;  %v3329_v57 = vsel %vm10438_vm0, %v10342_v27, %v3325_v12  ;;  %v1235_v2 = vsub.f32 0.0, %v10192_v58 }
 0x4b7   :  { %v5233_v22 = vpop.eup %5232  ;;  %5238 = vrcp.f32 %v10431_v24  ;;  %v3319_v42 = vsel %vm10375_vm9, %v3318_v41, %v3314_v20  ;;  %v3467_v30 = vand.u32 2147483648, %v10391_v50  ;;  %v3465_v16 = vand.u32 2147483647, %v10391_v50  ;;  %v10486_v25 = vpop.f32.mrf.mxu2  ;;  %3829 = vmatmul.f32.gmra.mxu2 %v10034_v10 }
 0x4b8   :  { %5240 = vrcp.f32 %v10446_v62  ;;  %v10468_v7 = vadd.f32 1.0, %v5231_v34  ;;  %v10470_v0 = vadd.f32 1.0, %v5233_v22  ;;  %v3334_v3 = vsel %vm10442_vm11, %v3333_v48, %v3329_v57  ;;  %v10488_v12 = vpop.f32.mrf.mxu3  ;;  %3942 = vmatmul.f32.gmra.mxu3 %v10101_v54 }
 0x4b9   :  { %v10465_v19 = vpop.eup %5234  ;;  %5242 = vpow2.f32 %v1482_v59  ;;  %v3480_v44 = vand.u32 2147483647, %v10399_v9  ;;  %v3482_v45 = vand.u32 2147483648, %v10399_v9  ;;  %v10481_v28 = vmul.f32 %v3319_v42, %v9845_v11 }
 0x4ba   :  { %v10472_v60 = vpop.eup %5236  ;;  %v3457_v46 = vmul.f32 %v10465_v19, %v10391_v50  ;;  %vm3461_vm10 = vweird.f32 %v10391_v50  ;;  %v1484_v33 = vmul.f32 1.442695, %v1235_v2  ;;  %v10492_v39 = vor.u32 1.1754944e-38, %v3467_v30 }
 0x4bb   :  { %v3472_v13 = vmul.f32 %v10472_v60, %v10399_v9  ;;  %vm3476_vm12 = vweird.f32 %v10399_v9  ;;  %5244 = vrcp.f32 %v10468_v7  ;;  %v10499_v41 = vmul.f32 %v3334_v3, %v9879_v38  ;;  %v10524_v42 = vpop.f32.mrf.mxu0  ;;  %4061 = vmatmul.f32.gmra.mxu0 %v10111_v8 }
 0x4bc   :  { %v3458_v5 = vsub.f32 1.0, %v3457_v46  ;;  %v3377_v20 = vand.u32 2147483648, %v10431_v24  ;;  %5246 = vrcp.f32 %v10470_v0  ;;  %vm10506_vm14 = vcmp.eq.f32.partialorder %v3465_v16, 8.507059e+37 }
 0x4bd   :  { %v10496_v11 = vpop.eup %5238  ;;  %v3473_v6 = vsub.f32 1.0, %v3472_v13  ;;  %vm10510_vm1 = vcmp.eq.f32.partialorder %v3480_v44, 8.507059e+37  ;;  %v10514_v15 = vor.u32 1.1754944e-38, %v3482_v45  ;;  %v3375_v56 = vand.u32 2147483647, %v10431_v24  ;;  %v10526_v30 = vpop.f32.mrf.mxu1  ;;  %4174 = vmatmul.f32.gmra.mxu1 %v10148_v49 }
 0x4be   :  { %v10503_v10 = vpop.eup %5240  ;;  %v3459_v54 = vmul.f32 %v10465_v19, %v3458_v5  ;;  %v3367_v38 = vmul.f32 %v10496_v11, %v10431_v24  ;;  %vm3462_vm2 = vweird.f32 %v10465_v19  ;;  %v3390_v2 = vand.u32 2147483647, %v10446_v62 }
 0x4bf   :  { %v5243_v48 = vpop.eup %5242  ;;  %v3474_v22 = vmul.f32 %v10472_v60, %v3473_v6  ;;  %v3382_v57 = vmul.f32 %v10503_v10, %v10446_v62  ;;  %vm3477_vm3 = vweird.f32 %v10472_v60  ;;  %vm3371_vm5 = vweird.f32 %v10431_v24  ;;  %vm10541_vm4 = vmor %vm3461_vm10, %vm3462_vm2 }
 0x4c0   :  { %v3368_v16 = vsub.f32 1.0, %v3367_v38  ;;  %vm3386_vm8 = vweird.f32 %v10446_v62  ;;  %v3378_v3 = vor.u32 1.1754944e-38, %v3377_v20  ;;  %v3392_v44 = vand.u32 2147483648, %v10446_v62  ;;  %vm10559_vm15 = vmor %vm3476_vm12, %vm3477_vm3  ;;  %v11997_v38 = vld [vmem:[#allocation27_spill] sm:$0xff] }
 0x4c1   :  { %v3383_v46 = vsub.f32 1.0, %v3382_v57  ;;  %5248 = vpow2.f32 %v1484_v33  ;;  %v10534_v45 = vpop.eup %5244  ;;  %v3460_v13 = vadd.f32 %v10465_v19, %v3459_v54  ;;  %v3475_v49 = vadd.f32 %v10472_v60, %v3474_v22  ;;  %v10573_v22 = vpop.f32.mrf.mxu3  ;;  %3945 = vmatmul.f32.gmra.mxu3 %v10229_v51 }
 0x4c2   :  { %v3369_v5 = vmul.f32 %v10496_v11, %v3368_v16  ;;  %vm10547_vm9 = vcmp.eq.f32.partialorder %v3375_v56, 8.507059e+37  ;;  %v10551_v33 = vadd.f32 1.0, %v5243_v48  ;;  %v10553_v20 = vpop.eup %5246  ;;  %vm3372_vm6 = vweird.f32 %v10496_v11  ;;  %v10571_v48 = vpop.f32.mrf.mxu2  ;;  %3832 = vmatmul.f32.gmra.mxu2 %v10184_v31 }
 0x4c3   :  { %v3384_v54 = vmul.f32 %v10503_v10, %v3383_v46  ;;  %vm10565_vm7 = vcmp.eq.f32.partialorder %v3390_v2, 8.507059e+37  ;;  %v3517_v56 = vmul.f32 %v10534_v45, %v10468_v7  ;;  %vm3387_vm13 = vweird.f32 %v10503_v10  ;;  %vm10595_vm0 = vmor %vm3371_vm5, %vm3372_vm6 }
 0x4c4   :  { %v3370_v9 = vadd.f32 %v10496_v11, %v3369_v5  ;;  %v3525_v57 = vand.u32 2147483647, %v10468_v7  ;;  %v3527_v2 = vand.u32 2147483648, %v10468_v7  ;;  %v3532_v27 = vmul.f32 %v10553_v20, %v10470_v0  ;;  %vm10602_vm11 = vmor %vm3386_vm8, %vm3387_vm13 }
 0x4c5   :  { %v3385_v16 = vadd.f32 %v10503_v10, %v3384_v54  ;;  %v3518_v46 = vsub.f32 1.0, %v3517_v56  ;;  %v3542_v40 = vand.u32 2147483648, %v10470_v0  ;;  %v3464_v31 = vsel %vm10541_vm4, %v10465_v19, %v3460_v13  ;;  %v10609_v13 = vpop.f32.mrf.mxu0  ;;  %v10611_v8 = vpop.f32.mrf.mxu1  ;;  %4064 = vmatmul.f32.gmra.mxu0 %v10277_v35  ;;  %4177 = vmatmul.f32.gmra.mxu1 %v10313_v47 }
 0x4c6   :  { %v3479_v5 = vsel %vm10559_vm15, %v10472_v60, %v3475_v49  ;;  %v3393_v54 = vor.u32 1.1754944e-38, %v3392_v44  ;;  %5250 = vrcp.f32 %v10551_v33  ;;  %vm3521_vm10 = vweird.f32 %v10468_v7 }
 0x4c7   :  { %v5249_v56 = vpop.eup %5248  ;;  %v3533_v60 = vsub.f32 1.0, %v3532_v27  ;;  %vm3536_vm12 = vweird.f32 %v10470_v0  ;;  %v3540_v24 = vand.u32 2147483647, %v10470_v0  ;;  %v3374_v62 = vsel %vm10595_vm0, %v10496_v11, %v3370_v9 }
 0x4c8   :  { %v3389_v27 = vsel %vm10602_vm11, %v10503_v10, %v3385_v16  ;;  %v3519_v44 = vmul.f32 %v10534_v45, %v3518_v46  ;;  %v10622_v49 = vor.u32 1.1754944e-38, %v3527_v2  ;;  %v3469_v50 = vsel %vm10506_vm14, %v10492_v39, %v3464_v31 }
 0x4c9   :  { %v3484_v35 = vsel %vm10510_vm1, %v10514_v15, %v3479_v5  ;;  %vm10630_vm2 = vcmp.eq.f32.partialorder %v3525_v57, 8.507059e+37  ;;  %v10634_v11 = vor.u32 1.1754944e-38, %v3542_v40  ;;  %v10636_v9 = vadd.f32 1.0, %v5249_v56  ;;  %v3877_v31 = vpop.f32.mrf.mxu3  ;;  %3948 = vmatmul.f32.gmra.mxu3 %v10413_v18 }
 0x4ca   :  { %vm3522_vm3 = vweird.f32 %v10534_v45  ;;  %v3534_v10 = vmul.f32 %v10553_v20, %v3533_v60  ;;  %v11993_v2 = vsub.f32 0.0, %v10300_v26  ;;  %v11994_v39 = vsub.f32 0.0, %v10322_v14  ;;  %v3764_v46 = vpop.f32.mrf.mxu2  ;;  %3835 = vmatmul.f32.gmra.mxu2 %v10367_v32 }
 0x4cb   :  { %v3379_v34 = vsel %vm10547_vm9, %v3378_v3, %v3374_v62  ;;  %v3394_v15 = vsel %vm10565_vm7, %v3393_v54, %v3389_v27  ;;  %vm10648_vm14 = vcmp.eq.f32.partialorder %v3540_v24, 8.507059e+37  ;;  %v3435_v57 = vand.u32 2147483647, %v10551_v33  ;;  %v11998_v54 = vld [vmem:[#allocation33_spill] sm:$0xff]  ;;  %vm10671_vm5 = vmor %vm3521_vm10, %vm3522_vm3 }
 0x4cc   :  { %v1490_v59 = vmul.f32 1.442695, %v11993_v2  ;;  %v1492_v16 = vmul.f32 1.442695, %v11994_v39  ;;  %5252 = vrcp.f32 %v10636_v9  ;;  %v10655_v5 = vpop.eup %5250  ;;  %v3520_v6 = vadd.f32 %v10534_v45, %v3519_v44 }
 0x4cd   :  { %vm3537_vm1 = vweird.f32 %v10553_v20  ;;  %v3437_v3 = vand.u32 2147483648, %v10551_v33  ;;  %v10662_v51 = vmul.f32 %v3469_v50, %v11997_v38  ;;  %v10665_v56 = vmul.f32 %v3484_v35, %v11998_v54  ;;  %v10699_v44 = vpop.f32.mrf.mxu0  ;;  %v10701_v50 = vpop.f32.mrf.mxu1  ;;  %4067 = vmatmul.f32.gmra.mxu0 %v10426_v4  ;;  %4180 = vmatmul.f32.gmra.mxu1 %v10434_v52 }
 0x4ce   :  { %5254 = vpow2.f32 %v1490_v59  ;;  %v3427_v19 = vmul.f32 %v10655_v5, %v10551_v33  ;;  %vm3431_vm8 = vweird.f32 %v10551_v33  ;;  %v10679_v18 = vmul.f32 %v3379_v34, %v10056_v29  ;;  %vm10687_vm4 = vmor %vm3536_vm12, %vm3537_vm1 }
 0x4cf   :  { %v10682_v60 = vmul.f32 %v3394_v15, %v10058_v36  ;;  %v3535_v24 = vadd.f32 %v10553_v20, %v3534_v10  ;;  %5256 = vpow2.f32 %v1492_v16  ;;  %vm10691_vm9 = vcmp.eq.f32.partialorder %v3435_v57, 8.507059e+37  ;;  %v12005_v16 = vld [vmem:[#allocation30_spill] sm:$0xff] }
 0x4d0   :  { %v3428_v62 = vsub.f32 1.0, %v3427_v19  ;;  %v3869_v29 = vadd.f32 %v10408_v63, %v10406_v53  ;;  %v3872_v36 = vadd.f32 %v10488_v12, %v10486_v25  ;;  %v3524_v0 = vsel %vm10671_vm5, %v10534_v45, %v3520_v6 }
 0x4d1   :  { %v3438_v35 = vor.u32 1.1754944e-38, %v3437_v3  ;;  %v3875_v10 = vadd.f32 %v10573_v22, %v10571_v48  ;;  %v3878_v53 = vadd.f32 %v3877_v31, %v3764_v46  ;;  %vm3432_vm15 = vweird.f32 %v10655_v5  ;;  %v3880_v15 = vpop.f32.mrf.mxu3  ;;  %3951 = vmatmul.f32.gmra.mxu3 %v10499_v41 }
 0x4d2   :  { %v10710_v63 = vpop.eup %5252  ;;  %v3429_v25 = vmul.f32 %v10655_v5, %v3428_v62  ;;  %v3982_v12 = vadd.f32 %v10262_v43, %v3869_v29  ;;  %v3985_v4 = vadd.f32 %v10379_v1, %v3872_v36  ;;  %v3539_v45 = vsel %vm10687_vm4, %v10553_v20, %v3535_v24  ;;  %v3767_v34 = vpop.f32.mrf.mxu2  ;;  %3838 = vmatmul.f32.gmra.mxu2 %v10481_v28  ;;  %vm10740_vm6 = vmor %vm3431_vm8, %vm3432_vm15 }
 0x4d3   :  { %v3442_v2 = vmul.f32 %v10710_v63, %v10636_v9  ;;  %v3988_v48 = vadd.f32 %v10454_v55, %v3875_v10  ;;  %v3991_v22 = vadd.f32 %v10524_v42, %v3878_v53  ;;  %v3529_v55 = vsel %vm10630_vm2, %v10622_v49, %v3524_v0 }
 0x4d4   :  { %v5255_v52 = vpop.eup %5254  ;;  %v3430_v59 = vadd.f32 %v10655_v5, %v3429_v25  ;;  %v10727_v43 = vadd.f32 %v12005_v16, %v3982_v12  ;;  %v10730_v1 = vadd.f32 %v10381_v61, %v3985_v4  ;;  %vm3446_vm7 = vweird.f32 %v10636_v9 }
 0x4d5   :  { %v10724_v39 = vadd.f32 1.0, %v5255_v52  ;;  %v5257_v20 = vpop.eup %5256  ;;  %v3443_v57 = vsub.f32 1.0, %v3442_v2  ;;  %v10746_v61 = vadd.f32 %v10526_v30, %v3991_v22  ;;  %v3450_v49 = vand.u32 2147483647, %v10636_v9  ;;  %v10772_v6 = vpop.f32.mrf.mxu0  ;;  %4070 = vmatmul.f32.gmra.mxu0 %v10662_v51 }
 0x4d6   :  { %v3434_v28 = vsel %vm10740_vm6, %v10655_v5, %v3430_v59  ;;  %v3452_v33 = vand.u32 2147483648, %v10636_v9  ;;  %4319 = vrot.lane.b32.xlu0 %v10727_v43, %s5269_s12  ;;  %4321 = vrot.lane.b32.xlu1 %v10730_v1, %s5269_s12  ;;  %v3544_v41 = vsel %vm10648_vm14, %v10634_v11, %v3539_v45  ;;  %v10763_v47 = vadd.f32 1.0, %v5257_v20  ;;  %v10774_v40 = vpop.f32.mrf.mxu1 }
 0x4d7   :  { %5258 = vrcp.f32 %v10724_v39  ;;  %v3444_v30 = vmul.f32 %v10710_v63, %v3443_v57  ;;  %4325 = vrot.lane.b32.xlu2 %v10746_v61, %s5269_s12  ;;  %v3881_v46 = vadd.f32 %v3880_v15, %v3767_v34  ;;  %vm3447_vm13 = vweird.f32 %v10710_v63  ;;  %4183 = vmatmul.f32.gmra.mxu1 %v10665_v56 }
 0x4d8   :  { %vm4447_vm0 = vcmask 1046528   ;;  %v4449_v31 = vrot.slane %v10730_v1, 1  ;;  %v10770_v5 = vadd.f32 %v10456_v23, %v3988_v48  ;;  %v3439_v11 = vsel %vm10691_vm9, %v3438_v35, %v3434_v28  ;;  %vm10801_vm12 = vmor %vm3446_vm7, %vm3447_vm13 }
 0x4d9   :  { %v3445_v3 = vadd.f32 %v10710_v63, %v3444_v30  ;;  %5260 = vrcp.f32 %v10763_v47  ;;  %v4448_v38 = vrot.slane %v10727_v43, 1  ;;  %v3672_v23 = vmul.f32 %v3529_v55, %v10094_v17  ;;  %v3883_v36 = vpop.f32.mrf.mxu3  ;;  %3954 = vmatmul.f32.gmra.mxu3 %v10682_v60 }
 0x4da   :  { %v3673_v54 = vmul.f32 %v3544_v41, %v10096_v21  ;;  %vm10785_vm11 = vcmp.eq.f32.partialorder %v3450_v49, 8.507059e+37  ;;  %v3453_v51 = vor.u32 1.1754944e-38, %v3452_v33  ;;  %v3994_v19 = vadd.f32 %v10609_v13, %v3881_v46  ;;  %v3770_v29 = vpop.f32.mrf.mxu2  ;;  %3841 = vmatmul.f32.gmra.mxu2 %v10679_v18 }
 0x4db   :  { %v4450_v56 = vsel %vm4447_vm0, %v4448_v38, %v4449_v31  ;;  %v4453_v24 = vrot.slane %v10746_v61, 1  ;;  %vm4222_vm10 = vcmask 1040384   ;;  %v3666_v17 = vmul.f32 %v3439_v11, %v10142_v37 }
 0x4dc   :  { %v3495_v62 = vand.u32 2147483647, %v10724_v39  ;;  %v3497_v27 = vand.u32 2147483648, %v10724_v39  ;;  %v4451_v13 = vrot.slane %v10770_v5, 1  ;;  %v3449_v37 = vsel %vm10801_vm12, %v10710_v63, %v3445_v3 }
 0x4dd   :  { %v10794_v7 = vpop.eup %5258  ;;  %v3512_v0 = vand.u32 2147483648, %v10763_v47  ;;  %v10816_v35 = vadd.f32 %v10611_v8, %v3994_v19  ;;  %v3884_v10 = vadd.f32 %v3883_v36, %v3770_v29  ;;  %v4223_v53 = vrot.slane %v10727_v43, 7  ;;  %v10833_v48 = vpop.f32.mrf.mxu0  ;;  %4073 = vmatmul.f32.gmra.mxu0 %v3672_v23 }
 0x4de   :  { %v3487_v9 = vmul.f32 %v10794_v7, %v10724_v39  ;;  %4514 = vrot.lane.b32.xlu0 %v4450_v56, %s5270_s21  ;;  %4323 = vrot.lane.b32.xlu1 %v10770_v5, %s5269_s12  ;;  %v4454_v18 = vsel %vm4447_vm0, %v4451_v13, %v4453_v24  ;;  %v4226_v63 = vrot.slane %v10770_v5, 7  ;;  %v4228_v60 = vrot.slane %v10746_v61, 7  ;;  %v10835_v22 = vpop.f32.mrf.mxu1 }
 0x4df   :  { %v5261_v25 = vpop.eup %5260  ;;  %4518 = vrot.lane.b32.xlu2 %v4454_v18, %s5270_s21  ;;  %v4455_v8 = vrot.slane %v10816_v35, 1  ;;  %v4224_v4 = vrot.slane %v10730_v1, 7  ;;  %v3454_v52 = vsel %vm10785_vm11, %v3453_v51, %v3449_v37  ;;  %v3997_v2 = vadd.f32 %v10699_v44, %v3884_v10  ;;  %4186 = vmatmul.f32.gmra.mxu1 %v3673_v54 }
 0x4e0   :  { %v3488_v12 = vsub.f32 1.0, %v3487_v9  ;;  %v3502_v45 = vmul.f32 %v5261_v25, %v10763_v47  ;;  %v4230_v59 = vrot.slane %v10816_v35, 7  ;;  %vm3492_vm2 = vweird.f32 %v10794_v7 }
 0x4e1   :  { %v10841_v34 = vsel %vm4222_vm10, %v4226_v63, %v4228_v60  ;;  %v10846_v15 = vsel %vm4222_vm10, %v4223_v53, %v4224_v4  ;;  %v4110_v20 = vadd.f32 %v10701_v50, %v3997_v2  ;;  %v10850_v55 = vsel %vm4222_vm10, %v4224_v4, %v4226_v63  ;;  %v3886_v30 = vpop.f32.mrf.mxu3 }
 0x4e2   :  { %v3489_v16 = vmul.f32 %v10794_v7, %v3488_v12  ;;  %v3503_v44 = vsub.f32 1.0, %v3502_v45  ;;  %v10853_v42 = vsel %vm4222_vm10, %v4228_v60, %v4230_v59  ;;  %v3667_v57 = vmul.f32 %v3454_v52, %v10192_v58  ;;  %v3773_v41 = vpop.f32.mrf.mxu2  ;;  %3844 = vmatmul.f32.gmra.mxu2 %v3666_v17 }
 0x4e3   :  { %vm3491_vm3 = vweird.f32 %v10724_v39  ;;  %v4456_v28 = vsel %vm4447_vm0, %v4453_v24, %v4455_v8  ;;  %vm3507_vm1 = vweird.f32 %v5261_v25  ;;  %v3510_v50 = vand.u32 2147483647, %v10763_v47 }
 0x4e4   :  { %v3490_v61 = vadd.f32 %v10794_v7, %v3489_v16  ;;  %vm10859_vm14 = vmor %vm3491_vm3, %vm3492_vm2  ;;  %v3504_v33 = vmul.f32 %v5261_v25, %v3503_v44  ;;  %v4232_v46 = vrot.slane %v4110_v20, 7  ;;  %v3498_v5 = vor.u32 1.1754944e-38, %v3497_v27  ;;  %3957 = vmatmul.f32.gmra.mxu3 %v3667_v57 }
 0x4e5   :  { %v4452_v39 = vsel %vm4447_vm0, %v4449_v31, %v4451_v13  ;;  %v3887_v11 = vadd.f32 %v3886_v30, %v3773_v41  ;;  %vm3496_vm5 = vcmp.eq.f32.partialorder %v3495_v62, 8.507059e+37  ;;  %vm3506_vm8 = vweird.f32 %v10763_v47  ;;  %v4005_v47 = vpop.f32.mrf.mxu0 }
 0x4e6   :  { %v3494_v58 = vsel %vm10859_vm14, %v10794_v7, %v3490_v61  ;;  %v3505_v3 = vadd.f32 %v5261_v25, %v3504_v33  ;;  %v3513_v38 = vor.u32 1.1754944e-38, %v3512_v0  ;;  %4516 = vrot.lane.b32.xlu1 %v4452_v39, %s5270_s21  ;;  %4520 = vrot.lane.b32.xlu0 %v4456_v28, %s5270_s21  ;;  %vm3508_vm4 = vmor %vm3506_vm8, %vm3507_vm1  ;;  %v4457_v31 = vrot.slane %v4110_v20, 1  ;;  %v4118_v51 = vpop.f32.mrf.mxu1 }
 0x4e7   :  { %v3499_v23 = vsel %vm3496_vm5, %v3498_v5, %v3494_v58  ;;  %4327 = vrot.lane.b32.xlu2 %v10816_v35, %s5269_s12  ;;  %v4000_v1 = vadd.f32 %v10772_v6, %v3887_v11  ;;  %v10878_v54 = vsel %vm4222_vm10, %v4230_v59, %v4232_v46  ;;  %vm3511_vm9 = vcmp.eq.f32.partialorder %v3510_v50, 8.507059e+37 }
 0x4e8   :  { %v3509_v32 = vsel %vm3508_vm4, %v5261_v25, %v3505_v3  ;;  %v3670_v24 = vmul.f32 %v3499_v23, %v10300_v26  ;;  %v4458_v17 = vsel %vm4447_vm0, %v4455_v8, %v4457_v31  ;;  %vm12014_vm15 = vcmask 261120  }
 0x4e9   :  { %v3514_v56 = vsel %vm3511_vm9, %v3513_v38, %v3509_v32  ;;  %v4113_v19 = vadd.f32 %v10774_v40, %v4000_v1  ;;  %v3889_v6 = vpop.f32.mrf.mxu3  ;;  %vm12015_vm6 = vmmov %vm12014_vm15 }
 0x4ea   :  { %v3671_v7 = vmul.f32 %v3514_v56, %v10322_v14  ;;  %v3776_v62 = vpop.f32.mrf.mxu2  ;;  %3847 = vmatmul.f32.gmra.mxu2 %v3670_v24  ;;  %vm12016_vm7 = vmmov %vm12015_vm6 }
 0x4eb   :  { %v4459_v21 = vrot.slane %v4113_v19, 1  ;;  %v4234_v27 = vrot.slane %v4113_v19, 7  ;;  %v3890_v13 = vadd.f32 %v3889_v6, %v3776_v62  ;;  %vm12017_vm13 = vmmov %vm12015_vm6 }
 0x4ec   :  { %3960 = vmatmul.f32.gmra.mxu3 %v3671_v7 }
 0x4ed   :  { %v4460_v29 = vsel %vm4447_vm0, %v4457_v31, %v4459_v21  ;;  %v10888_v40 = vsel %vm4222_vm10, %v4232_v46, %v4234_v27  ;;  %v4003_v26 = vadd.f32 %v10833_v48, %v3890_v13  ;;  %v4008_v14 = vpop.f32.mrf.mxu0 }
 0x4ee   :  { %4329 = vrot.lane.b32.xlu0 %v4110_v20, %s5269_s12  ;;  %4522 = vrot.lane.b32.xlu1 %v4458_v17, %s5270_s21  ;;  %v4121_v36 = vpop.f32.mrf.mxu1 }
 0x4ef   :  { %4524 = vrot.lane.b32.xlu2 %v4460_v29, %s5270_s21  ;;  %v4116_v37 = vadd.f32 %v10835_v22, %v4003_v26 }
 0x4f1   :  { %v4461_v9 = vrot.slane %v4116_v37, 1  ;;  %v3892_v35 = vpop.f32.mrf.mxu3  ;;  %v4236_v18 = vrot.slane %v4116_v37, 7 }
 0x4f2   :  { %v3779_v0 = vpop.f32.mrf.mxu2 }
 0x4f3   :  { %v3893_v10 = vadd.f32 %v3892_v35, %v3779_v0  ;;  %v4462_v63 = vsel %vm4447_vm0, %v4459_v21, %v4461_v9  ;;  %v10897_v25 = vsel %vm4222_vm10, %v4234_v27, %v4236_v18 }
 0x4f5   :  { %v4006_v12 = vadd.f32 %v4005_v47, %v3893_v10  ;;  %v4011_v8 = vpop.f32.mrf.mxu0 }
 0x4f6   :  { %4331 = vrot.lane.b32.xlu1 %v4113_v19, %s5269_s12  ;;  %4526 = vrot.lane.b32.xlu0 %v4462_v63, %s5270_s21  ;;  %v4124_v60 = vpop.f32.mrf.mxu1 }
 0x4f7   :  { %4333 = vrot.lane.b32.xlu2 %v4116_v37, %s5269_s12  ;;  %v4119_v4 = vadd.f32 %v4118_v51, %v4006_v12 }
 0x4f9   :  { %v4463_v52 = vrot.slane %v4119_v4, 1  ;;  %v3895_v2 = vpop.f32.mrf.mxu3  ;;  %v4238_v48 = vrot.slane %v4119_v4, 7 }
 0x4fa   :  { %v3782_v45 = vpop.f32.mrf.mxu2 }
 0x4fb   :  { %v3896_v22 = vadd.f32 %v3895_v2, %v3782_v45  ;;  %v4464_v59 = vsel %vm4447_vm0, %v4461_v9, %v4463_v52  ;;  %v10904_v16 = vsel %vm4222_vm10, %v4236_v18, %v4238_v48 }
 0x4fd   :  { %v4009_v44 = vadd.f32 %v4008_v14, %v3896_v22  ;;  %v4014_v20 = vpop.f32.mrf.mxu0 }
 0x4fe   :  { %4335 = vrot.lane.b32.xlu0 %v4119_v4, %s5269_s12  ;;  %4528 = vrot.lane.b32.xlu1 %v4464_v59, %s5270_s21  ;;  %v4127_v57 = vpop.f32.mrf.mxu1 }
 0x4ff   :  { %v4122_v61 = vadd.f32 %v4121_v36, %v4009_v44 }
 0x501   :  { %v4465_v28 = vrot.slane %v4122_v61, 1  ;;  %v3898_v33 = vpop.f32.mrf.mxu3  ;;  %v4240_v50 = vrot.slane %v4122_v61, 7 }
 0x502   :  { %v3785_v49 = vpop.f32.mrf.mxu2 }
 0x503   :  { %v3899_v41 = vadd.f32 %v3898_v33, %v3785_v49  ;;  %v4466_v30 = vsel %vm4447_vm0, %v4463_v52, %v4465_v28  ;;  %v10910_v46 = vsel %vm4222_vm10, %v4238_v48, %v4240_v50 }
 0x504   :  { %4530 = vrot.lane.b32.xlu2 %v4466_v30, %s5270_s21 }
 0x505   :  { %v4012_v58 = vadd.f32 %v4011_v8, %v3899_v41  ;;  %v4017_v5 = vpop.f32.mrf.mxu0 }
 0x506   :  { %4337 = vrot.lane.b32.xlu1 %v4122_v61, %s5269_s12  ;;  %v4130_v39 = vpop.f32.mrf.mxu1 }
 0x507   :  { %v4125_v11 = vadd.f32 %v4124_v60, %v4012_v58 }
 0x509   :  { %v4467_v3 = vrot.slane %v4125_v11, 1  ;;  %v3901_v23 = vpop.f32.mrf.mxu3  ;;  %v4242_v1 = vrot.slane %v4125_v11, 7 }
 0x50a   :  { %v3788_v38 = vpop.f32.mrf.mxu2 }
 0x50b   :  { %v3902_v31 = vadd.f32 %v3901_v23, %v3788_v38  ;;  %v4468_v32 = vsel %vm4447_vm0, %v4465_v28, %v4467_v3  ;;  %v10916_v47 = vsel %vm4222_vm10, %v4240_v50, %v4242_v1 }
 0x50c   :  { %4339 = vrot.lane.b32.xlu2 %v4125_v11, %s5269_s12  ;;  %4532 = vrot.lane.b32.xlu0 %v4468_v32, %s5270_s21 }
 0x50d   :  { %v4015_v51 = vadd.f32 %v4014_v20, %v3902_v31  ;;  %v4020_v56 = vpop.f32.mrf.mxu0 }
 0x50e   :  { %v4133_v19 = vpop.f32.mrf.mxu1 }
 0x50f   :  { %v4128_v24 = vadd.f32 %v4127_v57, %v4015_v51 }
 0x511   :  { %v4469_v7 = vrot.slane %v4128_v24, 1  ;;  %v3904_v21 = vpop.f32.mrf.mxu3  ;;  %v4244_v62 = vrot.slane %v4128_v24, 7 }
 0x512   :  { %v3791_v17 = vpop.f32.mrf.mxu2 }
 0x513   :  { %v3905_v6 = vadd.f32 %v3904_v21, %v3791_v17  ;;  %v4470_v27 = vsel %vm4447_vm0, %v4467_v3, %v4469_v7  ;;  %v10922_v13 = vsel %vm4222_vm10, %v4242_v1, %v4244_v62 }
 0x514   :  { %4341 = vrot.lane.b32.xlu0 %v4128_v24, %s5269_s12  ;;  %4534 = vrot.lane.b32.xlu1 %v4470_v27, %s5270_s21 }
 0x515   :  { %v4018_v29 = vadd.f32 %v4017_v5, %v3905_v6  ;;  %v4023_v26 = vpop.f32.mrf.mxu0 }
 0x516   :  { %v4136_v14 = vpop.f32.mrf.mxu1 }
 0x517   :  { %v4131_v36 = vadd.f32 %v4130_v39, %v4018_v29 }
 0x519   :  { %v4471_v37 = vrot.slane %v4131_v36, 1  ;;  %v3907_v0 = vpop.f32.mrf.mxu3  ;;  %v4246_v35 = vrot.slane %v4131_v36, 7 }
 0x51a   :  { %v3794_v9 = vpop.f32.mrf.mxu2 }
 0x51b   :  { %v3908_v18 = vadd.f32 %v3907_v0, %v3794_v9  ;;  %v4472_v10 = vsel %vm4447_vm0, %v4469_v7, %v4471_v37  ;;  %v10928_v63 = vsel %vm4222_vm10, %v4244_v62, %v4246_v35 }
 0x51c   :  { %4343 = vrot.lane.b32.xlu1 %v4131_v36, %s5269_s12  ;;  %4536 = vrot.lane.b32.xlu2 %v4472_v10, %s5270_s21 }
 0x51d   :  { %v4021_v12 = vadd.f32 %v4020_v56, %v3908_v18  ;;  %v4026_v8 = vpop.f32.mrf.mxu0 }
 0x51e   :  { %v4139_v60 = vpop.f32.mrf.mxu1 }
 0x51f   :  { %v4134_v4 = vadd.f32 %v4133_v19, %v4021_v12 }
 0x521   :  { %v4473_v52 = vrot.slane %v4134_v4, 1  ;;  %v3910_v2 = vpop.f32.mrf.mxu3  ;;  %v4248_v48 = vrot.slane %v4134_v4, 7 }
 0x522   :  { %v3797_v45 = vpop.f32.mrf.mxu2 }
 0x523   :  { %v3911_v22 = vadd.f32 %v3910_v2, %v3797_v45  ;;  %v4474_v59 = vsel %vm4447_vm0, %v4471_v37, %v4473_v52  ;;  %v10934_v44 = vsel %vm4222_vm10, %v4246_v35, %v4248_v48 }
 0x524   :  { %4345 = vrot.lane.b32.xlu2 %v4134_v4, %s5269_s12  ;;  %4538 = vrot.lane.b32.xlu0 %v4474_v59, %s5270_s21 }
 0x525   :  { %v4024_v20 = vadd.f32 %v4023_v26, %v3911_v22  ;;  %v4029_v57 = vpop.f32.mrf.mxu0 }
 0x526   :  { %v4142_v61 = vpop.f32.mrf.mxu1 }
 0x527   :  { %v4137_v28 = vadd.f32 %v4136_v14, %v4024_v20 }
 0x529   :  { %v4475_v49 = vrot.slane %v4137_v28, 1  ;;  %v3913_v50 = vpop.f32.mrf.mxu3  ;;  %v4250_v41 = vrot.slane %v4137_v28, 7 }
 0x52a   :  { %v3800_v33 = vpop.f32.mrf.mxu2 }
 0x52b   :  { %v3914_v30 = vadd.f32 %v3913_v50, %v3800_v33  ;;  %v4476_v58 = vsel %vm4447_vm0, %v4473_v52, %v4475_v49  ;;  %v10940_v5 = vsel %vm4222_vm10, %v4248_v48, %v4250_v41 }
 0x52c   :  { %4347 = vrot.lane.b32.xlu0 %v4137_v28, %s5269_s12  ;;  %4540 = vrot.lane.b32.xlu1 %v4476_v58, %s5270_s21 }
 0x52d   :  { %v4027_v39 = vadd.f32 %v4026_v8, %v3914_v30  ;;  %v4032_v11 = vpop.f32.mrf.mxu0 }
 0x52e   :  { %v4145_v3 = vpop.f32.mrf.mxu1 }
 0x52f   :  { %v4140_v23 = vadd.f32 %v4139_v60, %v4027_v39 }
 0x531   :  { %v4326_v38 = vpop.permute.xlu2 %4325  ;;  %v4477_v31 = vrot.slane %v4140_v23, 1  ;;  %v3916_v51 = vpop.f32.mrf.mxu3  ;;  %v4252_v56 = vrot.slane %v4140_v23, 7 }
 0x532   :  { %v10943_v1 = vadd.f32 %v4326_v38, %v10841_v34  ;;  %v3803_v32 = vpop.f32.mrf.mxu2 }
 0x533   :  { %v3917_v19 = vadd.f32 %v3916_v51, %v3803_v32  ;;  %v4478_v24 = vsel %vm4447_vm0, %v4475_v49, %v4477_v31  ;;  %v10949_v7 = vsel %vm4222_vm10, %v4250_v41, %v4252_v56 }
 0x534   :  { %4349 = vrot.lane.b32.xlu1 %v4140_v23, %s5269_s12  ;;  %4542 = vrot.lane.b32.xlu2 %v4478_v24, %s5270_s21 }
 0x535   :  { %v4030_v17 = vadd.f32 %v4029_v57, %v3917_v19  ;;  %v4035_v21 = vpop.f32.mrf.mxu0 }
 0x536   :  { %v4148_v62 = vpop.f32.mrf.mxu1 }
 0x537   :  { %v4143_v34 = vadd.f32 %v4142_v61, %v4030_v17 }
 0x539   :  { %v4519_v6 = vpop.permute.xlu2 %4518  ;;  %v4479_v27 = vrot.slane %v4143_v34, 1  ;;  %v3919_v26 = vpop.f32.mrf.mxu3  ;;  %v4254_v14 = vrot.slane %v4143_v34, 7 }
 0x53a   :  { %v3806_v29 = vpop.f32.mrf.mxu2 }
 0x53b   :  { %v3920_v36 = vadd.f32 %v3919_v26, %v3806_v29  ;;  %v4480_v37 = vsel %vm4447_vm0, %v4477_v31, %v4479_v27  ;;  %v10955_v9 = vsel %vm4222_vm10, %v4252_v56, %v4254_v14 }
 0x53c   :  { %4351 = vrot.lane.b32.xlu2 %v4143_v34, %s5269_s12  ;;  %4544 = vrot.lane.b32.xlu0 %v4480_v37, %s5270_s21 }
 0x53d   :  { %v4033_v0 = vadd.f32 %v4032_v11, %v3920_v36  ;;  %v4038_v35 = vpop.f32.mrf.mxu0 }
 0x53e   :  { %v4151_v18 = vpop.f32.mrf.mxu1 }
 0x53f   :  { %v4146_v12 = vadd.f32 %v4145_v3, %v4033_v0 }
 0x541   :  { %v4328_v10 = vpop.permute.xlu2 %4327  ;;  %v4481_v60 = vrot.slane %v4146_v12, 1  ;;  %v3922_v52 = vpop.f32.mrf.mxu3  ;;  %v4256_v45 = vrot.slane %v4146_v12, 7 }
 0x542   :  { %v10958_v8 = vadd.f32 %v4328_v10, %v10853_v42  ;;  %v3809_v4 = vpop.f32.mrf.mxu2  ;;  %v4318_v42 = vsel %vm4222_vm10, 0.0, %v4223_v53 }
 0x543   :  { %v3923_v2 = vadd.f32 %v3922_v52, %v3809_v4  ;;  %v4482_v48 = vsel %vm4447_vm0, %v4479_v27, %v4481_v60  ;;  %v10964_v22 = vsel %vm4222_vm10, %v4254_v14, %v4256_v45 }
 0x544   :  { %4353 = vrot.lane.b32.xlu0 %v4146_v12, %s5269_s12  ;;  %4546 = vrot.lane.b32.xlu1 %v4482_v48, %s5270_s21 }
 0x545   :  { %v4036_v59 = vadd.f32 %v4035_v21, %v3923_v2  ;;  %v4041_v49 = vpop.f32.mrf.mxu0 }
 0x546   :  { %v4154_v33 = vpop.f32.mrf.mxu1 }
 0x547   :  { %v4149_v50 = vadd.f32 %v4148_v62, %v4036_v59 }
 0x548   :  { %v4320_v20 = vpop.permute.xlu0 %4319  ;;  %v4322_v57 = vpop.permute.xlu1 %4321 }
 0x549   :  { %v4415_v61 = vadd.f32 %v4320_v20, %v4318_v42  ;;  %v4416_v28 = vadd.f32 %v4322_v57, %v10846_v15  ;;  %v4525_v41 = vpop.permute.xlu2 %4524  ;;  %v4483_v30 = vrot.slane %v4149_v50, 1  ;;  %v3925_v39 = vpop.f32.mrf.mxu3  ;;  %v4258_v11 = vrot.slane %v4149_v50, 7 }
 0x54a   :  { %v3812_v58 = vpop.f32.mrf.mxu2 }
 0x54b   :  { %v3926_v3 = vadd.f32 %v3925_v39, %v3812_v58  ;;  %v4484_v38 = vsel %vm4447_vm0, %v4481_v60, %v4483_v30  ;;  %v10974_v43 = vsel %vm4222_vm10, %v4256_v45, %v4258_v11 }
 0x54c   :  { %4355 = vrot.lane.b32.xlu1 %v4149_v50, %s5269_s12  ;;  %4548 = vrot.lane.b32.xlu2 %v4484_v38, %s5270_s21 }
 0x54d   :  { %v4039_v53 = vadd.f32 %v4038_v35, %v3926_v3  ;;  %v4044_v51 = vpop.f32.mrf.mxu0 }
 0x54e   :  { %v4157_v56 = vpop.f32.mrf.mxu1 }
 0x54f   :  { %v4152_v19 = vadd.f32 %v4151_v18, %v4039_v53 }
 0x550   :  { %v4515_v15 = vpop.permute.xlu0 %4514  ;;  %v4324_v23 = vpop.permute.xlu1 %4323 }
 0x551   :  { %v10976_v31 = vadd.f32 %v4515_v15, %v4415_v61  ;;  %v4417_v32 = vadd.f32 %v4324_v23, %v10850_v55  ;;  %v4334_v24 = vpop.permute.xlu2 %4333  ;;  %v4485_v62 = vrot.slane %v4152_v19, 1  ;;  %v3928_v27 = vpop.f32.mrf.mxu3  ;;  %v4260_v29 = vrot.slane %v4152_v19, 7 }
 0x552   :  { %v10982_v21 = vadd.f32 %v4334_v24, %v10897_v25  ;;  %v3815_v34 = vpop.f32.mrf.mxu2 }
 0x553   :  { %v10979_v17 = vadd.f32 %v4519_v6, %v4417_v32  ;;  %v3929_v26 = vadd.f32 %v3928_v27, %v3815_v34  ;;  %v4486_v14 = vsel %vm4447_vm0, %v4483_v30, %v4485_v62  ;;  %v10988_v55 = vsel %vm4222_vm10, %v4258_v11, %v4260_v29 }
 0x554   :  { %4357 = vrot.lane.b32.xlu2 %v4152_v19, %s5269_s12  ;;  %4550 = vrot.lane.b32.xlu0 %v4486_v14, %s5270_s21 }
 0x555   :  { %v4042_v36 = vadd.f32 %v4041_v49, %v3929_v26  ;;  %v4047_v35 = vpop.f32.mrf.mxu0 }
 0x556   :  { %v4160_v18 = vpop.f32.mrf.mxu1 }
 0x557   :  { %v4155_v10 = vadd.f32 %v4154_v33, %v4042_v36 }
 0x558   :  { %v4517_v6 = vpop.permute.xlu1 %4516  ;;  %v4521_v37 = vpop.permute.xlu0 %4520 }
 0x559   :  { %v10990_v0 = vadd.f32 %v4517_v6, %v4416_v28  ;;  %v10993_v25 = vadd.f32 %v4521_v37, %v10943_v1  ;;  %v4487_v12 = vrot.slane %v4155_v10, 1  ;;  %v3931_v4 = vpop.f32.mrf.mxu3  ;;  %v4262_v52 = vrot.slane %v4155_v10, 7 }
 0x55a   :  { %v3818_v60 = vpop.f32.mrf.mxu2 }
 0x55b   :  { %v3932_v45 = vadd.f32 %v3931_v4, %v3818_v60  ;;  %v4488_v2 = vsel %vm4447_vm0, %v4485_v62, %v4487_v12  ;;  %v10999_v48 = vsel %vm4222_vm10, %v4260_v29, %v4262_v52 }
 0x55c   :  { %4359 = vrot.lane.b32.xlu0 %v4155_v10, %s5269_s12  ;;  %4552 = vrot.lane.b32.xlu1 %v4488_v2, %s5270_s21 }
 0x55d   :  { %v4045_v59 = vadd.f32 %v4044_v51, %v3932_v45  ;;  %v4050_v61 = vpop.f32.mrf.mxu0 }
 0x55e   :  { %v4163_v28 = vpop.f32.mrf.mxu1  ;;  %v4531_v33 = vpop.permute.xlu2 %4530 }
 0x55f   :  { %v4158_v49 = vadd.f32 %v4157_v56, %v4045_v59 }
 0x560   :  { %v4330_v1 = vpop.permute.xlu0 %4329  ;;  %v4523_v20 = vpop.permute.xlu1 %4522 }
 0x561   :  { %v4420_v42 = vadd.f32 %v4330_v1, %v10878_v54  ;;  %v11003_v57 = vadd.f32 %v4523_v20, %v10958_v8  ;;  %v4489_v30 = vrot.slane %v4158_v49, 1  ;;  %v3934_v39 = vpop.f32.mrf.mxu3  ;;  %v4264_v11 = vrot.slane %v4158_v49, 7 }
 0x562   :  { %v3821_v58 = vpop.f32.mrf.mxu2 }
 0x563   :  { %v11005_v50 = vadd.f32 %v4525_v41, %v4420_v42  ;;  %v3935_v3 = vadd.f32 %v3934_v39, %v3821_v58  ;;  %v4490_v38 = vsel %vm4447_vm0, %v4487_v12, %v4489_v30  ;;  %v11011_v54 = vsel %vm4222_vm10, %v4262_v52, %v4264_v11 }
 0x564   :  { %4361 = vrot.lane.b32.xlu1 %v4158_v49, %s5269_s12  ;;  %4554 = vrot.lane.b32.xlu2 %v4490_v38, %s5270_s21 }
 0x565   :  { %v4048_v8 = vadd.f32 %v4047_v35, %v3935_v3  ;;  %v4053_v23 = vpop.f32.mrf.mxu0 }
 0x566   :  { %v4166_v32 = vpop.f32.mrf.mxu1  ;;  %v4340_v56 = vpop.permute.xlu2 %4339 }
 0x567   :  { %v4161_v51 = vadd.f32 %v4160_v18, %v4048_v8  ;;  %v11017_v24 = vadd.f32 %v4340_v56, %v10916_v47 }
 0x568   :  { %v4332_v53 = vpop.permute.xlu1 %4331  ;;  %v4527_v15 = vpop.permute.xlu0 %4526 }
 0x569   :  { %v4421_v41 = vadd.f32 %v4332_v53, %v10888_v40  ;;  %v4491_v62 = vrot.slane %v4161_v51, 1  ;;  %v3937_v27 = vpop.f32.mrf.mxu3  ;;  %v4266_v29 = vrot.slane %v4161_v51, 7 }
 0x56a   :  { %v3824_v34 = vpop.f32.mrf.mxu2 }
 0x56b   :  { %v11014_v19 = vadd.f32 %v4527_v15, %v4421_v41  ;;  %v3938_v26 = vadd.f32 %v3937_v27, %v3824_v34  ;;  %v4492_v14 = vsel %vm4447_vm0, %v4489_v30, %v4491_v62  ;;  %v11023_v40 = vsel %vm4222_vm10, %v4264_v11, %v4266_v29 }
 0x56c   :  { %4363 = vrot.lane.b32.xlu2 %v4161_v51, %s5269_s12  ;;  %4556 = vrot.lane.b32.xlu0 %v4492_v14, %s5270_s21 }
 0x56d   :  { %v4051_v36 = vadd.f32 %v4050_v61, %v3938_v26  ;;  %v4056_v35 = vpop.f32.mrf.mxu0 }
 0x56e   :  { %v4169_v12 = vpop.f32.mrf.mxu1 }
 0x56f   :  { %v4164_v10 = vadd.f32 %v4163_v28, %v4051_v36 }
 0x570   :  { %v4336_v6 = vpop.permute.xlu0 %4335  ;;  %v4529_v37 = vpop.permute.xlu1 %4528 }
 0x571   :  { %v4423_v47 = vadd.f32 %v4336_v6, %v10904_v16  ;;  %v11027_v18 = vadd.f32 %v4529_v37, %v10982_v21  ;;  %v4493_v4 = vrot.slane %v4164_v10, 1  ;;  %v3940_v45 = vpop.f32.mrf.mxu3  ;;  %v4268_v2 = vrot.slane %v4164_v10, 7 }
 0x572   :  { %v3827_v52 = vpop.f32.mrf.mxu2 }
 0x573   :  { %v11029_v60 = vadd.f32 %v4531_v33, %v4423_v47  ;;  %v3941_v59 = vadd.f32 %v3940_v45, %v3827_v52  ;;  %v4494_v1 = vsel %vm4447_vm0, %v4491_v62, %v4493_v4  ;;  %v11035_v16 = vsel %vm4222_vm10, %v4266_v29, %v4268_v2 }
 0x574   :  { %4365 = vrot.lane.b32.xlu0 %v4164_v10, %s5269_s12  ;;  %4558 = vrot.lane.b32.xlu1 %v4494_v1, %s5270_s21 }
 0x575   :  { %v4054_v21 = vadd.f32 %v4053_v23, %v3941_v59  ;;  %v4059_v49 = vpop.f32.mrf.mxu0 }
 0x576   :  { %v4537_v42 = vpop.permute.xlu2 %4536  ;;  %v4172_v11 = vpop.f32.mrf.mxu1 }
 0x577   :  { %v4167_v28 = vadd.f32 %v4166_v32, %v4054_v21 }
 0x578   :  { %v4338_v20 = vpop.permute.xlu1 %4337 }
 0x579   :  { %v4424_v61 = vadd.f32 %v4338_v20, %v10910_v46  ;;  %v4495_v33 = vrot.slane %v4167_v28, 1  ;;  %v3943_v58 = vpop.f32.mrf.mxu3  ;;  %v4270_v39 = vrot.slane %v4167_v28, 7 }
 0x57a   :  { %v3830_v30 = vpop.f32.mrf.mxu2 }
 0x57b   :  { %v3944_v3 = vadd.f32 %v3943_v58, %v3830_v30  ;;  %v4496_v38 = vsel %vm4447_vm0, %v4493_v4, %v4495_v33  ;;  %v11042_v8 = vsel %vm4222_vm10, %v4268_v2, %v4270_v39 }
 0x57c   :  { %4367 = vrot.lane.b32.xlu1 %v4167_v28, %s5269_s12  ;;  %4560 = vrot.lane.b32.xlu2 %v4496_v38, %s5270_s21 }
 0x57d   :  { %v4057_v53 = vadd.f32 %v4056_v35, %v3944_v3  ;;  %v4062_v27 = vpop.f32.mrf.mxu0 }
 0x57e   :  { %v4533_v15 = vpop.permute.xlu0 %4532  ;;  %v4346_v46 = vpop.permute.xlu2 %4345 }
 0x57f   :  { %v11044_v41 = vadd.f32 %v4533_v15, %v4424_v61  ;;  %v11047_v23 = vadd.f32 %v4346_v46, %v10934_v44  ;;  %v4170_v32 = vadd.f32 %v4169_v12, %v4057_v53  ;;  %v4175_v36 = vpop.f32.mrf.mxu1 }
 0x581   :  { %v4497_v51 = vrot.slane %v4170_v32, 1  ;;  %v3946_v62 = vpop.f32.mrf.mxu3  ;;  %v4272_v34 = vrot.slane %v4170_v32, 7 }
 0x582   :  { %v3833_v56 = vpop.f32.mrf.mxu2 }
 0x583   :  { %v3947_v29 = vadd.f32 %v3946_v62, %v3833_v56  ;;  %v4498_v26 = vsel %vm4447_vm0, %v4495_v33, %v4497_v51  ;;  %v11053_v14 = vsel %vm4222_vm10, %v4270_v39, %v4272_v34 }
 0x584   :  { %4369 = vrot.lane.b32.xlu2 %v4170_v32, %s5269_s12  ;;  %4562 = vrot.lane.b32.xlu0 %v4498_v26, %s5270_s21 }
 0x585   :  { %v4060_v6 = vadd.f32 %v4059_v49, %v3947_v29 }
 0x586   :  { %v4342_v44 = vpop.permute.xlu0 %4341  ;;  %v4535_v37 = vpop.permute.xlu1 %4534 }
 0x587   :  { %v4426_v35 = vadd.f32 %v4342_v44, %v10922_v13  ;;  %v11057_v47 = vadd.f32 %v4535_v37, %v11017_v24  ;;  %v4173_v10 = vadd.f32 %v4172_v11, %v4060_v6  ;;  %v4065_v13 = vpop.f32.mrf.mxu0 }
 0x589   :  { %v11059_v12 = vadd.f32 %v4537_v42, %v4426_v35  ;;  %v4499_v4 = vrot.slane %v4173_v10, 1  ;;  %v3949_v45 = vpop.f32.mrf.mxu3  ;;  %v4274_v2 = vrot.slane %v4173_v10, 7  ;;  %v4178_v42 = vpop.f32.mrf.mxu1 }
 0x58a   :  { %v3836_v52 = vpop.f32.mrf.mxu2 }
 0x58b   :  { %v3950_v59 = vadd.f32 %v3949_v45, %v3836_v52  ;;  %v4500_v1 = vsel %vm4447_vm0, %v4497_v51, %v4499_v4  ;;  %v11065_v21 = vsel %vm4222_vm10, %v4272_v34, %v4274_v2 }
 0x58c   :  { %4371 = vrot.lane.b32.xlu0 %v4173_v10, %s5269_s12  ;;  %4564 = vrot.lane.b32.xlu1 %v4500_v1, %s5270_s21 }
 0x58d   :  { %v4063_v24 = vadd.f32 %v4062_v27, %v3950_v59  ;;  %v19_v27 = vstv %s11363_s13 }
 0x58e   :  { %v4344_v20 = vpop.permute.xlu1 %4343  ;;  %v4543_v61 = vpop.permute.xlu2 %4542  ;;  %20 = vst [vmem:[#allocation3] sm:$0x1] %v19_v27 }
 0x58f   :  { %v4427_v28 = vadd.f32 %v4344_v20, %v10928_v63  ;;  %v4176_v49 = vadd.f32 %v4175_v36, %v4063_v24  ;;  %v4068_v32 = vpop.f32.mrf.mxu0 }
 0x591   :  { %v4501_v33 = vrot.slane %v4176_v49, 1  ;;  %v3952_v58 = vpop.f32.mrf.mxu3  ;;  %v4276_v39 = vrot.slane %v4176_v49, 7  ;;  %v4181_v62 = vpop.f32.mrf.mxu1 }
 0x592   :  { %v3839_v30 = vpop.f32.mrf.mxu2 }
 0x593   :  { %v3953_v11 = vadd.f32 %v3952_v58, %v3839_v30  ;;  %v4502_v3 = vsel %vm4447_vm0, %v4499_v4, %v4501_v33  ;;  %v11072_v38 = vsel %vm4222_vm10, %v4274_v2, %v4276_v39 }
 0x594   :  { %4373 = vrot.lane.b32.xlu1 %v4176_v49, %s5269_s12  ;;  %4566 = vrot.lane.b32.xlu2 %v4502_v3, %s5270_s21 }
 0x595   :  { %v4066_v53 = vadd.f32 %v4065_v13, %v3953_v11 }
 0x596   :  { %v4539_v15 = vpop.permute.xlu0 %4538  ;;  %v4352_v46 = vpop.permute.xlu2 %4351 }
 0x597   :  { %v11074_v63 = vadd.f32 %v4539_v15, %v4427_v28  ;;  %v11077_v51 = vadd.f32 %v4352_v46, %v10955_v9  ;;  %v4179_v56 = vadd.f32 %v4178_v42, %v4066_v53  ;;  %v4071_v2 = vpop.f32.mrf.mxu0 }
 0x599   :  { %v4503_v34 = vrot.slane %v4179_v56, 1  ;;  %v3955_v26 = vpop.f32.mrf.mxu3  ;;  %v4278_v36 = vrot.slane %v4179_v56, 7  ;;  %v4184_v42 = vpop.f32.mrf.mxu1 }
 0x59a   :  { %v3842_v29 = vpop.f32.mrf.mxu2 }
 0x59b   :  { %v3956_v6 = vadd.f32 %v3955_v26, %v3842_v29  ;;  %v4504_v44 = vsel %vm4447_vm0, %v4501_v33, %v4503_v34  ;;  %v11086_v9 = vsel %vm4222_vm10, %v4276_v39, %v4278_v36 }
 0x59c   :  { %4375 = vrot.lane.b32.xlu2 %v4179_v56, %s5269_s12  ;;  %4568 = vrot.lane.b32.xlu0 %v4504_v44, %s5270_s21 }
 0x59d   :  { %v4069_v37 = vadd.f32 %v4068_v32, %v3956_v6 }
 0x59e   :  { %v4348_v35 = vpop.permute.xlu0 %4347  ;;  %v4541_v10 = vpop.permute.xlu1 %4540 }
 0x59f   :  { %v4429_v4 = vadd.f32 %v4348_v35, %v10940_v5  ;;  %v11090_v52 = vadd.f32 %v4541_v10, %v11047_v23  ;;  %v4182_v45 = vadd.f32 %v4181_v62, %v4069_v37  ;;  %v4074_v32 = vpop.f32.mrf.mxu0 }
 0x5a1   :  { %v11092_v59 = vadd.f32 %v4543_v61, %v4429_v4  ;;  %v4505_v1 = vrot.slane %v4182_v45, 1  ;;  %v3958_v24 = vpop.f32.mrf.mxu3  ;;  %v4280_v20 = vrot.slane %v4182_v45, 7  ;;  %v4187_v62 = vpop.f32.mrf.mxu1 }
 0x5a2   :  { %v3845_v13 = vpop.f32.mrf.mxu2 }
 0x5a3   :  { %v3959_v28 = vadd.f32 %v3958_v24, %v3845_v13  ;;  %v4506_v49 = vsel %vm4447_vm0, %v4503_v34, %v4505_v1  ;;  %v11098_v5 = vsel %vm4222_vm10, %v4278_v36, %v4280_v20 }
 0x5a4   :  { %4377 = vrot.lane.b32.xlu0 %v4182_v45, %s5269_s12  ;;  %4570 = vrot.lane.b32.xlu1 %v4506_v49, %s5270_s21 }
 0x5a5   :  { %v4072_v23 = vadd.f32 %v4071_v2, %v3959_v28 }
 0x5a6   :  { %v4350_v33 = vpop.permute.xlu1 %4349  ;;  %v4549_v30 = vpop.permute.xlu2 %4548 }
 0x5a7   :  { %v4430_v61 = vadd.f32 %v4350_v33, %v10949_v7  ;;  %v4185_v58 = vadd.f32 %v4184_v42, %v4072_v23 }
 0x5a9   :  { %v4507_v39 = vrot.slane %v4185_v58, 1  ;;  %v3961_v3 = vpop.f32.mrf.mxu3  ;;  %v4282_v53 = vrot.slane %v4185_v58, 7 }
 0x5aa   :  { %v3848_v11 = vpop.f32.mrf.mxu2 }
 0x5ab   :  { %v3962_v15 = vadd.f32 %v3961_v3, %v3848_v11  ;;  %v4508_v46 = vsel %vm4447_vm0, %v4505_v1, %v4507_v39  ;;  %v11105_v56 = vsel %vm4222_vm10, %v4280_v20, %v4282_v53  ;;  %v4741_v1 = vld [vmem:[#allocation3] ss:$0 sm:$0xff] }
 0x5ac   :  { %4379 = vrot.lane.b32.xlu1 %v4185_v58, %s5269_s12  ;;  %4572 = vrot.lane.b32.xlu2 %v4508_v46, %s5270_s21 }
 0x5ad   :  { %v4075_v34 = vadd.f32 %v4074_v32, %v3962_v15 }
 0x5ae   :  { %v4545_v27 = vpop.permute.xlu0 %4544  ;;  %v4358_v7 = vpop.permute.xlu2 %4357 }
 0x5af   :  { %v11107_v29 = vadd.f32 %v4545_v27, %v4430_v61  ;;  %v11110_v26 = vadd.f32 %v4358_v7, %v10988_v55  ;;  %v4188_v36 = vadd.f32 %v4187_v62, %v4075_v34 }
 0x5b1   :  { %v4509_v6 = vrot.slane %v4188_v36, 1  ;;  %v4284_v44 = vrot.slane %v4188_v36, 7 }
 0x5b3   :  { %v4512_v37 = vsel %vm4447_vm0, %v4509_v6, 0.0  ;;  %v4510_v35 = vsel %vm4447_vm0, %v4507_v39, %v4509_v6  ;;  %v11117_v10 = vsel %vm4222_vm10, %v4282_v53, %v4284_v44  ;;  %vm12018_vm0 = vmmov %vm12015_vm6 }
 0x5b4   :  { %4381 = vrot.lane.b32.xlu2 %v4188_v36, %s5269_s12  ;;  %4576 = vrot.lane.b32.xlu1 %v4512_v37, %s5270_s21  ;;  %vm12019_vm11 = vmmov %vm12018_vm0 }
 0x5b5   :  { %4574 = vrot.lane.b32.xlu0 %v4510_v35, %s5270_s21  ;;  %vm12020_vm10 = vmmov %vm12018_vm0 }
 0x5b6   :  { %v4354_v4 = vpop.permute.xlu0 %4353  ;;  %v4547_v45 = vpop.permute.xlu1 %4546  ;;  %vm12021_vm12 = vmmov %vm12018_vm0 }
 0x5b7   :  { %v4432_v55 = vadd.f32 %v4354_v4, %v10964_v22  ;;  %v11122_v2 = vadd.f32 %v4547_v45, %v11077_v51  ;;  %vm12022_vm2 = vmmov %vm12018_vm0 }
 0x5b8   :  { %vm12023_vm3 = vmmov %vm12018_vm0 }
 0x5b9   :  { %v11124_v13 = vadd.f32 %v4549_v30, %v4432_v55  ;;  %vm12024_vm14 = vmmov %vm12018_vm0 }
 0x5ba   :  { %vm12025_vm1 = vmmov %vm12018_vm0 }
 0x5bb   :  { %vm12026_vm5 = vmmov %vm12018_vm0 }
 0x5bc   :  { %4646 = vperm.xlu2 %4736, %v4741_v1   ;;  %vm12027_vm8 = vmmov %vm12018_vm0 }
 0x5bd   :  { %vm12028_vm4 = vmmov %vm12018_vm0 }
 0x5be   :  { %v4555_v24 = vpop.permute.xlu2 %4554  ;;  %v4356_v61 = vpop.permute.xlu1 %4355  ;;  %vm12029_vm9 = vmmov %vm12018_vm0 }
 0x5c6   :  { %v4551_v20 = vpop.permute.xlu0 %4550  ;;  %v4364_v42 = vpop.permute.xlu2 %4363 }
 0x5c7   :  { %v11127_v28 = vadd.f32 %v4364_v42, %v11023_v40 }
 0x5ce   :  { %v4360_v49 = vpop.permute.xlu0 %4359  ;;  %v4553_v51 = vpop.permute.xlu1 %4552 }
 0x5cf   :  { %v4435_v23 = vadd.f32 %v4360_v49, %v10999_v48 }
 0x5d1   :  { %v11130_v33 = vadd.f32 %v4555_v24, %v4435_v23 }
 0x5d6   :  { %v4561_v58 = vpop.permute.xlu2 %4560  ;;  %v4362_v53 = vpop.permute.xlu1 %4361 }
 0x5d7   :  { %v4436_v24 = vadd.f32 %v4362_v53, %v11011_v54 }
 0x5de   :  { %v4557_v22 = vpop.permute.xlu0 %4556  ;;  %v11135_v3 = vpop.permute.xlu2 %4369 }
 0x5df   :  { %v4440_v23 = vadd.f32 %v11135_v3, %v11053_v14 }
 0x5e6   :  { %v4366_v39 = vpop.permute.xlu0 %4365  ;;  %v4559_v40 = vpop.permute.xlu1 %4558 }
 0x5e7   :  { %v4438_v30 = vadd.f32 %v4366_v39, %v11035_v16  ;;  %v4632_v54 = vadd.f32 %v4559_v40, %v11127_v28 }
 0x5e9   :  { %v11133_v11 = vadd.f32 %v4561_v58, %v4438_v30 }
 0x5ee   :  { %v11137_v15 = vpop.permute.xlu2 %4566  ;;  %v4368_v48 = vpop.permute.xlu1 %4367 }
 0x5f6   :  { %v11139_v46 = vpop.permute.xlu2 %4375  ;;  %v4563_v34 = vpop.permute.xlu0 %4562 }
 0x5fe   :  { %v11143_v62 = vpop.permute.xlu1 %4564  ;;  %v4372_v16 = vpop.permute.xlu0 %4371 }
 0x5ff   :  { %v4441_v42 = vadd.f32 %v4372_v16, %v11065_v21  ;;  %v4443_v21 = vadd.f32 %v11139_v46, %v11086_v9  ;;  %v4635_v14 = vadd.f32 %v11143_v62, %v4440_v23 }
 0x601   :  { %v4636_v58 = vadd.f32 %v11137_v15, %v4441_v42 }
 0x606   :  { %v11141_v32 = vpop.permute.xlu2 %4572  ;;  %v11147_v7 = vpop.permute.xlu1 %4373 }
 0x60e   :  { %v11145_v27 = vpop.permute.xlu2 %4381 }
 0x616   :  { %v11149_v36 = vpop.permute.xlu2 %4646  ;;  %v4571_v35 = vpop.permute.xlu1 %4570 }
 0x617   :  { %v4649_v6 = vadd.f32 %v11149_v36, %v10976_v31  ;;  %v4650_v44 = vadd.f32 %v11149_v36, %v10990_v0  ;;  %v4651_v37 = vadd.f32 %v11149_v36, %v10979_v17  ;;  %v4652_v4 = vadd.f32 %v11149_v36, %v10993_v25  ;;  %v4569_v17 = vpop.permute.xlu0 %4568 }
 0x618   :  { %v4653_v45 = vadd.f32 %v11149_v36, %v11003_v57  ;;  %v4654_v31 = vadd.f32 %v11149_v36, %v11005_v50  ;;  %v4655_v0 = vadd.f32 %v11149_v36, %v11014_v19  ;;  %v4656_v25 = vadd.f32 %v11149_v36, %v11027_v18 }
 0x619   :  { %4681 = vst.msk [vmem:[%s11364_s14] sm:$0xff] %vm12014_vm15, %v4649_v6  ;;  %v4657_v57 = vadd.f32 %v11149_v36, %v11029_v60  ;;  %v4658_v50 = vadd.f32 %v11149_v36, %v11044_v41  ;;  %v4659_v19 = vadd.f32 %v11149_v36, %v11057_v47  ;;  %v4660_v18 = vadd.f32 %v11149_v36, %v11059_v12  ;;  %vm12030_vm15 = vmmov %vm12018_vm0 }
 0x61a   :  { %4682 = vst.msk [vmem:[%s11364_s14 + $0x8] sm:$0xff] %vm12015_vm6, %v4650_v44  ;;  %v4661_v60 = vadd.f32 %v11149_v36, %v11074_v63  ;;  %v4662_v41 = vadd.f32 %v11149_v36, %v11090_v52  ;;  %v4433_v12 = vadd.f32 %v4356_v61, %v10974_v43  ;;  %v4663_v55 = vadd.f32 %v11149_v36, %v11092_v59  ;;  %vm12031_vm6 = vmmov %vm12018_vm0 }
 0x61b   :  { %4683 = vst.msk [vmem:[%s11364_s14 + $0x10] sm:$0xff] %vm12016_vm7, %v4651_v37  ;;  %v4664_v63 = vadd.f32 %v11149_v36, %v11107_v29  ;;  %v4665_v43 = vadd.f32 %v11149_v36, %v11122_v2  ;;  %v4629_v59 = vadd.f32 %v4553_v51, %v11110_v26  ;;  %v4666_v29 = vadd.f32 %v11149_v36, %v11124_v13  ;;  %vm12032_vm7 = vmmov %vm12018_vm0 }
 0x61c   :  { %4684 = vst.msk [vmem:[%s11364_s14 + $0x18] sm:$0xff] %vm12017_vm13, %v4652_v4  ;;  %v4628_v52 = vadd.f32 %v4551_v20, %v4433_v12  ;;  %v4631_v2 = vadd.f32 %v4557_v22, %v4436_v24  ;;  %v4439_v13 = vadd.f32 %v4368_v48, %v11042_v8  ;;  %v4669_v49 = vadd.f32 %v11149_v36, %v11130_v33  ;;  %vm12033_vm13 = vmmov %vm12018_vm0 }
 0x61d   :  { %4685 = vst.msk [vmem:[%s11364_s14 + $0x20] sm:$0xff] %vm12018_vm0, %v4653_v45  ;;  %v4668_v26 = vadd.f32 %v11149_v36, %v4629_v59  ;;  %v4671_v28 = vadd.f32 %v11149_v36, %v4632_v54  ;;  %v4672_v33 = vadd.f32 %v11149_v36, %v11133_v11  ;;  %v4446_v51 = vadd.f32 %v11145_v27, %v11117_v10 }
 0x61e   :  { %4686 = vst.msk [vmem:[%s11364_s14 + $0x28] sm:$0xff] %vm12019_vm11, %v4654_v31  ;;  %v4380_v47 = vpop.permute.xlu1 %4379  ;;  %v4667_v20 = vadd.f32 %v11149_v36, %v4628_v52  ;;  %v4670_v22 = vadd.f32 %v11149_v36, %v4631_v2  ;;  %v4634_v8 = vadd.f32 %v4563_v34, %v4439_v13  ;;  %v4638_v39 = vadd.f32 %v4571_v35, %v4443_v21  ;;  %vm12034_vm11 = vmmov %vm12018_vm0 }
 0x61f   :  { %4687 = vst.msk [vmem:[%s11364_s14 + $0x30] sm:$0xff] %vm12020_vm10, %v4655_v0  ;;  %v4378_v1 = vpop.permute.xlu0 %4377  ;;  %v4674_v53 = vadd.f32 %v11149_v36, %v4635_v14  ;;  %v4445_v10 = vadd.f32 %v4380_v47, %v11105_v56  ;;  %v4675_v15 = vadd.f32 %v11149_v36, %v4636_v58  ;;  %vm12035_vm10 = vmmov %vm12018_vm0 }
 0x620   :  { %4688 = vst.msk [vmem:[%s11364_s14 + $0x38] sm:$0xff] %vm12021_vm12, %v4656_v25  ;;  %v4444_v61 = vadd.f32 %v4378_v1, %v11098_v5  ;;  %v4442_v5 = vadd.f32 %v11147_v7, %v11072_v38  ;;  %v4673_v30 = vadd.f32 %v11149_v36, %v4634_v8  ;;  %vm12036_vm12 = vmmov %vm12018_vm0 }
 0x621   :  { %4689 = vst.msk [vmem:[%s11364_s14 + $0x40] sm:$0xff] %vm12022_vm2, %v4657_v57  ;;  %vm12037_vm2 = vmmov %vm12018_vm0 }
 0x622   :  { %4690 = vst.msk [vmem:[%s11364_s14 + $0x48] sm:$0xff] %vm12023_vm3, %v4658_v50  ;;  %v4637_v11 = vadd.f32 %v4569_v17, %v4442_v5  ;;  %v4639_v3 = vadd.f32 %v11141_v32, %v4444_v61  ;;  %v4677_v32 = vadd.f32 %v11149_v36, %v4638_v39  ;;  %vm12038_vm3 = vmmov %vm12018_vm0 }
 0x623   :  { %4691 = vst.msk [vmem:[%s11364_s14 + $0x50] sm:$0xff] %vm12024_vm14, %v4659_v19  ;;  %vm12039_vm14 = vmmov %vm12018_vm0 }
 0x624   :  { %4692 = vst.msk [vmem:[%s11364_s14 + $0x58] sm:$0xff] %vm12025_vm1, %v4660_v18  ;;  %v4676_v46 = vadd.f32 %v11149_v36, %v4637_v11  ;;  %v4678_v56 = vadd.f32 %v11149_v36, %v4639_v3  ;;  %vm12040_vm1 = vmmov %vm12018_vm0 }
 0x625   :  { %4693 = vst.msk [vmem:[%s11364_s14 + $0x60] sm:$0xff] %vm12026_vm5, %v4661_v60  ;;  %vm12041_vm5 = vmmov %vm12018_vm0 }
 0x626   :  { %4694 = vst.msk [vmem:[%s11364_s14 + $0x68] sm:$0xff] %vm12027_vm8, %v4662_v41  ;;  %v4577_v9 = vpop.permute.xlu1 %4576  ;;  %vm12042_vm8 = vmmov %vm12018_vm0 }
 0x627   :  { %4695 = vst.msk [vmem:[%s11364_s14 + $0x70] sm:$0xff] %vm12028_vm4, %v4663_v55  ;;  %v4575_v38 = vpop.permute.xlu0 %4574  ;;  %v4641_v40 = vadd.f32 %v4577_v9, %v4446_v51  ;;  %vm12043_vm4 = vmmov %vm12018_vm0 }
 0x628   :  { %4696 = vst.msk [vmem:[%s11364_s14 + $0x78] sm:$0xff] %vm12029_vm9, %v4664_v63  ;;  %v4640_v48 = vadd.f32 %v4575_v38, %v4445_v10  ;;  %vm12044_vm9 = vmmov %vm12018_vm0 }
 0x629   :  { %4697 = vst.msk [vmem:[%s11364_s14 + $0x80] sm:$0xff] %vm12030_vm15, %v4665_v43  ;;  %v4680_v62 = vadd.f32 %v11149_v36, %v4641_v40 }
 0x62a   :  { %4698 = vst.msk [vmem:[%s11364_s14 + $0x88] sm:$0xff] %vm12031_vm6, %v4666_v29  ;;  %v4679_v34 = vadd.f32 %v11149_v36, %v4640_v48 }
 0x62b   :  { %4699 = vst.msk [vmem:[%s11364_s14 + $0x90] sm:$0xff] %vm12032_vm7, %v4667_v20 }
 0x62c   :  { %4700 = vst.msk [vmem:[%s11364_s14 + $0x98] sm:$0xff] %vm12033_vm13, %v4668_v26 }
 0x62d   :  { %4701 = vst.msk [vmem:[%s11364_s14 + $0xa0] sm:$0xff] %vm12018_vm0, %v4669_v49 }
 0x62e   :  { %4702 = vst.msk [vmem:[%s11364_s14 + $0xa8] sm:$0xff] %vm12034_vm11, %v4670_v22 }
 0x62f   :  { %4703 = vst.msk [vmem:[%s11364_s14 + $0xb0] sm:$0xff] %vm12035_vm10, %v4671_v28 }
 0x630   :  { %4704 = vst.msk [vmem:[%s11364_s14 + $0xb8] sm:$0xff] %vm12036_vm12, %v4672_v33 }
 0x631   :  { %4705 = vst.msk [vmem:[%s11364_s14 + $0xc0] sm:$0xff] %vm12037_vm2, %v4673_v30 }
 0x632   :  { %4706 = vst.msk [vmem:[%s11364_s14 + $0xc8] sm:$0xff] %vm12038_vm3, %v4674_v53 }
 0x633   :  { %4707 = vst.msk [vmem:[%s11364_s14 + $0xd0] sm:$0xff] %vm12039_vm14, %v4675_v15 }
 0x634   :  { %4708 = vst.msk [vmem:[%s11364_s14 + $0xd8] sm:$0xff] %vm12040_vm1, %v4676_v46 }
 0x635   :  { %4709 = vst.msk [vmem:[%s11364_s14 + $0xe0] sm:$0xff] %vm12041_vm5, %v4677_v32 }
 0x636   :  { %4710 = vst.msk [vmem:[%s11364_s14 + $0xe8] sm:$0xff] %vm12042_vm8, %v4678_v56 }
 0x637   :  { %4712 = vst.msk [vmem:[%s11364_s14 + $0xf8] sm:$0xff] %vm12043_vm4, %v4680_v62 }
 0x638   :  { %4711 = vst.msk [vmem:[%s11364_s14 + $0xf0] sm:$0xff] %vm12044_vm9, %v4679_v34 }

</bundles_post_ra>
